<compile_context>
chip_gen: v7x
topology: tpu7x:2x2x1
jax: 0.10.0
libtpu: 0.0.40
codegen_flags: <defaults>
</compile_context>

<pallas_src>
import functools

import jax
import jax.numpy as jnp
from jax import lax
from jax.experimental import pallas as pl
from jax.experimental.pallas import tpu as pltpu

_BN_EPS = 1e-5
_VMEM = pl.BlockSpec(memory_space=pltpu.MemorySpace.VMEM)


def _swish(v):
    # x * sigmoid(x); the 1/(1+exp(-x)) divide uses the EUP reciprocal slot.
    return v * pl.reciprocal(1.0 + jnp.exp(-v), approx=True)


def _conv_norm_pool_block(x, prm, c_ref, n_batch, ksize):
    """One ConvNormPool block on batch-stacked 2-D activations.

    x:      (N*L, Ci) f32, batch-major rows
    prm:    12 values: (w_flat, bias, gamma, beta) for conv1/conv2/conv3;
            conv weights flattened tap-major to (K*Ci, H)
    c_ref:  (N*L, H) VMEM canvas scratch (left-pad buffer + pooling source)
    returns (N*L//2, H) stacked MaxPool1d(2) output
    """
    (wf1, b1, g1, be1, wf2, b2, g2, be2, wf3, b3, g3, be3) = prm
    NL, H = c_ref.shape
    L = NL // n_batch                 # per-batch length inside this block
    P = ksize - 1
    Lout = L - P                      # valid conv rows per batch element
    M = NL - P                        # conv-grid rows (incl. batch-seam junk)

    def conv(z, wf, b):
        # z: (NL, Ci) -> (M, Co); one im2col matmul (or K broadcast-MACs if Ci==1)
        Ci = z.shape[1]
        if Ci == 1:
            acc = jnp.zeros((M, wf.shape[1]), jnp.float32)
            for t in range(ksize):                      # static unroll over taps
                acc = acc + z[t:t + M, :] * wf[t:t + 1, :]
            y = acc
        else:
            col = jnp.concatenate([z[t:t + M, :] for t in range(ksize)], axis=1)
            y = jnp.dot(col, wf, preferred_element_type=jnp.float32)
        return y + b

    def batchnorm(y, g, be):
        # training-mode BatchNorm1d: biased stats over the N*Lout valid rows,
        # single pass (sum & sum of squares); batch-seam junk rows excluded.
        cnt = float(n_batch * Lout)
        y2 = y * y
        s = jnp.zeros((1, y.shape[1]), jnp.float32)
        ss = jnp.zeros((1, y.shape[1]), jnp.float32)
        for n in range(n_batch):
            lo = n * L
            s = s + jnp.sum(y[lo:lo + Lout, :], axis=0, keepdims=True)
            ss = ss + jnp.sum(y2[lo:lo + Lout, :], axis=0, keepdims=True)
        mean = s / cnt
        var = jnp.maximum(ss / cnt - mean * mean, 0.0)
        scale = lax.rsqrt(var + _BN_EPS) * g            # EUP rsqrt
        shift = be - mean * scale
        return y * scale + shift                        # single FMA per element

    def to_canvas(a):
        # F.pad(a, (K-1, 0)) per batch element: valid rows land after the
        # (already-zeroed) P-row prefix of each batch segment.
        for n in range(n_batch):
            c_ref[n * L + P:(n + 1) * L, :] = a[n * L:n * L + Lout, :]

    # Zero the pad prefixes ONCE per block (they are never overwritten).
    zpad = jnp.zeros((P, H), jnp.float32)
    for n in range(n_batch):
        c_ref[n * L:n * L + P, :] = zpad

    y1 = conv(x, wf1, b1)                                # (M, H), kept for skip
    a = _swish(batchnorm(y1, g1, be1))
    to_canvas(a)
    a = conv(c_ref[...], wf2, b2)
    a = _swish(batchnorm(a, g2, be2))
    to_canvas(a)
    y3 = conv(c_ref[...], wf3, b3)
    a = _swish(batchnorm(y1 + y3, g3, be3))
    to_canvas(a)                                         # final left-pad

    # MaxPool1d(2): VPU max of even/odd sublane-strided canvas reads.
    half = NL // 2
    ev = c_ref[pl.ds(0, half, stride=2), :]
    od = c_ref[pl.ds(1, half, stride=2), :]
    return jnp.maximum(ev, od)                           # (N*L//2, H)


def _cnn_kernel(ksize, n_batch, *refs):
    # refs: x, 36 block params, fc_w, fc_b | out | 3 canvas scratches
    x_ref = refs[0]
    prm_refs = refs[1:37]
    fcw_ref, fcb_ref = refs[37], refs[38]
    o_ref = refs[39]
    canvases = refs[40:43]

    x = x_ref[...].astype(jnp.float32)
    for blk in range(3):
        prm = tuple(r[...] for r in prm_refs[blk * 12:(blk + 1) * 12])
        x = _conv_norm_pool_block(x, prm, canvases[blk], n_batch, ksize)

    # Head: AdaptiveAvgPool1d(1) -> flatten -> Linear -> softmax(dim=1).
    # AvgPool is a per-batch XLU row-sum (no selection-matrix matmul needed).
    NLf, C = x.shape
    Lf = NLf // n_batch
    inv_lf = 1.0 / float(Lf)
    pooled = jnp.concatenate(
        [jnp.sum(x[n * Lf:(n + 1) * Lf, :], axis=0, keepdims=True) * inv_lf
         for n in range(n_batch)], axis=0)                           # (N, C)
    logits = jnp.dot(pooled, fcw_ref[...],
                     preferred_element_type=jnp.float32) + fcb_ref[...]
    mx = jnp.max(logits, axis=-1, keepdims=True)
    ex = jnp.exp(logits - mx)
    # Exact divide (not approx reciprocal) so probabilities sum to 1 tightly.
    o_ref[...] = (ex / jnp.sum(ex, axis=-1, keepdims=True)).astype(o_ref.dtype)


def _flatten_block_params(p):
    def wflat(w):
        k, ci, co = w.shape
        return w.reshape(k * ci, co)       # tap-major rows: row t*Ci + ci
    return [wflat(p["w1"]), p["b1"], p["g1"], p["be1"],
            wflat(p["w2"]), p["b2"], p["g2"], p["be2"],
            wflat(p["w3"]), p["b3"], p["g3"], p["be3"]]


@jax.jit
def cnn_forward(x_ncl, params):
    # x_ncl: PyTorch Conv1d layout (N, Cin, L)
    N, Cin, L = x_ncl.shape
    K = params["block1"]["w1"].shape[0]
    H1 = params["block1"]["w1"].shape[2]
    H2 = params["block2"]["w1"].shape[2]
    H3 = params["block3"]["w1"].shape[2]
    n_cls = params["fc_w"].shape[1]

    # channel-last, batch folded into rows: (N*L, Cin)
    x = jnp.transpose(x_ncl, (0, 2, 1)).reshape(N * L, Cin)

    flat = ([x]
            + _flatten_block_params(params["block1"])
            + _flatten_block_params(params["block2"])
            + _flatten_block_params(params["block3"])
            + [params["fc_w"], params["fc_b"]])

    kernel = functools.partial(_cnn_kernel, K, N)
    return pl.pallas_call(
        kernel,
        out_shape=jax.ShapeDtypeStruct((N, n_cls), jnp.float32),
        in_specs=[_VMEM] * len(flat),
        out_specs=_VMEM,
        scratch_shapes=[
            pltpu.VMEM((N * L, H1), jnp.float32),
            pltpu.VMEM((N * L // 2, H2), jnp.float32),
            pltpu.VMEM((N * L // 4, H3), jnp.float32),
        ],
        # TODO(synk): for large N/L add a grid + BlockSpecs (requires a
        # cross-tile BN-stats pass since training-mode BN couples the batch).
    )(*flat)


def _init_block(key, cin, hid, k):
    ks = jax.random.split(key, 6)

    def w(kk, ci):
        return jax.random.normal(kk, (k, ci, hid), jnp.float32) / jnp.sqrt(ci * k)

    def b(kk, ci):
        lim = 1.0 / jnp.sqrt(ci * k)
        return jax.random.uniform(kk, (1, hid), jnp.float32, -lim, lim)

    ones = jnp.ones((1, hid), jnp.float32)    # BatchNorm default weight
    zeros = jnp.zeros((1, hid), jnp.float32)  # BatchNorm default bias
    return dict(
        w1=w(ks[0], cin), b1=b(ks[1], cin), g1=ones, be1=zeros,
        w2=w(ks[2], hid), b2=b(ks[3], hid), g2=ones, be2=zeros,
        w3=w(ks[4], hid), b3=b(ks[5], hid), g3=ones, be3=zeros,
    )


def init_params(key, input_size=1, hid_size=32, kernel_size=5, num_classes=5):
    k1, k2, k3, k4, k5 = jax.random.split(key, 5)
    c_last = hid_size // 4
    return dict(
        block1=_init_block(k1, input_size, hid_size, kernel_size),
        block2=_init_block(k2, hid_size, hid_size // 2, kernel_size),
        block3=_init_block(k3, hid_size // 2, hid_size // 4, kernel_size),
        fc_w=jax.random.normal(k4, (c_last, num_classes), jnp.float32)
        / jnp.sqrt(c_last),
        fc_b=jax.random.uniform(k5, (1, num_classes), jnp.float32,
                                -1.0 / jnp.sqrt(c_last), 1.0 / jnp.sqrt(c_last)),
    )


if __name__ == "__main__":
    key = jax.random.PRNGKey(0)
    pkey, xkey = jax.random.split(key)

    N, CIN, L = 2, 1, 64          # L must survive 3x (conv+pool): 64->32->16->8
    HID, KS, NCLS = 32, 5, 5      # hid_size=32 -> 32/16/8 channels

    params = init_params(pkey, input_size=CIN, hid_size=HID,
                         kernel_size=KS, num_classes=NCLS)
    x = jax.random.normal(xkey, (N, CIN, L), jnp.float32)

    probs = jax.block_until_ready(cnn_forward(x, params))

    assert probs.shape == (N, NCLS)
    assert bool(jnp.all(jnp.isfinite(probs)))
    assert bool(jnp.allclose(jnp.sum(probs, axis=1), 1.0, atol=1e-4))
    print("KERNEL_OK")
</pallas_src>

<mosaic_0001>
module attributes {stable_mosaic.version = 11 : i64} {
  func.func @_cnn_kernel(%arg0: memref<128x1xf32, #tpu.memory_space<vmem>>, %arg1: memref<5x32xf32, #tpu.memory_space<vmem>>, %arg2: memref<1x32xf32, #tpu.memory_space<vmem>>, %arg3: memref<1x32xf32, #tpu.memory_space<vmem>>, %arg4: memref<1x32xf32, #tpu.memory_space<vmem>>, %arg5: memref<160x32xf32, #tpu.memory_space<vmem>>, %arg6: memref<1x32xf32, #tpu.memory_space<vmem>>, %arg7: memref<1x32xf32, #tpu.memory_space<vmem>>, %arg8: memref<1x32xf32, #tpu.memory_space<vmem>>, %arg9: memref<160x32xf32, #tpu.memory_space<vmem>>, %arg10: memref<1x32xf32, #tpu.memory_space<vmem>>, %arg11: memref<1x32xf32, #tpu.memory_space<vmem>>, %arg12: memref<1x32xf32, #tpu.memory_space<vmem>>, %arg13: memref<160x16xf32, #tpu.memory_space<vmem>>, %arg14: memref<1x16xf32, #tpu.memory_space<vmem>>, %arg15: memref<1x16xf32, #tpu.memory_space<vmem>>, %arg16: memref<1x16xf32, #tpu.memory_space<vmem>>, %arg17: memref<80x16xf32, #tpu.memory_space<vmem>>, %arg18: memref<1x16xf32, #tpu.memory_space<vmem>>, %arg19: memref<1x16xf32, #tpu.memory_space<vmem>>, %arg20: memref<1x16xf32, #tpu.memory_space<vmem>>, %arg21: memref<80x16xf32, #tpu.memory_space<vmem>>, %arg22: memref<1x16xf32, #tpu.memory_space<vmem>>, %arg23: memref<1x16xf32, #tpu.memory_space<vmem>>, %arg24: memref<1x16xf32, #tpu.memory_space<vmem>>, %arg25: memref<80x8xf32, #tpu.memory_space<vmem>>, %arg26: memref<1x8xf32, #tpu.memory_space<vmem>>, %arg27: memref<1x8xf32, #tpu.memory_space<vmem>>, %arg28: memref<1x8xf32, #tpu.memory_space<vmem>>, %arg29: memref<40x8xf32, #tpu.memory_space<vmem>>, %arg30: memref<1x8xf32, #tpu.memory_space<vmem>>, %arg31: memref<1x8xf32, #tpu.memory_space<vmem>>, %arg32: memref<1x8xf32, #tpu.memory_space<vmem>>, %arg33: memref<40x8xf32, #tpu.memory_space<vmem>>, %arg34: memref<1x8xf32, #tpu.memory_space<vmem>>, %arg35: memref<1x8xf32, #tpu.memory_space<vmem>>, %arg36: memref<1x8xf32, #tpu.memory_space<vmem>>, %arg37: memref<8x5xf32, #tpu.memory_space<vmem>>, %arg38: memref<1x5xf32, #tpu.memory_space<vmem>>, %arg39: memref<2x5xf32, #tpu.memory_space<vmem>>, %arg40: memref<128x32xf32, #tpu.memory_space<vmem>>, %arg41: memref<64x16xf32, #tpu.memory_space<vmem>>, %arg42: memref<32x8xf32, #tpu.memory_space<vmem>>) attributes {dimension_semantics = [], scalar_prefetch = 0 : i64, scratch_operands = 3 : i64, tpu.core_type = #tpu.core_type<tc>} {
    %c0 = arith.constant 0 : index
    %c0_0 = arith.constant 0 : index
    %0 = vector.load %arg0[%c0, %c0_0] : memref<128x1xf32, #tpu.memory_space<vmem>>, vector<128x1xf32>
    %c0_1 = arith.constant 0 : index
    %c0_2 = arith.constant 0 : index
    %1 = vector.load %arg1[%c0_1, %c0_2] : memref<5x32xf32, #tpu.memory_space<vmem>>, vector<5x32xf32>
    %c0_3 = arith.constant 0 : index
    %c0_4 = arith.constant 0 : index
    %2 = vector.load %arg2[%c0_3, %c0_4] : memref<1x32xf32, #tpu.memory_space<vmem>>, vector<1x32xf32>
    %c0_5 = arith.constant 0 : index
    %c0_6 = arith.constant 0 : index
    %3 = vector.load %arg3[%c0_5, %c0_6] : memref<1x32xf32, #tpu.memory_space<vmem>>, vector<1x32xf32>
    %c0_7 = arith.constant 0 : index
    %c0_8 = arith.constant 0 : index
    %4 = vector.load %arg4[%c0_7, %c0_8] : memref<1x32xf32, #tpu.memory_space<vmem>>, vector<1x32xf32>
    %c0_9 = arith.constant 0 : index
    %c0_10 = arith.constant 0 : index
    %5 = vector.load %arg5[%c0_9, %c0_10] : memref<160x32xf32, #tpu.memory_space<vmem>>, vector<160x32xf32>
    %c0_11 = arith.constant 0 : index
    %c0_12 = arith.constant 0 : index
    %6 = vector.load %arg6[%c0_11, %c0_12] : memref<1x32xf32, #tpu.memory_space<vmem>>, vector<1x32xf32>
    %c0_13 = arith.constant 0 : index
    %c0_14 = arith.constant 0 : index
    %7 = vector.load %arg7[%c0_13, %c0_14] : memref<1x32xf32, #tpu.memory_space<vmem>>, vector<1x32xf32>
    %c0_15 = arith.constant 0 : index
    %c0_16 = arith.constant 0 : index
    %8 = vector.load %arg8[%c0_15, %c0_16] : memref<1x32xf32, #tpu.memory_space<vmem>>, vector<1x32xf32>
    %c0_17 = arith.constant 0 : index
    %c0_18 = arith.constant 0 : index
    %9 = vector.load %arg9[%c0_17, %c0_18] : memref<160x32xf32, #tpu.memory_space<vmem>>, vector<160x32xf32>
    %c0_19 = arith.constant 0 : index
    %c0_20 = arith.constant 0 : index
    %10 = vector.load %arg10[%c0_19, %c0_20] : memref<1x32xf32, #tpu.memory_space<vmem>>, vector<1x32xf32>
    %c0_21 = arith.constant 0 : index
    %c0_22 = arith.constant 0 : index
    %11 = vector.load %arg11[%c0_21, %c0_22] : memref<1x32xf32, #tpu.memory_space<vmem>>, vector<1x32xf32>
    %c0_23 = arith.constant 0 : index
    %c0_24 = arith.constant 0 : index
    %12 = vector.load %arg12[%c0_23, %c0_24] : memref<1x32xf32, #tpu.memory_space<vmem>>, vector<1x32xf32>
    %cst = arith.constant 0.000000e+00 : f32
    %13 = vector.broadcast %cst : f32 to vector<4x32xf32>
    %c0_25 = arith.constant 0 : index
    %c0_26 = arith.constant 0 : index
    %14 = vector.load %arg40[%c0_25, %c0_26] : memref<128x32xf32, #tpu.memory_space<vmem>>, vector<4x32xf32>
    tpu.vector_store %arg40[%c0_25, %c0_26], %13 {strides = array<i32>} : memref<128x32xf32, #tpu.memory_space<vmem>>, vector<4x32xf32>,
    %c64 = arith.constant 64 : index
    %c0_27 = arith.constant 0 : index
    %15 = vector.load %arg40[%c64, %c0_27] : memref<128x32xf32, #tpu.memory_space<vmem>>, vector<4x32xf32>
    tpu.vector_store %arg40[%c64, %c0_27], %13 {strides = array<i32>} : memref<128x32xf32, #tpu.memory_space<vmem>>, vector<4x32xf32>,
    %cst_28 = arith.constant 0.000000e+00 : f32
    %16 = vector.broadcast %cst_28 : f32 to vector<124x32xf32>
    %17 = vector.extract_strided_slice %0 {offsets = [0, 0], sizes = [124, 1], strides = [1, 1]} : vector<128x1xf32> to vector<124x1xf32>
    %18 = vector.extract_strided_slice %1 {offsets = [0, 0], sizes = [1, 32], strides = [1, 1]} : vector<5x32xf32> to vector<1x32xf32>
    %19 = vector.broadcast %17 : vector<124x1xf32> to vector<124x32xf32>
    %20 = vector.broadcast %18 : vector<1x32xf32> to vector<124x32xf32>
    %21 = arith.mulf %19, %20 : vector<124x32xf32>
    %22 = arith.addf %16, %21 : vector<124x32xf32>
    %23 = vector.extract_strided_slice %0 {offsets = [1, 0], sizes = [124, 1], strides = [1, 1]} : vector<128x1xf32> to vector<124x1xf32>
    %24 = vector.extract_strided_slice %1 {offsets = [1, 0], sizes = [1, 32], strides = [1, 1]} : vector<5x32xf32> to vector<1x32xf32>
    %25 = vector.broadcast %23 : vector<124x1xf32> to vector<124x32xf32>
    %26 = vector.broadcast %24 : vector<1x32xf32> to vector<124x32xf32>
    %27 = arith.mulf %25, %26 : vector<124x32xf32>
    %28 = arith.addf %22, %27 : vector<124x32xf32>
    %29 = vector.extract_strided_slice %0 {offsets = [2, 0], sizes = [124, 1], strides = [1, 1]} : vector<128x1xf32> to vector<124x1xf32>
    %30 = vector.extract_strided_slice %1 {offsets = [2, 0], sizes = [1, 32], strides = [1, 1]} : vector<5x32xf32> to vector<1x32xf32>
    %31 = vector.broadcast %29 : vector<124x1xf32> to vector<124x32xf32>
    %32 = vector.broadcast %30 : vector<1x32xf32> to vector<124x32xf32>
    %33 = arith.mulf %31, %32 : vector<124x32xf32>
    %34 = arith.addf %28, %33 : vector<124x32xf32>
    %35 = vector.extract_strided_slice %0 {offsets = [3, 0], sizes = [124, 1], strides = [1, 1]} : vector<128x1xf32> to vector<124x1xf32>
    %36 = vector.extract_strided_slice %1 {offsets = [3, 0], sizes = [1, 32], strides = [1, 1]} : vector<5x32xf32> to vector<1x32xf32>
    %37 = vector.broadcast %35 : vector<124x1xf32> to vector<124x32xf32>
    %38 = vector.broadcast %36 : vector<1x32xf32> to vector<124x32xf32>
    %39 = arith.mulf %37, %38 : vector<124x32xf32>
    %40 = arith.addf %34, %39 : vector<124x32xf32>
    %41 = vector.extract_strided_slice %0 {offsets = [4, 0], sizes = [124, 1], strides = [1, 1]} : vector<128x1xf32> to vector<124x1xf32>
    %42 = vector.extract_strided_slice %1 {offsets = [4, 0], sizes = [1, 32], strides = [1, 1]} : vector<5x32xf32> to vector<1x32xf32>
    %43 = vector.broadcast %41 : vector<124x1xf32> to vector<124x32xf32>
    %44 = vector.broadcast %42 : vector<1x32xf32> to vector<124x32xf32>
    %45 = arith.mulf %43, %44 : vector<124x32xf32>
    %46 = arith.addf %40, %45 : vector<124x32xf32>
    %47 = vector.broadcast %2 : vector<1x32xf32> to vector<124x32xf32>
    %48 = arith.addf %46, %47 : vector<124x32xf32>
    %49 = arith.mulf %48, %48 : vector<124x32xf32>
    %cst_29 = arith.constant 0.000000e+00 : f32
    %50 = vector.broadcast %cst_29 : f32 to vector<1x32xf32>
    %cst_30 = arith.constant 0.000000e+00 : f32
    %51 = vector.broadcast %cst_30 : f32 to vector<1x32xf32>
    %52 = vector.extract_strided_slice %48 {offsets = [0, 0], sizes = [60, 32], strides = [1, 1]} : vector<124x32xf32> to vector<60x32xf32>
    %cst_31 = arith.constant dense<0.000000e+00> : vector<32xf32>
    %53 = vector.multi_reduction <add>, %52, %cst_31 [0] : vector<60x32xf32> to vector<32xf32>
    %54 = vector.shape_cast %53 : vector<32xf32> to vector<1x32xf32>
    %55 = arith.addf %50, %54 : vector<1x32xf32>
    %56 = vector.extract_strided_slice %49 {offsets = [0, 0], sizes = [60, 32], strides = [1, 1]} : vector<124x32xf32> to vector<60x32xf32>
    %cst_32 = arith.constant dense<0.000000e+00> : vector<32xf32>
    %57 = vector.multi_reduction <add>, %56, %cst_32 [0] : vector<60x32xf32> to vector<32xf32>
    %58 = vector.shape_cast %57 : vector<32xf32> to vector<1x32xf32>
    %59 = arith.addf %51, %58 : vector<1x32xf32>
    %60 = vector.extract_strided_slice %48 {offsets = [64, 0], sizes = [60, 32], strides = [1, 1]} : vector<124x32xf32> to vector<60x32xf32>
    %cst_33 = arith.constant dense<0.000000e+00> : vector<32xf32>
    %61 = vector.multi_reduction <add>, %60, %cst_33 [0] : vector<60x32xf32> to vector<32xf32>
    %62 = vector.shape_cast %61 : vector<32xf32> to vector<1x32xf32>
    %63 = arith.addf %55, %62 : vector<1x32xf32>
    %64 = vector.extract_strided_slice %49 {offsets = [64, 0], sizes = [60, 32], strides = [1, 1]} : vector<124x32xf32> to vector<60x32xf32>
    %cst_34 = arith.constant dense<0.000000e+00> : vector<32xf32>
    %65 = vector.multi_reduction <add>, %64, %cst_34 [0] : vector<60x32xf32> to vector<32xf32>
    %66 = vector.shape_cast %65 : vector<32xf32> to vector<1x32xf32>
    %67 = arith.addf %59, %66 : vector<1x32xf32>
    %cst_35 = arith.constant 1.200000e+02 : f32
    %68 = vector.broadcast %cst_35 : f32 to vector<1x32xf32>
    %69 = arith.divf %63, %68 : vector<1x32xf32>
    %cst_36 = arith.constant 1.200000e+02 : f32
    %70 = vector.broadcast %cst_36 : f32 to vector<1x32xf32>
    %71 = arith.divf %67, %70 : vector<1x32xf32>
    %72 = arith.mulf %69, %69 : vector<1x32xf32>
    %73 = arith.subf %71, %72 : vector<1x32xf32>
    %cst_37 = arith.constant 0.000000e+00 : f32
    %74 = vector.broadcast %cst_37 : f32 to vector<1x32xf32>
    %75 = arith.maximumf %73, %74 : vector<1x32xf32>
    %cst_38 = arith.constant 9.99999974E-6 : f32
    %76 = vector.broadcast %cst_38 : f32 to vector<1x32xf32>
    %77 = arith.addf %75, %76 : vector<1x32xf32>
    %78 = math.rsqrt %77 : vector<1x32xf32>
    %79 = arith.mulf %78, %3 : vector<1x32xf32>
    %80 = arith.mulf %69, %79 : vector<1x32xf32>
    %81 = arith.subf %4, %80 : vector<1x32xf32>
    %82 = vector.broadcast %79 : vector<1x32xf32> to vector<124x32xf32>
    %83 = arith.mulf %48, %82 : vector<124x32xf32>
    %84 = vector.broadcast %81 : vector<1x32xf32> to vector<124x32xf32>
    %85 = arith.addf %83, %84 : vector<124x32xf32>
    %cst_39 = arith.constant 0.000000e+00 : f32
    %86 = vector.broadcast %cst_39 : f32 to vector<124x32xf32>
    %87 = arith.subf %86, %85 : vector<124x32xf32>
    %88 = math.exp %87 : vector<124x32xf32>
    %cst_40 = arith.constant 1.000000e+00 : f32
    %89 = vector.broadcast %cst_40 : f32 to vector<124x32xf32>
    %90 = arith.addf %89, %88 : vector<124x32xf32>
    %91 = tpu.reciprocal %90 {approx = true} : vector<124x32xf32> -> vector<124x32xf32>
    %92 = arith.mulf %85, %91 : vector<124x32xf32>
    %93 = vector.extract_strided_slice %92 {offsets = [0, 0], sizes = [60, 32], strides = [1, 1]} : vector<124x32xf32> to vector<60x32xf32>
    %c4 = arith.constant 4 : index
    %c0_41 = arith.constant 0 : index
    %94 = vector.load %arg40[%c4, %c0_41] : memref<128x32xf32, #tpu.memory_space<vmem>>, vector<60x32xf32>
    tpu.vector_store %arg40[%c4, %c0_41], %93 {strides = array<i32>} : memref<128x32xf32, #tpu.memory_space<vmem>>, vector<60x32xf32>,
    %95 = vector.extract_strided_slice %92 {offsets = [64, 0], sizes = [60, 32], strides = [1, 1]} : vector<124x32xf32> to vector<60x32xf32>
    %c68 = arith.constant 68 : index
    %c0_42 = arith.constant 0 : index
    %96 = vector.load %arg40[%c68, %c0_42] : memref<128x32xf32, #tpu.memory_space<vmem>>, vector<60x32xf32>
    tpu.vector_store %arg40[%c68, %c0_42], %95 {strides = array<i32>} : memref<128x32xf32, #tpu.memory_space<vmem>>, vector<60x32xf32>,
    %c0_43 = arith.constant 0 : index
    %c0_44 = arith.constant 0 : index
    %97 = vector.load %arg40[%c0_43, %c0_44] : memref<128x32xf32, #tpu.memory_space<vmem>>, vector<128x32xf32>
    %98 = vector.extract_strided_slice %97 {offsets = [0, 0], sizes = [124, 32], strides = [1, 1]} : vector<128x32xf32> to vector<124x32xf32>
    %99 = vector.extract_strided_slice %97 {offsets = [1, 0], sizes = [124, 32], strides = [1, 1]} : vector<128x32xf32> to vector<124x32xf32>
    %100 = vector.extract_strided_slice %97 {offsets = [2, 0], sizes = [124, 32], strides = [1, 1]} : vector<128x32xf32> to vector<124x32xf32>
    %101 = vector.extract_strided_slice %97 {offsets = [3, 0], sizes = [124, 32], strides = [1, 1]} : vector<128x32xf32> to vector<124x32xf32>
    %102 = vector.extract_strided_slice %97 {offsets = [4, 0], sizes = [124, 32], strides = [1, 1]} : vector<128x32xf32> to vector<124x32xf32>
    %103 = tpu.concatenate %98, %99, %100, %101, %102 in 1 : vector<124x32xf32>, vector<124x32xf32>, vector<124x32xf32>, vector<124x32xf32>, vector<124x32xf32> -> vector<124x160xf32>
    %cst_45 = arith.constant dense<0.000000e+00> : vector<124x32xf32>
    %104 = tpu.matmul %103, %5, %cst_45 {dimension_numbers = #tpu.dot_dimension_numbers<[1], [0], [0], [1], [0, 0, 1, 1], [], []>} : vector<124x160xf32>, vector<160x32xf32>, vector<124x32xf32> -> vector<124x32xf32>
    %105 = vector.broadcast %6 : vector<1x32xf32> to vector<124x32xf32>
    %106 = arith.addf %104, %105 : vector<124x32xf32>
    %107 = arith.mulf %106, %106 : vector<124x32xf32>
    %cst_46 = arith.constant 0.000000e+00 : f32
    %108 = vector.broadcast %cst_46 : f32 to vector<1x32xf32>
    %cst_47 = arith.constant 0.000000e+00 : f32
    %109 = vector.broadcast %cst_47 : f32 to vector<1x32xf32>
    %110 = vector.extract_strided_slice %106 {offsets = [0, 0], sizes = [60, 32], strides = [1, 1]} : vector<124x32xf32> to vector<60x32xf32>
    %cst_48 = arith.constant dense<0.000000e+00> : vector<32xf32>
    %111 = vector.multi_reduction <add>, %110, %cst_48 [0] : vector<60x32xf32> to vector<32xf32>
    %112 = vector.shape_cast %111 : vector<32xf32> to vector<1x32xf32>
    %113 = arith.addf %108, %112 : vector<1x32xf32>
    %114 = vector.extract_strided_slice %107 {offsets = [0, 0], sizes = [60, 32], strides = [1, 1]} : vector<124x32xf32> to vector<60x32xf32>
    %cst_49 = arith.constant dense<0.000000e+00> : vector<32xf32>
    %115 = vector.multi_reduction <add>, %114, %cst_49 [0] : vector<60x32xf32> to vector<32xf32>
    %116 = vector.shape_cast %115 : vector<32xf32> to vector<1x32xf32>
    %117 = arith.addf %109, %116 : vector<1x32xf32>
    %118 = vector.extract_strided_slice %106 {offsets = [64, 0], sizes = [60, 32], strides = [1, 1]} : vector<124x32xf32> to vector<60x32xf32>
    %cst_50 = arith.constant dense<0.000000e+00> : vector<32xf32>
    %119 = vector.multi_reduction <add>, %118, %cst_50 [0] : vector<60x32xf32> to vector<32xf32>
    %120 = vector.shape_cast %119 : vector<32xf32> to vector<1x32xf32>
    %121 = arith.addf %113, %120 : vector<1x32xf32>
    %122 = vector.extract_strided_slice %107 {offsets = [64, 0], sizes = [60, 32], strides = [1, 1]} : vector<124x32xf32> to vector<60x32xf32>
    %cst_51 = arith.constant dense<0.000000e+00> : vector<32xf32>
    %123 = vector.multi_reduction <add>, %122, %cst_51 [0] : vector<60x32xf32> to vector<32xf32>
    %124 = vector.shape_cast %123 : vector<32xf32> to vector<1x32xf32>
    %125 = arith.addf %117, %124 : vector<1x32xf32>
    %cst_52 = arith.constant 1.200000e+02 : f32
    %126 = vector.broadcast %cst_52 : f32 to vector<1x32xf32>
    %127 = arith.divf %121, %126 : vector<1x32xf32>
    %cst_53 = arith.constant 1.200000e+02 : f32
    %128 = vector.broadcast %cst_53 : f32 to vector<1x32xf32>
    %129 = arith.divf %125, %128 : vector<1x32xf32>
    %130 = arith.mulf %127, %127 : vector<1x32xf32>
    %131 = arith.subf %129, %130 : vector<1x32xf32>
    %cst_54 = arith.constant 0.000000e+00 : f32
    %132 = vector.broadcast %cst_54 : f32 to vector<1x32xf32>
    %133 = arith.maximumf %131, %132 : vector<1x32xf32>
    %cst_55 = arith.constant 9.99999974E-6 : f32
    %134 = vector.broadcast %cst_55 : f32 to vector<1x32xf32>
    %135 = arith.addf %133, %134 : vector<1x32xf32>
    %136 = math.rsqrt %135 : vector<1x32xf32>
    %137 = arith.mulf %136, %7 : vector<1x32xf32>
    %138 = arith.mulf %127, %137 : vector<1x32xf32>
    %139 = arith.subf %8, %138 : vector<1x32xf32>
    %140 = vector.broadcast %137 : vector<1x32xf32> to vector<124x32xf32>
    %141 = arith.mulf %106, %140 : vector<124x32xf32>
    %142 = vector.broadcast %139 : vector<1x32xf32> to vector<124x32xf32>
    %143 = arith.addf %141, %142 : vector<124x32xf32>
    %cst_56 = arith.constant 0.000000e+00 : f32
    %144 = vector.broadcast %cst_56 : f32 to vector<124x32xf32>
    %145 = arith.subf %144, %143 : vector<124x32xf32>
    %146 = math.exp %145 : vector<124x32xf32>
    %cst_57 = arith.constant 1.000000e+00 : f32
    %147 = vector.broadcast %cst_57 : f32 to vector<124x32xf32>
    %148 = arith.addf %147, %146 : vector<124x32xf32>
    %149 = tpu.reciprocal %148 {approx = true} : vector<124x32xf32> -> vector<124x32xf32>
    %150 = arith.mulf %143, %149 : vector<124x32xf32>
    %151 = vector.extract_strided_slice %150 {offsets = [0, 0], sizes = [60, 32], strides = [1, 1]} : vector<124x32xf32> to vector<60x32xf32>
    %c4_58 = arith.constant 4 : index
    %c0_59 = arith.constant 0 : index
    %152 = vector.load %arg40[%c4_58, %c0_59] : memref<128x32xf32, #tpu.memory_space<vmem>>, vector<60x32xf32>
    tpu.vector_store %arg40[%c4_58, %c0_59], %151 {strides = array<i32>} : memref<128x32xf32, #tpu.memory_space<vmem>>, vector<60x32xf32>,
    %153 = vector.extract_strided_slice %150 {offsets = [64, 0], sizes = [60, 32], strides = [1, 1]} : vector<124x32xf32> to vector<60x32xf32>
    %c68_60 = arith.constant 68 : index
    %c0_61 = arith.constant 0 : index
    %154 = vector.load %arg40[%c68_60, %c0_61] : memref<128x32xf32, #tpu.memory_space<vmem>>, vector<60x32xf32>
    tpu.vector_store %arg40[%c68_60, %c0_61], %153 {strides = array<i32>} : memref<128x32xf32, #tpu.memory_space<vmem>>, vector<60x32xf32>,
    %c0_62 = arith.constant 0 : index
    %c0_63 = arith.constant 0 : index
    %155 = vector.load %arg40[%c0_62, %c0_63] : memref<128x32xf32, #tpu.memory_space<vmem>>, vector<128x32xf32>
    %156 = vector.extract_strided_slice %155 {offsets = [0, 0], sizes = [124, 32], strides = [1, 1]} : vector<128x32xf32> to vector<124x32xf32>
    %157 = vector.extract_strided_slice %155 {offsets = [1, 0], sizes = [124, 32], strides = [1, 1]} : vector<128x32xf32> to vector<124x32xf32>
    %158 = vector.extract_strided_slice %155 {offsets = [2, 0], sizes = [124, 32], strides = [1, 1]} : vector<128x32xf32> to vector<124x32xf32>
    %159 = vector.extract_strided_slice %155 {offsets = [3, 0], sizes = [124, 32], strides = [1, 1]} : vector<128x32xf32> to vector<124x32xf32>
    %160 = vector.extract_strided_slice %155 {offsets = [4, 0], sizes = [124, 32], strides = [1, 1]} : vector<128x32xf32> to vector<124x32xf32>
    %161 = tpu.concatenate %156, %157, %158, %159, %160 in 1 : vector<124x32xf32>, vector<124x32xf32>, vector<124x32xf32>, vector<124x32xf32>, vector<124x32xf32> -> vector<124x160xf32>
    %cst_64 = arith.constant dense<0.000000e+00> : vector<124x32xf32>
    %162 = tpu.matmul %161, %9, %cst_64 {dimension_numbers = #tpu.dot_dimension_numbers<[1], [0], [0], [1], [0, 0, 1, 1], [], []>} : vector<124x160xf32>, vector<160x32xf32>, vector<124x32xf32> -> vector<124x32xf32>
    %163 = vector.broadcast %10 : vector<1x32xf32> to vector<124x32xf32>
    %164 = arith.addf %162, %163 : vector<124x32xf32>
    %165 = arith.addf %48, %164 : vector<124x32xf32>
    %166 = arith.mulf %165, %165 : vector<124x32xf32>
    %cst_65 = arith.constant 0.000000e+00 : f32
    %167 = vector.broadcast %cst_65 : f32 to vector<1x32xf32>
    %cst_66 = arith.constant 0.000000e+00 : f32
    %168 = vector.broadcast %cst_66 : f32 to vector<1x32xf32>
    %169 = vector.extract_strided_slice %165 {offsets = [0, 0], sizes = [60, 32], strides = [1, 1]} : vector<124x32xf32> to vector<60x32xf32>
    %cst_67 = arith.constant dense<0.000000e+00> : vector<32xf32>
    %170 = vector.multi_reduction <add>, %169, %cst_67 [0] : vector<60x32xf32> to vector<32xf32>
    %171 = vector.shape_cast %170 : vector<32xf32> to vector<1x32xf32>
    %172 = arith.addf %167, %171 : vector<1x32xf32>
    %173 = vector.extract_strided_slice %166 {offsets = [0, 0], sizes = [60, 32], strides = [1, 1]} : vector<124x32xf32> to vector<60x32xf32>
    %cst_68 = arith.constant dense<0.000000e+00> : vector<32xf32>
    %174 = vector.multi_reduction <add>, %173, %cst_68 [0] : vector<60x32xf32> to vector<32xf32>
    %175 = vector.shape_cast %174 : vector<32xf32> to vector<1x32xf32>
    %176 = arith.addf %168, %175 : vector<1x32xf32>
    %177 = vector.extract_strided_slice %165 {offsets = [64, 0], sizes = [60, 32], strides = [1, 1]} : vector<124x32xf32> to vector<60x32xf32>
    %cst_69 = arith.constant dense<0.000000e+00> : vector<32xf32>
    %178 = vector.multi_reduction <add>, %177, %cst_69 [0] : vector<60x32xf32> to vector<32xf32>
    %179 = vector.shape_cast %178 : vector<32xf32> to vector<1x32xf32>
    %180 = arith.addf %172, %179 : vector<1x32xf32>
    %181 = vector.extract_strided_slice %166 {offsets = [64, 0], sizes = [60, 32], strides = [1, 1]} : vector<124x32xf32> to vector<60x32xf32>
    %cst_70 = arith.constant dense<0.000000e+00> : vector<32xf32>
    %182 = vector.multi_reduction <add>, %181, %cst_70 [0] : vector<60x32xf32> to vector<32xf32>
    %183 = vector.shape_cast %182 : vector<32xf32> to vector<1x32xf32>
    %184 = arith.addf %176, %183 : vector<1x32xf32>
    %cst_71 = arith.constant 1.200000e+02 : f32
    %185 = vector.broadcast %cst_71 : f32 to vector<1x32xf32>
    %186 = arith.divf %180, %185 : vector<1x32xf32>
    %cst_72 = arith.constant 1.200000e+02 : f32
    %187 = vector.broadcast %cst_72 : f32 to vector<1x32xf32>
    %188 = arith.divf %184, %187 : vector<1x32xf32>
    %189 = arith.mulf %186, %186 : vector<1x32xf32>
    %190 = arith.subf %188, %189 : vector<1x32xf32>
    %cst_73 = arith.constant 0.000000e+00 : f32
    %191 = vector.broadcast %cst_73 : f32 to vector<1x32xf32>
    %192 = arith.maximumf %190, %191 : vector<1x32xf32>
    %cst_74 = arith.constant 9.99999974E-6 : f32
    %193 = vector.broadcast %cst_74 : f32 to vector<1x32xf32>
    %194 = arith.addf %192, %193 : vector<1x32xf32>
    %195 = math.rsqrt %194 : vector<1x32xf32>
    %196 = arith.mulf %195, %11 : vector<1x32xf32>
    %197 = arith.mulf %186, %196 : vector<1x32xf32>
    %198 = arith.subf %12, %197 : vector<1x32xf32>
    %199 = vector.broadcast %196 : vector<1x32xf32> to vector<124x32xf32>
    %200 = arith.mulf %165, %199 : vector<124x32xf32>
    %201 = vector.broadcast %198 : vector<1x32xf32> to vector<124x32xf32>
    %202 = arith.addf %200, %201 : vector<124x32xf32>
    %cst_75 = arith.constant 0.000000e+00 : f32
    %203 = vector.broadcast %cst_75 : f32 to vector<124x32xf32>
    %204 = arith.subf %203, %202 : vector<124x32xf32>
    %205 = math.exp %204 : vector<124x32xf32>
    %cst_76 = arith.constant 1.000000e+00 : f32
    %206 = vector.broadcast %cst_76 : f32 to vector<124x32xf32>
    %207 = arith.addf %206, %205 : vector<124x32xf32>
    %208 = tpu.reciprocal %207 {approx = true} : vector<124x32xf32> -> vector<124x32xf32>
    %209 = arith.mulf %202, %208 : vector<124x32xf32>
    %210 = vector.extract_strided_slice %209 {offsets = [0, 0], sizes = [60, 32], strides = [1, 1]} : vector<124x32xf32> to vector<60x32xf32>
    %c4_77 = arith.constant 4 : index
    %c0_78 = arith.constant 0 : index
    %211 = vector.load %arg40[%c4_77, %c0_78] : memref<128x32xf32, #tpu.memory_space<vmem>>, vector<60x32xf32>
    tpu.vector_store %arg40[%c4_77, %c0_78], %210 {strides = array<i32>} : memref<128x32xf32, #tpu.memory_space<vmem>>, vector<60x32xf32>,
    %212 = vector.extract_strided_slice %209 {offsets = [64, 0], sizes = [60, 32], strides = [1, 1]} : vector<124x32xf32> to vector<60x32xf32>
    %c68_79 = arith.constant 68 : index
    %c0_80 = arith.constant 0 : index
    %213 = vector.load %arg40[%c68_79, %c0_80] : memref<128x32xf32, #tpu.memory_space<vmem>>, vector<60x32xf32>
    tpu.vector_store %arg40[%c68_79, %c0_80], %212 {strides = array<i32>} : memref<128x32xf32, #tpu.memory_space<vmem>>, vector<60x32xf32>,
    %c0_81 = arith.constant 0 : index
    %c0_82 = arith.constant 0 : index
    %214 = tpu.strided_load %arg40[%c0_81, %c0_82] {strides = array<i32: 2, 1>} : memref<128x32xf32, #tpu.memory_space<vmem>>, vector<64x32xf32>
    %c1 = arith.constant 1 : index
    %c0_83 = arith.constant 0 : index
    %215 = tpu.strided_load %arg40[%c1, %c0_83] {strides = array<i32: 2, 1>} : memref<128x32xf32, #tpu.memory_space<vmem>>, vector<64x32xf32>
    %216 = arith.maximumf %214, %215 : vector<64x32xf32>
    %c0_84 = arith.constant 0 : index
    %c0_85 = arith.constant 0 : index
    %217 = vector.load %arg13[%c0_84, %c0_85] : memref<160x16xf32, #tpu.memory_space<vmem>>, vector<160x16xf32>
    %c0_86 = arith.constant 0 : index
    %c0_87 = arith.constant 0 : index
    %218 = vector.load %arg14[%c0_86, %c0_87] : memref<1x16xf32, #tpu.memory_space<vmem>>, vector<1x16xf32>
    %c0_88 = arith.constant 0 : index
    %c0_89 = arith.constant 0 : index
    %219 = vector.load %arg15[%c0_88, %c0_89] : memref<1x16xf32, #tpu.memory_space<vmem>>, vector<1x16xf32>
    %c0_90 = arith.constant 0 : index
    %c0_91 = arith.constant 0 : index
    %220 = vector.load %arg16[%c0_90, %c0_91] : memref<1x16xf32, #tpu.memory_space<vmem>>, vector<1x16xf32>
    %c0_92 = arith.constant 0 : index
    %c0_93 = arith.constant 0 : index
    %221 = vector.load %arg17[%c0_92, %c0_93] : memref<80x16xf32, #tpu.memory_space<vmem>>, vector<80x16xf32>
    %c0_94 = arith.constant 0 : index
    %c0_95 = arith.constant 0 : index
    %222 = vector.load %arg18[%c0_94, %c0_95] : memref<1x16xf32, #tpu.memory_space<vmem>>, vector<1x16xf32>
    %c0_96 = arith.constant 0 : index
    %c0_97 = arith.constant 0 : index
    %223 = vector.load %arg19[%c0_96, %c0_97] : memref<1x16xf32, #tpu.memory_space<vmem>>, vector<1x16xf32>
    %c0_98 = arith.constant 0 : index
    %c0_99 = arith.constant 0 : index
    %224 = vector.load %arg20[%c0_98, %c0_99] : memref<1x16xf32, #tpu.memory_space<vmem>>, vector<1x16xf32>
    %c0_100 = arith.constant 0 : index
    %c0_101 = arith.constant 0 : index
    %225 = vector.load %arg21[%c0_100, %c0_101] : memref<80x16xf32, #tpu.memory_space<vmem>>, vector<80x16xf32>
    %c0_102 = arith.constant 0 : index
    %c0_103 = arith.constant 0 : index
    %226 = vector.load %arg22[%c0_102, %c0_103] : memref<1x16xf32, #tpu.memory_space<vmem>>, vector<1x16xf32>
    %c0_104 = arith.constant 0 : index
    %c0_105 = arith.constant 0 : index
    %227 = vector.load %arg23[%c0_104, %c0_105] : memref<1x16xf32, #tpu.memory_space<vmem>>, vector<1x16xf32>
    %c0_106 = arith.constant 0 : index
    %c0_107 = arith.constant 0 : index
    %228 = vector.load %arg24[%c0_106, %c0_107] : memref<1x16xf32, #tpu.memory_space<vmem>>, vector<1x16xf32>
    %cst_108 = arith.constant 0.000000e+00 : f32
    %229 = vector.broadcast %cst_108 : f32 to vector<4x16xf32>
    %c0_109 = arith.constant 0 : index
    %c0_110 = arith.constant 0 : index
    %230 = vector.load %arg41[%c0_109, %c0_110] : memref<64x16xf32, #tpu.memory_space<vmem>>, vector<4x16xf32>
    tpu.vector_store %arg41[%c0_109, %c0_110], %229 {strides = array<i32>} : memref<64x16xf32, #tpu.memory_space<vmem>>, vector<4x16xf32>,
    %c32 = arith.constant 32 : index
    %c0_111 = arith.constant 0 : index
    %231 = vector.load %arg41[%c32, %c0_111] : memref<64x16xf32, #tpu.memory_space<vmem>>, vector<4x16xf32>
    tpu.vector_store %arg41[%c32, %c0_111], %229 {strides = array<i32>} : memref<64x16xf32, #tpu.memory_space<vmem>>, vector<4x16xf32>,
    %232 = vector.extract_strided_slice %216 {offsets = [0, 0], sizes = [60, 32], strides = [1, 1]} : vector<64x32xf32> to vector<60x32xf32>
    %233 = vector.extract_strided_slice %216 {offsets = [1, 0], sizes = [60, 32], strides = [1, 1]} : vector<64x32xf32> to vector<60x32xf32>
    %234 = vector.extract_strided_slice %216 {offsets = [2, 0], sizes = [60, 32], strides = [1, 1]} : vector<64x32xf32> to vector<60x32xf32>
    %235 = vector.extract_strided_slice %216 {offsets = [3, 0], sizes = [60, 32], strides = [1, 1]} : vector<64x32xf32> to vector<60x32xf32>
    %236 = vector.extract_strided_slice %216 {offsets = [4, 0], sizes = [60, 32], strides = [1, 1]} : vector<64x32xf32> to vector<60x32xf32>
    %237 = tpu.concatenate %232, %233, %234, %235, %236 in 1 : vector<60x32xf32>, vector<60x32xf32>, vector<60x32xf32>, vector<60x32xf32>, vector<60x32xf32> -> vector<60x160xf32>
    %cst_112 = arith.constant dense<0.000000e+00> : vector<60x16xf32>
    %238 = tpu.matmul %237, %217, %cst_112 {dimension_numbers = #tpu.dot_dimension_numbers<[1], [0], [0], [1], [0, 0, 1, 1], [], []>} : vector<60x160xf32>, vector<160x16xf32>, vector<60x16xf32> -> vector<60x16xf32>
    %239 = vector.broadcast %218 : vector<1x16xf32> to vector<60x16xf32>
    %240 = arith.addf %238, %239 : vector<60x16xf32>
    %241 = arith.mulf %240, %240 : vector<60x16xf32>
    %cst_113 = arith.constant 0.000000e+00 : f32
    %242 = vector.broadcast %cst_113 : f32 to vector<1x16xf32>
    %cst_114 = arith.constant 0.000000e+00 : f32
    %243 = vector.broadcast %cst_114 : f32 to vector<1x16xf32>
    %244 = vector.extract_strided_slice %240 {offsets = [0, 0], sizes = [28, 16], strides = [1, 1]} : vector<60x16xf32> to vector<28x16xf32>
    %cst_115 = arith.constant dense<0.000000e+00> : vector<16xf32>
    %245 = vector.multi_reduction <add>, %244, %cst_115 [0] : vector<28x16xf32> to vector<16xf32>
    %246 = vector.shape_cast %245 : vector<16xf32> to vector<1x16xf32>
    %247 = arith.addf %242, %246 : vector<1x16xf32>
    %248 = vector.extract_strided_slice %241 {offsets = [0, 0], sizes = [28, 16], strides = [1, 1]} : vector<60x16xf32> to vector<28x16xf32>
    %cst_116 = arith.constant dense<0.000000e+00> : vector<16xf32>
    %249 = vector.multi_reduction <add>, %248, %cst_116 [0] : vector<28x16xf32> to vector<16xf32>
    %250 = vector.shape_cast %249 : vector<16xf32> to vector<1x16xf32>
    %251 = arith.addf %243, %250 : vector<1x16xf32>
    %252 = vector.extract_strided_slice %240 {offsets = [32, 0], sizes = [28, 16], strides = [1, 1]} : vector<60x16xf32> to vector<28x16xf32>
    %cst_117 = arith.constant dense<0.000000e+00> : vector<16xf32>
    %253 = vector.multi_reduction <add>, %252, %cst_117 [0] : vector<28x16xf32> to vector<16xf32>
    %254 = vector.shape_cast %253 : vector<16xf32> to vector<1x16xf32>
    %255 = arith.addf %247, %254 : vector<1x16xf32>
    %256 = vector.extract_strided_slice %241 {offsets = [32, 0], sizes = [28, 16], strides = [1, 1]} : vector<60x16xf32> to vector<28x16xf32>
    %cst_118 = arith.constant dense<0.000000e+00> : vector<16xf32>
    %257 = vector.multi_reduction <add>, %256, %cst_118 [0] : vector<28x16xf32> to vector<16xf32>
    %258 = vector.shape_cast %257 : vector<16xf32> to vector<1x16xf32>
    %259 = arith.addf %251, %258 : vector<1x16xf32>
    %cst_119 = arith.constant 5.600000e+01 : f32
    %260 = vector.broadcast %cst_119 : f32 to vector<1x16xf32>
    %261 = arith.divf %255, %260 : vector<1x16xf32>
    %cst_120 = arith.constant 5.600000e+01 : f32
    %262 = vector.broadcast %cst_120 : f32 to vector<1x16xf32>
    %263 = arith.divf %259, %262 : vector<1x16xf32>
    %264 = arith.mulf %261, %261 : vector<1x16xf32>
    %265 = arith.subf %263, %264 : vector<1x16xf32>
    %cst_121 = arith.constant 0.000000e+00 : f32
    %266 = vector.broadcast %cst_121 : f32 to vector<1x16xf32>
    %267 = arith.maximumf %265, %266 : vector<1x16xf32>
    %cst_122 = arith.constant 9.99999974E-6 : f32
    %268 = vector.broadcast %cst_122 : f32 to vector<1x16xf32>
    %269 = arith.addf %267, %268 : vector<1x16xf32>
    %270 = math.rsqrt %269 : vector<1x16xf32>
    %271 = arith.mulf %270, %219 : vector<1x16xf32>
    %272 = arith.mulf %261, %271 : vector<1x16xf32>
    %273 = arith.subf %220, %272 : vector<1x16xf32>
    %274 = vector.broadcast %271 : vector<1x16xf32> to vector<60x16xf32>
    %275 = arith.mulf %240, %274 : vector<60x16xf32>
    %276 = vector.broadcast %273 : vector<1x16xf32> to vector<60x16xf32>
    %277 = arith.addf %275, %276 : vector<60x16xf32>
    %cst_123 = arith.constant 0.000000e+00 : f32
    %278 = vector.broadcast %cst_123 : f32 to vector<60x16xf32>
    %279 = arith.subf %278, %277 : vector<60x16xf32>
    %280 = math.exp %279 : vector<60x16xf32>
    %cst_124 = arith.constant 1.000000e+00 : f32
    %281 = vector.broadcast %cst_124 : f32 to vector<60x16xf32>
    %282 = arith.addf %281, %280 : vector<60x16xf32>
    %283 = tpu.reciprocal %282 {approx = true} : vector<60x16xf32> -> vector<60x16xf32>
    %284 = arith.mulf %277, %283 : vector<60x16xf32>
    %285 = vector.extract_strided_slice %284 {offsets = [0, 0], sizes = [28, 16], strides = [1, 1]} : vector<60x16xf32> to vector<28x16xf32>
    %c4_125 = arith.constant 4 : index
    %c0_126 = arith.constant 0 : index
    %286 = vector.load %arg41[%c4_125, %c0_126] : memref<64x16xf32, #tpu.memory_space<vmem>>, vector<28x16xf32>
    tpu.vector_store %arg41[%c4_125, %c0_126], %285 {strides = array<i32>} : memref<64x16xf32, #tpu.memory_space<vmem>>, vector<28x16xf32>,
    %287 = vector.extract_strided_slice %284 {offsets = [32, 0], sizes = [28, 16], strides = [1, 1]} : vector<60x16xf32> to vector<28x16xf32>
    %c36 = arith.constant 36 : index
    %c0_127 = arith.constant 0 : index
    %288 = vector.load %arg41[%c36, %c0_127] : memref<64x16xf32, #tpu.memory_space<vmem>>, vector<28x16xf32>
    tpu.vector_store %arg41[%c36, %c0_127], %287 {strides = array<i32>} : memref<64x16xf32, #tpu.memory_space<vmem>>, vector<28x16xf32>,
    %c0_128 = arith.constant 0 : index
    %c0_129 = arith.constant 0 : index
    %289 = vector.load %arg41[%c0_128, %c0_129] : memref<64x16xf32, #tpu.memory_space<vmem>>, vector<64x16xf32>
    %290 = vector.extract_strided_slice %289 {offsets = [0, 0], sizes = [60, 16], strides = [1, 1]} : vector<64x16xf32> to vector<60x16xf32>
    %291 = vector.extract_strided_slice %289 {offsets = [1, 0], sizes = [60, 16], strides = [1, 1]} : vector<64x16xf32> to vector<60x16xf32>
    %292 = vector.extract_strided_slice %289 {offsets = [2, 0], sizes = [60, 16], strides = [1, 1]} : vector<64x16xf32> to vector<60x16xf32>
    %293 = vector.extract_strided_slice %289 {offsets = [3, 0], sizes = [60, 16], strides = [1, 1]} : vector<64x16xf32> to vector<60x16xf32>
    %294 = vector.extract_strided_slice %289 {offsets = [4, 0], sizes = [60, 16], strides = [1, 1]} : vector<64x16xf32> to vector<60x16xf32>
    %295 = tpu.concatenate %290, %291, %292, %293, %294 in 1 : vector<60x16xf32>, vector<60x16xf32>, vector<60x16xf32>, vector<60x16xf32>, vector<60x16xf32> -> vector<60x80xf32>
    %cst_130 = arith.constant dense<0.000000e+00> : vector<60x16xf32>
    %296 = tpu.matmul %295, %221, %cst_130 {dimension_numbers = #tpu.dot_dimension_numbers<[1], [0], [0], [1], [0, 0, 1, 1], [], []>} : vector<60x80xf32>, vector<80x16xf32>, vector<60x16xf32> -> vector<60x16xf32>
    %297 = vector.broadcast %222 : vector<1x16xf32> to vector<60x16xf32>
    %298 = arith.addf %296, %297 : vector<60x16xf32>
    %299 = arith.mulf %298, %298 : vector<60x16xf32>
    %cst_131 = arith.constant 0.000000e+00 : f32
    %300 = vector.broadcast %cst_131 : f32 to vector<1x16xf32>
    %cst_132 = arith.constant 0.000000e+00 : f32
    %301 = vector.broadcast %cst_132 : f32 to vector<1x16xf32>
    %302 = vector.extract_strided_slice %298 {offsets = [0, 0], sizes = [28, 16], strides = [1, 1]} : vector<60x16xf32> to vector<28x16xf32>
    %cst_133 = arith.constant dense<0.000000e+00> : vector<16xf32>
    %303 = vector.multi_reduction <add>, %302, %cst_133 [0] : vector<28x16xf32> to vector<16xf32>
    %304 = vector.shape_cast %303 : vector<16xf32> to vector<1x16xf32>
    %305 = arith.addf %300, %304 : vector<1x16xf32>
    %306 = vector.extract_strided_slice %299 {offsets = [0, 0], sizes = [28, 16], strides = [1, 1]} : vector<60x16xf32> to vector<28x16xf32>
    %cst_134 = arith.constant dense<0.000000e+00> : vector<16xf32>
    %307 = vector.multi_reduction <add>, %306, %cst_134 [0] : vector<28x16xf32> to vector<16xf32>
    %308 = vector.shape_cast %307 : vector<16xf32> to vector<1x16xf32>
    %309 = arith.addf %301, %308 : vector<1x16xf32>
    %310 = vector.extract_strided_slice %298 {offsets = [32, 0], sizes = [28, 16], strides = [1, 1]} : vector<60x16xf32> to vector<28x16xf32>
    %cst_135 = arith.constant dense<0.000000e+00> : vector<16xf32>
    %311 = vector.multi_reduction <add>, %310, %cst_135 [0] : vector<28x16xf32> to vector<16xf32>
    %312 = vector.shape_cast %311 : vector<16xf32> to vector<1x16xf32>
    %313 = arith.addf %305, %312 : vector<1x16xf32>
    %314 = vector.extract_strided_slice %299 {offsets = [32, 0], sizes = [28, 16], strides = [1, 1]} : vector<60x16xf32> to vector<28x16xf32>
    %cst_136 = arith.constant dense<0.000000e+00> : vector<16xf32>
    %315 = vector.multi_reduction <add>, %314, %cst_136 [0] : vector<28x16xf32> to vector<16xf32>
    %316 = vector.shape_cast %315 : vector<16xf32> to vector<1x16xf32>
    %317 = arith.addf %309, %316 : vector<1x16xf32>
    %cst_137 = arith.constant 5.600000e+01 : f32
    %318 = vector.broadcast %cst_137 : f32 to vector<1x16xf32>
    %319 = arith.divf %313, %318 : vector<1x16xf32>
    %cst_138 = arith.constant 5.600000e+01 : f32
    %320 = vector.broadcast %cst_138 : f32 to vector<1x16xf32>
    %321 = arith.divf %317, %320 : vector<1x16xf32>
    %322 = arith.mulf %319, %319 : vector<1x16xf32>
    %323 = arith.subf %321, %322 : vector<1x16xf32>
    %cst_139 = arith.constant 0.000000e+00 : f32
    %324 = vector.broadcast %cst_139 : f32 to vector<1x16xf32>
    %325 = arith.maximumf %323, %324 : vector<1x16xf32>
    %cst_140 = arith.constant 9.99999974E-6 : f32
    %326 = vector.broadcast %cst_140 : f32 to vector<1x16xf32>
    %327 = arith.addf %325, %326 : vector<1x16xf32>
    %328 = math.rsqrt %327 : vector<1x16xf32>
    %329 = arith.mulf %328, %223 : vector<1x16xf32>
    %330 = arith.mulf %319, %329 : vector<1x16xf32>
    %331 = arith.subf %224, %330 : vector<1x16xf32>
    %332 = vector.broadcast %329 : vector<1x16xf32> to vector<60x16xf32>
    %333 = arith.mulf %298, %332 : vector<60x16xf32>
    %334 = vector.broadcast %331 : vector<1x16xf32> to vector<60x16xf32>
    %335 = arith.addf %333, %334 : vector<60x16xf32>
    %cst_141 = arith.constant 0.000000e+00 : f32
    %336 = vector.broadcast %cst_141 : f32 to vector<60x16xf32>
    %337 = arith.subf %336, %335 : vector<60x16xf32>
    %338 = math.exp %337 : vector<60x16xf32>
    %cst_142 = arith.constant 1.000000e+00 : f32
    %339 = vector.broadcast %cst_142 : f32 to vector<60x16xf32>
    %340 = arith.addf %339, %338 : vector<60x16xf32>
    %341 = tpu.reciprocal %340 {approx = true} : vector<60x16xf32> -> vector<60x16xf32>
    %342 = arith.mulf %335, %341 : vector<60x16xf32>
    %343 = vector.extract_strided_slice %342 {offsets = [0, 0], sizes = [28, 16], strides = [1, 1]} : vector<60x16xf32> to vector<28x16xf32>
    %c4_143 = arith.constant 4 : index
    %c0_144 = arith.constant 0 : index
    %344 = vector.load %arg41[%c4_143, %c0_144] : memref<64x16xf32, #tpu.memory_space<vmem>>, vector<28x16xf32>
    tpu.vector_store %arg41[%c4_143, %c0_144], %343 {strides = array<i32>} : memref<64x16xf32, #tpu.memory_space<vmem>>, vector<28x16xf32>,
    %345 = vector.extract_strided_slice %342 {offsets = [32, 0], sizes = [28, 16], strides = [1, 1]} : vector<60x16xf32> to vector<28x16xf32>
    %c36_145 = arith.constant 36 : index
    %c0_146 = arith.constant 0 : index
    %346 = vector.load %arg41[%c36_145, %c0_146] : memref<64x16xf32, #tpu.memory_space<vmem>>, vector<28x16xf32>
    tpu.vector_store %arg41[%c36_145, %c0_146], %345 {strides = array<i32>} : memref<64x16xf32, #tpu.memory_space<vmem>>, vector<28x16xf32>,
    %c0_147 = arith.constant 0 : index
    %c0_148 = arith.constant 0 : index
    %347 = vector.load %arg41[%c0_147, %c0_148] : memref<64x16xf32, #tpu.memory_space<vmem>>, vector<64x16xf32>
    %348 = vector.extract_strided_slice %347 {offsets = [0, 0], sizes = [60, 16], strides = [1, 1]} : vector<64x16xf32> to vector<60x16xf32>
    %349 = vector.extract_strided_slice %347 {offsets = [1, 0], sizes = [60, 16], strides = [1, 1]} : vector<64x16xf32> to vector<60x16xf32>
    %350 = vector.extract_strided_slice %347 {offsets = [2, 0], sizes = [60, 16], strides = [1, 1]} : vector<64x16xf32> to vector<60x16xf32>
    %351 = vector.extract_strided_slice %347 {offsets = [3, 0], sizes = [60, 16], strides = [1, 1]} : vector<64x16xf32> to vector<60x16xf32>
    %352 = vector.extract_strided_slice %347 {offsets = [4, 0], sizes = [60, 16], strides = [1, 1]} : vector<64x16xf32> to vector<60x16xf32>
    %353 = tpu.concatenate %348, %349, %350, %351, %352 in 1 : vector<60x16xf32>, vector<60x16xf32>, vector<60x16xf32>, vector<60x16xf32>, vector<60x16xf32> -> vector<60x80xf32>
    %cst_149 = arith.constant dense<0.000000e+00> : vector<60x16xf32>
    %354 = tpu.matmul %353, %225, %cst_149 {dimension_numbers = #tpu.dot_dimension_numbers<[1], [0], [0], [1], [0, 0, 1, 1], [], []>} : vector<60x80xf32>, vector<80x16xf32>, vector<60x16xf32> -> vector<60x16xf32>
    %355 = vector.broadcast %226 : vector<1x16xf32> to vector<60x16xf32>
    %356 = arith.addf %354, %355 : vector<60x16xf32>
    %357 = arith.addf %240, %356 : vector<60x16xf32>
    %358 = arith.mulf %357, %357 : vector<60x16xf32>
    %cst_150 = arith.constant 0.000000e+00 : f32
    %359 = vector.broadcast %cst_150 : f32 to vector<1x16xf32>
    %cst_151 = arith.constant 0.000000e+00 : f32
    %360 = vector.broadcast %cst_151 : f32 to vector<1x16xf32>
    %361 = vector.extract_strided_slice %357 {offsets = [0, 0], sizes = [28, 16], strides = [1, 1]} : vector<60x16xf32> to vector<28x16xf32>
    %cst_152 = arith.constant dense<0.000000e+00> : vector<16xf32>
    %362 = vector.multi_reduction <add>, %361, %cst_152 [0] : vector<28x16xf32> to vector<16xf32>
    %363 = vector.shape_cast %362 : vector<16xf32> to vector<1x16xf32>
    %364 = arith.addf %359, %363 : vector<1x16xf32>
    %365 = vector.extract_strided_slice %358 {offsets = [0, 0], sizes = [28, 16], strides = [1, 1]} : vector<60x16xf32> to vector<28x16xf32>
    %cst_153 = arith.constant dense<0.000000e+00> : vector<16xf32>
    %366 = vector.multi_reduction <add>, %365, %cst_153 [0] : vector<28x16xf32> to vector<16xf32>
    %367 = vector.shape_cast %366 : vector<16xf32> to vector<1x16xf32>
    %368 = arith.addf %360, %367 : vector<1x16xf32>
    %369 = vector.extract_strided_slice %357 {offsets = [32, 0], sizes = [28, 16], strides = [1, 1]} : vector<60x16xf32> to vector<28x16xf32>
    %cst_154 = arith.constant dense<0.000000e+00> : vector<16xf32>
    %370 = vector.multi_reduction <add>, %369, %cst_154 [0] : vector<28x16xf32> to vector<16xf32>
    %371 = vector.shape_cast %370 : vector<16xf32> to vector<1x16xf32>
    %372 = arith.addf %364, %371 : vector<1x16xf32>
    %373 = vector.extract_strided_slice %358 {offsets = [32, 0], sizes = [28, 16], strides = [1, 1]} : vector<60x16xf32> to vector<28x16xf32>
    %cst_155 = arith.constant dense<0.000000e+00> : vector<16xf32>
    %374 = vector.multi_reduction <add>, %373, %cst_155 [0] : vector<28x16xf32> to vector<16xf32>
    %375 = vector.shape_cast %374 : vector<16xf32> to vector<1x16xf32>
    %376 = arith.addf %368, %375 : vector<1x16xf32>
    %cst_156 = arith.constant 5.600000e+01 : f32
    %377 = vector.broadcast %cst_156 : f32 to vector<1x16xf32>
    %378 = arith.divf %372, %377 : vector<1x16xf32>
    %cst_157 = arith.constant 5.600000e+01 : f32
    %379 = vector.broadcast %cst_157 : f32 to vector<1x16xf32>
    %380 = arith.divf %376, %379 : vector<1x16xf32>
    %381 = arith.mulf %378, %378 : vector<1x16xf32>
    %382 = arith.subf %380, %381 : vector<1x16xf32>
    %cst_158 = arith.constant 0.000000e+00 : f32
    %383 = vector.broadcast %cst_158 : f32 to vector<1x16xf32>
    %384 = arith.maximumf %382, %383 : vector<1x16xf32>
    %cst_159 = arith.constant 9.99999974E-6 : f32
    %385 = vector.broadcast %cst_159 : f32 to vector<1x16xf32>
    %386 = arith.addf %384, %385 : vector<1x16xf32>
    %387 = math.rsqrt %386 : vector<1x16xf32>
    %388 = arith.mulf %387, %227 : vector<1x16xf32>
    %389 = arith.mulf %378, %388 : vector<1x16xf32>
    %390 = arith.subf %228, %389 : vector<1x16xf32>
    %391 = vector.broadcast %388 : vector<1x16xf32> to vector<60x16xf32>
    %392 = arith.mulf %357, %391 : vector<60x16xf32>
    %393 = vector.broadcast %390 : vector<1x16xf32> to vector<60x16xf32>
    %394 = arith.addf %392, %393 : vector<60x16xf32>
    %cst_160 = arith.constant 0.000000e+00 : f32
    %395 = vector.broadcast %cst_160 : f32 to vector<60x16xf32>
    %396 = arith.subf %395, %394 : vector<60x16xf32>
    %397 = math.exp %396 : vector<60x16xf32>
    %cst_161 = arith.constant 1.000000e+00 : f32
    %398 = vector.broadcast %cst_161 : f32 to vector<60x16xf32>
    %399 = arith.addf %398, %397 : vector<60x16xf32>
    %400 = tpu.reciprocal %399 {approx = true} : vector<60x16xf32> -> vector<60x16xf32>
    %401 = arith.mulf %394, %400 : vector<60x16xf32>
    %402 = vector.extract_strided_slice %401 {offsets = [0, 0], sizes = [28, 16], strides = [1, 1]} : vector<60x16xf32> to vector<28x16xf32>
    %c4_162 = arith.constant 4 : index
    %c0_163 = arith.constant 0 : index
    %403 = vector.load %arg41[%c4_162, %c0_163] : memref<64x16xf32, #tpu.memory_space<vmem>>, vector<28x16xf32>
    tpu.vector_store %arg41[%c4_162, %c0_163], %402 {strides = array<i32>} : memref<64x16xf32, #tpu.memory_space<vmem>>, vector<28x16xf32>,
    %404 = vector.extract_strided_slice %401 {offsets = [32, 0], sizes = [28, 16], strides = [1, 1]} : vector<60x16xf32> to vector<28x16xf32>
    %c36_164 = arith.constant 36 : index
    %c0_165 = arith.constant 0 : index
    %405 = vector.load %arg41[%c36_164, %c0_165] : memref<64x16xf32, #tpu.memory_space<vmem>>, vector<28x16xf32>
    tpu.vector_store %arg41[%c36_164, %c0_165], %404 {strides = array<i32>} : memref<64x16xf32, #tpu.memory_space<vmem>>, vector<28x16xf32>,
    %c0_166 = arith.constant 0 : index
    %c0_167 = arith.constant 0 : index
    %406 = tpu.strided_load %arg41[%c0_166, %c0_167] {strides = array<i32: 2, 1>} : memref<64x16xf32, #tpu.memory_space<vmem>>, vector<32x16xf32>
    %c1_168 = arith.constant 1 : index
    %c0_169 = arith.constant 0 : index
    %407 = tpu.strided_load %arg41[%c1_168, %c0_169] {strides = array<i32: 2, 1>} : memref<64x16xf32, #tpu.memory_space<vmem>>, vector<32x16xf32>
    %408 = arith.maximumf %406, %407 : vector<32x16xf32>
    %c0_170 = arith.constant 0 : index
    %c0_171 = arith.constant 0 : index
    %409 = vector.load %arg25[%c0_170, %c0_171] : memref<80x8xf32, #tpu.memory_space<vmem>>, vector<80x8xf32>
    %c0_172 = arith.constant 0 : index
    %c0_173 = arith.constant 0 : index
    %410 = vector.load %arg26[%c0_172, %c0_173] : memref<1x8xf32, #tpu.memory_space<vmem>>, vector<1x8xf32>
    %c0_174 = arith.constant 0 : index
    %c0_175 = arith.constant 0 : index
    %411 = vector.load %arg27[%c0_174, %c0_175] : memref<1x8xf32, #tpu.memory_space<vmem>>, vector<1x8xf32>
    %c0_176 = arith.constant 0 : index
    %c0_177 = arith.constant 0 : index
    %412 = vector.load %arg28[%c0_176, %c0_177] : memref<1x8xf32, #tpu.memory_space<vmem>>, vector<1x8xf32>
    %c0_178 = arith.constant 0 : index
    %c0_179 = arith.constant 0 : index
    %413 = vector.load %arg29[%c0_178, %c0_179] : memref<40x8xf32, #tpu.memory_space<vmem>>, vector<40x8xf32>
    %c0_180 = arith.constant 0 : index
    %c0_181 = arith.constant 0 : index
    %414 = vector.load %arg30[%c0_180, %c0_181] : memref<1x8xf32, #tpu.memory_space<vmem>>, vector<1x8xf32>
    %c0_182 = arith.constant 0 : index
    %c0_183 = arith.constant 0 : index
    %415 = vector.load %arg31[%c0_182, %c0_183] : memref<1x8xf32, #tpu.memory_space<vmem>>, vector<1x8xf32>
    %c0_184 = arith.constant 0 : index
    %c0_185 = arith.constant 0 : index
    %416 = vector.load %arg32[%c0_184, %c0_185] : memref<1x8xf32, #tpu.memory_space<vmem>>, vector<1x8xf32>
    %c0_186 = arith.constant 0 : index
    %c0_187 = arith.constant 0 : index
    %417 = vector.load %arg33[%c0_186, %c0_187] : memref<40x8xf32, #tpu.memory_space<vmem>>, vector<40x8xf32>
    %c0_188 = arith.constant 0 : index
    %c0_189 = arith.constant 0 : index
    %418 = vector.load %arg34[%c0_188, %c0_189] : memref<1x8xf32, #tpu.memory_space<vmem>>, vector<1x8xf32>
    %c0_190 = arith.constant 0 : index
    %c0_191 = arith.constant 0 : index
    %419 = vector.load %arg35[%c0_190, %c0_191] : memref<1x8xf32, #tpu.memory_space<vmem>>, vector<1x8xf32>
    %c0_192 = arith.constant 0 : index
    %c0_193 = arith.constant 0 : index
    %420 = vector.load %arg36[%c0_192, %c0_193] : memref<1x8xf32, #tpu.memory_space<vmem>>, vector<1x8xf32>
    %cst_194 = arith.constant 0.000000e+00 : f32
    %421 = vector.broadcast %cst_194 : f32 to vector<4x8xf32>
    %c0_195 = arith.constant 0 : index
    %c0_196 = arith.constant 0 : index
    %422 = vector.load %arg42[%c0_195, %c0_196] : memref<32x8xf32, #tpu.memory_space<vmem>>, vector<4x8xf32>
    tpu.vector_store %arg42[%c0_195, %c0_196], %421 {strides = array<i32>} : memref<32x8xf32, #tpu.memory_space<vmem>>, vector<4x8xf32>,
    %c16 = arith.constant 16 : index
    %c0_197 = arith.constant 0 : index
    %423 = vector.load %arg42[%c16, %c0_197] : memref<32x8xf32, #tpu.memory_space<vmem>>, vector<4x8xf32>
    tpu.vector_store %arg42[%c16, %c0_197], %421 {strides = array<i32>} : memref<32x8xf32, #tpu.memory_space<vmem>>, vector<4x8xf32>,
    %424 = vector.extract_strided_slice %408 {offsets = [0, 0], sizes = [28, 16], strides = [1, 1]} : vector<32x16xf32> to vector<28x16xf32>
    %425 = vector.extract_strided_slice %408 {offsets = [1, 0], sizes = [28, 16], strides = [1, 1]} : vector<32x16xf32> to vector<28x16xf32>
    %426 = vector.extract_strided_slice %408 {offsets = [2, 0], sizes = [28, 16], strides = [1, 1]} : vector<32x16xf32> to vector<28x16xf32>
    %427 = vector.extract_strided_slice %408 {offsets = [3, 0], sizes = [28, 16], strides = [1, 1]} : vector<32x16xf32> to vector<28x16xf32>
    %428 = vector.extract_strided_slice %408 {offsets = [4, 0], sizes = [28, 16], strides = [1, 1]} : vector<32x16xf32> to vector<28x16xf32>
    %429 = tpu.concatenate %424, %425, %426, %427, %428 in 1 : vector<28x16xf32>, vector<28x16xf32>, vector<28x16xf32>, vector<28x16xf32>, vector<28x16xf32> -> vector<28x80xf32>
    %cst_198 = arith.constant dense<0.000000e+00> : vector<28x8xf32>
    %430 = tpu.matmul %429, %409, %cst_198 {dimension_numbers = #tpu.dot_dimension_numbers<[1], [0], [0], [1], [0, 0, 1, 1], [], []>} : vector<28x80xf32>, vector<80x8xf32>, vector<28x8xf32> -> vector<28x8xf32>
    %431 = vector.broadcast %410 : vector<1x8xf32> to vector<28x8xf32>
    %432 = arith.addf %430, %431 : vector<28x8xf32>
    %433 = arith.mulf %432, %432 : vector<28x8xf32>
    %cst_199 = arith.constant 0.000000e+00 : f32
    %434 = vector.broadcast %cst_199 : f32 to vector<1x8xf32>
    %cst_200 = arith.constant 0.000000e+00 : f32
    %435 = vector.broadcast %cst_200 : f32 to vector<1x8xf32>
    %436 = vector.extract_strided_slice %432 {offsets = [0, 0], sizes = [12, 8], strides = [1, 1]} : vector<28x8xf32> to vector<12x8xf32>
    %cst_201 = arith.constant dense<0.000000e+00> : vector<8xf32>
    %437 = vector.multi_reduction <add>, %436, %cst_201 [0] : vector<12x8xf32> to vector<8xf32>
    %438 = vector.shape_cast %437 : vector<8xf32> to vector<1x8xf32>
    %439 = arith.addf %434, %438 : vector<1x8xf32>
    %440 = vector.extract_strided_slice %433 {offsets = [0, 0], sizes = [12, 8], strides = [1, 1]} : vector<28x8xf32> to vector<12x8xf32>
    %cst_202 = arith.constant dense<0.000000e+00> : vector<8xf32>
    %441 = vector.multi_reduction <add>, %440, %cst_202 [0] : vector<12x8xf32> to vector<8xf32>
    %442 = vector.shape_cast %441 : vector<8xf32> to vector<1x8xf32>
    %443 = arith.addf %435, %442 : vector<1x8xf32>
    %444 = vector.extract_strided_slice %432 {offsets = [16, 0], sizes = [12, 8], strides = [1, 1]} : vector<28x8xf32> to vector<12x8xf32>
    %cst_203 = arith.constant dense<0.000000e+00> : vector<8xf32>
    %445 = vector.multi_reduction <add>, %444, %cst_203 [0] : vector<12x8xf32> to vector<8xf32>
    %446 = vector.shape_cast %445 : vector<8xf32> to vector<1x8xf32>
    %447 = arith.addf %439, %446 : vector<1x8xf32>
    %448 = vector.extract_strided_slice %433 {offsets = [16, 0], sizes = [12, 8], strides = [1, 1]} : vector<28x8xf32> to vector<12x8xf32>
    %cst_204 = arith.constant dense<0.000000e+00> : vector<8xf32>
    %449 = vector.multi_reduction <add>, %448, %cst_204 [0] : vector<12x8xf32> to vector<8xf32>
    %450 = vector.shape_cast %449 : vector<8xf32> to vector<1x8xf32>
    %451 = arith.addf %443, %450 : vector<1x8xf32>
    %cst_205 = arith.constant 2.400000e+01 : f32
    %452 = vector.broadcast %cst_205 : f32 to vector<1x8xf32>
    %453 = arith.divf %447, %452 : vector<1x8xf32>
    %cst_206 = arith.constant 2.400000e+01 : f32
    %454 = vector.broadcast %cst_206 : f32 to vector<1x8xf32>
    %455 = arith.divf %451, %454 : vector<1x8xf32>
    %456 = arith.mulf %453, %453 : vector<1x8xf32>
    %457 = arith.subf %455, %456 : vector<1x8xf32>
    %cst_207 = arith.constant 0.000000e+00 : f32
    %458 = vector.broadcast %cst_207 : f32 to vector<1x8xf32>
    %459 = arith.maximumf %457, %458 : vector<1x8xf32>
    %cst_208 = arith.constant 9.99999974E-6 : f32
    %460 = vector.broadcast %cst_208 : f32 to vector<1x8xf32>
    %461 = arith.addf %459, %460 : vector<1x8xf32>
    %462 = math.rsqrt %461 : vector<1x8xf32>
    %463 = arith.mulf %462, %411 : vector<1x8xf32>
    %464 = arith.mulf %453, %463 : vector<1x8xf32>
    %465 = arith.subf %412, %464 : vector<1x8xf32>
    %466 = vector.broadcast %463 : vector<1x8xf32> to vector<28x8xf32>
    %467 = arith.mulf %432, %466 : vector<28x8xf32>
    %468 = vector.broadcast %465 : vector<1x8xf32> to vector<28x8xf32>
    %469 = arith.addf %467, %468 : vector<28x8xf32>
    %cst_209 = arith.constant 0.000000e+00 : f32
    %470 = vector.broadcast %cst_209 : f32 to vector<28x8xf32>
    %471 = arith.subf %470, %469 : vector<28x8xf32>
    %472 = math.exp %471 : vector<28x8xf32>
    %cst_210 = arith.constant 1.000000e+00 : f32
    %473 = vector.broadcast %cst_210 : f32 to vector<28x8xf32>
    %474 = arith.addf %473, %472 : vector<28x8xf32>
    %475 = tpu.reciprocal %474 {approx = true} : vector<28x8xf32> -> vector<28x8xf32>
    %476 = arith.mulf %469, %475 : vector<28x8xf32>
    %477 = vector.extract_strided_slice %476 {offsets = [0, 0], sizes = [12, 8], strides = [1, 1]} : vector<28x8xf32> to vector<12x8xf32>
    %c4_211 = arith.constant 4 : index
    %c0_212 = arith.constant 0 : index
    %478 = vector.load %arg42[%c4_211, %c0_212] : memref<32x8xf32, #tpu.memory_space<vmem>>, vector<12x8xf32>
    tpu.vector_store %arg42[%c4_211, %c0_212], %477 {strides = array<i32>} : memref<32x8xf32, #tpu.memory_space<vmem>>, vector<12x8xf32>,
    %479 = vector.extract_strided_slice %476 {offsets = [16, 0], sizes = [12, 8], strides = [1, 1]} : vector<28x8xf32> to vector<12x8xf32>
    %c20 = arith.constant 20 : index
    %c0_213 = arith.constant 0 : index
    %480 = vector.load %arg42[%c20, %c0_213] : memref<32x8xf32, #tpu.memory_space<vmem>>, vector<12x8xf32>
    tpu.vector_store %arg42[%c20, %c0_213], %479 {strides = array<i32>} : memref<32x8xf32, #tpu.memory_space<vmem>>, vector<12x8xf32>,
    %c0_214 = arith.constant 0 : index
    %c0_215 = arith.constant 0 : index
    %481 = vector.load %arg42[%c0_214, %c0_215] : memref<32x8xf32, #tpu.memory_space<vmem>>, vector<32x8xf32>
    %482 = vector.extract_strided_slice %481 {offsets = [0, 0], sizes = [28, 8], strides = [1, 1]} : vector<32x8xf32> to vector<28x8xf32>
    %483 = vector.extract_strided_slice %481 {offsets = [1, 0], sizes = [28, 8], strides = [1, 1]} : vector<32x8xf32> to vector<28x8xf32>
    %484 = vector.extract_strided_slice %481 {offsets = [2, 0], sizes = [28, 8], strides = [1, 1]} : vector<32x8xf32> to vector<28x8xf32>
    %485 = vector.extract_strided_slice %481 {offsets = [3, 0], sizes = [28, 8], strides = [1, 1]} : vector<32x8xf32> to vector<28x8xf32>
    %486 = vector.extract_strided_slice %481 {offsets = [4, 0], sizes = [28, 8], strides = [1, 1]} : vector<32x8xf32> to vector<28x8xf32>
    %487 = tpu.concatenate %482, %483, %484, %485, %486 in 1 : vector<28x8xf32>, vector<28x8xf32>, vector<28x8xf32>, vector<28x8xf32>, vector<28x8xf32> -> vector<28x40xf32>
    %cst_216 = arith.constant dense<0.000000e+00> : vector<28x8xf32>
    %488 = tpu.matmul %487, %413, %cst_216 {dimension_numbers = #tpu.dot_dimension_numbers<[1], [0], [0], [1], [0, 0, 1, 1], [], []>} : vector<28x40xf32>, vector<40x8xf32>, vector<28x8xf32> -> vector<28x8xf32>
    %489 = vector.broadcast %414 : vector<1x8xf32> to vector<28x8xf32>
    %490 = arith.addf %488, %489 : vector<28x8xf32>
    %491 = arith.mulf %490, %490 : vector<28x8xf32>
    %cst_217 = arith.constant 0.000000e+00 : f32
    %492 = vector.broadcast %cst_217 : f32 to vector<1x8xf32>
    %cst_218 = arith.constant 0.000000e+00 : f32
    %493 = vector.broadcast %cst_218 : f32 to vector<1x8xf32>
    %494 = vector.extract_strided_slice %490 {offsets = [0, 0], sizes = [12, 8], strides = [1, 1]} : vector<28x8xf32> to vector<12x8xf32>
    %cst_219 = arith.constant dense<0.000000e+00> : vector<8xf32>
    %495 = vector.multi_reduction <add>, %494, %cst_219 [0] : vector<12x8xf32> to vector<8xf32>
    %496 = vector.shape_cast %495 : vector<8xf32> to vector<1x8xf32>
    %497 = arith.addf %492, %496 : vector<1x8xf32>
    %498 = vector.extract_strided_slice %491 {offsets = [0, 0], sizes = [12, 8], strides = [1, 1]} : vector<28x8xf32> to vector<12x8xf32>
    %cst_220 = arith.constant dense<0.000000e+00> : vector<8xf32>
    %499 = vector.multi_reduction <add>, %498, %cst_220 [0] : vector<12x8xf32> to vector<8xf32>
    %500 = vector.shape_cast %499 : vector<8xf32> to vector<1x8xf32>
    %501 = arith.addf %493, %500 : vector<1x8xf32>
    %502 = vector.extract_strided_slice %490 {offsets = [16, 0], sizes = [12, 8], strides = [1, 1]} : vector<28x8xf32> to vector<12x8xf32>
    %cst_221 = arith.constant dense<0.000000e+00> : vector<8xf32>
    %503 = vector.multi_reduction <add>, %502, %cst_221 [0] : vector<12x8xf32> to vector<8xf32>
    %504 = vector.shape_cast %503 : vector<8xf32> to vector<1x8xf32>
    %505 = arith.addf %497, %504 : vector<1x8xf32>
    %506 = vector.extract_strided_slice %491 {offsets = [16, 0], sizes = [12, 8], strides = [1, 1]} : vector<28x8xf32> to vector<12x8xf32>
    %cst_222 = arith.constant dense<0.000000e+00> : vector<8xf32>
    %507 = vector.multi_reduction <add>, %506, %cst_222 [0] : vector<12x8xf32> to vector<8xf32>
    %508 = vector.shape_cast %507 : vector<8xf32> to vector<1x8xf32>
    %509 = arith.addf %501, %508 : vector<1x8xf32>
    %cst_223 = arith.constant 2.400000e+01 : f32
    %510 = vector.broadcast %cst_223 : f32 to vector<1x8xf32>
    %511 = arith.divf %505, %510 : vector<1x8xf32>
    %cst_224 = arith.constant 2.400000e+01 : f32
    %512 = vector.broadcast %cst_224 : f32 to vector<1x8xf32>
    %513 = arith.divf %509, %512 : vector<1x8xf32>
    %514 = arith.mulf %511, %511 : vector<1x8xf32>
    %515 = arith.subf %513, %514 : vector<1x8xf32>
    %cst_225 = arith.constant 0.000000e+00 : f32
    %516 = vector.broadcast %cst_225 : f32 to vector<1x8xf32>
    %517 = arith.maximumf %515, %516 : vector<1x8xf32>
    %cst_226 = arith.constant 9.99999974E-6 : f32
    %518 = vector.broadcast %cst_226 : f32 to vector<1x8xf32>
    %519 = arith.addf %517, %518 : vector<1x8xf32>
    %520 = math.rsqrt %519 : vector<1x8xf32>
    %521 = arith.mulf %520, %415 : vector<1x8xf32>
    %522 = arith.mulf %511, %521 : vector<1x8xf32>
    %523 = arith.subf %416, %522 : vector<1x8xf32>
    %524 = vector.broadcast %521 : vector<1x8xf32> to vector<28x8xf32>
    %525 = arith.mulf %490, %524 : vector<28x8xf32>
    %526 = vector.broadcast %523 : vector<1x8xf32> to vector<28x8xf32>
    %527 = arith.addf %525, %526 : vector<28x8xf32>
    %cst_227 = arith.constant 0.000000e+00 : f32
    %528 = vector.broadcast %cst_227 : f32 to vector<28x8xf32>
    %529 = arith.subf %528, %527 : vector<28x8xf32>
    %530 = math.exp %529 : vector<28x8xf32>
    %cst_228 = arith.constant 1.000000e+00 : f32
    %531 = vector.broadcast %cst_228 : f32 to vector<28x8xf32>
    %532 = arith.addf %531, %530 : vector<28x8xf32>
    %533 = tpu.reciprocal %532 {approx = true} : vector<28x8xf32> -> vector<28x8xf32>
    %534 = arith.mulf %527, %533 : vector<28x8xf32>
    %535 = vector.extract_strided_slice %534 {offsets = [0, 0], sizes = [12, 8], strides = [1, 1]} : vector<28x8xf32> to vector<12x8xf32>
    %c4_229 = arith.constant 4 : index
    %c0_230 = arith.constant 0 : index
    %536 = vector.load %arg42[%c4_229, %c0_230] : memref<32x8xf32, #tpu.memory_space<vmem>>, vector<12x8xf32>
    tpu.vector_store %arg42[%c4_229, %c0_230], %535 {strides = array<i32>} : memref<32x8xf32, #tpu.memory_space<vmem>>, vector<12x8xf32>,
    %537 = vector.extract_strided_slice %534 {offsets = [16, 0], sizes = [12, 8], strides = [1, 1]} : vector<28x8xf32> to vector<12x8xf32>
    %c20_231 = arith.constant 20 : index
    %c0_232 = arith.constant 0 : index
    %538 = vector.load %arg42[%c20_231, %c0_232] : memref<32x8xf32, #tpu.memory_space<vmem>>, vector<12x8xf32>
    tpu.vector_store %arg42[%c20_231, %c0_232], %537 {strides = array<i32>} : memref<32x8xf32, #tpu.memory_space<vmem>>, vector<12x8xf32>,
    %c0_233 = arith.constant 0 : index
    %c0_234 = arith.constant 0 : index
    %539 = vector.load %arg42[%c0_233, %c0_234] : memref<32x8xf32, #tpu.memory_space<vmem>>, vector<32x8xf32>
    %540 = vector.extract_strided_slice %539 {offsets = [0, 0], sizes = [28, 8], strides = [1, 1]} : vector<32x8xf32> to vector<28x8xf32>
    %541 = vector.extract_strided_slice %539 {offsets = [1, 0], sizes = [28, 8], strides = [1, 1]} : vector<32x8xf32> to vector<28x8xf32>
    %542 = vector.extract_strided_slice %539 {offsets = [2, 0], sizes = [28, 8], strides = [1, 1]} : vector<32x8xf32> to vector<28x8xf32>
    %543 = vector.extract_strided_slice %539 {offsets = [3, 0], sizes = [28, 8], strides = [1, 1]} : vector<32x8xf32> to vector<28x8xf32>
    %544 = vector.extract_strided_slice %539 {offsets = [4, 0], sizes = [28, 8], strides = [1, 1]} : vector<32x8xf32> to vector<28x8xf32>
    %545 = tpu.concatenate %540, %541, %542, %543, %544 in 1 : vector<28x8xf32>, vector<28x8xf32>, vector<28x8xf32>, vector<28x8xf32>, vector<28x8xf32> -> vector<28x40xf32>
    %cst_235 = arith.constant dense<0.000000e+00> : vector<28x8xf32>
    %546 = tpu.matmul %545, %417, %cst_235 {dimension_numbers = #tpu.dot_dimension_numbers<[1], [0], [0], [1], [0, 0, 1, 1], [], []>} : vector<28x40xf32>, vector<40x8xf32>, vector<28x8xf32> -> vector<28x8xf32>
    %547 = vector.broadcast %418 : vector<1x8xf32> to vector<28x8xf32>
    %548 = arith.addf %546, %547 : vector<28x8xf32>
    %549 = arith.addf %432, %548 : vector<28x8xf32>
    %550 = arith.mulf %549, %549 : vector<28x8xf32>
    %cst_236 = arith.constant 0.000000e+00 : f32
    %551 = vector.broadcast %cst_236 : f32 to vector<1x8xf32>
    %cst_237 = arith.constant 0.000000e+00 : f32
    %552 = vector.broadcast %cst_237 : f32 to vector<1x8xf32>
    %553 = vector.extract_strided_slice %549 {offsets = [0, 0], sizes = [12, 8], strides = [1, 1]} : vector<28x8xf32> to vector<12x8xf32>
    %cst_238 = arith.constant dense<0.000000e+00> : vector<8xf32>
    %554 = vector.multi_reduction <add>, %553, %cst_238 [0] : vector<12x8xf32> to vector<8xf32>
    %555 = vector.shape_cast %554 : vector<8xf32> to vector<1x8xf32>
    %556 = arith.addf %551, %555 : vector<1x8xf32>
    %557 = vector.extract_strided_slice %550 {offsets = [0, 0], sizes = [12, 8], strides = [1, 1]} : vector<28x8xf32> to vector<12x8xf32>
    %cst_239 = arith.constant dense<0.000000e+00> : vector<8xf32>
    %558 = vector.multi_reduction <add>, %557, %cst_239 [0] : vector<12x8xf32> to vector<8xf32>
    %559 = vector.shape_cast %558 : vector<8xf32> to vector<1x8xf32>
    %560 = arith.addf %552, %559 : vector<1x8xf32>
    %561 = vector.extract_strided_slice %549 {offsets = [16, 0], sizes = [12, 8], strides = [1, 1]} : vector<28x8xf32> to vector<12x8xf32>
    %cst_240 = arith.constant dense<0.000000e+00> : vector<8xf32>
    %562 = vector.multi_reduction <add>, %561, %cst_240 [0] : vector<12x8xf32> to vector<8xf32>
    %563 = vector.shape_cast %562 : vector<8xf32> to vector<1x8xf32>
    %564 = arith.addf %556, %563 : vector<1x8xf32>
    %565 = vector.extract_strided_slice %550 {offsets = [16, 0], sizes = [12, 8], strides = [1, 1]} : vector<28x8xf32> to vector<12x8xf32>
    %cst_241 = arith.constant dense<0.000000e+00> : vector<8xf32>
    %566 = vector.multi_reduction <add>, %565, %cst_241 [0] : vector<12x8xf32> to vector<8xf32>
    %567 = vector.shape_cast %566 : vector<8xf32> to vector<1x8xf32>
    %568 = arith.addf %560, %567 : vector<1x8xf32>
    %cst_242 = arith.constant 2.400000e+01 : f32
    %569 = vector.broadcast %cst_242 : f32 to vector<1x8xf32>
    %570 = arith.divf %564, %569 : vector<1x8xf32>
    %cst_243 = arith.constant 2.400000e+01 : f32
    %571 = vector.broadcast %cst_243 : f32 to vector<1x8xf32>
    %572 = arith.divf %568, %571 : vector<1x8xf32>
    %573 = arith.mulf %570, %570 : vector<1x8xf32>
    %574 = arith.subf %572, %573 : vector<1x8xf32>
    %cst_244 = arith.constant 0.000000e+00 : f32
    %575 = vector.broadcast %cst_244 : f32 to vector<1x8xf32>
    %576 = arith.maximumf %574, %575 : vector<1x8xf32>
    %cst_245 = arith.constant 9.99999974E-6 : f32
    %577 = vector.broadcast %cst_245 : f32 to vector<1x8xf32>
    %578 = arith.addf %576, %577 : vector<1x8xf32>
    %579 = math.rsqrt %578 : vector<1x8xf32>
    %580 = arith.mulf %579, %419 : vector<1x8xf32>
    %581 = arith.mulf %570, %580 : vector<1x8xf32>
    %582 = arith.subf %420, %581 : vector<1x8xf32>
    %583 = vector.broadcast %580 : vector<1x8xf32> to vector<28x8xf32>
    %584 = arith.mulf %549, %583 : vector<28x8xf32>
    %585 = vector.broadcast %582 : vector<1x8xf32> to vector<28x8xf32>
    %586 = arith.addf %584, %585 : vector<28x8xf32>
    %cst_246 = arith.constant 0.000000e+00 : f32
    %587 = vector.broadcast %cst_246 : f32 to vector<28x8xf32>
    %588 = arith.subf %587, %586 : vector<28x8xf32>
    %589 = math.exp %588 : vector<28x8xf32>
    %cst_247 = arith.constant 1.000000e+00 : f32
    %590 = vector.broadcast %cst_247 : f32 to vector<28x8xf32>
    %591 = arith.addf %590, %589 : vector<28x8xf32>
    %592 = tpu.reciprocal %591 {approx = true} : vector<28x8xf32> -> vector<28x8xf32>
    %593 = arith.mulf %586, %592 : vector<28x8xf32>
    %594 = vector.extract_strided_slice %593 {offsets = [0, 0], sizes = [12, 8], strides = [1, 1]} : vector<28x8xf32> to vector<12x8xf32>
    %c4_248 = arith.constant 4 : index
    %c0_249 = arith.constant 0 : index
    %595 = vector.load %arg42[%c4_248, %c0_249] : memref<32x8xf32, #tpu.memory_space<vmem>>, vector<12x8xf32>
    tpu.vector_store %arg42[%c4_248, %c0_249], %594 {strides = array<i32>} : memref<32x8xf32, #tpu.memory_space<vmem>>, vector<12x8xf32>,
    %596 = vector.extract_strided_slice %593 {offsets = [16, 0], sizes = [12, 8], strides = [1, 1]} : vector<28x8xf32> to vector<12x8xf32>
    %c20_250 = arith.constant 20 : index
    %c0_251 = arith.constant 0 : index
    %597 = vector.load %arg42[%c20_250, %c0_251] : memref<32x8xf32, #tpu.memory_space<vmem>>, vector<12x8xf32>
    tpu.vector_store %arg42[%c20_250, %c0_251], %596 {strides = array<i32>} : memref<32x8xf32, #tpu.memory_space<vmem>>, vector<12x8xf32>,
    %c0_252 = arith.constant 0 : index
    %c0_253 = arith.constant 0 : index
    %598 = tpu.strided_load %arg42[%c0_252, %c0_253] {strides = array<i32: 2, 1>} : memref<32x8xf32, #tpu.memory_space<vmem>>, vector<16x8xf32>
    %c1_254 = arith.constant 1 : index
    %c0_255 = arith.constant 0 : index
    %599 = tpu.strided_load %arg42[%c1_254, %c0_255] {strides = array<i32: 2, 1>} : memref<32x8xf32, #tpu.memory_space<vmem>>, vector<16x8xf32>
    %600 = arith.maximumf %598, %599 : vector<16x8xf32>
    %601 = vector.extract_strided_slice %600 {offsets = [0, 0], sizes = [8, 8], strides = [1, 1]} : vector<16x8xf32> to vector<8x8xf32>
    %cst_256 = arith.constant dense<0.000000e+00> : vector<8xf32>
    %602 = vector.multi_reduction <add>, %601, %cst_256 [0] : vector<8x8xf32> to vector<8xf32>
    %603 = vector.shape_cast %602 : vector<8xf32> to vector<1x8xf32>
    %cst_257 = arith.constant 1.250000e-01 : f32
    %604 = vector.broadcast %cst_257 : f32 to vector<1x8xf32>
    %605 = arith.mulf %603, %604 : vector<1x8xf32>
    %606 = vector.extract_strided_slice %600 {offsets = [8, 0], sizes = [8, 8], strides = [1, 1]} : vector<16x8xf32> to vector<8x8xf32>
    %cst_258 = arith.constant dense<0.000000e+00> : vector<8xf32>
    %607 = vector.multi_reduction <add>, %606, %cst_258 [0] : vector<8x8xf32> to vector<8xf32>
    %608 = vector.shape_cast %607 : vector<8xf32> to vector<1x8xf32>
    %cst_259 = arith.constant 1.250000e-01 : f32
    %609 = vector.broadcast %cst_259 : f32 to vector<1x8xf32>
    %610 = arith.mulf %608, %609 : vector<1x8xf32>
    %611 = tpu.concatenate %605, %610 in 0 : vector<1x8xf32>, vector<1x8xf32> -> vector<2x8xf32>
    %c0_260 = arith.constant 0 : index
    %c0_261 = arith.constant 0 : index
    %612 = vector.load %arg37[%c0_260, %c0_261] : memref<8x5xf32, #tpu.memory_space<vmem>>, vector<8x5xf32>
    %cst_262 = arith.constant dense<0.000000e+00> : vector<2x5xf32>
    %613 = tpu.matmul %611, %612, %cst_262 {dimension_numbers = #tpu.dot_dimension_numbers<[1], [0], [0], [1], [0, 0, 1, 1], [], []>} : vector<2x8xf32>, vector<8x5xf32>, vector<2x5xf32> -> vector<2x5xf32>
    %c0_263 = arith.constant 0 : index
    %c0_264 = arith.constant 0 : index
    %614 = vector.load %arg38[%c0_263, %c0_264] : memref<1x5xf32, #tpu.memory_space<vmem>>, vector<1x5xf32>
    %615 = vector.broadcast %614 : vector<1x5xf32> to vector<2x5xf32>
    %616 = arith.addf %613, %615 : vector<2x5xf32>
    %cst_265 = arith.constant dense<0xFF800000> : vector<2xf32>
    %617 = vector.multi_reduction <maximumf>, %616, %cst_265 [1] : vector<2x5xf32> to vector<2xf32>
    %618 = vector.shape_cast %617 : vector<2xf32> to vector<2x1xf32>
    %619 = vector.broadcast %618 : vector<2x1xf32> to vector<2x5xf32>
    %620 = arith.subf %616, %619 : vector<2x5xf32>
    %621 = math.exp %620 : vector<2x5xf32>
    %cst_266 = arith.constant dense<0.000000e+00> : vector<2xf32>
    %622 = vector.multi_reduction <add>, %621, %cst_266 [1] : vector<2x5xf32> to vector<2xf32>
    %623 = vector.shape_cast %622 : vector<2xf32> to vector<2x1xf32>
    %624 = vector.broadcast %623 : vector<2x1xf32> to vector<2x5xf32>
    %625 = arith.divf %621, %624 : vector<2x5xf32>
    %c0_267 = arith.constant 0 : index
    %c0_268 = arith.constant 0 : index
    %626 = vector.load %arg39[%c0_267, %c0_268] : memref<2x5xf32, #tpu.memory_space<vmem>>, vector<2x5xf32>
    tpu.vector_store %arg39[%c0_267, %c0_268], %625 {strides = array<i32>} : memref<2x5xf32, #tpu.memory_space<vmem>>, vector<2x5xf32>,
    return
  }
}

</mosaic_0001>

<bundles_post_ra>
// kernel: cnn_forward.1
= control target key start
LH: loop header
LB: loop body
LE: loop exit
PB: predicated region body
PF: predicated region fallthrough
CT: control target
= control target key end

     0   :  { %s7296_s6 = smov 1   ;;  %s7297_s10 = smov 2   ;;  %s10626_s0 = inlined_call_operand.smem [shape: u32[40], index: -1, kind: input, shape index: {}] }
   0x1   :  { %s7378_s5 = sld [smem:[%s10626_s0]]   ;;  %s7298_s14 = smov 3  }
   0x2   :  { %s7383_s9 = sld [smem:[%s10626_s0 + %s7296_s6]]   ;;  %s7299_s18 = smov 4  }
   0x3   :  { %s7388_s13 = sld [smem:[%s10626_s0 + %s7297_s10]]   ;;  %s7300_s22 = smov 5  }
   0x4   :  { %s7393_s17 = sld [smem:[%s10626_s0 + %s7298_s14]]   ;;  %s7301_s26 = smov 6  }
   0x5   :  { %s7398_s21 = sld [smem:[%s10626_s0 + %s7299_s18]]   ;;  %s7302_s30 = smov 7  }
   0x6   :  { %s7403_s25 = sld [smem:[%s10626_s0 + %s7300_s22]]   ;;  %s7303_s4 = smov 8  }
   0x7   :  { %10649 = sst [smem:[#allocation55_spill]] %s7378_s5  ;;  %s7304_s10 = smov 9  }
   0x8   :  { %10650 = sst [smem:[#allocation56_spill]] %s7383_s9  ;;  %s7305_s15 = smov 10  }
   0x9   :  { %s7408_s29 = sld [smem:[%s10626_s0 + %s7301_s26]]   ;;  %s7306_s20 = smov 11  }
   0xa   :  { %s7413_s3 = sld [smem:[%s10626_s0 + %s7302_s30]]   ;;  %s7307_s26 = smov 12  }
   0xb   :  { %s7418_s8 = sld [smem:[%s10626_s0 + %s7303_s4]]   ;;  %s7308_s1 = smov 13  }
   0xc   :  { %10651 = sst [smem:[#allocation57_spill]] %s7403_s25  ;;  %s7309_s7 = smov 14  }
   0xd   :  { %s7423_s14 = sld [smem:[%s10626_s0 + %s7304_s10]]   ;;  %s7311_s22 = smov 16  }
   0xe   :  { %s7428_s19 = sld [smem:[%s10626_s0 + %s7305_s15]]   ;;  %s7310_s15 = smov 15  }
   0xf   :  { %s7433_s24 = sld [smem:[%s10626_s0 + %s7306_s20]]   ;;  %s7312_s28 = smov 17  }
  0x10   :  { %s7438_s30 = sld [smem:[%s10626_s0 + %s7307_s26]]  }
  0x11   :  { %s7443_s6 = sld [smem:[%s10626_s0 + %s7308_s1]]  }
  0x12   :  { %s7448_s12 = sld [smem:[%s10626_s0 + %s7309_s7]]   ;;  %s7313_s7 = smov 18  }
  0x13   :  { %10652 = sst [smem:[#allocation58_spill]] %s7423_s14 }
  0x14   :  { %10653 = sst [smem:[#allocation59_spill]] %s7428_s19 }
  0x15   :  { %s7453_s20 = sld [smem:[%s10626_s0 + %s7310_s15]]   ;;  %s7314_s15 = smov 19  }
  0x16   :  { %10654 = sst [smem:[#allocation60_spill]] %s7438_s30 }
  0x17   :  { %10655 = sst [smem:[#allocation61_spill]] %s7443_s6 }
  0x18   :  { %s7458_s27 = sld [smem:[%s10626_s0 + %s7311_s22]]   ;;  %s7315_s22 = smov 20  }
  0x19   :  { %s7463_s4 = sld [smem:[%s10626_s0 + %s7312_s28]]   ;;  %s7316_s28 = smov 21  }
  0x1a   :  { %s7468_s6 = sld [smem:[%s10626_s0 + %s7313_s7]]   ;;  %s7317_s7 = smov 22  }
  0x1b   :  { %10656 = sst [smem:[#allocation62_spill]] %s7453_s20 }
  0x1c   :  { %s7473_s14 = sld [smem:[%s10626_s0 + %s7314_s15]]   ;;  %s7318_s15 = smov 23  }
  0x1d   :  { %s7478_s25 = sld [smem:[%s10626_s0 + %s7315_s22]]   ;;  %s7319_s22 = smov 24  }
  0x1e   :  { %s7488_s9 = sld [smem:[%s10626_s0 + %s7317_s7]]   ;;  %s7321_s7 = smov 26  }
  0x1f   :  { %10657 = sst [smem:[#allocation63_spill]] %s7463_s4 }
  0x20   :  { %10658 = sst [smem:[#allocation64_spill]] %s7468_s6 }
  0x21   :  { %s7483_s4 = sld [smem:[%s10626_s0 + %s7316_s28]]   ;;  %s7320_s28 = smov 25  }
  0x22   :  { %s7493_s5 = sld [smem:[%s10626_s0 + %s7318_s15]]   ;;  %s7322_s15 = smov 27  }
  0x23   :  { %10659 = sst [smem:[#allocation65_spill]] %s7478_s25 }
  0x24   :  { %s7498_s25 = sld [smem:[%s10626_s0 + %s7319_s22]]   ;;  %s7323_s22 = smov 28  }
  0x25   :  { %s7508_s6 = sld [smem:[%s10626_s0 + %s7321_s7]]   ;;  %s7325_s7 = smov 30  }
  0x26   :  { %s7518_s20 = sld [smem:[%s10626_s0 + %s7323_s22]]   ;;  %s7327_s22 = smov 32  }
  0x27   :  { %10660 = sst [smem:[#allocation66_spill]] %s7483_s4 }
  0x28   :  { %10661 = sst [smem:[#allocation67_spill]] %s7493_s5 }
  0x29   :  { %s7503_s4 = sld [smem:[%s10626_s0 + %s7320_s28]]   ;;  %s7324_s28 = smov 29  }
  0x2a   :  { %s7513_s5 = sld [smem:[%s10626_s0 + %s7322_s15]]   ;;  %s7326_s15 = smov 31  }
  0x2b   :  { %10663 = sst [smem:[#allocation69_spill]] %s7508_s6 }
  0x2c   :  { %s7528_s6 = sld [smem:[%s10626_s0 + %s7325_s7]]   ;;  %s7329_s7 = smov 34  }
  0x2d   :  { %s7538_s30 = sld [smem:[%s10626_s0 + %s7327_s22]]   ;;  %s7331_s22 = smov 36  }
  0x2e   :  { %s7558_s19 = sld [smem:[%s10626_s0 + %s7331_s22]]  }
  0x2f   :  { %10662 = sst [smem:[#allocation68_spill]] %s7503_s4 }
  0x30   :  { %10664 = sst [smem:[#allocation70_spill]] %s7513_s5 }
  0x31   :  { %s7523_s4 = sld [smem:[%s10626_s0 + %s7324_s28]]   ;;  %s7328_s28 = smov 33  }
  0x32   :  { %10666 = sst [smem:[#allocation72_spill]] %s7528_s6 }
  0x33   :  { %s7533_s5 = sld [smem:[%s10626_s0 + %s7326_s15]]   ;;  %s7330_s15 = smov 35  }
  0x34   :  { %s7548_s6 = sld [smem:[%s10626_s0 + %s7329_s7]]   ;;  %s7333_s7 = smov 38  }
  0x37   :  { %10665 = sst [smem:[#allocation71_spill]] %s7523_s4 }
  0x38   :  { %s7543_s4 = sld [smem:[%s10626_s0 + %s7328_s28]]   ;;  %s7332_s28 = smov 37  }
  0x39   :  { %10667 = sst [smem:[#allocation73_spill]] %s7533_s5 }
  0x3a   :  { %10669 = sst [smem:[#allocation75_spill]] %s7548_s6 }
  0x3b   :  { %s7553_s5 = sld [smem:[%s10626_s0 + %s7330_s15]]   ;;  %s7334_s15 = smov 39  }
  0x3c   :  { %s7568_s6 = sld [smem:[%s10626_s0 + %s7333_s7]]  }
  0x3e   :  { %10668 = sst [smem:[#allocation74_spill]] %s7543_s4 }
  0x3f   :  { %s7563_s4 = sld [smem:[%s10626_s0 + %s7332_s28]]  }
  0x41   :  { %10670 = sst [smem:[#allocation76_spill]] %s7553_s5 }
  0x42   :  { %s7573_s5 = sld [smem:[%s10626_s0 + %s7334_s15]]  }
  0x43   :  { %84 = vsyncpa [#allocation6], 0 }
  0x44   :  { %85 = vsyncpa [#allocation9], 0 }
  0x45   :  { %86 = vsyncpa [#allocation12], 0 }
  0x46   :  { %87 = vsyncpa [#allocation15], 0 }
  0x47   :  { %88 = vsyncpa [#allocation18], 0 }
  0x48   :  { %89 = vsyncpa [#allocation21], 0 }
  0x49   :  { %90 = vsyncpa [#allocation24], 0 }
  0x4a   :  { %91 = vsyncpa [#allocation27], 0 }
  0x4b   :  { %92 = vsyncpa [#allocation30], 0 }
  0x4c   :  { %93 = vsyncpa [#allocation33], 0 }
  0x4d   :  { %94 = vsyncpa [#allocation36], 0 }
  0x4e   :  { %95 = vsyncpa [#allocation39], 0 }
  0x4f   :  { %96 = vsyncpa [#allocation7], 0  ;;  %s7335_s22 = smov [#allocation8]   ;;  %s7336_s0 = smov [#allocation11]  }
  0x50   :  { %s117_s23 = sshll.u32 %s7335_s22, 4  ;;  %s139_s26 = sshll.u32 %s7336_s0, 4  ;;  %s118_s23 = int_to_ptr.vmem [resolvable:$true] %s117_s23  ;;  %s140_s26 = int_to_ptr.vmem [resolvable:$true] %s139_s26 }
  0x51   :  { %s6742_s28 = scalar_lea.hbm %s7393_s17, 16 }
  0x52   :  { %p6743_p0 = scmp.ne.s32.totalorder %s7393_s17, %s6742_s28  ;;  %p6746_p1 = scmp.lt.u32.totalorder %s6742_s28, %s7393_s17 }
  0x54   :  { %p6748_p2 = pnand %p6746_p1, %p6743_p0 }
  0x56   :  { %6751 = shalt.err (!%p6748_p2)
}
  0x57   :  { %s6752_s1 = scalar_lea.vmem %s118_s23, 16  ;;  %s6756_s2 = scalar_lea.vmem %s118_s23, 32 }
  0x58   :  { %p6753_p3 = scmp.ne.s32.totalorder %s118_s23, %s6752_s1  ;;  %p6757_p4 = scmp.lt.s32.totalorder %s118_s23, %s118_s23 }
  0x59   :  { %p6758_p5 = scmp.lt.s32.totalorder %s6756_s2, %s6752_s1 }
  0x5b   :  { %p6759_p6 = por %p6758_p5, %p6757_p4 }
  0x5d   :  { %p6760_p7 = pnand %p6759_p6, %p6753_p3 }
  0x5f   :  { %6763 = shalt.err (!%p6760_p7)
}
  0x60   :  { %120 = dma.hbm_to_vmem [thread:$0]  %s7393_s17, 16, %s118_s23, [#allocation9]  }
  0x61   :  { %s6764_s7 = scalar_lea.hbm %s7408_s29, 16 }
  0x62   :  { %p6765_p8 = scmp.ne.s32.totalorder %s7408_s29, %s6764_s7  ;;  %p6768_p9 = scmp.lt.u32.totalorder %s6764_s7, %s7408_s29 }
  0x64   :  { %p6770_p10 = pnand %p6768_p9, %p6765_p8 }
  0x66   :  { %6773 = shalt.err (!%p6770_p10)
}
  0x67   :  { %s6774_s10 = scalar_lea.vmem %s140_s26, 16  ;;  %s6778_s11 = scalar_lea.vmem %s140_s26, 32 }
  0x68   :  { %p6775_p11 = scmp.ne.s32.totalorder %s140_s26, %s6774_s10  ;;  %p6779_p12 = scmp.lt.s32.totalorder %s140_s26, %s140_s26 }
  0x69   :  { %p6780_p13 = scmp.lt.s32.totalorder %s6778_s11, %s6774_s10 }
  0x6b   :  { %p6781_p0 = por %p6780_p13, %p6779_p12 }
  0x6d   :  { %p6782_p1 = pnand %p6781_p0, %p6775_p11 }
  0x6f   :  { %6785 = shalt.err (!%p6782_p1)
}
  0x70   :  { %142 = dma.hbm_to_vmem [thread:$0]  %s7408_s29, 16, %s140_s26, [#allocation12]  }
  0x71   :  { %s7337_s15 = smov [#allocation14]   ;;  %s7338_s16 = smov [#allocation17]  }
  0x72   :  { %s159_s17 = sshll.u32 %s7337_s15, 4  ;;  %s181_s18 = sshll.u32 %s7338_s16, 4  ;;  %s160_s17 = int_to_ptr.vmem [resolvable:$true] %s159_s17  ;;  %s182_s18 = int_to_ptr.vmem [resolvable:$true] %s181_s18 }
  0x73   :  { %s6786_s22 = scalar_lea.hbm %s7418_s8, 16 }
  0x74   :  { %p6787_p2 = scmp.ne.s32.totalorder %s7418_s8, %s6786_s22  ;;  %p6790_p3 = scmp.lt.u32.totalorder %s6786_s22, %s7418_s8 }
  0x76   :  { %p6792_p4 = pnand %p6790_p3, %p6787_p2 }
  0x78   :  { %6795 = shalt.err (!%p6792_p4)
}
  0x79   :  { %s6796_s23 = scalar_lea.vmem %s160_s17, 16  ;;  %s6800_s0 = scalar_lea.vmem %s160_s17, 32 }
  0x7a   :  { %p6797_p5 = scmp.ne.s32.totalorder %s160_s17, %s6796_s23  ;;  %p6801_p6 = scmp.lt.s32.totalorder %s160_s17, %s160_s17 }
  0x7b   :  { %p6802_p7 = scmp.lt.s32.totalorder %s6800_s0, %s6796_s23 }
  0x7d   :  { %p6803_p8 = por %p6802_p7, %p6801_p6 }
  0x7f   :  { %p6804_p9 = pnand %p6803_p8, %p6797_p5 }
  0x81   :  { %6807 = shalt.err (!%p6804_p9)
}
  0x82   :  { %162 = dma.hbm_to_vmem [thread:$0]  %s7418_s8, 16, %s160_s17, [#allocation15]  }
  0x83   :  { %s6808_s29 = scalar_lea.hbm %s7433_s24, 16 }
  0x84   :  { %p6809_p10 = scmp.ne.s32.totalorder %s7433_s24, %s6808_s29  ;;  %p6812_p11 = scmp.lt.u32.totalorder %s6808_s29, %s7433_s24 }
  0x86   :  { %p6814_p12 = pnand %p6812_p11, %p6809_p10 }
  0x88   :  { %6817 = shalt.err (!%p6814_p12)
}
  0x89   :  { %s6818_s26 = scalar_lea.vmem %s182_s18, 16  ;;  %s6822_s28 = scalar_lea.vmem %s182_s18, 32 }
  0x8a   :  { %p6819_p13 = scmp.ne.s32.totalorder %s182_s18, %s6818_s26  ;;  %p6823_p0 = scmp.lt.s32.totalorder %s182_s18, %s182_s18 }
  0x8b   :  { %p6824_p1 = scmp.lt.s32.totalorder %s6822_s28, %s6818_s26 }
  0x8d   :  { %p6825_p2 = por %p6824_p1, %p6823_p0 }
  0x8f   :  { %p6826_p3 = pnand %p6825_p2, %p6819_p13 }
  0x91   :  { %6829 = shalt.err (!%p6826_p3)
}
  0x92   :  { %184 = dma.hbm_to_vmem [thread:$0]  %s7433_s24, 16, %s182_s18, [#allocation18]  }
  0x93   :  { %s7339_s1 = smov [#allocation20]   ;;  %s7340_s2 = smov [#allocation23]  }
  0x94   :  { %s203_s8 = sshll.u32 %s7339_s1, 4  ;;  %s223_s7 = sshll.u32 %s7340_s2, 4  ;;  %s204_s8 = int_to_ptr.vmem [resolvable:$true] %s203_s8  ;;  %s224_s7 = int_to_ptr.vmem [resolvable:$true] %s223_s7 }
  0x95   :  { %s6830_s10 = scalar_lea.hbm %s7448_s12, 16 }
  0x96   :  { %p6831_p4 = scmp.ne.s32.totalorder %s7448_s12, %s6830_s10  ;;  %p6834_p5 = scmp.lt.u32.totalorder %s6830_s10, %s7448_s12 }
  0x98   :  { %p6836_p6 = pnand %p6834_p5, %p6831_p4 }
  0x9a   :  { %6839 = shalt.err (!%p6836_p6)
}
  0x9b   :  { %s6840_s11 = scalar_lea.vmem %s204_s8, 16  ;;  %s6844_s15 = scalar_lea.vmem %s204_s8, 32 }
  0x9c   :  { %p6841_p7 = scmp.ne.s32.totalorder %s204_s8, %s6840_s11  ;;  %p6845_p8 = scmp.lt.s32.totalorder %s204_s8, %s204_s8 }
  0x9d   :  { %p6846_p9 = scmp.lt.s32.totalorder %s6844_s15, %s6840_s11 }
  0x9f   :  { %p6847_p10 = por %p6846_p9, %p6845_p8 }
  0xa1   :  { %p6848_p11 = pnand %p6847_p10, %p6841_p7 }
  0xa3   :  { %6851 = shalt.err (!%p6848_p11)
}
  0xa4   :  { %206 = dma.hbm_to_vmem [thread:$0]  %s7448_s12, 16, %s204_s8, [#allocation21]  }
  0xa5   :  { %s6852_s24 = scalar_lea.hbm %s7458_s27, 16 }
  0xa6   :  { %p6853_p12 = scmp.ne.s32.totalorder %s7458_s27, %s6852_s24  ;;  %p6856_p13 = scmp.lt.u32.totalorder %s6852_s24, %s7458_s27 }
  0xa8   :  { %p6858_p0 = pnand %p6856_p13, %p6853_p12 }
  0xaa   :  { %6861 = shalt.err (!%p6858_p0)
}
  0xab   :  { %s6862_s17 = scalar_lea.vmem %s224_s7, 16  ;;  %s6866_s16 = scalar_lea.vmem %s224_s7, 32 }
  0xac   :  { %p6863_p1 = scmp.ne.s32.totalorder %s224_s7, %s6862_s17  ;;  %p6867_p2 = scmp.lt.s32.totalorder %s224_s7, %s224_s7 }
  0xad   :  { %p6868_p3 = scmp.lt.s32.totalorder %s6866_s16, %s6862_s17 }
  0xaf   :  { %p6869_p4 = por %p6868_p3, %p6867_p2 }
  0xb1   :  { %p6870_p5 = pnand %p6869_p4, %p6863_p1 }
  0xb3   :  { %6873 = shalt.err (!%p6870_p5)
}
  0xb4   :  { %226 = dma.hbm_to_vmem [thread:$0]  %s7458_s27, 16, %s224_s7, [#allocation24]  }
  0xb5   :  { %s7341_s18 = smov [#allocation26]   ;;  %s7342_s22 = smov [#allocation29]  }
  0xb6   :  { %s245_s12 = sshll.u32 %s7341_s18, 4  ;;  %s267_s23 = sshll.u32 %s7342_s22, 4  ;;  %s246_s12 = int_to_ptr.vmem [resolvable:$true] %s245_s12  ;;  %s268_s23 = int_to_ptr.vmem [resolvable:$true] %s267_s23 }
  0xb7   :  { %s6874_s0 = scalar_lea.hbm %s7473_s14, 16 }
  0xb8   :  { %p6875_p6 = scmp.ne.s32.totalorder %s7473_s14, %s6874_s0  ;;  %p6878_p7 = scmp.lt.u32.totalorder %s6874_s0, %s7473_s14 }
  0xba   :  { %p6880_p8 = pnand %p6878_p7, %p6875_p6 }
  0xbc   :  { %6883 = shalt.err (!%p6880_p8)
}
  0xbd   :  { %s6884_s29 = scalar_lea.vmem %s246_s12, 16  ;;  %s6888_s26 = scalar_lea.vmem %s246_s12, 32 }
  0xbe   :  { %p6885_p9 = scmp.ne.s32.totalorder %s246_s12, %s6884_s29  ;;  %p6889_p10 = scmp.lt.s32.totalorder %s246_s12, %s246_s12 }
  0xbf   :  { %p6890_p11 = scmp.lt.s32.totalorder %s6888_s26, %s6884_s29 }
  0xc1   :  { %p6891_p12 = por %p6890_p11, %p6889_p10 }
  0xc3   :  { %p6892_p13 = pnand %p6891_p12, %p6885_p9 }
  0xc5   :  { %6895 = shalt.err (!%p6892_p13)
}
  0xc6   :  { %248 = dma.hbm_to_vmem [thread:$0]  %s7473_s14, 16, %s246_s12, [#allocation27]  }
  0xc7   :  { %s6896_s27 = scalar_lea.hbm %s7488_s9, 16 }
  0xc8   :  { %p6897_p0 = scmp.ne.s32.totalorder %s7488_s9, %s6896_s27  ;;  %p6900_p1 = scmp.lt.u32.totalorder %s6896_s27, %s7488_s9 }
  0xca   :  { %p6902_p2 = pnand %p6900_p1, %p6897_p0 }
  0xcc   :  { %6905 = shalt.err (!%p6902_p2)
}
  0xcd   :  { %s6906_s28 = scalar_lea.vmem %s268_s23, 16  ;;  %s6910_s1 = scalar_lea.vmem %s268_s23, 32 }
  0xce   :  { %p6907_p3 = scmp.ne.s32.totalorder %s268_s23, %s6906_s28  ;;  %p6911_p4 = scmp.lt.s32.totalorder %s268_s23, %s268_s23 }
  0xcf   :  { %p6912_p5 = scmp.lt.s32.totalorder %s6910_s1, %s6906_s28 }
  0xd1   :  { %p6913_p6 = por %p6912_p5, %p6911_p4 }
  0xd3   :  { %p6914_p7 = pnand %p6913_p6, %p6907_p3 }
  0xd5   :  { %6917 = shalt.err (!%p6914_p7)
}
  0xd6   :  { %270 = dma.hbm_to_vmem [thread:$0]  %s7488_s9, 16, %s268_s23, [#allocation30]  }
  0xd7   :  { %s7343_s8 = smov [#allocation32]   ;;  %s7344_s2 = smov [#allocation35]  }
  0xd8   :  { %s287_s14 = sshll.u32 %s7343_s8, 4  ;;  %s311_s7 = sshll.u32 %s7344_s2, 4  ;;  %s288_s14 = int_to_ptr.vmem [resolvable:$true] %s287_s14  ;;  %s312_s7 = int_to_ptr.vmem [resolvable:$true] %s311_s7 }
  0xd9   :  { %s6918_s10 = scalar_lea.hbm %s7498_s25, 16 }
  0xda   :  { %p6919_p8 = scmp.ne.s32.totalorder %s7498_s25, %s6918_s10  ;;  %p6922_p9 = scmp.lt.u32.totalorder %s6918_s10, %s7498_s25 }
  0xdc   :  { %p6924_p10 = pnand %p6922_p9, %p6919_p8 }
  0xde   :  { %6927 = shalt.err (!%p6924_p10)
}
  0xdf   :  { %s6928_s11 = scalar_lea.vmem %s288_s14, 16  ;;  %s6932_s15 = scalar_lea.vmem %s288_s14, 32 }
  0xe0   :  { %p6929_p11 = scmp.ne.s32.totalorder %s288_s14, %s6928_s11  ;;  %p6933_p12 = scmp.lt.s32.totalorder %s288_s14, %s288_s14 }
  0xe1   :  { %p6934_p13 = scmp.lt.s32.totalorder %s6932_s15, %s6928_s11 }
  0xe3   :  { %p6935_p0 = por %p6934_p13, %p6933_p12 }
  0xe5   :  { %p6936_p1 = pnand %p6935_p0, %p6929_p11 }
  0xe7   :  { %6939 = shalt.err (!%p6936_p1)
}
  0xe8   :  { %290 = dma.hbm_to_vmem [thread:$0]  %s7498_s25, 16, %s288_s14, [#allocation33]  }
  0xe9   :  { %s6940_s9 = scalar_lea.hbm %s7518_s20, 16 }
  0xea   :  { %p6941_p2 = scmp.ne.s32.totalorder %s7518_s20, %s6940_s9  ;;  %p6944_p3 = scmp.lt.u32.totalorder %s6940_s9, %s7518_s20 }
  0xec   :  { %p6946_p4 = pnand %p6944_p3, %p6941_p2 }
  0xee   :  { %6949 = shalt.err (!%p6946_p4)
}
  0xef   :  { %s6950_s24 = scalar_lea.vmem %s312_s7, 16  ;;  %s6954_s17 = scalar_lea.vmem %s312_s7, 32 }
  0xf0   :  { %p6951_p5 = scmp.ne.s32.totalorder %s312_s7, %s6950_s24  ;;  %p6955_p6 = scmp.lt.s32.totalorder %s312_s7, %s312_s7 }
  0xf1   :  { %p6956_p7 = scmp.lt.s32.totalorder %s6954_s17, %s6950_s24 }
  0xf3   :  { %p6957_p8 = por %p6956_p7, %p6955_p6 }
  0xf5   :  { %p6958_p9 = pnand %p6957_p8, %p6951_p5 }
  0xf7   :  { %6961 = shalt.err (!%p6958_p9)
}
  0xf8   :  { %314 = dma.hbm_to_vmem [thread:$0]  %s7518_s20, 16, %s312_s7, [#allocation36]  }
  0xf9   :  { %s7345_s16 = smov [#allocation38]   ;;  %s7346_s18 = smov [#allocation5]  }
  0xfa   :  { %s335_s25 = sshll.u32 %s7345_s16, 4  ;;  %s107_s12 = sshll.u32 %s7346_s18, 4  ;;  %s336_s25 = int_to_ptr.vmem [resolvable:$true] %s335_s25  ;;  %s108_s12 = int_to_ptr.vmem [resolvable:$true] %s107_s12 }
  0xfb   :  { %s6962_s22 = scalar_lea.hbm %s7538_s30, 16 }
  0xfc   :  { %p6963_p10 = scmp.ne.s32.totalorder %s7538_s30, %s6962_s22  ;;  %p6966_p11 = scmp.lt.u32.totalorder %s6962_s22, %s7538_s30 }
  0xfe   :  { %p6968_p12 = pnand %p6966_p11, %p6963_p10 }
 0x100   :  { %6971 = shalt.err (!%p6968_p12)
}
 0x101   :  { %s6972_s23 = scalar_lea.vmem %s336_s25, 16  ;;  %s6976_s0 = scalar_lea.vmem %s336_s25, 32 }
 0x102   :  { %p6973_p13 = scmp.ne.s32.totalorder %s336_s25, %s6972_s23  ;;  %p6977_p0 = scmp.lt.s32.totalorder %s336_s25, %s336_s25 }
 0x103   :  { %p6978_p1 = scmp.lt.s32.totalorder %s6976_s0, %s6972_s23 }
 0x105   :  { %p6979_p2 = por %p6978_p1, %p6977_p0 }
 0x107   :  { %p6980_p3 = pnand %p6979_p2, %p6973_p13 }
 0x109   :  { %6983 = shalt.err (!%p6980_p3)
}
 0x10a   :  { %338 = dma.hbm_to_vmem [thread:$0]  %s7538_s30, 16, %s336_s25, [#allocation39]  }
 0x10b   :  { %s6984_s20 = scalar_lea.hbm %s7388_s13, 16 }
 0x10c   :  { %p6985_p4 = scmp.ne.s32.totalorder %s7388_s13, %s6984_s20  ;;  %p6988_p5 = scmp.lt.u32.totalorder %s6984_s20, %s7388_s13 }
 0x10e   :  { %p6990_p6 = pnand %p6988_p5, %p6985_p4 }
 0x110   :  { %6993 = shalt.err (!%p6990_p6)
}
 0x111   :  { %s6994_s29 = scalar_lea.vmem %s108_s12, 16  ;;  %s6998_s26 = scalar_lea.vmem %s108_s12, 32 }
 0x112   :  { %p6995_p7 = scmp.ne.s32.totalorder %s108_s12, %s6994_s29  ;;  %p6999_p8 = scmp.lt.s32.totalorder %s108_s12, %s108_s12 }
 0x113   :  { %p7000_p9 = scmp.lt.s32.totalorder %s6998_s26, %s6994_s29 }
 0x115   :  { %p7001_p10 = por %p7000_p9, %p6999_p8 }
 0x117   :  { %p7002_p11 = pnand %p7001_p10, %p6995_p7 }
 0x119   :  { %7005 = shalt.err (!%p7002_p11)
}
 0x11a   :  { %110 = dma.hbm_to_vmem [thread:$0]  %s7388_s13, 16, %s108_s12, [#allocation6]  }
 0x11b   :  { %s7347_s27 = smov [#allocation10]   ;;  %s7348_s28 = smov [#allocation13]  }
 0x11c   :  { %s127_s30 = sshll.u32 %s7347_s27, 4  ;;  %s149_s1 = sshll.u32 %s7348_s28, 4  ;;  %s128_s30 = int_to_ptr.vmem [resolvable:$true] %s127_s30  ;;  %s150_s1 = int_to_ptr.vmem [resolvable:$true] %s149_s1 }
 0x11d   :  { %s7006_s8 = scalar_lea.hbm %s7398_s21, 16 }
 0x11e   :  { %p7007_p12 = scmp.ne.s32.totalorder %s7398_s21, %s7006_s8  ;;  %p7010_p13 = scmp.lt.u32.totalorder %s7006_s8, %s7398_s21 }
 0x120   :  { %p7012_p0 = pnand %p7010_p13, %p7007_p12 }
 0x122   :  { %7015 = shalt.err (!%p7012_p0)
}
 0x123   :  { %s7016_s14 = scalar_lea.vmem %s128_s30, 16  ;;  %s7020_s2 = scalar_lea.vmem %s128_s30, 32 }
 0x124   :  { %p7017_p1 = scmp.ne.s32.totalorder %s128_s30, %s7016_s14  ;;  %p7021_p2 = scmp.lt.s32.totalorder %s128_s30, %s128_s30 }
 0x125   :  { %p7022_p3 = scmp.lt.s32.totalorder %s7020_s2, %s7016_s14 }
 0x127   :  { %p7023_p4 = por %p7022_p3, %p7021_p2 }
 0x129   :  { %p7024_p5 = pnand %p7023_p4, %p7017_p1 }
 0x12b   :  { %7027 = shalt.err (!%p7024_p5)
}
 0x12c   :  { %130 = dma.hbm_to_vmem [thread:$0]  %s7398_s21, 16, %s128_s30, [#allocation9]  }
 0x12d   :  { %s7028_s13 = scalar_lea.hbm %s7413_s3, 16 }
 0x12e   :  { %p7029_p6 = scmp.ne.s32.totalorder %s7413_s3, %s7028_s13  ;;  %p7032_p7 = scmp.lt.u32.totalorder %s7028_s13, %s7413_s3 }
 0x130   :  { %p7034_p8 = pnand %p7032_p7, %p7029_p6 }
 0x132   :  { %7037 = shalt.err (!%p7034_p8)
}
 0x133   :  { %s7038_s7 = scalar_lea.vmem %s150_s1, 16  ;;  %s7042_s10 = scalar_lea.vmem %s150_s1, 32 }
 0x134   :  { %p7039_p9 = scmp.ne.s32.totalorder %s150_s1, %s7038_s7  ;;  %p7043_p10 = scmp.lt.s32.totalorder %s150_s1, %s150_s1 }
 0x135   :  { %p7044_p11 = scmp.lt.s32.totalorder %s7042_s10, %s7038_s7 }
 0x137   :  { %p7045_p12 = por %p7044_p11, %p7043_p10 }
 0x139   :  { %p7046_p13 = pnand %p7045_p12, %p7039_p9 }
 0x13b   :  { %7049 = shalt.err (!%p7046_p13)
}
 0x13c   :  { %s10671_s11 = sld [smem:[#allocation59_spill]]  ;;  %s7349_s15 = smov [#allocation16]  }
 0x13d   :  { %152 = dma.hbm_to_vmem [thread:$0]  %s7413_s3, 16, %s150_s1, [#allocation12]  }
 0x13e   :  { %s171_s21 = sshll.u32 %s7349_s15, 4  ;;  %s7350_s9 = smov [#allocation19]   ;;  %s172_s21 = int_to_ptr.vmem [resolvable:$true] %s171_s21 }
 0x13f   :  { %s191_s24 = sshll.u32 %s7350_s9, 4  ;;  %s192_s24 = int_to_ptr.vmem [resolvable:$true] %s191_s24 }
 0x142   :  { %s7050_s17 = scalar_lea.hbm %s10671_s11, 16 }
 0x143   :  { %p7051_p0 = scmp.ne.s32.totalorder %s10671_s11, %s7050_s17  ;;  %p7054_p1 = scmp.lt.u32.totalorder %s7050_s17, %s10671_s11 }
 0x145   :  { %p7056_p2 = pnand %p7054_p1, %p7051_p0 }
 0x147   :  { %7059 = shalt.err (!%p7056_p2)
}
 0x148   :  { %s7060_s16 = scalar_lea.vmem %s172_s21, 16  ;;  %s7064_s25 = scalar_lea.vmem %s172_s21, 32 }
 0x149   :  { %p7061_p3 = scmp.ne.s32.totalorder %s172_s21, %s7060_s16  ;;  %p7065_p4 = scmp.lt.s32.totalorder %s172_s21, %s172_s21 }
 0x14a   :  { %p7066_p5 = scmp.lt.s32.totalorder %s7064_s25, %s7060_s16 }
 0x14c   :  { %p7067_p6 = por %p7066_p5, %p7065_p4 }
 0x14e   :  { %p7068_p7 = pnand %p7067_p6, %p7061_p3 }
 0x150   :  { %7071 = shalt.err (!%p7068_p7)
}
 0x151   :  { %s10672_s3 = sld [smem:[#allocation60_spill]] }
 0x152   :  { %174 = dma.hbm_to_vmem [thread:$0]  %s10671_s11, 16, %s172_s21, [#allocation15]  }
 0x157   :  { %s7072_s18 = scalar_lea.hbm %s10672_s3, 16 }
 0x158   :  { %p7073_p8 = scmp.ne.s32.totalorder %s10672_s3, %s7072_s18  ;;  %p7076_p9 = scmp.lt.u32.totalorder %s7072_s18, %s10672_s3 }
 0x15a   :  { %p7078_p10 = pnand %p7076_p9, %p7073_p8 }
 0x15c   :  { %7081 = shalt.err (!%p7078_p10)
}
 0x15d   :  { %s7082_s12 = scalar_lea.vmem %s192_s24, 16  ;;  %s7086_s22 = scalar_lea.vmem %s192_s24, 32 }
 0x15e   :  { %p7083_p11 = scmp.ne.s32.totalorder %s192_s24, %s7082_s12  ;;  %p7087_p12 = scmp.lt.s32.totalorder %s192_s24, %s192_s24 }
 0x15f   :  { %p7088_p13 = scmp.lt.s32.totalorder %s7086_s22, %s7082_s12 }
 0x161   :  { %p7089_p0 = por %p7088_p13, %p7087_p12 }
 0x163   :  { %p7090_p1 = pnand %p7089_p0, %p7083_p11 }
 0x165   :  { %7093 = shalt.err (!%p7090_p1)
}
 0x166   :  { %s10673_s23 = sld [smem:[#allocation62_spill]]  ;;  %s7351_s0 = smov [#allocation22]  }
 0x167   :  { %194 = dma.hbm_to_vmem [thread:$0]  %s10672_s3, 16, %s192_s24, [#allocation18]  }
 0x168   :  { %s213_s20 = sshll.u32 %s7351_s0, 4  ;;  %s7352_s29 = smov [#allocation25]   ;;  %s214_s20 = int_to_ptr.vmem [resolvable:$true] %s213_s20 }
 0x169   :  { %s235_s26 = sshll.u32 %s7352_s29, 4  ;;  %s236_s26 = int_to_ptr.vmem [resolvable:$true] %s235_s26 }
 0x16c   :  { %s7094_s27 = scalar_lea.hbm %s10673_s23, 16 }
 0x16d   :  { %p7095_p2 = scmp.ne.s32.totalorder %s10673_s23, %s7094_s27  ;;  %p7098_p3 = scmp.lt.u32.totalorder %s7094_s27, %s10673_s23 }
 0x16f   :  { %p7100_p4 = pnand %p7098_p3, %p7095_p2 }
 0x171   :  { %7103 = shalt.err (!%p7100_p4)
}
 0x172   :  { %s7104_s30 = scalar_lea.vmem %s214_s20, 16  ;;  %s7108_s28 = scalar_lea.vmem %s214_s20, 32 }
 0x173   :  { %p7105_p5 = scmp.ne.s32.totalorder %s214_s20, %s7104_s30  ;;  %p7109_p6 = scmp.lt.s32.totalorder %s214_s20, %s214_s20 }
 0x174   :  { %p7110_p7 = scmp.lt.s32.totalorder %s7108_s28, %s7104_s30 }
 0x176   :  { %p7111_p8 = por %p7110_p7, %p7109_p6 }
 0x178   :  { %p7112_p9 = pnand %p7111_p8, %p7105_p5 }
 0x17a   :  { %7115 = shalt.err (!%p7112_p9)
}
 0x17b   :  { %s10674_s1 = sld [smem:[#allocation64_spill]] }
 0x17c   :  { %216 = dma.hbm_to_vmem [thread:$0]  %s10673_s23, 16, %s214_s20, [#allocation21]  }
 0x181   :  { %s7116_s8 = scalar_lea.hbm %s10674_s1, 16 }
 0x182   :  { %p7117_p10 = scmp.ne.s32.totalorder %s10674_s1, %s7116_s8  ;;  %p7120_p11 = scmp.lt.u32.totalorder %s7116_s8, %s10674_s1 }
 0x184   :  { %p7122_p12 = pnand %p7120_p11, %p7117_p10 }
 0x186   :  { %7125 = shalt.err (!%p7122_p12)
}
 0x187   :  { %s7126_s14 = scalar_lea.vmem %s236_s26, 16  ;;  %s7130_s2 = scalar_lea.vmem %s236_s26, 32 }
 0x188   :  { %p7127_p13 = scmp.ne.s32.totalorder %s236_s26, %s7126_s14  ;;  %p7131_p0 = scmp.lt.s32.totalorder %s236_s26, %s236_s26 }
 0x189   :  { %p7132_p1 = scmp.lt.s32.totalorder %s7130_s2, %s7126_s14 }
 0x18b   :  { %p7133_p2 = por %p7132_p1, %p7131_p0 }
 0x18d   :  { %p7134_p3 = pnand %p7133_p2, %p7127_p13 }
 0x18f   :  { %7137 = shalt.err (!%p7134_p3)
}
 0x190   :  { %s10675_s13 = sld [smem:[#allocation65_spill]]  ;;  %s7353_s7 = smov [#allocation28]  }
 0x191   :  { %238 = dma.hbm_to_vmem [thread:$0]  %s10674_s1, 16, %s236_s26, [#allocation24]  }
 0x192   :  { %s255_s10 = sshll.u32 %s7353_s7, 4  ;;  %s7354_s11 = smov [#allocation31]   ;;  %s256_s10 = int_to_ptr.vmem [resolvable:$true] %s255_s10 }
 0x193   :  { %s277_s15 = sshll.u32 %s7354_s11, 4  ;;  %s278_s15 = int_to_ptr.vmem [resolvable:$true] %s277_s15 }
 0x196   :  { %s7138_s21 = scalar_lea.hbm %s10675_s13, 16 }
 0x197   :  { %p7139_p4 = scmp.ne.s32.totalorder %s10675_s13, %s7138_s21  ;;  %p7142_p5 = scmp.lt.u32.totalorder %s7138_s21, %s10675_s13 }
 0x199   :  { %p7144_p6 = pnand %p7142_p5, %p7139_p4 }
 0x19b   :  { %7147 = shalt.err (!%p7144_p6)
}
 0x19c   :  { %s7148_s9 = scalar_lea.vmem %s256_s10, 16  ;;  %s7152_s24 = scalar_lea.vmem %s256_s10, 32 }
 0x19d   :  { %p7149_p7 = scmp.ne.s32.totalorder %s256_s10, %s7148_s9  ;;  %p7153_p8 = scmp.lt.s32.totalorder %s256_s10, %s256_s10 }
 0x19e   :  { %p7154_p9 = scmp.lt.s32.totalorder %s7152_s24, %s7148_s9 }
 0x1a0   :  { %p7155_p10 = por %p7154_p9, %p7153_p8 }
 0x1a2   :  { %p7156_p11 = pnand %p7155_p10, %p7149_p7 }
 0x1a4   :  { %7159 = shalt.err (!%p7156_p11)
}
 0x1a5   :  { %s10676_s17 = sld [smem:[#allocation67_spill]] }
 0x1a6   :  { %258 = dma.hbm_to_vmem [thread:$0]  %s10675_s13, 16, %s256_s10, [#allocation27]  }
 0x1ab   :  { %s7160_s16 = scalar_lea.hbm %s10676_s17, 16 }
 0x1ac   :  { %p7161_p12 = scmp.ne.s32.totalorder %s10676_s17, %s7160_s16  ;;  %p7164_p13 = scmp.lt.u32.totalorder %s7160_s16, %s10676_s17 }
 0x1ae   :  { %p7166_p0 = pnand %p7164_p13, %p7161_p12 }
 0x1b0   :  { %7169 = shalt.err (!%p7166_p0)
}
 0x1b1   :  { %s7170_s25 = scalar_lea.vmem %s278_s15, 16  ;;  %s7174_s3 = scalar_lea.vmem %s278_s15, 32 }
 0x1b2   :  { %p7171_p1 = scmp.ne.s32.totalorder %s278_s15, %s7170_s25  ;;  %p7175_p2 = scmp.lt.s32.totalorder %s278_s15, %s278_s15 }
 0x1b3   :  { %p7176_p3 = scmp.lt.s32.totalorder %s7174_s3, %s7170_s25 }
 0x1b5   :  { %p7177_p4 = por %p7176_p3, %p7175_p2 }
 0x1b7   :  { %p7178_p5 = pnand %p7177_p4, %p7171_p1 }
 0x1b9   :  { %7181 = shalt.err (!%p7178_p5)
}
 0x1ba   :  { %s10677_s18 = sld [smem:[#allocation69_spill]]  ;;  %s7355_s12 = smov [#allocation34]  }
 0x1bb   :  { %280 = dma.hbm_to_vmem [thread:$0]  %s10676_s17, 16, %s278_s15, [#allocation30]  }
 0x1bc   :  { %s299_s22 = sshll.u32 %s7355_s12, 4  ;;  %s7356_s23 = smov [#allocation37]   ;;  %s300_s22 = int_to_ptr.vmem [resolvable:$true] %s299_s22 }
 0x1bd   :  { %s323_s0 = sshll.u32 %s7356_s23, 4  ;;  %s324_s0 = int_to_ptr.vmem [resolvable:$true] %s323_s0 }
 0x1c0   :  { %s7182_s20 = scalar_lea.hbm %s10677_s18, 16 }
 0x1c1   :  { %p7183_p6 = scmp.ne.s32.totalorder %s10677_s18, %s7182_s20  ;;  %p7186_p7 = scmp.lt.u32.totalorder %s7182_s20, %s10677_s18 }
 0x1c3   :  { %p7188_p8 = pnand %p7186_p7, %p7183_p6 }
 0x1c5   :  { %7191 = shalt.err (!%p7188_p8)
}
 0x1c6   :  { %s7192_s29 = scalar_lea.vmem %s300_s22, 16  ;;  %s7196_s26 = scalar_lea.vmem %s300_s22, 32 }
 0x1c7   :  { %p7193_p9 = scmp.ne.s32.totalorder %s300_s22, %s7192_s29  ;;  %p7197_p10 = scmp.lt.s32.totalorder %s300_s22, %s300_s22 }
 0x1c8   :  { %p7198_p11 = scmp.lt.s32.totalorder %s7196_s26, %s7192_s29 }
 0x1ca   :  { %p7199_p12 = por %p7198_p11, %p7197_p10 }
 0x1cc   :  { %p7200_p13 = pnand %p7199_p12, %p7193_p9 }
 0x1ce   :  { %7203 = shalt.err (!%p7200_p13)
}
 0x1cf   :  { %s10678_s27 = sld [smem:[#allocation72_spill]] }
 0x1d0   :  { %302 = dma.hbm_to_vmem [thread:$0]  %s10677_s18, 16, %s300_s22, [#allocation33]  }
 0x1d5   :  { %s7204_s30 = scalar_lea.hbm %s10678_s27, 16 }
 0x1d6   :  { %p7205_p0 = scmp.ne.s32.totalorder %s10678_s27, %s7204_s30  ;;  %p7208_p1 = scmp.lt.u32.totalorder %s7204_s30, %s10678_s27 }
 0x1d8   :  { %p7210_p2 = pnand %p7208_p1, %p7205_p0 }
 0x1da   :  { %7213 = shalt.err (!%p7210_p2)
}
 0x1db   :  { %s7214_s28 = scalar_lea.vmem %s324_s0, 16  ;;  %s7218_s1 = scalar_lea.vmem %s324_s0, 32 }
 0x1dc   :  { %p7215_p3 = scmp.ne.s32.totalorder %s324_s0, %s7214_s28  ;;  %p7219_p4 = scmp.lt.s32.totalorder %s324_s0, %s324_s0 }
 0x1dd   :  { %p7220_p5 = scmp.lt.s32.totalorder %s7218_s1, %s7214_s28 }
 0x1df   :  { %p7221_p6 = por %p7220_p5, %p7219_p4 }
 0x1e1   :  { %p7222_p7 = pnand %p7221_p6, %p7215_p3 }
 0x1e3   :  { %7225 = shalt.err (!%p7222_p7)
}
 0x1e4   :  { %s10679_s8 = sld [smem:[#allocation75_spill]]  ;;  %s7357_s14 = smov [#allocation40]  }
 0x1e5   :  { %326 = dma.hbm_to_vmem [thread:$0]  %s10678_s27, 16, %s324_s0, [#allocation36]  }
 0x1e6   :  { %s347_s2 = sshll.u32 %s7357_s14, 4  ;;  %s348_s2 = int_to_ptr.vmem [resolvable:$true] %s347_s2 }
 0x1ea   :  { %s7226_s13 = scalar_lea.hbm %s10679_s8, 16 }
 0x1eb   :  { %p7227_p8 = scmp.ne.s32.totalorder %s10679_s8, %s7226_s13  ;;  %p7230_p9 = scmp.lt.u32.totalorder %s7226_s13, %s10679_s8 }
 0x1ed   :  { %p7232_p10 = pnand %p7230_p9, %p7227_p8 }
 0x1ef   :  { %7235 = shalt.err (!%p7232_p10)
}
 0x1f0   :  { %s7236_s7 = scalar_lea.vmem %s348_s2, 16  ;;  %s7240_s10 = scalar_lea.vmem %s348_s2, 32 }
 0x1f1   :  { %p7237_p11 = scmp.ne.s32.totalorder %s348_s2, %s7236_s7  ;;  %p7241_p12 = scmp.lt.s32.totalorder %s348_s2, %s348_s2 }
 0x1f2   :  { %p7242_p13 = scmp.lt.s32.totalorder %s7240_s10, %s7236_s7 }
 0x1f4   :  { %p7243_p0 = por %p7242_p13, %p7241_p12 }
 0x1f6   :  { %p7244_p1 = pnand %p7243_p0, %p7237_p11 }
 0x1f8   :  { %7247 = shalt.err (!%p7244_p1)
}
 0x1f9   :  { %350 = dma.hbm_to_vmem [thread:$0]  %s10679_s8, 16, %s348_s2, [#allocation39]  }
 0x1fa   :  { %7270 = dma.done.wait [#allocation6], 16  }
 0x1fb   :  { %7271 = vsyncadd [#allocation6], 4294967280 }
 0x1fc   :  { %7272 = dma.done.wait [#allocation9], 32  }
 0x1fd   :  { %7273 = vsyncadd [#allocation9], 4294967264 }
 0x1fe   :  { %7274 = dma.done.wait [#allocation12], 32  }
 0x1ff   :  { %7275 = vsyncadd [#allocation12], 4294967264 }
 0x200   :  { %7276 = dma.done.wait [#allocation15], 32  }
 0x201   :  { %7277 = vsyncadd [#allocation15], 4294967264 }
 0x202   :  { %7278 = dma.done.wait [#allocation18], 32  }
 0x203   :  { %7279 = vsyncadd [#allocation18], 4294967264 }
 0x204   :  { %7280 = dma.done.wait [#allocation21], 32  }
 0x205   :  { %7281 = vsyncadd [#allocation21], 4294967264 }
 0x206   :  { %7282 = dma.done.wait [#allocation24], 32  }
 0x207   :  { %7283 = vsyncadd [#allocation24], 4294967264 }
 0x208   :  { %7284 = dma.done.wait [#allocation27], 32  }
 0x209   :  { %7285 = vsyncadd [#allocation27], 4294967264 }
 0x20a   :  { %7286 = dma.done.wait [#allocation30], 32  }
 0x20b   :  { %7287 = vsyncadd [#allocation30], 4294967264 }
 0x20c   :  { %7288 = dma.done.wait [#allocation33], 32  }
 0x20d   :  { %7289 = vsyncadd [#allocation33], 4294967264 }
 0x20e   :  { %7290 = dma.done.wait [#allocation36], 32  }
 0x20f   :  { %7291 = vsyncadd [#allocation36], 4294967264 }
 0x210   :  { %7292 = dma.done.wait [#allocation39], 32  }
 0x211   :  { %7293 = vsyncadd [#allocation39], 4294967264  ;;  %s10680_s11 = sld [smem:[#allocation55_spill]]  ;;  %v7358_v0 = vmov 0   ;;  %s10681_s15 = sld [smem:[#allocation56_spill]]  ;;  %v577_v17 = vlaneseq  ;;  %vm649_vm0 = vcmask 1046528  }
 0x212   :  { %6128 = vset.pattern.permute.xlu1 %v7358_v0  ;;  %6127 = vset.pattern.permute.xlu0 %v7358_v0  ;;  %vm749_vm1 = vcmask 1045504   ;;  %vm849_vm2 = vcmask 1044480   ;;  %vm949_vm3 = vcmask 1043456   ;;  %vm1051_vm4 = vcmask 261120   ;;  %s10686_s21 = sld [smem:[#allocation57_spill]]  ;;  %s7361_s9 = smov 64  }
 0x213   :  { %v578_v18 = vshrl.u32 %v577_v17, 7  ;;  %vm494_vm5 = vcmask 257024   ;;  %s7362_s24 = smov 32   ;;  %s7363_s17 = smov 96   ;;  %vm1621_vm6 = vcmask 523264   ;;  %vm1638_vm7 = vcmask 785408  }
 0x214   :  { %s10687_s16 = sld [smem:[#allocation58_spill]]  ;;  %s10688_s25 = sld [smem:[#allocation61_spill]]  ;;  %vm3009_vm8 = vcmask 125952   ;;  %vm3311_vm9 = vcmask 130048   ;;  %vm3649_vm10 = vcmask 392192   ;;  %vm3672_vm11 = vcmask 654336  }
 0x215   :  { %v615_v19 = vsub.s32 1, %v578_v18  ;;  %v715_v20 = vsub.s32 2, %v578_v18  ;;  %v815_v21 = vsub.s32 3, %v578_v18  ;;  %v915_v23 = vsub.s32 4, %v578_v18  ;;  %s10689_s3 = sld [smem:[#allocation63_spill]]  ;;  %s7364_s18 = smov 16  }
 0x216   :  { %v7684_v24 = vsub.s32 0, %v578_v18  ;;  %s7365_s12 = smov 48   ;;  %s10690_s22 = sld [smem:[#allocation66_spill]]  ;;  %vm4509_vm12 = vcmask 60416   ;;  %vm4715_vm13 = vcmask 64512   ;;  %vm4905_vm14 = vcmask 195584  }
 0x217   :  { %v430_v1 = vld [vmem:[%s10680_s11 + $0x10] sm:$0xff]  ;;  %v428_v2 = vld [vmem:[%s10680_s11] sm:$0xff]  ;;  %v429_v4 = vld [vmem:[%s10680_s11 + $0x8] sm:$0xff]  ;;  %s10691_s23 = sld [smem:[#allocation68_spill]]  ;;  %s10692_s0 = sld [smem:[#allocation70_spill]]  ;;  %vm4920_vm15 = vcmask 326656  }
 0x218   :  { %509 = vperm.xlu1 %6128, %v430_v1   ;;  %499 = vperm.xlu0 %6127, %v428_v2   ;;  %v436_v3 = vld [vmem:[%s10680_s11 + $0x40] sm:$0xff]  ;;  %v438_v5 = vld [vmem:[%s10680_s11 + $0x50] sm:$0xff]  ;;  %v437_v6 = vld [vmem:[%s10680_s11 + $0x48] sm:$0xff]  ;;  %s10693_s20 = sld [smem:[#allocation71_spill]]  ;;  %s7366_s29 = smov 8  }
 0x219   :  { %v439_v7 = vld [vmem:[%s10680_s11 + $0x58] sm:$0xff]  ;;  %v440_v9 = vld [vmem:[%s10680_s11 + $0x60] sm:$0xff]  ;;  %v441_v11 = vld [vmem:[%s10680_s11 + $0x68] sm:$0xff]  ;;  %s7367_s26 = smov 24   ;;  %s10694_s27 = sld [smem:[#allocation73_spill]] }
 0x21a   :  { %v431_v8 = vld [vmem:[%s10680_s11 + $0x18] sm:$0xff]  ;;  %v432_v10 = vld [vmem:[%s10680_s11 + $0x20] sm:$0xff]  ;;  %v433_v12 = vld [vmem:[%s10680_s11 + $0x28] sm:$0xff]  ;;  %s10695_s30 = sld [smem:[#allocation74_spill]] }
 0x21b   :  { %v442_v13 = vld [vmem:[%s10680_s11 + $0x70] sm:$0xff]  ;;  %v443_v15 = vld [vmem:[%s10680_s11 + $0x78] sm:$0xff]  ;;  %v444_v22 = vld [vmem:[%s10681_s15] sm:$0x1f] }
 0x21c   :  { %539 = vperm.xlu1 %6128, %v436_v3   ;;  %504 = vperm.xlu0 %6127, %v429_v4   ;;  %v434_v14 = vld [vmem:[%s10680_s11 + $0x30] sm:$0xff]  ;;  %v435_v16 = vld [vmem:[%s10680_s11 + $0x38] sm:$0xff]  ;;  %v7686_v25 = vrot.slane %v444_v22, %v615_v19  ;;  %v7688_v26 = vrot.slane %v444_v22, %v715_v20  ;;  %v7690_v27 = vrot.slane %v444_v22, %v815_v21 }
 0x21d   :  { %v7692_v28 = vrot.slane %v444_v22, %v915_v23  ;;  %v7695_v29 = vrot.slane %v444_v22, %v7684_v24 }
 0x220   :  { %549 = vperm.xlu1 %6128, %v438_v5   ;;  %544 = vperm.xlu0 %6127, %v437_v6  }
 0x224   :  { %554 = vperm.xlu1 %6128, %v439_v7   ;;  %514 = vperm.xlu0 %6127, %v431_v8  }
 0x228   :  { %559 = vperm.xlu1 %6128, %v440_v9   ;;  %519 = vperm.xlu0 %6127, %v432_v10  }
 0x22c   :  { %564 = vperm.xlu1 %6128, %v441_v11   ;;  %524 = vperm.xlu0 %6127, %v433_v12  }
 0x230   :  { %569 = vperm.xlu1 %6128, %v442_v13   ;;  %529 = vperm.xlu0 %6127, %v434_v14  }
 0x234   :  { %574 = vperm.xlu1 %6128, %v443_v15   ;;  %534 = vperm.xlu0 %6127, %v435_v16  }
 0x297   :  { %v7697_v30 = vpop.permute.xlu1 %509  ;;  %v500_v31 = vpop.permute.xlu0 %499 }
 0x298   :  { %v7701_v32 = vmul.f32 %v7686_v25, %v7697_v30  ;;  %v7705_v33 = vmul.f32 %v7688_v26, %v7697_v30  ;;  %v7709_v34 = vmul.f32 %v7690_v27, %v7697_v30  ;;  %v7713_v35 = vmul.f32 %v7692_v28, %v7697_v30 }
 0x299   :  { %v617_v36 = vmul.f32 %v7686_v25, %v500_v31  ;;  %v717_v37 = vmul.f32 %v7688_v26, %v500_v31  ;;  %v817_v38 = vmul.f32 %v7690_v27, %v500_v31  ;;  %v581_v39 = vmul.f32 %v7695_v29, %v500_v31 }
 0x29a   :  { %v917_v40 = vmul.f32 %v7692_v28, %v500_v31  ;;  %v653_v43 = vrot.slane %v7701_v32, 1  ;;  %v753_v44 = vrot.slane %v7705_v33, 2  ;;  %v853_v45 = vrot.slane %v7709_v34, 3 }
 0x29b   :  { %v540_v41 = vpop.permute.xlu1 %539  ;;  %v505_v42 = vpop.permute.xlu0 %504  ;;  %v953_v46 = vrot.slane %v7713_v35, 4  ;;  %v650_v47 = vrot.slane %v617_v36, 1  ;;  %v750_v48 = vrot.slane %v717_v37, 2  ;;  %v850_v51 = vrot.slane %v817_v38, 3 }
 0x29c   :  { %v7725_v49 = vmul.f32 %v7686_v25, %v540_v41  ;;  %v7728_v50 = vmul.f32 %v7688_v26, %v540_v41  ;;  %v7731_v52 = vmul.f32 %v7690_v27, %v540_v41  ;;  %v618_v53 = vmul.f32 %v7686_v25, %v505_v42 }
 0x29d   :  { %v718_v54 = vmul.f32 %v7688_v26, %v505_v42  ;;  %v950_v55 = vrot.slane %v917_v40, 4  ;;  %v589_v56 = vmul.f32 %v7695_v29, %v540_v41  ;;  %v818_v57 = vmul.f32 %v7690_v27, %v505_v42 }
 0x29e   :  { %v918_v58 = vmul.f32 %v7692_v28, %v505_v42  ;;  %v7739_v60 = vmul.f32 %v7692_v28, %v540_v41  ;;  %v582_v61 = vmul.f32 %v7695_v29, %v505_v42  ;;  %v651_v62 = vrot.slane %v618_v53, 1  ;;  %v7778_v41 = vld [vmem:[#allocation5] ss:$0 sm:$0xff] }
 0x29f   :  { %v550_v59 = vpop.permute.xlu1 %549  ;;  %v751_v63 = vrot.slane %v718_v54, 2  ;;  %v665_v0 = vrot.slane %v7725_v49, 1  ;;  %v10647_v1 = vrot.slane %v7728_v50, 2  ;;  %v851_v2 = vrot.slane %v818_v57, 3  ;;  %v545_v12 = vpop.permute.xlu0 %544 }
 0x2a0   :  { %v951_v3 = vrot.slane %v918_v58, 4  ;;  %v10646_v4 = vrot.slane %v7731_v52, 3  ;;  %v652_v5 = vsel %vm649_vm0, %v650_v47, %v651_v62  ;;  %v654_v6 = vsel %vm649_vm0, %v651_v62, %v653_v43 }
 0x2a1   :  { %v7750_v7 = vmul.f32 %v7686_v25, %v550_v59  ;;  %v697_v8 = vadd.f32 %v652_v5, %v581_v39  ;;  %v698_v9 = vadd.f32 %v654_v6, %v582_v61  ;;  %v7753_v10 = vmul.f32 %v7688_v26, %v550_v59 }
 0x2a2   :  { %v7756_v11 = vmul.f32 %v7690_v27, %v550_v59  ;;  %v752_v13 = vsel %vm749_vm1, %v750_v48, %v751_v63  ;;  %v754_v14 = vsel %vm749_vm1, %v751_v63, %v753_v44  ;;  %v852_v15 = vsel %vm849_vm2, %v850_v51, %v851_v2 }
 0x2a3   :  { %v854_v16 = vsel %vm849_vm2, %v851_v2, %v853_v45  ;;  %v797_v17 = vadd.f32 %v752_v13, %v697_v8  ;;  %v798_v18 = vadd.f32 %v754_v14, %v698_v9  ;;  %v952_v19 = vsel %vm949_vm3, %v950_v55, %v951_v3  ;;  %v555_v40 = vpop.permute.xlu1 %554 }
 0x2a4   :  { %v954_v20 = vsel %vm949_vm3, %v951_v3, %v953_v46  ;;  %v669_v21 = vrot.slane %v7750_v7, 1  ;;  %v626_v22 = vmul.f32 %v7686_v25, %v545_v12  ;;  %v726_v23 = vmul.f32 %v7688_v26, %v545_v12 }
 0x2a5   :  { %v826_v31 = vmul.f32 %v7690_v27, %v545_v12  ;;  %v897_v36 = vadd.f32 %v852_v15, %v797_v17  ;;  %v898_v37 = vadd.f32 %v854_v16, %v798_v18  ;;  %v7775_v38 = vmul.f32 %v7692_v28, %v550_v59 }
 0x2a6   :  { %v926_v39 = vmul.f32 %v7692_v28, %v545_v12  ;;  %v769_v42 = vrot.slane %v7753_v10, 2  ;;  %v869_v47 = vrot.slane %v7756_v11, 3  ;;  %v590_v48 = vmul.f32 %v7695_v29, %v545_v12 }
 0x2a7   :  { %v667_v51 = vrot.slane %v626_v22, 1  ;;  %v997_v53 = vadd.f32 %v952_v19, %v897_v36  ;;  %v998_v54 = vadd.f32 %v954_v20, %v898_v37  ;;  %v767_v55 = vrot.slane %v726_v23, 2  ;;  %v515_v20 = vpop.permute.xlu0 %514 }
 0x2a8   :  { %v867_v57 = vrot.slane %v826_v31, 3  ;;  %v967_v62 = vrot.slane %v926_v39, 4  ;;  %v7788_v63 = vmul.f32 %v7686_v25, %v555_v40  ;;  %v969_v3 = vrot.slane %v7775_v38, 4 }
 0x2a9   :  { %v668_v58 = vsel %vm649_vm0, %v665_v0, %v667_v51  ;;  %v670_v61 = vsel %vm649_vm0, %v667_v51, %v669_v21  ;;  %v7791_v2 = vadd.f32 %v7778_v41, %v997_v53  ;;  %v583_v7 = vmul.f32 %v7695_v29, %v7697_v30 }
 0x2aa   :  { %v705_v5 = vadd.f32 %v668_v58, %v589_v56  ;;  %v706_v6 = vadd.f32 %v670_v61, %v590_v48  ;;  %v10645_v8 = vrot.slane %v7739_v60, 4  ;;  %v7798_v9 = vadd.f32 %v7778_v41, %v998_v54 }
 0x2ab   :  { %v591_v10 = vmul.f32 %v7695_v29, %v550_v59  ;;  %v768_v11 = vsel %vm749_vm1, %v10647_v1, %v767_v55  ;;  %v770_v12 = vsel %vm749_vm1, %v767_v55, %v769_v42  ;;  %v868_v56 = vsel %vm849_vm2, %v10646_v4, %v867_v57 }
 0x2ac   :  { %v870_v13 = vsel %vm849_vm2, %v867_v57, %v869_v47  ;;  %v805_v30 = vadd.f32 %v768_v11, %v705_v5  ;;  %v806_v14 = vadd.f32 %v770_v12, %v706_v6  ;;  %v968_v15 = vsel %vm949_vm3, %v10645_v8, %v967_v62 }
 0x2ad   :  { %v671_v59 = vrot.slane %v7788_v63, 1  ;;  %v1035_v16 = vmul.f32 %v7791_v2, %v7791_v2  ;;  %v970_v17 = vsel %vm949_vm3, %v967_v62, %v969_v3  ;;  %v7817_v18 = vmul.f32 %v7688_v26, %v555_v40 }
 0x2ae   :  { %v7820_v19 = vmul.f32 %v7690_v27, %v555_v40  ;;  %v1036_v22 = vmul.f32 %v7798_v9, %v7798_v9  ;;  %v905_v23 = vadd.f32 %v868_v56, %v805_v30  ;;  %v906_v31 = vadd.f32 %v870_v13, %v806_v14 }
 0x2af   :  { %v672_v36 = vsel %vm649_vm0, %v669_v21, %v671_v59  ;;  %v1052_v37 = vsel %vm1051_vm4, %v7791_v2, 0.0  ;;  %v771_v39 = vrot.slane %v7817_v18, 2  ;;  %v7831_v48 = vmul.f32 %v7692_v28, %v555_v40 }
 0x2b0   :  { %v707_v38 = vadd.f32 %v672_v36, %v591_v10  ;;  %v1005_v51 = vadd.f32 %v968_v15, %v905_v23  ;;  %v1006_v53 = vadd.f32 %v970_v17, %v906_v31  ;;  %v871_v54 = vrot.slane %v7820_v19, 3  ;;  %v560_v23 = vpop.permute.xlu1 %559 }
 0x2b1   :  { %v7835_v55 = vmul.f32 %v7686_v25, %v515_v20  ;;  %v1053_v57 = vsel %vm1051_vm4, %v7798_v9, 0.0  ;;  %v772_v21 = vsel %vm749_vm1, %v769_v42, %v771_v39  ;;  %v971_v58 = vrot.slane %v7831_v48, 4 }
 0x2b2   :  { %v7842_v61 = vmul.f32 %v7688_v26, %v515_v20  ;;  %v7845_v62 = vadd.f32 %v7778_v41, %v1005_v51  ;;  %v7848_v5 = vadd.f32 %v7778_v41, %v1006_v53  ;;  %v807_v6 = vadd.f32 %v772_v21, %v707_v38 }
 0x2b3   :  { %v655_v10 = vrot.slane %v7835_v55, 1  ;;  %v592_v11 = vmul.f32 %v7695_v29, %v555_v40  ;;  %v7854_v42 = vmul.f32 %v7690_v27, %v515_v20  ;;  %v7857_v56 = vmul.f32 %v7692_v28, %v515_v20 }
 0x2b4   :  { %v755_v12 = vrot.slane %v7842_v61, 2  ;;  %v7859_v13 = vadd.f32 %v1053_v57, %v1052_v37  ;;  %v1074_v30 = vsel %vm1051_vm4, %v1035_v16, 0.0  ;;  %v1043_v14 = vmul.f32 %v7845_v62, %v7845_v62 }
 0x2b5   :  { %v872_v15 = vsel %vm849_vm2, %v869_v47, %v871_v54  ;;  %v1075_v40 = vsel %vm1051_vm4, %v1036_v22, 0.0  ;;  %v972_v18 = vsel %vm949_vm3, %v969_v3, %v971_v58  ;;  %v656_v16 = vsel %vm649_vm0, %v653_v43, %v655_v10 }
 0x2b6   :  { %v907_v17 = vadd.f32 %v872_v15, %v807_v6  ;;  %v1044_v31 = vmul.f32 %v7848_v5, %v7848_v5  ;;  %v1096_v47 = vsel %vm1051_vm4, %v7845_v62, 0.0  ;;  %v699_v36 = vadd.f32 %v656_v16, %v583_v7 }
 0x2b7   :  { %v855_v22 = vrot.slane %v7854_v42, 3  ;;  %v1097_v37 = vsel %vm1051_vm4, %v7848_v5, 0.0  ;;  %v756_v32 = vsel %vm749_vm1, %v753_v44, %v755_v12  ;;  %v955_v43 = vrot.slane %v7857_v56, 4 }
 0x2b8   :  { %v1007_v3 = vadd.f32 %v972_v18, %v907_v17  ;;  %v1118_v38 = vsel %vm1051_vm4, %v1043_v14, 0.0  ;;  %v799_v51 = vadd.f32 %v756_v32, %v699_v36  ;;  %v629_v53 = vmul.f32 %v7686_v25, %v560_v23  ;;  %v520_v36 = vpop.permute.xlu0 %519 }
 0x2b9   :  { %v7892_v7 = vmul.f32 %v7688_v26, %v560_v23  ;;  %v856_v33 = vsel %vm849_vm2, %v853_v45, %v855_v22  ;;  %v7903_v44 = vmul.f32 %v7690_v27, %v560_v23  ;;  %v7906_v21 = vmul.f32 %v7692_v28, %v560_v23 }
 0x2ba   :  { %v7895_v57 = vadd.f32 %v7778_v41, %v1007_v3  ;;  %v1119_v6 = vsel %vm1051_vm4, %v1044_v31, 0.0  ;;  %v899_v14 = vadd.f32 %v856_v33, %v799_v51  ;;  %v673_v15 = vrot.slane %v629_v53, 1 }
 0x2bb   :  { %v773_v17 = vrot.slane %v7892_v7, 2  ;;  %v7910_v18 = vadd.f32 %v1075_v40, %v1074_v30  ;;  %v584_v34 = vmul.f32 %v7695_v29, %v515_v20  ;;  %v956_v45 = vsel %vm949_vm3, %v953_v46, %v955_v43  ;;  %v565_v7 = vpop.permute.xlu1 %564 }
 0x2bc   :  { %v1045_v16 = vmul.f32 %v7895_v57, %v7895_v57  ;;  %v1098_v3 = vadd.f32 %v1097_v37, %v1096_v47  ;;  %v999_v31 = vadd.f32 %v956_v45, %v899_v14  ;;  %v674_v32 = vsel %vm649_vm0, %v671_v59, %v673_v15 }
 0x2bd   :  { %v873_v30 = vrot.slane %v7903_v44, 3  ;;  %v1120_v40 = vadd.f32 %v1119_v6, %v1118_v38  ;;  %v1099_v51 = vsel %vm1051_vm4, %v7895_v57, 0.0  ;;  %v708_v20 = vadd.f32 %v674_v32, %v592_v11 }
 0x2be   :  { %v973_v53 = vrot.slane %v7906_v21, 4  ;;  %v1121_v35 = vsel %vm1051_vm4, %v1045_v16, 0.0  ;;  %v774_v46 = vsel %vm749_vm1, %v771_v39, %v773_v17  ;;  %v621_v47 = vmul.f32 %v7686_v25, %v520_v36 }
 0x2bf   :  { %v7931_v37 = vmul.f32 %v7688_v26, %v520_v36  ;;  %v7934_v63 = vadd.f32 %v7778_v41, %v999_v31  ;;  %v808_v59 = vadd.f32 %v774_v46, %v708_v20  ;;  %v7937_v38 = vmul.f32 %v7690_v27, %v520_v36  ;;  %v525_v20 = vpop.permute.xlu0 %524 }
 0x2c0   :  { %v7940_v11 = vmul.f32 %v7692_v28, %v520_v36  ;;  %v593_v33 = vmul.f32 %v7695_v29, %v560_v23  ;;  %v874_v39 = vsel %vm849_vm2, %v871_v54, %v873_v30  ;;  %v657_v44 = vrot.slane %v621_v47, 1 }
 0x2c1   :  { %v757_v21 = vrot.slane %v7931_v37, 2  ;;  %v1100_v6 = vadd.f32 %v1099_v51, %v1098_v3  ;;  %v908_v14 = vadd.f32 %v874_v39, %v808_v59  ;;  %v585_v16 = vmul.f32 %v7695_v29, %v520_v36 }
 0x2c2   :  { %v857_v45 = vrot.slane %v7937_v38, 3  ;;  %v1122_v31 = vadd.f32 %v1121_v35, %v1120_v40  ;;  %v974_v32 = vsel %vm949_vm3, %v971_v58, %v973_v53  ;;  %v658_v19 = vsel %vm649_vm0, %v655_v10, %v657_v44 }
 0x2c3   :  { %v7956_v54 = vmul.f32 %v7686_v25, %v565_v7  ;;  %v1037_v23 = vmul.f32 %v7934_v63, %v7934_v63  ;;  %v1008_v3 = vadd.f32 %v974_v32, %v908_v14  ;;  %v700_v51 = vadd.f32 %v658_v19, %v584_v34 }
 0x2c4   :  { %v957_v36 = vrot.slane %v7940_v11, 4  ;;  %v758_v48 = vsel %vm749_vm1, %v755_v12, %v757_v21  ;;  %v7966_v55 = vmul.f32 %v7688_v26, %v565_v7  ;;  %v7969_v10 = vmul.f32 %v7690_v27, %v565_v7 }
 0x2c5   :  { %v675_v58 = vrot.slane %v7956_v54, 1  ;;  %v7972_v40 = vadd.f32 %v7778_v41, %v1008_v3  ;;  %v800_v35 = vadd.f32 %v758_v48, %v700_v51  ;;  %v858_v34 = vsel %vm849_vm2, %v855_v22, %v857_v45 }
 0x2c6   :  { %v7978_v61 = vmul.f32 %v7692_v28, %v565_v7  ;;  %v775_v46 = vrot.slane %v7966_v55, 2  ;;  %v875_v47 = vrot.slane %v7969_v10, 3  ;;  %v7984_v37 = vmul.f32 %v7686_v25, %v525_v20  ;;  %v570_v55 = vpop.permute.xlu1 %569 }
 0x2c7   :  { %v676_v12 = vsel %vm649_vm0, %v673_v15, %v675_v58  ;;  %v1046_v59 = vmul.f32 %v7972_v40, %v7972_v40  ;;  %v900_v38 = vadd.f32 %v858_v34, %v800_v35  ;;  %v594_v42 = vmul.f32 %v7695_v29, %v565_v7 }
 0x2c8   :  { %v709_v11 = vadd.f32 %v676_v12, %v593_v33  ;;  %v1055_v22 = vsel %vm1051_vm4, %v7934_v63, 0.0  ;;  %v958_v15 = vsel %vm949_vm3, %v955_v43, %v957_v36  ;;  %v776_v39 = vsel %vm749_vm1, %v773_v17, %v775_v46 }
 0x2c9   :  { %v975_v14 = vrot.slane %v7978_v61, 4  ;;  %v1077_v32 = vsel %vm1051_vm4, %v1037_v23, 0.0  ;;  %v1000_v19 = vadd.f32 %v958_v15, %v900_v38  ;;  %v659_v3 = vrot.slane %v7984_v37, 1 }
 0x2ca   :  { %v809_v54 = vadd.f32 %v776_v39, %v709_v11  ;;  %v1101_v7 = vsel %vm1051_vm4, %v7972_v40, 0.0  ;;  %v876_v33 = vsel %vm849_vm2, %v873_v30, %v875_v47  ;;  %v8004_v56 = vmul.f32 %v7688_v26, %v525_v20 }
 0x2cb   :  { %v8007_v43 = vmul.f32 %v7690_v27, %v525_v20  ;;  %v1123_v17 = vsel %vm1051_vm4, %v1046_v59, 0.0  ;;  %v660_v51 = vsel %vm649_vm0, %v657_v44, %v659_v3  ;;  %v8014_v48 = vmul.f32 %v7692_v28, %v525_v20 }
 0x2cc   :  { %v909_v23 = vadd.f32 %v876_v33, %v809_v54  ;;  %v976_v30 = vsel %vm949_vm3, %v973_v53, %v975_v14  ;;  %v701_v35 = vadd.f32 %v660_v51, %v585_v16  ;;  %v759_v34 = vrot.slane %v8004_v56, 2  ;;  %v530_v51 = vpop.permute.xlu0 %529 }
 0x2cd   :  { %v859_v12 = vrot.slane %v8007_v43, 3  ;;  %v1056_v59 = vadd.f32 %v1055_v22, %v7859_v13  ;;  %v8023_v38 = vadd.f32 %v1077_v32, %v7910_v18  ;;  %v8026_v44 = vadd.f32 %v7778_v41, %v1000_v19 }
 0x2ce   :  { %v1009_v11 = vadd.f32 %v976_v30, %v909_v23  ;;  %v586_v15 = vmul.f32 %v7695_v29, %v525_v20  ;;  %v760_v39 = vsel %vm749_vm1, %v757_v21, %v759_v34  ;;  %v959_v53 = vrot.slane %v8014_v48, 4 }
 0x2cf   :  { %v8032_v16 = vmul.f32 %v7686_v25, %v570_v55  ;;  %v1102_v54 = vadd.f32 %v1101_v7, %v1100_v6  ;;  %v1124_v33 = vadd.f32 %v1123_v17, %v1122_v31  ;;  %v801_v18 = vadd.f32 %v760_v39, %v701_v35 }
 0x2d0   :  { %v8035_v13 = vadd.f32 %v7778_v41, %v1009_v11  ;;  %v860_v22 = vsel %vm849_vm2, %v857_v45, %v859_v12  ;;  %v8042_v20 = vmul.f32 %v7688_v26, %v570_v55  ;;  %v8045_v21 = vmul.f32 %v7690_v27, %v570_v55 }
 0x2d1   :  { %v677_v32 = vrot.slane %v8032_v16, 1  ;;  %v1057_v6 = vsel %vm1051_vm4, %v8026_v44, 0.0  ;;  %v901_v19 = vadd.f32 %v860_v22, %v801_v18  ;;  %v8052_v7 = vmul.f32 %v7692_v28, %v570_v55 }
 0x2d2   :  { %v1047_v31 = vmul.f32 %v8035_v13, %v8035_v13  ;;  %v960_v45 = vsel %vm949_vm3, %v957_v36, %v959_v53  ;;  %v777_v17 = vrot.slane %v8042_v20, 2  ;;  %v877_v23 = vrot.slane %v8045_v21, 3 }
 0x2d3   :  { %v678_v56 = vsel %vm649_vm0, %v675_v58, %v677_v32  ;;  %v1038_v30 = vmul.f32 %v8026_v44, %v8026_v44  ;;  %v1001_v35 = vadd.f32 %v960_v45, %v901_v19  ;;  %v595_v11 = vmul.f32 %v7695_v29, %v570_v55 }
 0x2d4   :  { %v710_v39 = vadd.f32 %v678_v56, %v594_v42  ;;  %v8063_v16 = vadd.f32 %v1057_v6, %v1056_v59  ;;  %v1103_v18 = vsel %vm1051_vm4, %v8035_v13, 0.0  ;;  %v778_v36 = vsel %vm749_vm1, %v775_v46, %v777_v17 }
 0x2d5   :  { %v10648_v58 = vrot.slane %v8052_v7, 4  ;;  %v1125_v22 = vsel %vm1051_vm4, %v1047_v31, 0.0  ;;  %v878_v19 = vsel %vm849_vm2, %v875_v47, %v877_v23  ;;  %v623_v42 = vmul.f32 %v7686_v25, %v530_v51  ;;  %v575_v31 = vpop.permute.xlu1 %574 }
 0x2d6   :  { %v810_v20 = vadd.f32 %v778_v36, %v710_v39  ;;  %v8077_v55 = vadd.f32 %v7778_v41, %v1001_v35  ;;  %v8080_v59 = vmul.f32 %v7688_v26, %v530_v51  ;;  %v8083_v46 = vmul.f32 %v7690_v27, %v530_v51 }
 0x2d7   :  { %v8086_v6 = vmul.f32 %v7692_v28, %v530_v51  ;;  %v8089_v45 = vsel %vm1051_vm4, %v1038_v30, 0.0  ;;  %v1104_v10 = vadd.f32 %v1103_v18, %v1102_v54  ;;  %v661_v56 = vrot.slane %v623_v42, 1 }
 0x2d8   :  { %v910_v47 = vadd.f32 %v878_v19, %v810_v20  ;;  %v1126_v39 = vadd.f32 %v1125_v22, %v1124_v33  ;;  %v978_v35 = vsel %vm949_vm3, %v975_v14, %v10648_v58  ;;  %v587_v36 = vmul.f32 %v7695_v29, %v530_v51 }
 0x2d9   :  { %v761_v8 = vrot.slane %v8080_v59, 2  ;;  %v662_v30 = vsel %vm649_vm0, %v659_v3, %v661_v56  ;;  %v861_v54 = vrot.slane %v8083_v46, 3  ;;  %v632_v18 = vmul.f32 %v7686_v25, %v575_v31 }
 0x2da   :  { %v1010_v4 = vadd.f32 %v978_v35, %v910_v47  ;;  %v1039_v33 = vmul.f32 %v8077_v55, %v8077_v55  ;;  %v702_v22 = vadd.f32 %v662_v30, %v586_v15  ;;  %v961_v61 = vrot.slane %v8086_v6, 4  ;;  %v535_v47 = vpop.permute.xlu0 %534 }
 0x2db   :  { %v596_v14 = vmul.f32 %v7695_v29, %v575_v31  ;;  %v762_v20 = vsel %vm749_vm1, %v759_v34, %v761_v8  ;;  %v679_v37 = vrot.slane %v632_v18, 1  ;;  %v732_v3 = vmul.f32 %v7688_v26, %v575_v31 }
 0x2dc   :  { %v8108_v51 = vadd.f32 %v7778_v41, %v1010_v4  ;;  %v8114_v19 = vsel %vm1051_vm4, %v8077_v55, 0.0  ;;  %v802_v42 = vadd.f32 %v762_v20, %v702_v22  ;;  %v832_v59 = vmul.f32 %v7690_v27, %v575_v31 }
 0x2dd   :  { %v932_v15 = vmul.f32 %v7692_v28, %v575_v31  ;;  %v862_v4 = vsel %vm849_vm2, %v859_v12, %v861_v54  ;;  %v680_v34 = vsel %vm649_vm0, %v677_v32, %v679_v37  ;;  %v712_v30 = vadd.f32 %v679_v37, %v596_v14 }
 0x2de   :  { %v1048_v35 = vmul.f32 %v8108_v51, %v8108_v51  ;;  %v902_v18 = vadd.f32 %v862_v4, %v802_v42  ;;  %v962_v31 = vsel %vm949_vm3, %v959_v53, %v961_v61  ;;  %v711_v22 = vadd.f32 %v680_v34, %v595_v11 }
 0x2df   :  { %v779_v20 = vrot.slane %v732_v3, 2  ;;  %v1105_v1 = vsel %vm1051_vm4, %v8108_v51, 0.0  ;;  %v879_v58 = vrot.slane %v832_v59, 3  ;;  %v588_v43 = vmul.f32 %v7695_v29, %v535_v47 }
 0x2e0   :  { %v624_v12 = vmul.f32 %v7686_v25, %v535_v47  ;;  %v1002_v32 = vadd.f32 %v962_v31, %v902_v18  ;;  %v979_v42 = vrot.slane %v932_v15, 4  ;;  %v1127_v48 = vsel %vm1051_vm4, %v1048_v35, 0.0 }
 0x2e1   :  { %v780_v14 = vsel %vm749_vm1, %v777_v17, %v779_v20  ;;  %v812_v37 = vadd.f32 %v779_v20, %v712_v30  ;;  %v880_v53 = vsel %vm849_vm2, %v877_v23, %v879_v58  ;;  %v724_v29 = vmul.f32 %v7688_v26, %v535_v47 }
 0x2e2   :  { %v811_v4 = vadd.f32 %v780_v14, %v711_v22  ;;  %v663_v11 = vrot.slane %v624_v12, 1  ;;  %v8141_v3 = vadd.f32 %v7778_v41, %v1002_v32  ;;  %v824_v25 = vmul.f32 %v7690_v27, %v535_v47 }
 0x2e3   :  { %v912_v59 = vadd.f32 %v879_v58, %v812_v37  ;;  %v924_v21 = vmul.f32 %v7692_v28, %v535_v47  ;;  %v1081_v23 = vsel %vm1051_vm4, %v1039_v33, 0.0  ;;  %v10682_v35 = vrot.slane %v8052_v7, 4 }
 0x2e4   :  { %v911_v34 = vadd.f32 %v880_v53, %v811_v4  ;;  %v664_v17 = vsel %vm649_vm0, %v661_v56, %v663_v11  ;;  %v666_v15 = vsel %vm649_vm0, %v663_v11, %v665_v0  ;;  %v1106_v26 = vadd.f32 %v1105_v1, %v1104_v10 }
 0x2e5   :  { %v980_v30 = vsel %vm949_vm3, %v10682_v35, %v979_v42  ;;  %v1012_v58 = vadd.f32 %v979_v42, %v912_v59  ;;  %v703_v18 = vadd.f32 %v664_v17, %v587_v36  ;;  %v704_v27 = vadd.f32 %v666_v15, %v588_v43 }
 0x2e6   :  { %v1011_v31 = vadd.f32 %v980_v30, %v911_v34  ;;  %v763_v22 = vrot.slane %v724_v29, 2  ;;  %v1128_v20 = vadd.f32 %v1127_v48, %v1126_v39  ;;  %v1040_v49 = vmul.f32 %v8141_v3, %v8141_v3 }
 0x2e7   :  { %v8157_v0 = vadd.f32 %v7778_v41, %v1012_v58  ;;  %v863_v28 = vrot.slane %v824_v25, 3  ;;  %v10683_v33 = vrot.slane %v7728_v50, 2  ;;  %v963_v10 = vrot.slane %v924_v21, 4 }
 0x2e8   :  { %v8160_v56 = vadd.f32 %v7778_v41, %v1011_v31  ;;  %v764_v7 = vsel %vm749_vm1, %v761_v8, %v763_v22  ;;  %v1061_v39 = vsel %vm1051_vm4, %v8141_v3, 0.0  ;;  %v10684_v8 = vrot.slane %v7731_v52, 3 }
 0x2e9   :  { %v766_v1 = vsel %vm749_vm1, %v763_v22, %v10683_v33  ;;  %v1050_v36 = vmul.f32 %v8157_v0, %v8157_v0  ;;  %v803_v47 = vadd.f32 %v764_v7, %v703_v18  ;;  %v864_v50 = vsel %vm849_vm2, %v861_v54, %v863_v28 }
 0x2ea   :  { %v804_v43 = vadd.f32 %v766_v1, %v704_v27  ;;  %v1049_v12 = vmul.f32 %v8160_v56, %v8160_v56  ;;  %v1107_v32 = vsel %vm1051_vm4, %v8160_v56, 0.0  ;;  %v866_v14 = vsel %vm849_vm2, %v863_v28, %v10684_v8 }
 0x2eb   :  { %v1108_v37 = vadd.f32 %v1107_v32, %v1106_v26  ;;  %v1109_v42 = vsel %vm494_vm5, %v8157_v0, 0.0  ;;  %v903_v48 = vadd.f32 %v864_v50, %v803_v47  ;;  %v964_v11 = vsel %vm949_vm3, %v961_v61, %v963_v10 }
 0x2ec   :  { %v904_v4 = vadd.f32 %v866_v14, %v804_v43  ;;  %v1129_v53 = vsel %vm1051_vm4, %v1049_v12, 0.0  ;;  %v10685_v46 = vrot.slane %v7739_v60, 4  ;;  %v7359_v34 = vmov 0.0  }
 0x2ed   :  { %v1110_v59 = vadd.f32 %v1109_v42, %v1108_v37  ;;  %v1130_v52 = vadd.f32 %v1129_v53, %v1128_v20  ;;  %v1003_v29 = vadd.f32 %v964_v11, %v903_v48  ;;  %495 = vst.msk [vmem:[#allocation2] sm:$0xf] %vm494_vm5, %v7359_v34  ;;  %496 = vst.msk [vmem:[#allocation2 + $0x40] sm:$0xf] %vm494_vm5, %v7359_v34  ;;  %v1083_v60 = vsel %vm1051_vm4, %v1040_v49, 0.0 }
 0x2ee   :  { %v966_v54 = vsel %vm949_vm3, %v963_v10, %v10685_v46  ;;  %v1080_v6 = vadd.f32 %v8089_v45, %v8023_v38  ;;  %v1060_v61 = vadd.f32 %v8114_v19, %v8063_v16  ;;  %v1131_v17 = vsel %vm494_vm5, %v1050_v36, 0.0  ;;  %3010 = vst.msk [vmem:[#allocation3] sm:$0xf] %vm3009_vm8, %v7359_v34  ;;  %3011 = vst.msk [vmem:[#allocation3 + $0x20] sm:$0xf] %vm3009_vm8, %v7359_v34 }
 0x2ef   :  { %v1004_v25 = vadd.f32 %v966_v54, %v904_v4  ;;  %v1111_v15 = vrot.slane %v1110_v59, 4  ;;  %v1132_v21 = vadd.f32 %v1131_v17, %v1130_v52  ;;  %v8200_v35 = vadd.f32 %v7778_v41, %v1003_v29  ;;  %4510 = vst.msk [vmem:[#allocation4] sm:$0xf] %vm4509_vm12, %v7359_v34  ;;  %4511 = vst.msk [vmem:[#allocation4 + $0x10] sm:$0xf] %vm4509_vm12, %v7359_v34 }
 0x2f0   :  { %v1082_v58 = vadd.f32 %v1081_v23, %v1080_v6  ;;  %v1062_v18 = vadd.f32 %v1061_v39, %v1060_v61 }
 0x2f1   :  { %v8203_v30 = vadd.f32 %v7778_v41, %v1004_v25  ;;  %v1112_v26 = vadd.f32 %v1111_v15, %v1110_v59  ;;  %v1133_v31 = vrot.slane %v1132_v21, 4  ;;  %v1041_v38 = vmul.f32 %v8200_v35, %v8200_v35  ;;  %v448_v15 = vld [vmem:[%s10686_s21] sm:$0xff] }
 0x2f2   :  { %v1084_v45 = vadd.f32 %v1083_v60, %v1082_v58  ;;  %v1063_v19 = vsel %vm1051_vm4, %v8200_v35, 0.0  ;;  %v450_v58 = vld [vmem:[%s10686_s21 + $0x10] sm:$0xff] }
 0x2f3   :  { %v1042_v16 = vmul.f32 %v8203_v30, %v8203_v30  ;;  %v1113_v27 = vrot.slane %v1112_v26, 2  ;;  %v1134_v22 = vadd.f32 %v1133_v31, %v1132_v21  ;;  %v1064_v20 = vadd.f32 %v1063_v19, %v1062_v18  ;;  %v449_v21 = vld [vmem:[%s10686_s21 + $0x8] sm:$0xff]  ;;  %v451_v31 = vld [vmem:[%s10686_s21 + $0x18] sm:$0xff] }
 0x2f4   :  { %v1085_v41 = vsel %vm1051_vm4, %v1041_v38, 0.0  ;;  %v1065_v23 = vsel %vm494_vm5, %v8203_v30, 0.0  ;;  %v7360_v18 = vmov 0.0|0.0   ;;  %v5891_v38 = vpack.c.bf16 %v451_v31, %v450_v58 }
 0x2f5   :  { %v1086_v49 = vadd.f32 %v1085_v41, %v1084_v45  ;;  %v1135_v28 = vrot.slane %v1134_v22, 2  ;;  %v1066_v7 = vadd.f32 %v1065_v23, %v1064_v20  ;;  %v1087_v33 = vsel %vm494_vm5, %v1042_v16, 0.0  ;;  %5887 = vmatprep.subr.bf16.mxu0 %v7360_v18  ;;  %5917 = vmatprep.subr.bf16.mxu1 %v7360_v18  ;;  %v452_v16 = vld [vmem:[%s10686_s21 + $0x20] sm:$0xff]  ;;  %v453_v45 = vld [vmem:[%s10686_s21 + $0x28] sm:$0xff] }
 0x2f6   :  { %v1114_v10 = vadd.f32 %v1113_v27, %v1112_v26  ;;  %v5888_v26 = vpack.c.bf16 %v449_v21, %v448_v15  ;;  %v5894_v19 = vpack.c.bf16 %v453_v45, %v452_v16  ;;  %v454_v27 = vld [vmem:[%s10686_s21 + $0x30] sm:$0xff]  ;;  %v446_v20 = vld [vmem:[#allocation8] sm:$0x1]  ;;  %v447_v23 = vld [vmem:[#allocation10] sm:$0x1] }
 0x2f7   :  { %v1088_v1 = vadd.f32 %v1087_v33, %v1086_v49  ;;  %v1067_v39 = vrot.slane %v1066_v7, 4  ;;  %v1136_v36 = vadd.f32 %v1135_v28, %v1134_v22  ;;  %v455_v22 = vld [vmem:[%s10686_s21 + $0x38] sm:$0xff]  ;;  %v456_v28 = vld [vmem:[%s10686_s21 + $0x40] sm:$0xff] }
 0x2f8   :  { %v1115_v32 = vrot.slane %v1114_v10, 1  ;;  %5889 = vmatpush1.bf16.msra.mxu0 %v5888_v26  ;;  %v5897_v49 = vpack.c.bf16 %v455_v22, %v454_v27 }
 0x2f9   :  { %v1089_v47 = vrot.slane %v1088_v1, 4  ;;  %v1068_v43 = vadd.f32 %v1067_v39, %v1066_v7  ;;  %v1137_v8 = vrot.slane %v1136_v36, 1  ;;  %5890 = vmatprep.subr.bf16.mxu0 %v7360_v18  ;;  %v457_v7 = vld [vmem:[%s10686_s21 + $0x48] sm:$0xff]  ;;  %v460_v39 = vld [vmem:[%s10686_s21 + $0x60] sm:$0xff] }
 0x2fa   :  { %v1116_v48 = vadd.f32 %v1115_v32, %v1114_v10  ;;  %v459_v10 = vld [vmem:[%s10686_s21 + $0x58] sm:$0xff] }
 0x2fb   :  { %v1090_v12 = vadd.f32 %v1089_v47, %v1088_v1  ;;  %v1069_v50 = vrot.slane %v1068_v43, 2  ;;  %v1138_v53 = vadd.f32 %v1137_v8, %v1136_v36  ;;  %v458_v1 = vld [vmem:[%s10686_s21 + $0x50] sm:$0xff]  ;;  %v461_v36 = vld [vmem:[%s10686_s21 + $0x68] sm:$0xff] }
 0x2fc   :  { %5892 = vmatpush1.bf16.msra.mxu0 %v5891_v38  ;;  %v8235_v47 = vld [vmem:[%s10686_s21 + $0x70] sm:$0xff] }
 0x2fd   :  { %v1091_v14 = vrot.slane %v1090_v12, 2  ;;  %v1070_v37 = vadd.f32 %v1069_v50, %v1068_v43  ;;  %5893 = vmatprep.subr.bf16.mxu0 %v7360_v18  ;;  %v8238_v43 = vld [vmem:[%s10686_s21 + $0x78] sm:$0xff]  ;;  %v5900_v50 = vpack.c.bf16 %v457_v7, %v456_v28 }
 0x2ff   :  { %v1092_v42 = vadd.f32 %v1091_v14, %v1090_v12  ;;  %v1071_v4 = vrot.slane %v1070_v37, 1  ;;  %v5903_v14 = vpack.c.bf16 %v459_v10, %v458_v1 }
 0x300   :  { %5895 = vmatpush1.bf16.msra.mxu0 %v5894_v19 }
 0x301   :  { %v1093_v11 = vrot.slane %v1092_v42, 1  ;;  %v1072_v46 = vadd.f32 %v1071_v4, %v1070_v37  ;;  %5896 = vmatprep.subr.bf16.mxu0 %v7360_v18  ;;  %v5906_v37 = vpack.c.bf16 %v461_v36, %v460_v39 }
 0x303   :  { %v1094_v54 = vadd.f32 %v1093_v11, %v1092_v42  ;;  %v1117_v59 = vadd.f32 %v1116_v48, %v1072_v46  ;;  %v5909_v42 = vpack.c.bf16 %v8238_v43, %v8235_v47 }
 0x304   :  { %5898 = vmatpush1.bf16.msra.mxu0 %v5897_v49 }
 0x305   :  { %v1139_v52 = vadd.f32 %v1138_v53, %v1094_v54  ;;  %v1141_v29 = vmul.f32 0.008333334, %v1117_v59  ;;  %5899 = vmatprep.subr.bf16.mxu0 %v7360_v18 }
 0x307   :  { %v1142_v25 = vmul.f32 0.008333334, %v1139_v52  ;;  %v1143_v6 = vmul.f32 %v1141_v29, %v1141_v29 }
 0x308   :  { %5901 = vmatpush1.bf16.msra.mxu0 %v5900_v50 }
 0x309   :  { %v1144_v61 = vsub.f32 %v1142_v25, %v1143_v6  ;;  %5902 = vmatprep.subr.bf16.mxu0 %v7360_v18 }
 0x30b   :  { %v1145_v60 = vmax.f32 %v1144_v61, 0.0 }
 0x30c   :  { %5904 = vmatpush1.bf16.msra.mxu0 %v5903_v14 }
 0x30d   :  { %v1146_v17 = vadd.f32 1e-05, %v1145_v60  ;;  %5905 = vmatprep.subr.bf16.mxu0 %v7360_v18 }
 0x30f   :  { %6384 = vrsqrt.f32 %v1146_v17 }
 0x310   :  { %5907 = vmatpush1.bf16.msra.mxu0 %v5906_v37 }
 0x311   :  { %5908 = vmatprep.subr.bf16.mxu0 %v7360_v18 }
 0x314   :  { %5910 = vmatpush1.bf16.msra.mxu0 %v5909_v42 }
 0x315   :  { %5911 = vmatprep.subr.bf16.mxu0 %v7360_v18 }
 0x319   :  { %v6385_v41 = vpop.eup %6384 }
 0x31a   :  { %v1148_v33 = vmul.f32 %v6385_v41, %v446_v20 }
 0x31c   :  { %v1149_v12 = vmul.f32 %v1148_v33, %v1141_v29  ;;  %v8241_v32 = vrot.slane %v1148_v33, %v7684_v24 }
 0x31e   :  { %v1150_v8 = vsub.f32 %v447_v23, %v1149_v12  ;;  %v1161_v48 = vmul.f32 %v8241_v32, %v8200_v35  ;;  %v1162_v4 = vmul.f32 %v8241_v32, %v8203_v30  ;;  %v1155_v53 = vmul.f32 %v8241_v32, %v7791_v2 }
 0x31f   :  { %v1156_v11 = vmul.f32 %v8241_v32, %v7798_v9  ;;  %v1157_v54 = vmul.f32 %v8241_v32, %v7934_v63  ;;  %v1158_v59 = vmul.f32 %v8241_v32, %v8026_v44  ;;  %v1159_v52 = vmul.f32 %v8241_v32, %v8077_v55 }
 0x320   :  { %v8255_v46 = vrot.slane %v1150_v8, %v7684_v24  ;;  %v1160_v29 = vmul.f32 %v8241_v32, %v8141_v3  ;;  %v1163_v25 = vmul.f32 %v8241_v32, %v7845_v62  ;;  %v1164_v6 = vmul.f32 %v8241_v32, %v7848_v5 }
 0x321   :  { %v1165_v61 = vmul.f32 %v8241_v32, %v7895_v57  ;;  %v1166_v23 = vmul.f32 %v8241_v32, %v7972_v40  ;;  %v1167_v36 = vmul.f32 %v8241_v32, %v8035_v13 }
 0x322   :  { %v8272_v60 = vadd.f32 %v8255_v46, %v1161_v48  ;;  %v8275_v17 = vadd.f32 %v8255_v46, %v1162_v4  ;;  %v8278_v15 = vadd.f32 %v8255_v46, %v1155_v53  ;;  %v8281_v21 = vadd.f32 %v8255_v46, %v1156_v11 }
 0x323   :  { %v8285_v58 = vadd.f32 %v8255_v46, %v1157_v54  ;;  %v8288_v26 = vadd.f32 %v8255_v46, %v1158_v59  ;;  %v8291_v31 = vadd.f32 %v8255_v46, %v1159_v52  ;;  %v8294_v38 = vadd.f32 %v8255_v46, %v1160_v29 }
 0x324   :  { %v1199_v16 = vsub.f32 0.0, %v8272_v60  ;;  %v1200_v45 = vsub.f32 0.0, %v8275_v17  ;;  %v1193_v19 = vsub.f32 0.0, %v8278_v15  ;;  %v1194_v27 = vsub.f32 0.0, %v8281_v21 }
 0x325   :  { %v1195_v22 = vsub.f32 0.0, %v8285_v58  ;;  %v1196_v20 = vsub.f32 0.0, %v8288_v26  ;;  %v1197_v41 = vsub.f32 0.0, %v8291_v31  ;;  %v8306_v33 = vadd.f32 %v8255_v46, %v1163_v25 }
 0x326   :  { %v1221_v49 = vmul.f32 1.442695, %v1199_v16  ;;  %v1223_v28 = vmul.f32 1.442695, %v1200_v45  ;;  %v1209_v7 = vmul.f32 1.442695, %v1193_v19  ;;  %v8311_v39 = vadd.f32 %v8255_v46, %v1164_v6 }
 0x327   :  { %v1211_v1 = vmul.f32 1.442695, %v1194_v27  ;;  %v1198_v10 = vsub.f32 0.0, %v8294_v38  ;;  %v1213_v47 = vmul.f32 1.442695, %v1195_v22  ;;  %v1201_v12 = vsub.f32 0.0, %v8306_v33 }
 0x328   :  { %6386 = vpow2.f32 %v1221_v49  ;;  %v1215_v43 = vmul.f32 1.442695, %v1196_v20  ;;  %v8317_v50 = vadd.f32 %v8255_v46, %v1165_v61  ;;  %v1202_v8 = vsub.f32 0.0, %v8311_v39 }
 0x329   :  { %6388 = vpow2.f32 %v1223_v28  ;;  %v8321_v14 = vadd.f32 %v8255_v46, %v1166_v23  ;;  %v1217_v48 = vmul.f32 1.442695, %v1197_v41  ;;  %v8324_v4 = vadd.f32 %v8255_v46, %v1167_v36 }
 0x32a   :  { %6390 = vpow2.f32 %v1209_v7  ;;  %v1219_v53 = vmul.f32 1.442695, %v1198_v10  ;;  %v1203_v11 = vsub.f32 0.0, %v8317_v50  ;;  %v1225_v59 = vmul.f32 1.442695, %v1201_v12 }
 0x32b   :  { %6392 = vpow2.f32 %v1211_v1  ;;  %v1204_v54 = vsub.f32 0.0, %v8321_v14  ;;  %v1205_v52 = vsub.f32 0.0, %v8324_v4  ;;  %v1227_v29 = vmul.f32 1.442695, %v1202_v8 }
 0x32c   :  { %6394 = vpow2.f32 %v1213_v47  ;;  %v1229_v37 = vmul.f32 1.442695, %v1203_v11 }
 0x32d   :  { %6396 = vpow2.f32 %v1215_v43  ;;  %v1231_v25 = vmul.f32 1.442695, %v1204_v54  ;;  %v1233_v6 = vmul.f32 1.442695, %v1205_v52 }
 0x32e   :  { %6398 = vpow2.f32 %v1217_v48 }
 0x32f   :  { %6400 = vpow2.f32 %v1219_v53 }
 0x330   :  { %6402 = vpow2.f32 %v1225_v59 }
 0x331   :  { %6404 = vpow2.f32 %v1227_v29 }
 0x332   :  { %v6387_v61 = vpop.eup %6386  ;;  %6406 = vpow2.f32 %v1229_v37 }
 0x333   :  { %v6389_v16 = vpop.eup %6388  ;;  %v1247_v45 = vadd.f32 1.0, %v6387_v61  ;;  %6408 = vpow2.f32 %v1231_v25 }
 0x334   :  { %v6391_v19 = vpop.eup %6390  ;;  %v1248_v27 = vadd.f32 1.0, %v6389_v16  ;;  %6410 = vpow2.f32 %v1233_v6  ;;  %v1168_v6 = vmul.f32 %v8241_v32, %v8108_v51 }
 0x335   :  { %v6393_v22 = vpop.eup %6392  ;;  %6412 = vrcp.f32 %v1247_v45  ;;  %v1241_v42 = vadd.f32 1.0, %v6391_v19  ;;  %v1169_v45 = vmul.f32 %v8241_v32, %v8160_v56 }
 0x336   :  { %v6395_v20 = vpop.eup %6394  ;;  %6414 = vrcp.f32 %v1248_v27  ;;  %v1242_v41 = vadd.f32 1.0, %v6393_v22  ;;  %v8340_v22 = vadd.f32 %v8255_v46, %v1168_v6 }
 0x337   :  { %v6397_v23 = vpop.eup %6396  ;;  %6416 = vrcp.f32 %v1241_v42  ;;  %v1243_v49 = vadd.f32 1.0, %v6395_v20 }
 0x338   :  { %v6399_v28 = vpop.eup %6398  ;;  %6418 = vrcp.f32 %v1242_v41  ;;  %v1244_v7 = vadd.f32 1.0, %v6397_v23 }
 0x339   :  { %v6401_v1 = vpop.eup %6400  ;;  %6420 = vrcp.f32 %v1243_v49  ;;  %v1245_v10 = vadd.f32 1.0, %v6399_v28  ;;  %v1170_v49 = vmul.f32 %v8241_v32, %v8157_v0 }
 0x33a   :  { %v6403_v36 = vpop.eup %6402  ;;  %6422 = vrcp.f32 %v1244_v7  ;;  %v1246_v47 = vadd.f32 1.0, %v6401_v1  ;;  %v1206_v7 = vsub.f32 0.0, %v8340_v22  ;;  %v464_v1 = vld [vmem:[%s10686_s21 + $0x80] sm:$0xff] }
 0x33b   :  { %v6405_v43 = vpop.eup %6404  ;;  %6424 = vrcp.f32 %v1245_v10  ;;  %v1249_v12 = vadd.f32 1.0, %v6403_v36  ;;  %v465_v10 = vld [vmem:[%s10686_s21 + $0x88] sm:$0xff] }
 0x33c   :  { %v6407_v8 = vpop.eup %6406  ;;  %6426 = vrcp.f32 %v1246_v47  ;;  %v1250_v48 = vadd.f32 1.0, %v6405_v43  ;;  %v5912_v32 = vpack.c.bf16 %v465_v10, %v464_v1 }
 0x33d   :  { %v6409_v53 = vpop.eup %6408  ;;  %6428 = vrcp.f32 %v1249_v12  ;;  %v1251_v11 = vadd.f32 1.0, %v6407_v8 }
 0x33e   :  { %v6411_v54 = vpop.eup %6410  ;;  %6430 = vrcp.f32 %v1250_v48  ;;  %v1252_v59 = vadd.f32 1.0, %v6409_v53  ;;  %5913 = vmatpush1.bf16.msra.mxu0 %v5912_v32 }
 0x33f   :  { %v6413_v52 = vpop.eup %6412  ;;  %6432 = vrcp.f32 %v1251_v11  ;;  %v1253_v29 = vadd.f32 1.0, %v6411_v54  ;;  %5914 = vmatprep.subr.bf16.mxu0 %v7360_v18  ;;  %v1235_v11 = vmul.f32 1.442695, %v1206_v7 }
 0x340   :  { %v6415_v37 = vpop.eup %6414  ;;  %v1279_v25 = vmul.f32 %v6413_v52, %v8272_v60  ;;  %6434 = vrcp.f32 %v1252_v59 }
 0x341   :  { %v6417_v61 = vpop.eup %6416  ;;  %v1280_v16 = vmul.f32 %v6415_v37, %v8275_v17  ;;  %6436 = vrcp.f32 %v1253_v29  ;;  %v8345_v17 = vadd.f32 %v8255_v46, %v1169_v45 }
 0x342   :  { %v6419_v19 = vpop.eup %6418  ;;  %1295 = vst.msk [vmem:[#allocation2 + $0x34] sm:$0xff] %vm1051_vm4, %v1279_v25  ;;  %v1273_v27 = vmul.f32 %v6417_v61, %v8278_v15  ;;  %6438 = vpow2.f32 %v1235_v11 }
 0x343   :  { %v6421_v60 = vpop.eup %6420  ;;  %1296 = vst.msk [vmem:[#allocation2 + $0x3c] sm:$0xf] %vm494_vm5, %v1280_v16  ;;  %v1274_v42 = vmul.f32 %v6419_v19, %v8281_v21  ;;  %v1207_v47 = vsub.f32 0.0, %v8345_v17 }
 0x344   :  { %v6423_v20 = vpop.eup %6422  ;;  %1289 = vst.msk [vmem:[#allocation2 + $0x4] sm:$0xff] %vm1051_vm4, %v1273_v27  ;;  %v1275_v41 = vmul.f32 %v6421_v60, %v8285_v58 }
 0x345   :  { %v6425_v23 = vpop.eup %6424  ;;  %1290 = vst.msk [vmem:[#allocation2 + $0xc] sm:$0xff] %vm1051_vm4, %v1274_v42  ;;  %v1276_v15 = vmul.f32 %v6423_v20, %v8288_v26  ;;  %v8362_v26 = vadd.f32 %v8255_v46, %v1170_v49  ;;  %v1237_v54 = vmul.f32 1.442695, %v1207_v47 }
 0x346   :  { %v6427_v28 = vpop.eup %6426  ;;  %1291 = vst.msk [vmem:[#allocation2 + $0x14] sm:$0xff] %vm1051_vm4, %v1275_v41  ;;  %v1277_v21 = vmul.f32 %v6425_v23, %v8291_v31 }
 0x347   :  { %v6429_v36 = vpop.eup %6428  ;;  %1292 = vst.msk [vmem:[#allocation2 + $0x1c] sm:$0xff] %vm1051_vm4, %v1276_v15  ;;  %v1278_v58 = vmul.f32 %v6427_v28, %v8294_v38  ;;  %v1208_v59 = vsub.f32 0.0, %v8362_v26  ;;  %6440 = vpow2.f32 %v1237_v54 }
 0x348   :  { %v6431_v43 = vpop.eup %6430  ;;  %1293 = vst.msk [vmem:[#allocation2 + $0x24] sm:$0xff] %vm1051_vm4, %v1277_v21  ;;  %v1281_v31 = vmul.f32 %v6429_v36, %v8306_v33 }
 0x349   :  { %v6433_v12 = vpop.eup %6432  ;;  %1294 = vst.msk [vmem:[#allocation2 + $0x2c] sm:$0xff] %vm1051_vm4, %v1278_v58  ;;  %v1282_v8 = vmul.f32 %v6431_v43, %v8311_v39 }
 0x34a   :  { %v6435_v48 = vpop.eup %6434  ;;  %1297 = vst.msk [vmem:[#allocation2 + $0x44] sm:$0xff] %vm1051_vm4, %v1281_v31  ;;  %v1283_v38 = vmul.f32 %v6433_v12, %v8317_v50 }
 0x34b   :  { %v6437_v46 = vpop.eup %6436  ;;  %v8371_v53 = vld [vmem:[#allocation2] sm:$0xff]  ;;  %1298 = vst.msk [vmem:[#allocation2 + $0x4c] sm:$0xff] %vm1051_vm4, %v1282_v8  ;;  %v1284_v33 = vmul.f32 %v6435_v48, %v8321_v14 }
 0x34c   :  { %v8376_v39 = vld [vmem:[#allocation2 + $0x8] sm:$0xff]  ;;  %v1574_v52 = vrot.slane %v8371_v53, 4  ;;  %v1416_v29 = vrot.slane %v8371_v53, 2  ;;  %v1337_v50 = vrot.slane %v8371_v53, 1  ;;  %v1495_v37 = vrot.slane %v8371_v53, 3  ;;  %1299 = vst.msk [vmem:[#allocation2 + $0x54] sm:$0xff] %vm1051_vm4, %v1283_v38 }
 0x34d   :  { %v1575_v25 = vrot.slane %v8376_v39, 4  ;;  %v8384_v6 = vld [vmem:[#allocation2 + $0x10] sm:$0xff]  ;;  %v1417_v14 = vrot.slane %v8376_v39, 2  ;;  %v1338_v61 = vrot.slane %v8376_v39, 1  ;;  %v1496_v16 = vrot.slane %v8376_v39, 3  ;;  %1300 = vst.msk [vmem:[#allocation2 + $0x5c] sm:$0xff] %vm1051_vm4, %v1284_v33 }
 0x34e   :  { %v1419_v45 = vrot.slane %v8384_v6, 2  ;;  %v1340_v19 = vrot.slane %v8384_v6, 1  ;;  %v8392_v27 = vld [vmem:[#allocation2 + $0x18] sm:$0xff]  ;;  %v1498_v60 = vrot.slane %v8384_v6, 3  ;;  %v1285_v42 = vmul.f32 %v6437_v46, %v8324_v4 }
 0x34f   :  { %v1576_v20 = vsel %vm949_vm3, %v1574_v52, %v1575_v25  ;;  %v1418_v41 = vsel %vm749_vm1, %v1416_v29, %v1417_v14  ;;  %v1339_v23 = vsel %vm649_vm0, %v1337_v50, %v1338_v61  ;;  %v8401_v15 = vld [vmem:[#allocation2 + $0x20] sm:$0xff]  ;;  %v1342_v49 = vrot.slane %v8392_v27, 1 }
 0x350   :  { %5613 = vmatprep.mubr.msk.f32.mxu0 %vm1051_vm4, %v1576_v20  ;;  %v1420_v28 = vsel %vm749_vm1, %v1417_v14, %v1419_v45  ;;  %v1341_v21 = vsel %vm649_vm0, %v1338_v61, %v1340_v19  ;;  %v1344_v4 = vrot.slane %v8401_v15, 1  ;;  %v1497_v7 = vsel %vm849_vm2, %v1495_v37, %v1496_v16  ;;  %1301 = vst.msk [vmem:[#allocation2 + $0x64] sm:$0xff] %vm1051_vm4, %v1285_v42  ;;  %v8415_v31 = vld [vmem:[#allocation2 + $0x28] sm:$0xff]  ;;  %v8417_v12 = vld [vmem:[#allocation2 + $0x30] sm:$0xff]  ;;  %v8427_v14 = vld [vmem:[#allocation2 + $0x38] sm:$0xff] }
 0x351   :  { %v6134_v1 = vpack.i.bf16 %v1420_v28, %v1418_v41  ;;  %v6129_v10 = vpack.i.bf16 %v1341_v21, %v1339_v23  ;;  %v1343_v36 = vsel %vm649_vm0, %v1340_v19, %v1342_v49  ;;  %v1499_v58 = vsel %vm849_vm2, %v1496_v16, %v1498_v60  ;;  %v8433_v19 = vld [vmem:[#allocation2 + $0x40] sm:$0xff] }
 0x352   :  { %v1345_v47 = vsel %vm649_vm0, %v1342_v49, %v1344_v4  ;;  %v1500_v32 = vrot.slane %v8392_v27, 3  ;;  %v1502_v43 = vrot.slane %v8401_v15, 3  ;;  %v1421_v8 = vrot.slane %v8392_v27, 2 }
 0x353   :  { %6135 = vrot.lane.b32.xlu1 %v6134_v1, %s7361_s9  ;;  %6130 = vrot.lane.b32.xlu0 %v6129_v10, %s7362_s24  ;;  %v1423_v48 = vrot.slane %v8401_v15, 2  ;;  %v1239_v38 = vmul.f32 1.442695, %v1208_v59  ;;  %v6144_v46 = vpack.i.bf16 %v1345_v47, %v1343_v36  ;;  %v6139_v33 = vpack.i.bf16 %v1499_v58, %v1497_v7  ;;  %v8449_v10 = vld [vmem:[#allocation2 + $0x48] sm:$0xff]  ;;  %v6439_v36 = vpop.eup %6438 }
 0x354   :  { %v1501_v52 = vsel %vm849_vm2, %v1498_v60, %v1500_v32  ;;  %v1503_v29 = vsel %vm849_vm2, %v1500_v32, %v1502_v43  ;;  %v1425_v50 = vrot.slane %v8415_v31, 2  ;;  %v1427_v37 = vrot.slane %v8417_v12, 2 }
 0x355   :  { %v1422_v61 = vsel %vm749_vm1, %v1419_v45, %v1421_v8  ;;  %v1424_v16 = vsel %vm749_vm1, %v1421_v8, %v1423_v48  ;;  %v1346_v11 = vrot.slane %v8415_v31, 1  ;;  %v1348_v59 = vrot.slane %v8417_v12, 1  ;;  %v8453_v8 = vld [vmem:[#allocation2 + $0x50] sm:$0xff] }
 0x356   :  { %6442 = vpow2.f32 %v1239_v38  ;;  %v6154_v54 = vpack.i.bf16 %v1503_v29, %v1501_v52  ;;  %v1350_v60 = vrot.slane %v8427_v14, 1  ;;  %v6149_v42 = vpack.i.bf16 %v1424_v16, %v1422_v61 }
 0x357   :  { %6145 = vrot.lane.b32.xlu1 %v6144_v46, %s7362_s24  ;;  %6140 = vrot.lane.b32.xlu0 %v6139_v33, %s7363_s17  ;;  %v1426_v45 = vsel %vm749_vm1, %v1423_v48, %v1425_v50  ;;  %v1428_v20 = vsel %vm749_vm1, %v1425_v50, %v1427_v37  ;;  %v1352_v41 = vrot.slane %v8433_v19, 1  ;;  %v1347_v23 = vsel %vm649_vm0, %v1344_v4, %v1346_v11  ;;  %v6441_v48 = vpop.eup %6440 }
 0x358   :  { %v1349_v49 = vsel %vm649_vm0, %v1346_v11, %v1348_v59  ;;  %v1504_v28 = vrot.slane %v8415_v31, 3  ;;  %v1506_v21 = vrot.slane %v8417_v12, 3  ;;  %v1508_v7 = vrot.slane %v8427_v14, 3  ;;  %v8465_v11 = vld [vmem:[#allocation2 + $0x58] sm:$0xff] }
 0x359   :  { %v1510_v1 = vrot.slane %v8433_v19, 3  ;;  %v6164_v58 = vpack.i.bf16 %v1428_v20, %v1426_v45  ;;  %v6159_v47 = vpack.i.bf16 %v1349_v49, %v1347_v23  ;;  %v1351_v4 = vsel %vm649_vm0, %v1348_v59, %v1350_v60  ;;  %v8467_v59 = vld [vmem:[#allocation2 + $0x60] sm:$0xff]  ;;  %v466_v23 = vld [vmem:[%s10686_s21 + $0x90] sm:$0xff]  ;;  %v467_v49 = vld [vmem:[%s10686_s21 + $0x98] sm:$0xff] }
 0x35a   :  { %v1353_v32 = vsel %vm649_vm0, %v1350_v60, %v1352_v41  ;;  %v1505_v38 = vsel %vm849_vm2, %v1502_v43, %v1504_v28  ;;  %v1507_v46 = vsel %vm849_vm2, %v1504_v28, %v1506_v21  ;;  %v1429_v33 = vrot.slane %v8427_v14, 2 }
 0x35b   :  { %6155 = vrot.lane.b32.xlu1 %v6154_v54, %s7363_s17  ;;  %6150 = vrot.lane.b32.xlu0 %v6149_v42, %s7361_s9  ;;  %v1431_v52 = vrot.slane %v8433_v19, 2  ;;  %v1509_v29 = vsel %vm849_vm2, %v1506_v21, %v1508_v7  ;;  %v1511_v50 = vsel %vm849_vm2, %v1508_v7, %v1510_v1  ;;  %v1433_v61 = vrot.slane %v8449_v10, 2 }
 0x35c   :  { %v6174_v16 = vpack.i.bf16 %v1353_v32, %v1351_v4  ;;  %v1435_v43 = vrot.slane %v8453_v8, 2  ;;  %v6169_v60 = vpack.i.bf16 %v1507_v46, %v1505_v38  ;;  %v1354_v42 = vrot.slane %v8449_v10, 1 }
 0x35d   :  { %v1356_v45 = vrot.slane %v8453_v8, 1  ;;  %v1254_v20 = vadd.f32 1.0, %v6439_v36  ;;  %v6184_v28 = vpack.i.bf16 %v1511_v50, %v1509_v29  ;;  %v1430_v21 = vsel %vm749_vm1, %v1427_v37, %v1429_v33 }
 0x35e   :  { %v1432_v7 = vsel %vm749_vm1, %v1429_v33, %v1431_v52  ;;  %v1358_v4 = vrot.slane %v8465_v11, 1  ;;  %v1360_v32 = vrot.slane %v8467_v59, 1  ;;  %v1436_v36 = vsel %vm749_vm1, %v1433_v61, %v1435_v43 }
 0x35f   :  { %6165 = vrot.lane.b32.xlu1 %v6164_v58, %s7361_s9  ;;  %6160 = vrot.lane.b32.xlu0 %v6159_v47, %s7362_s24  ;;  %v1255_v58 = vadd.f32 1.0, %v6441_v48  ;;  %v1434_v47 = vsel %vm749_vm1, %v1431_v52, %v1433_v61  ;;  %6444 = vrcp.f32 %v1254_v20  ;;  %v5915_v46 = vpack.c.bf16 %v467_v49, %v466_v23 }
 0x360   :  { %v6443_v54 = vpop.eup %6442  ;;  %v6179_v37 = vpack.i.bf16 %v1432_v7, %v1430_v21  ;;  %v1355_v33 = vsel %vm649_vm0, %v1352_v41, %v1354_v42  ;;  %v1357_v48 = vsel %vm649_vm0, %v1354_v42, %v1356_v45  ;;  %v1512_v29 = vrot.slane %v8449_v10, 3 }
 0x361   :  { %6446 = vrcp.f32 %v1255_v58  ;;  %v1256_v38 = vadd.f32 1.0, %v6443_v54  ;;  %v1514_v50 = vrot.slane %v8453_v8, 3  ;;  %5916 = vmatpush1.bf16.msra.mxu0 %v5915_v46  ;;  %v6194_v52 = vpack.i.bf16 %v1436_v36, %v1434_v47 }
 0x362   :  { %v6189_v61 = vpack.i.bf16 %v1357_v48, %v1355_v33  ;;  %5947 = vmatprep.subr.bf16.mxu0 %v7360_v18  ;;  %v1361_v41 = vsel %vm649_vm0, %v1358_v4, %v1360_v32  ;;  %v1513_v54 = vsel %vm849_vm2, %v1510_v1, %v1512_v29  ;;  %v1518_v20 = vrot.slane %v8467_v59, 3 }
 0x363   :  { %6175 = vrot.lane.b32.xlu1 %v6174_v16, %s7362_s24  ;;  %6170 = vrot.lane.b32.xlu0 %v6169_v60, %s7363_s17  ;;  %6448 = vrcp.f32 %v1256_v38  ;;  %v1359_v16 = vsel %vm649_vm0, %v1356_v45, %v1358_v4  ;;  %v1516_v60 = vrot.slane %v8465_v11, 3  ;;  %v1515_v42 = vsel %vm849_vm2, %v1512_v29, %v1514_v50 }
 0x364   :  { %v1437_v23 = vrot.slane %v8465_v11, 2  ;;  %v1439_v49 = vrot.slane %v8467_v59, 2  ;;  %v6204_v45 = vpack.i.bf16 %v1361_v41, %v1359_v16  ;;  %v6199_v21 = vpack.i.bf16 %v1515_v42, %v1513_v54 }
 0x365   :  { %v1517_v7 = vsel %vm849_vm2, %v1514_v50, %v1516_v60  ;;  %v1519_v58 = vsel %vm849_vm2, %v1516_v60, %v1518_v20 }
 0x366   :  { %v1438_v47 = vsel %vm749_vm1, %v1435_v43, %v1437_v23  ;;  %v1440_v4 = vsel %vm749_vm1, %v1437_v23, %v1439_v49 }
 0x367   :  { %6185 = vrot.lane.b32.xlu1 %v6184_v28, %s7363_s17  ;;  %6180 = vrot.lane.b32.xlu0 %v6179_v37, %s7361_s9  ;;  %v6214_v37 = vpack.i.bf16 %v1519_v58, %v1517_v7  ;;  %v6209_v33 = vpack.i.bf16 %v1440_v4, %v1438_v47 }
 0x369   :  { %v6445_v28 = vpop.eup %6444 }
 0x36a   :  { %v1286_v36 = vmul.f32 %v6445_v28, %v8340_v22 }
 0x36b   :  { %6195 = vrot.lane.b32.xlu1 %v6194_v52, %s7361_s9  ;;  %6190 = vrot.lane.b32.xlu0 %v6189_v61, %s7362_s24  ;;  %v6447_v1 = vpop.eup %6446 }
 0x36c   :  { %v1287_v38 = vmul.f32 %v6447_v1, %v8345_v17  ;;  %1302 = vst.msk [vmem:[#allocation2 + $0x6c] sm:$0xff] %vm1051_vm4, %v1286_v36 }
 0x36d   :  { %v6449_v46 = vpop.eup %6448 }
 0x36e   :  { %1303 = vst.msk [vmem:[#allocation2 + $0x74] sm:$0xff] %vm1051_vm4, %v1287_v38  ;;  %v1288_v48 = vmul.f32 %v6449_v46, %v8362_v26 }
 0x36f   :  { %6205 = vrot.lane.b32.xlu1 %v6204_v45, %s7362_s24  ;;  %6200 = vrot.lane.b32.xlu0 %v6199_v21, %s7363_s17 }
 0x370   :  { %1304 = vst.msk [vmem:[#allocation2 + $0x7c] sm:$0xf] %vm494_vm5, %v1288_v48 }
 0x373   :  { %6215 = vrot.lane.b32.xlu1 %v6214_v37, %s7363_s17  ;;  %6210 = vrot.lane.b32.xlu0 %v6209_v33, %s7361_s9  ;;  %v8512_v22 = vld [vmem:[#allocation2 + $0x68] sm:$0xff] }
 0x374   :  { %v1441_v17 = vrot.slane %v8512_v22, 2  ;;  %v1362_v29 = vrot.slane %v8512_v22, 1  ;;  %v1520_v26 = vrot.slane %v8512_v22, 3 }
 0x375   :  { %v8514_v43 = vld [vmem:[#allocation2 + $0x70] sm:$0xff] }
 0x376   :  { %v1443_v50 = vrot.slane %v8514_v43, 2  ;;  %v1364_v52 = vrot.slane %v8514_v43, 1  ;;  %v1522_v61 = vrot.slane %v8514_v43, 3  ;;  %v1442_v16 = vsel %vm749_vm1, %v1439_v49, %v1441_v17 }
 0x377   :  { %v1363_v41 = vsel %vm649_vm0, %v1360_v32, %v1362_v29  ;;  %v8524_v54 = vld [vmem:[#allocation2 + $0x78] sm:$0xff]  ;;  %v1521_v21 = vsel %vm849_vm2, %v1518_v20, %v1520_v26 }
 0x378   :  { %v1444_v60 = vsel %vm749_vm1, %v1441_v17, %v1443_v50  ;;  %v1365_v42 = vsel %vm649_vm0, %v1362_v29, %v1364_v52  ;;  %v1366_v45 = vrot.slane %v8524_v54, 1  ;;  %v1523_v7 = vsel %vm849_vm2, %v1520_v26, %v1522_v61 }
 0x379   :  { %v6224_v23 = vpack.i.bf16 %v1444_v60, %v1442_v16  ;;  %v6219_v28 = vpack.i.bf16 %v1365_v42, %v1363_v41  ;;  %v6229_v49 = vpack.i.bf16 %v1523_v7, %v1521_v21  ;;  %v1524_v1 = vrot.slane %v8524_v54, 3 }
 0x37a   :  { %v1367_v32 = vsel %vm649_vm0, %v1364_v52, %v1366_v45  ;;  %v1445_v58 = vrot.slane %v8524_v54, 2  ;;  %v1577_v29 = vrot.slane %v8384_v6, 4 }
 0x37b   :  { %6225 = vrot.lane.b32.xlu1 %v6224_v23, %s7361_s9  ;;  %6220 = vrot.lane.b32.xlu0 %v6219_v28, %s7362_s24  ;;  %v1525_v47 = vsel %vm849_vm2, %v1522_v61, %v1524_v1  ;;  %v1579_v28 = vrot.slane %v8392_v27, 4 }
 0x37c   :  { %v1446_v20 = vsel %vm749_vm1, %v1443_v50, %v1445_v58 }
 0x37f   :  { %1396 = vrot.lane.b32.xlu1 %v1367_v32, %s7362_s24  ;;  %6230 = vrot.lane.b32.xlu0 %v6229_v49, %s7363_s17 }
 0x383   :  { %1554 = vrot.lane.b32.xlu1 %v1525_v47, %s7363_s17  ;;  %1475 = vrot.lane.b32.xlu0 %v1446_v20, %s7361_s9 }
 0x387   :  { %1477 = vrot.lane.b32.xlu1 %v1445_v58, %s7361_s9  ;;  %1398 = vrot.lane.b32.xlu0 %v1366_v45, %s7362_s24 }
 0x38b   :  { %1556 = vrot.lane.b32.xlu0 %v1524_v1, %s7363_s17 }
 0x3c5   :  { %v6136_v4 = vpop.permute.xlu1 %6135  ;;  %v6131_v36 = vpop.permute.xlu0 %6130 }
 0x3c6   :  { %v6132_v38 = vunpack.i.l.bf16 %v6131_v36  ;;  %v6137_v46 = vunpack.i.l.bf16 %v6136_v4  ;;  %v6133_v37 = vunpack.i.h.bf16 %v6131_v36  ;;  %v6138_v52 = vunpack.i.h.bf16 %v6136_v4 }
 0x3c7   :  { %v1581_v4 = vrot.slane %v8401_v15, 4 }
 0x3c8   :  { %v1605_v33 = vsel %vm1051_vm4, %v8371_v53, %v6132_v38  ;;  %v1606_v60 = vsel %vm1051_vm4, %v8376_v39, %v6133_v37  ;;  %v1578_v53 = vsel %vm949_vm3, %v1575_v25, %v1577_v29  ;;  %v1580_v39 = vsel %vm949_vm3, %v1577_v29, %v1579_v28 }
 0x3c9   :  { %v6146_v48 = vpop.permute.xlu1 %6145  ;;  %v6141_v17 = vpop.permute.xlu0 %6140  ;;  %v1622_v26 = vsel %vm1621_vm6, %v1605_v33, %v6137_v46  ;;  %v1623_v21 = vsel %vm1621_vm6, %v1606_v60, %v6138_v52  ;;  %v1583_v29 = vrot.slane %v8415_v31, 4  ;;  %v1585_v60 = vrot.slane %v8417_v12, 4 }
 0x3ca   :  { %v6142_v50 = vunpack.i.l.bf16 %v6141_v17  ;;  %v6147_v61 = vunpack.i.l.bf16 %v6146_v48  ;;  %v6143_v16 = vunpack.i.h.bf16 %v6141_v17  ;;  %v6148_v7 = vunpack.i.h.bf16 %v6146_v48 }
 0x3cb   :  { %v1582_v48 = vsel %vm949_vm3, %v1579_v28, %v1581_v4 }
 0x3cc   :  { %v1639_v41 = vsel %vm1638_vm7, %v1622_v26, %v6142_v50  ;;  %v1640_v32 = vsel %vm1638_vm7, %v1623_v21, %v6143_v16  ;;  %v1607_v1 = vsel %vm1051_vm4, %v8384_v6, %v6147_v61  ;;  %v1608_v37 = vsel %vm1051_vm4, %v8392_v27, %v6148_v7 }
 0x3cd   :  { %v6156_v42 = vpop.permute.xlu1 %6155  ;;  %v6151_v23 = vpop.permute.xlu0 %6150  ;;  %1758 = vmatmul.mubr.f32.vlgmr.msra.gmra.mrb[0].mxu0 %v1639_v41  ;;  %v1584_v41 = vsel %vm949_vm3, %v1581_v4, %v1583_v29 }
 0x3ce   :  { %v6152_v45 = vunpack.i.l.bf16 %v6151_v23  ;;  %5614 = vmatprep.mubr.msk.f32.mxu0 %vm1051_vm4, %v1578_v53  ;;  %v6157_v49 = vunpack.i.l.bf16 %v6156_v42  ;;  %v6153_v58 = vunpack.i.h.bf16 %v6151_v23  ;;  %v6158_v36 = vunpack.i.h.bf16 %v6156_v42 }
 0x3d0   :  { %v1624_v25 = vsel %vm1621_vm6, %v1607_v1, %v6152_v45  ;;  %v1625_v17 = vsel %vm1621_vm6, %v1608_v37, %v6153_v58 }
 0x3d1   :  { %v6166_v47 = vpop.permute.xlu1 %6165  ;;  %v6161_v20 = vpop.permute.xlu0 %6160  ;;  %1763 = vmatmul.mubr.f32.gmra.mrb[2].mxu0 %v1640_v32  ;;  %v1641_v46 = vsel %vm1638_vm7, %v1624_v25, %v6157_v49  ;;  %v1642_v61 = vsel %vm1638_vm7, %v1625_v17, %v6158_v36  ;;  %v1586_v49 = vsel %vm949_vm3, %v1583_v29, %v1585_v60  ;;  %v1587_v32 = vrot.slane %v8427_v14, 4 }
 0x3d2   :  { %5615 = vmatprep.mubr.msk.f32.mxu0 %vm1051_vm4, %v1580_v39  ;;  %v6162_v38 = vunpack.i.l.bf16 %v6161_v20  ;;  %v6167_v50 = vunpack.i.l.bf16 %v6166_v47  ;;  %v6163_v52 = vunpack.i.h.bf16 %v6161_v20  ;;  %v6168_v23 = vunpack.i.h.bf16 %v6166_v47 }
 0x3d3   :  { %v1588_v36 = vsel %vm949_vm3, %v1585_v60, %v1587_v32  ;;  %v1593_v60 = vrot.slane %v8453_v8, 4 }
 0x3d4   :  { %v1609_v16 = vsel %vm1051_vm4, %v8401_v15, %v6162_v38  ;;  %v1610_v7 = vsel %vm1051_vm4, %v8415_v31, %v6163_v52 }
 0x3d5   :  { %v6176_v6 = vpop.permute.xlu1 %6175  ;;  %v6171_v33 = vpop.permute.xlu0 %6170  ;;  %1768 = vmatmul.mubr.f32.gmra.mrb[4].mxu0 %v1641_v46  ;;  %v1626_v53 = vsel %vm1621_vm6, %v1609_v16, %v6167_v50  ;;  %v1627_v58 = vsel %vm1621_vm6, %v1610_v7, %v6168_v23  ;;  %v1589_v46 = vrot.slane %v8433_v19, 4  ;;  %v1591_v50 = vrot.slane %v8449_v10, 4 }
 0x3d6   :  { %5616 = vmatprep.mubr.msk.f32.mxu0 %vm1051_vm4, %v1582_v48  ;;  %v6172_v26 = vunpack.i.l.bf16 %v6171_v33  ;;  %v6177_v28 = vunpack.i.l.bf16 %v6176_v6  ;;  %v6173_v45 = vunpack.i.h.bf16 %v6171_v33  ;;  %v6178_v47 = vunpack.i.h.bf16 %v6176_v6 }
 0x3d8   :  { %v1643_v21 = vsel %vm1638_vm7, %v1626_v53, %v6172_v26  ;;  %v1644_v25 = vsel %vm1638_vm7, %v1627_v58, %v6173_v45  ;;  %v1611_v4 = vsel %vm1051_vm4, %v8417_v12, %v6177_v28  ;;  %v1612_v17 = vsel %vm1051_vm4, %v8427_v14, %v6178_v47 }
 0x3d9   :  { %v6181_v27 = vpop.permute.xlu0 %6180  ;;  %1773 = vmatmul.mubr.f32.gmra.mrb[6].mxu0 %v1642_v61  ;;  %v6186_v42 = vpop.permute.xlu1 %6185  ;;  %v1590_v12 = vsel %vm949_vm3, %v1587_v32, %v1589_v46  ;;  %v1592_v14 = vsel %vm949_vm3, %v1589_v46, %v1591_v50  ;;  %v1595_v32 = vrot.slane %v8465_v11, 4 }
 0x3da   :  { %5617 = vmatprep.mubr.msk.f32.mxu0 %vm1051_vm4, %v1584_v41  ;;  %v6182_v15 = vunpack.i.l.bf16 %v6181_v27  ;;  %v6187_v20 = vunpack.i.l.bf16 %v6186_v42  ;;  %v6183_v31 = vunpack.i.h.bf16 %v6181_v27  ;;  %v6188_v37 = vunpack.i.h.bf16 %v6186_v42 }
 0x3dc   :  { %v1628_v38 = vsel %vm1621_vm6, %v1611_v4, %v6182_v15  ;;  %v1629_v29 = vsel %vm1621_vm6, %v1612_v17, %v6183_v31 }
 0x3dd   :  { %1778 = vmatmul.mubr.f32.gmra.mrb[8].mxu0 %v1643_v21  ;;  %v6191_v1 = vpop.permute.xlu0 %6190  ;;  %v6196_v39 = vpop.permute.xlu1 %6195  ;;  %v1645_v48 = vsel %vm1638_vm7, %v1628_v38, %v6187_v20  ;;  %v1646_v27 = vsel %vm1638_vm7, %v1629_v29, %v6188_v37 }
 0x3de   :  { %5618 = vmatprep.mubr.msk.f32.mxu0 %vm1051_vm4, %v1586_v49  ;;  %v6192_v33 = vunpack.i.l.bf16 %v6191_v1  ;;  %v6197_v26 = vunpack.i.l.bf16 %v6196_v39  ;;  %v6193_v61 = vunpack.i.h.bf16 %v6191_v1  ;;  %v6198_v23 = vunpack.i.h.bf16 %v6196_v39 }
 0x3df   :  { %v1594_v49 = vsel %vm949_vm3, %v1591_v50, %v1593_v60 }
 0x3e0   :  { %v1613_v41 = vsel %vm1051_vm4, %v8433_v19, %v6192_v33  ;;  %v1614_v15 = vsel %vm1051_vm4, %v8449_v10, %v6193_v61  ;;  %v1596_v10 = vsel %vm949_vm3, %v1593_v60, %v1595_v32 }
 0x3e1   :  { %1783 = vmatmul.mubr.f32.gmra.mrb[10].mxu0 %v1644_v25  ;;  %v6201_v6 = vpop.permute.xlu0 %6200  ;;  %v6206_v52 = vpop.permute.xlu1 %6205  ;;  %v1630_v53 = vsel %vm1621_vm6, %v1613_v41, %v6197_v26  ;;  %v1631_v1 = vsel %vm1621_vm6, %v1614_v15, %v6198_v23  ;;  %v1601_v41 = vrot.slane %v8514_v43, 4 }
 0x3e2   :  { %5619 = vmatprep.mubr.msk.f32.mxu0 %vm1051_vm4, %v1588_v36  ;;  %v6202_v16 = vunpack.i.l.bf16 %v6201_v6  ;;  %v6207_v28 = vunpack.i.l.bf16 %v6206_v52  ;;  %v6203_v45 = vunpack.i.h.bf16 %v6201_v6  ;;  %v6208_v58 = vunpack.i.h.bf16 %v6206_v52 }
 0x3e3   :  { %v1597_v36 = vrot.slane %v8467_v59, 4 }
 0x3e4   :  { %v1647_v7 = vsel %vm1638_vm7, %v1630_v53, %v6202_v16  ;;  %v1648_v39 = vsel %vm1638_vm7, %v1631_v1, %v6203_v45  ;;  %v1615_v25 = vsel %vm1051_vm4, %v8453_v8, %v6207_v28  ;;  %v1603_v28 = vrot.slane %v8524_v54, 4 }
 0x3e5   :  { %1788 = vmatmul.mubr.f32.gmra.mrb[12].mxu0 %v1645_v48  ;;  %v6211_v42 = vpop.permute.xlu0 %6210  ;;  %v6216_v21 = vpop.permute.xlu1 %6215  ;;  %v1616_v48 = vsel %vm1051_vm4, %v8465_v11, %v6208_v58  ;;  %v1598_v8 = vsel %vm949_vm3, %v1595_v32, %v1597_v36 }
 0x3e6   :  { %5620 = vmatprep.mubr.msk.f32.mxu0 %vm1051_vm4, %v1590_v12  ;;  %v6212_v19 = vunpack.i.l.bf16 %v6211_v42  ;;  %v6217_v47 = vunpack.i.l.bf16 %v6216_v21  ;;  %v6213_v4 = vunpack.i.h.bf16 %v6211_v42  ;;  %v6218_v46 = vunpack.i.h.bf16 %v6216_v21 }
 0x3e7   :  { %v1599_v12 = vrot.slane %v8512_v22, 4 }
 0x3e8   :  { %v1632_v31 = vsel %vm1621_vm6, %v1615_v25, %v6212_v19  ;;  %v1633_v17 = vsel %vm1621_vm6, %v1616_v48, %v6213_v4 }
 0x3e9   :  { %1793 = vmatmul.mubr.f32.gmra.mrb[14].mxu0 %v1646_v27  ;;  %v1649_v6 = vsel %vm1638_vm7, %v1632_v31, %v6217_v47  ;;  %v1650_v61 = vsel %vm1638_vm7, %v1633_v17, %v6218_v46  ;;  %v1600_v11 = vsel %vm949_vm3, %v1597_v36, %v1599_v12 }
 0x3ea   :  { %5621 = vmatprep.mubr.msk.f32.mxu0 %vm1051_vm4, %v1592_v14 }
 0x3ed   :  { %1798 = vmatmul.mubr.f32.gmra.mrb[16].mxu0 %v1647_v7  ;;  %v6221_v20 = vpop.permute.xlu0 %6220  ;;  %v6226_v38 = vpop.permute.xlu1 %6225 }
 0x3ee   :  { %5622 = vmatprep.mubr.msk.f32.mxu0 %vm1051_vm4, %v1594_v49  ;;  %v6222_v37 = vunpack.i.l.bf16 %v6221_v20  ;;  %v6227_v29 = vunpack.i.l.bf16 %v6226_v38  ;;  %v6223_v50 = vunpack.i.h.bf16 %v6221_v20  ;;  %v6228_v14 = vunpack.i.h.bf16 %v6226_v38 }
 0x3f0   :  { %v1617_v16 = vsel %vm1051_vm4, %v8467_v59, %v6222_v37  ;;  %v1618_v53 = vsel %vm1051_vm4, %v8512_v22, %v6223_v50  ;;  %v1602_v59 = vsel %vm949_vm3, %v1599_v12, %v1601_v41  ;;  %v1604_v22 = vsel %vm949_vm3, %v1601_v41, %v1603_v28 }
 0x3f1   :  { %1803 = vmatmul.mubr.f32.gmra.mrb[18].mxu0 %v1648_v39  ;;  %v6231_v33 = vpop.permute.xlu0 %6230  ;;  %v1397_v52 = vpop.permute.xlu1 %1396  ;;  %v1634_v60 = vsel %vm1621_vm6, %v1617_v16, %v6227_v29  ;;  %v1635_v7 = vsel %vm1621_vm6, %v1618_v53, %v6228_v14  ;;  %v8654_v39 = vld [vmem:[#allocation11] ss:$0 sm:$0xff] }
 0x3f2   :  { %5623 = vmatprep.mubr.msk.f32.mxu0 %vm1051_vm4, %v1596_v10  ;;  %v6232_v26 = vunpack.i.l.bf16 %v6231_v33  ;;  %v6233_v42 = vunpack.i.h.bf16 %v6231_v33  ;;  %v1619_v15 = vsel %vm1051_vm4, %v8514_v43, %v1397_v52 }
 0x3f4   :  { %v1651_v23 = vsel %vm1638_vm7, %v1634_v60, %v6232_v26  ;;  %v1652_v19 = vsel %vm1638_vm7, %v1635_v7, %v6233_v42 }
 0x3f5   :  { %1808 = vmatmul.mubr.f32.gmra.mrb[20].mxu0 %v1649_v6  ;;  %v1476_v27 = vpop.permute.xlu0 %1475  ;;  %v1555_v45 = vpop.permute.xlu1 %1554 }
 0x3f6   :  { %5624 = vmatprep.mubr.msk.f32.mxu0 %vm1051_vm4, %v1598_v8  ;;  %v1636_v49 = vsel %vm1621_vm6, %v1619_v15, %v1476_v27 }
 0x3f7   :  { %v1653_v58 = vsel %vm1638_vm7, %v1636_v49, %v1555_v45 }
 0x3f9   :  { %1813 = vmatmul.mubr.f32.gmra.mrb[22].mxu0 %v1650_v61  ;;  %v1399_v21 = vpop.permute.xlu0 %1398  ;;  %v1478_v32 = vpop.permute.xlu1 %1477 }
 0x3fa   :  { %5625 = vmatprep.mubr.msk.f32.mxu0 %vm1051_vm4, %v1600_v11  ;;  %v1620_v1 = vsel %vm1051_vm4, %v8524_v54, %v1399_v21 }
 0x3fb   :  { %v1637_v43 = vsel %vm1621_vm6, %v1620_v1, %v1478_v32 }
 0x3fd   :  { %1818 = vmatmul.mubr.f32.gmra.mrb[24].mxu0 %v1651_v23  ;;  %v1557_v47 = vpop.permute.xlu0 %1556 }
 0x3fe   :  { %5626 = vmatprep.mubr.msk.f32.mxu0 %vm1051_vm4, %v1602_v59  ;;  %v1654_v20 = vsel %vm1638_vm7, %v1637_v43, %v1557_v47 }
 0x401   :  { %1823 = vmatmul.mubr.f32.gmra.mrb[26].mxu0 %v1652_v19 }
 0x402   :  { %5627 = vmatprep.mubr.msk.f32.mxu0 %vm1051_vm4, %v1604_v22 }
 0x405   :  { %1828 = vmatmul.mubr.f32.gmra.mrb[28].mxu0 %v1653_v58 }
 0x406   :  { %5628 = vmatprep.mubr.msk.f32.mxu0 %vm1051_vm4, %v1603_v28 }
 0x409   :  { %1833 = vmatmul.mubr.f32.gmra.mrb[30].mxu0 %v1654_v20 }
 0x4a0   :  { %v1759_v25 = vpop.f32.mrb[0].mxu0 }
 0x4a1   :  { %v8657_v4 = vadd.f32 %v8654_v39, %v1759_v25  ;;  %v1761_v10 = vpop.f32.mrb[1].mxu0 }
 0x4a3   :  { %v1838_v54 = vmul.f32 %v8657_v4, %v8657_v4  ;;  %v1854_v46 = vsel %vm1051_vm4, %v8657_v4, 0.0 }
 0x4a4   :  { %v1764_v31 = vpop.f32.mrb[2].mxu0 }
 0x4a5   :  { %v8662_v36 = vadd.f32 %v8654_v39, %v1764_v31  ;;  %v1766_v38 = vpop.f32.mrb[3].mxu0  ;;  %v1876_v8 = vsel %vm1051_vm4, %v1838_v54, 0.0 }
 0x4a7   :  { %v1839_v37 = vmul.f32 %v8662_v36, %v8662_v36  ;;  %v1855_v33 = vsel %vm1051_vm4, %v8662_v36, 0.0 }
 0x4a8   :  { %v1856_v6 = vadd.f32 %v1855_v33, %v1854_v46  ;;  %v1769_v48 = vpop.f32.mrb[4].mxu0 }
 0x4a9   :  { %v1877_v17 = vsel %vm1051_vm4, %v1839_v37, 0.0  ;;  %v8673_v12 = vadd.f32 %v8654_v39, %v1769_v48  ;;  %v1771_v29 = vpop.f32.mrb[5].mxu0 }
 0x4aa   :  { %v1878_v50 = vadd.f32 %v1877_v17, %v1876_v8 }
 0x4ab   :  { %v1840_v52 = vmul.f32 %v8673_v12, %v8673_v12  ;;  %v1857_v26 = vsel %vm1051_vm4, %v8673_v12, 0.0 }
 0x4ac   :  { %v1858_v61 = vadd.f32 %v1857_v26, %v1856_v6  ;;  %v1774_v16 = vpop.f32.mrb[6].mxu0 }
 0x4ad   :  { %v1879_v27 = vsel %vm1051_vm4, %v1840_v52, 0.0  ;;  %v8681_v11 = vadd.f32 %v8654_v39, %v1774_v16  ;;  %v1776_v41 = vpop.f32.mrb[7].mxu0 }
 0x4ae   :  { %v1880_v14 = vadd.f32 %v1879_v27, %v1878_v50 }
 0x4af   :  { %v1841_v60 = vmul.f32 %v8681_v11, %v8681_v11  ;;  %v1859_v42 = vsel %vm1051_vm4, %v8681_v11, 0.0 }
 0x4b0   :  { %v1860_v23 = vadd.f32 %v1859_v42, %v1858_v61  ;;  %v1779_v53 = vpop.f32.mrb[8].mxu0 }
 0x4b1   :  { %v1881_v59 = vsel %vm1051_vm4, %v1841_v60, 0.0  ;;  %v8689_v28 = vadd.f32 %v8654_v39, %v1779_v53  ;;  %v1781_v45 = vpop.f32.mrb[9].mxu0 }
 0x4b2   :  { %v1882_v21 = vadd.f32 %v1881_v59, %v1880_v14 }
 0x4b3   :  { %v1842_v7 = vmul.f32 %v8689_v28, %v8689_v28  ;;  %v1861_v15 = vsel %vm1051_vm4, %v8689_v28, 0.0 }
 0x4b4   :  { %v1862_v19 = vadd.f32 %v1861_v15, %v1860_v23  ;;  %v1784_v49 = vpop.f32.mrb[10].mxu0 }
 0x4b5   :  { %v1883_v22 = vsel %vm1051_vm4, %v1842_v7, 0.0  ;;  %v8697_v32 = vadd.f32 %v8654_v39, %v1784_v49  ;;  %v1786_v1 = vpop.f32.mrb[11].mxu0 }
 0x4b6   :  { %v1884_v58 = vadd.f32 %v1883_v22, %v1882_v21 }
 0x4b7   :  { %v1843_v47 = vmul.f32 %v8697_v32, %v8697_v32  ;;  %v1863_v43 = vsel %vm1051_vm4, %v8697_v32, 0.0 }
 0x4b8   :  { %v1864_v20 = vadd.f32 %v1863_v43, %v1862_v19  ;;  %v1789_v25 = vpop.f32.mrb[12].mxu0 }
 0x4b9   :  { %v1885_v10 = vsel %vm1051_vm4, %v1843_v47, 0.0  ;;  %v8705_v31 = vadd.f32 %v8654_v39, %v1789_v25  ;;  %v1791_v54 = vpop.f32.mrb[13].mxu0 }
 0x4ba   :  { %v1886_v38 = vadd.f32 %v1885_v10, %v1884_v58 }
 0x4bb   :  { %v1844_v46 = vmul.f32 %v8705_v31, %v8705_v31  ;;  %v1865_v37 = vsel %vm1051_vm4, %v8705_v31, 0.0 }
 0x4bc   :  { %v1866_v33 = vadd.f32 %v1865_v37, %v1864_v20  ;;  %v1794_v6 = vpop.f32.mrb[14].mxu0 }
 0x4bd   :  { %v1887_v48 = vsel %vm1051_vm4, %v1844_v46, 0.0  ;;  %v8713_v8 = vadd.f32 %v8654_v39, %v1794_v6  ;;  %v1796_v17 = vpop.f32.mrb[15].mxu0 }
 0x4be   :  { %v1888_v29 = vadd.f32 %v1887_v48, %v1886_v38 }
 0x4bf   :  { %v1845_v50 = vmul.f32 %v8713_v8, %v8713_v8  ;;  %v1867_v52 = vsel %vm494_vm5, %v8713_v8, 0.0 }
 0x4c0   :  { %v1868_v26 = vadd.f32 %v1867_v52, %v1866_v33  ;;  %v1799_v61 = vpop.f32.mrb[16].mxu0 }
 0x4c1   :  { %v1889_v16 = vsel %vm494_vm5, %v1845_v50, 0.0  ;;  %v1801_v27 = vpop.f32.mrb[17].mxu0  ;;  %v8724_v23 = vadd.f32 %v8654_v39, %v1799_v61 }
 0x4c2   :  { %v1890_v41 = vadd.f32 %v1889_v16, %v1888_v29 }
 0x4c3   :  { %v1846_v7 = vmul.f32 %v8724_v23, %v8724_v23  ;;  %v1898_v22 = vsel %vm1051_vm4, %v8724_v23, 0.0 }
 0x4c4   :  { %v1804_v14 = vpop.f32.mrb[18].mxu0 }
 0x4c5   :  { %v8721_v60 = vadd.f32 %v8654_v39, %v1804_v14  ;;  %v1806_v42 = vpop.f32.mrb[19].mxu0  ;;  %v1920_v25 = vsel %vm1051_vm4, %v1846_v7, 0.0 }
 0x4c7   :  { %v1847_v59 = vmul.f32 %v8721_v60, %v8721_v60  ;;  %v1899_v15 = vsel %vm1051_vm4, %v8721_v60, 0.0 }
 0x4c8   :  { %v1809_v53 = vpop.f32.mrb[20].mxu0  ;;  %v1900_v20 = vadd.f32 %v1899_v15, %v1898_v22 }
 0x4c9   :  { %v8729_v45 = vadd.f32 %v8654_v39, %v1809_v53  ;;  %v1811_v21 = vpop.f32.mrb[21].mxu0  ;;  %v1921_v1 = vsel %vm1051_vm4, %v1847_v59, 0.0 }
 0x4ca   :  { %v1922_v46 = vadd.f32 %v1921_v1, %v1920_v25 }
 0x4cb   :  { %v1848_v19 = vmul.f32 %v8729_v45, %v8729_v45  ;;  %v1901_v58 = vsel %vm1051_vm4, %v8729_v45, 0.0 }
 0x4cc   :  { %v1814_v49 = vpop.f32.mrb[22].mxu0  ;;  %v1902_v37 = vadd.f32 %v1901_v58, %v1900_v20  ;;  %v1891_v20 = vrot.slane %v1890_v41, 4 }
 0x4cd   :  { %v8743_v47 = vadd.f32 %v8654_v39, %v1814_v49  ;;  %v1816_v43 = vpop.f32.mrb[23].mxu0  ;;  %v1923_v10 = vsel %vm1051_vm4, %v1848_v19, 0.0  ;;  %v1869_v19 = vrot.slane %v1868_v26, 4 }
 0x4ce   :  { %v1924_v29 = vadd.f32 %v1923_v10, %v1922_v46 }
 0x4cf   :  { %v1849_v54 = vmul.f32 %v8743_v47, %v8743_v47  ;;  %v1903_v38 = vsel %vm1051_vm4, %v8743_v47, 0.0 }
 0x4d0   :  { %v1819_v33 = vpop.f32.mrb[24].mxu0  ;;  %v1904_v50 = vadd.f32 %v1903_v38, %v1902_v37  ;;  %v1870_v38 = vadd.f32 %v1869_v19, %v1868_v26 }
 0x4d1   :  { %v1925_v6 = vsel %vm1051_vm4, %v1849_v54, 0.0  ;;  %v8753_v48 = vadd.f32 %v8654_v39, %v1819_v33  ;;  %v1821_v17 = vpop.f32.mrb[25].mxu0 }
 0x4d2   :  { %v1926_v16 = vadd.f32 %v1925_v6, %v1924_v29  ;;  %v1892_v29 = vadd.f32 %v1891_v20, %v1890_v41 }
 0x4d3   :  { %v1850_v52 = vmul.f32 %v8753_v48, %v8753_v48  ;;  %v1905_v61 = vsel %vm1051_vm4, %v8753_v48, 0.0 }
 0x4d4   :  { %v1906_v27 = vadd.f32 %v1905_v61, %v1904_v50  ;;  %v1824_v14 = vpop.f32.mrb[26].mxu0 }
 0x4d5   :  { %v1927_v42 = vsel %vm1051_vm4, %v1850_v52, 0.0  ;;  %v8761_v53 = vadd.f32 %v8654_v39, %v1824_v14  ;;  %v1826_v59 = vpop.f32.mrb[27].mxu0  ;;  %v1893_v14 = vrot.slane %v1892_v29, 2 }
 0x4d6   :  { %v1928_v21 = vadd.f32 %v1927_v42, %v1926_v16  ;;  %v1871_v16 = vrot.slane %v1870_v38, 2 }
 0x4d7   :  { %v1851_v7 = vmul.f32 %v8761_v53, %v8761_v53  ;;  %v1907_v15 = vsel %vm1051_vm4, %v8761_v53, 0.0 }
 0x4d8   :  { %v1908_v49 = vadd.f32 %v1907_v15, %v1906_v27  ;;  %v1829_v22 = vpop.f32.mrb[28].mxu0  ;;  %v1894_v15 = vadd.f32 %v1893_v14, %v1892_v29  ;;  %v473_v14 = vld [vmem:[%s10687_s16 + $0x10] sm:$0xff] }
 0x4d9   :  { %v1929_v1 = vsel %vm1051_vm4, %v1851_v7, 0.0  ;;  %v8769_v58 = vadd.f32 %v8654_v39, %v1829_v22  ;;  %v1831_v43 = vpop.f32.mrb[29].mxu0 }
 0x4da   :  { %v1930_v25 = vadd.f32 %v1929_v1, %v1928_v21  ;;  %v1872_v21 = vadd.f32 %v1871_v16, %v1870_v38  ;;  %v1895_v43 = vrot.slane %v1894_v15, 1 }
 0x4db   :  { %v1852_v10 = vmul.f32 %v8769_v58, %v8769_v58  ;;  %v1909_v54 = vsel %vm1051_vm4, %v8769_v58, 0.0 }
 0x4dc   :  { %v1910_v46 = vadd.f32 %v1909_v54, %v1908_v49  ;;  %v1834_v37 = vpop.f32.mrb[30].mxu0  ;;  %v1873_v49 = vrot.slane %v1872_v21, 1 }
 0x4dd   :  { %v1931_v33 = vsel %vm1051_vm4, %v1852_v10, 0.0  ;;  %v8777_v6 = vadd.f32 %v8654_v39, %v1834_v37  ;;  %v1836_v17 = vpop.f32.mrb[31].mxu0  ;;  %v1896_v37 = vadd.f32 %v1895_v43, %v1894_v15  ;;  %v476_v15 = vld [vmem:[%s10687_s16 + $0x28] sm:$0xff]  ;;  %v479_v43 = vld [vmem:[%s10687_s16 + $0x40] sm:$0xff] }
 0x4de   :  { %v1932_v50 = vadd.f32 %v1931_v33, %v1930_v25  ;;  %v1874_v10 = vadd.f32 %v1873_v49, %v1872_v21  ;;  %v474_v21 = vld [vmem:[%s10687_s16 + $0x18] sm:$0xff] }
 0x4df   :  { %v1853_v52 = vmul.f32 %v8777_v6, %v8777_v6  ;;  %v1911_v61 = vsel %vm494_vm5, %v8777_v6, 0.0  ;;  %v478_v49 = vld [vmem:[%s10687_s16 + $0x38] sm:$0xff] }
 0x4e0   :  { %v1912_v27 = vadd.f32 %v1911_v61, %v1910_v46 }
 0x4e1   :  { %v1933_v26 = vsel %vm494_vm5, %v1853_v52, 0.0 }
 0x4e2   :  { %v1913_v42 = vrot.slane %v1912_v27, 4  ;;  %v1934_v59 = vadd.f32 %v1933_v26, %v1932_v50  ;;  %v472_v26 = vld [vmem:[%s10687_s16 + $0x8] sm:$0xff] }
 0x4e4   :  { %v1914_v7 = vadd.f32 %v1913_v42, %v1912_v27  ;;  %v1935_v39 = vrot.slane %v1934_v59, 4  ;;  %v471_v27 = vld [vmem:[%s10687_s16] sm:$0xff] }
 0x4e6   :  { %v1915_v19 = vrot.slane %v1914_v7, 2  ;;  %v1936_v41 = vadd.f32 %v1935_v39, %v1934_v59  ;;  %v5918_v59 = vpack.c.bf16 %v472_v26, %v471_v27  ;;  %v475_v39 = vld [vmem:[%s10687_s16 + $0x20] sm:$0xff] }
 0x4e8   :  { %v1916_v22 = vadd.f32 %v1915_v19, %v1914_v7  ;;  %v1937_v1 = vrot.slane %v1936_v41, 2  ;;  %5919 = vmatpush1.bf16.msra.mxu1 %v5918_v59  ;;  %v5921_v7 = vpack.c.bf16 %v474_v21, %v473_v14  ;;  %v5924_v19 = vpack.c.bf16 %v476_v15, %v475_v39 }
 0x4e9   :  { %5920 = vmatprep.subr.bf16.mxu1 %v7360_v18 }
 0x4ea   :  { %v1917_v20 = vrot.slane %v1916_v22, 1  ;;  %v1938_v25 = vadd.f32 %v1937_v1, %v1936_v41  ;;  %v477_v41 = vld [vmem:[%s10687_s16 + $0x30] sm:$0xff] }
 0x4eb   :  { %v5927_v1 = vpack.c.bf16 %v478_v49, %v477_v41 }
 0x4ec   :  { %v1918_v54 = vadd.f32 %v1917_v20, %v1916_v22  ;;  %v1939_v46 = vrot.slane %v1938_v25, 1  ;;  %5922 = vmatpush1.bf16.msra.mxu1 %v5921_v7  ;;  %v469_v22 = vld [vmem:[#allocation13] sm:$0x1] }
 0x4ed   :  { %5923 = vmatprep.subr.bf16.mxu1 %v7360_v18  ;;  %v480_v20 = vld [vmem:[%s10687_s16 + $0x48] sm:$0xff] }
 0x4ee   :  { %v1919_v38 = vadd.f32 %v1918_v54, %v1874_v10  ;;  %v1940_v33 = vadd.f32 %v1939_v46, %v1938_v25  ;;  %v481_v54 = vld [vmem:[%s10687_s16 + $0x50] sm:$0xff]  ;;  %v482_v46 = vld [vmem:[%s10687_s16 + $0x58] sm:$0xff] }
 0x4f0   :  { %v1941_v17 = vadd.f32 %v1940_v33, %v1896_v37  ;;  %v1942_v29 = vmul.f32 0.008333334, %v1919_v38  ;;  %5925 = vmatpush1.bf16.msra.mxu1 %v5924_v19  ;;  %v470_v37 = vld [vmem:[#allocation14] sm:$0x1]  ;;  %v5930_v38 = vpack.c.bf16 %v480_v20, %v479_v43 }
 0x4f1   :  { %5926 = vmatprep.subr.bf16.mxu1 %v7360_v18 }
 0x4f2   :  { %v1943_v50 = vmul.f32 0.008333334, %v1941_v17  ;;  %v1944_v52 = vmul.f32 %v1942_v29, %v1942_v29 }
 0x4f4   :  { %v1945_v61 = vsub.f32 %v1943_v50, %v1944_v52  ;;  %5928 = vmatpush1.bf16.msra.mxu1 %v5927_v1  ;;  %v5933_v50 = vpack.c.bf16 %v482_v46, %v481_v54  ;;  %v483_v52 = vld [vmem:[%s10687_s16 + $0x60] sm:$0xff] }
 0x4f5   :  { %5929 = vmatprep.subr.bf16.mxu1 %v7360_v18 }
 0x4f6   :  { %v1946_v16 = vmax.f32 %v1945_v61, 0.0  ;;  %v484_v61 = vld [vmem:[%s10687_s16 + $0x68] sm:$0xff] }
 0x4f8   :  { %v1947_v42 = vadd.f32 1e-05, %v1946_v16  ;;  %5931 = vmatpush1.bf16.msra.mxu1 %v5930_v38 }
 0x4f9   :  { %5932 = vmatprep.subr.bf16.mxu1 %v7360_v18 }
 0x4fa   :  { %6450 = vrsqrt.f32 %v1947_v42  ;;  %v485_v42 = vld [vmem:[%s10687_s16 + $0x70] sm:$0xff] }
 0x4fc   :  { %5934 = vmatpush1.bf16.msra.mxu1 %v5933_v50 }
 0x4fd   :  { %5935 = vmatprep.subr.bf16.mxu1 %v7360_v18 }
 0x504   :  { %v6451_v25 = vpop.eup %6450 }
 0x505   :  { %v1949_v10 = vmul.f32 %v6451_v25, %v469_v22 }
 0x507   :  { %v1950_v33 = vmul.f32 %v1949_v10, %v1942_v29  ;;  %v8800_v17 = vrot.slane %v1949_v10, %v7684_v24  ;;  %v486_v29 = vld [vmem:[%s10687_s16 + $0x78] sm:$0xff] }
 0x508   :  { %v5939_v15 = vpack.c.bf16 %v486_v29, %v485_v42 }
 0x509   :  { %v1951_v16 = vsub.f32 %v470_v37, %v1950_v33  ;;  %v1971_v27 = vmul.f32 %v8800_v17, %v8777_v6  ;;  %v1956_v26 = vmul.f32 %v8800_v17, %v8657_v4  ;;  %v1957_v14 = vmul.f32 %v8800_v17, %v8662_v36 }
 0x50a   :  { %v1958_v59 = vmul.f32 %v8800_v17, %v8673_v12  ;;  %v1959_v21 = vmul.f32 %v8800_v17, %v8681_v11  ;;  %v1960_v7 = vmul.f32 %v8800_v17, %v8689_v28  ;;  %v1961_v6 = vmul.f32 %v8800_v17, %v8697_v32 }
 0x50b   :  { %v8822_v4 = vrot.slane %v1951_v16, %v7684_v24  ;;  %v1962_v36 = vmul.f32 %v8800_v17, %v8705_v31  ;;  %v1963_v39 = vmul.f32 %v8800_v17, %v8713_v8  ;;  %v5936_v12 = vpack.c.bf16 %v484_v61, %v483_v52 }
 0x50c   :  { %v1964_v11 = vmul.f32 %v8800_v17, %v8724_v23  ;;  %v1967_v28 = vmul.f32 %v8800_v17, %v8743_v47  ;;  %v1968_v32 = vmul.f32 %v8800_v17, %v8753_v48  ;;  %v1965_v46 = vmul.f32 %v8800_v17, %v8721_v60 }
 0x50d   :  { %v8836_v19 = vadd.f32 %v8822_v4, %v1971_v27  ;;  %v8839_v31 = vadd.f32 %v8822_v4, %v1956_v26  ;;  %v8842_v8 = vadd.f32 %v8822_v4, %v1957_v14  ;;  %v8845_v41 = vadd.f32 %v8822_v4, %v1958_v59  ;;  %5937 = vmatpush1.bf16.msra.mxu1 %v5936_v12 }
 0x50e   :  { %v8848_v23 = vadd.f32 %v8822_v4, %v1959_v21  ;;  %v8851_v47 = vadd.f32 %v8822_v4, %v1960_v7  ;;  %v8854_v48 = vadd.f32 %v8822_v4, %v1961_v6  ;;  %v8857_v49 = vadd.f32 %v8822_v4, %v1962_v36  ;;  %5938 = vmatprep.subr.bf16.mxu1 %v7360_v18 }
 0x50f   :  { %v2009_v22 = vsub.f32 0.0, %v8836_v19  ;;  %v1994_v1 = vsub.f32 0.0, %v8839_v31  ;;  %v1995_v43 = vsub.f32 0.0, %v8842_v8  ;;  %v1996_v20 = vsub.f32 0.0, %v8845_v41 }
 0x510   :  { %v1997_v25 = vsub.f32 0.0, %v8848_v23  ;;  %v1998_v10 = vsub.f32 0.0, %v8851_v47  ;;  %v1999_v54 = vsub.f32 0.0, %v8854_v48  ;;  %v8870_v50 = vadd.f32 %v8822_v4, %v1963_v39 }
 0x511   :  { %v2040_v37 = vmul.f32 1.442695, %v2009_v22  ;;  %v2010_v38 = vmul.f32 1.442695, %v1994_v1  ;;  %v2012_v33 = vmul.f32 1.442695, %v1995_v43  ;;  %v8874_v16 = vadd.f32 %v8822_v4, %v1964_v11  ;;  %5940 = vmatpush1.bf16.msra.mxu1 %v5939_v15 }
 0x512   :  { %v2014_v52 = vmul.f32 1.442695, %v1996_v20  ;;  %v2000_v61 = vsub.f32 0.0, %v8857_v49  ;;  %v1966_v27 = vmul.f32 %v8800_v17, %v8729_v45  ;;  %v2016_v26 = vmul.f32 1.442695, %v1997_v25  ;;  %5941 = vmatprep.subr.bf16.mxu1 %v7360_v18 }
 0x513   :  { %6452 = vpow2.f32 %v2040_v37  ;;  %v2018_v14 = vmul.f32 1.442695, %v1998_v10  ;;  %v2001_v60 = vsub.f32 0.0, %v8870_v50  ;;  %v2002_v42 = vsub.f32 0.0, %v8874_v16 }
 0x514   :  { %6454 = vpow2.f32 %v2010_v38  ;;  %v8882_v29 = vadd.f32 %v8822_v4, %v1965_v46  ;;  %v8885_v59 = vadd.f32 %v8822_v4, %v1966_v27  ;;  %v2020_v21 = vmul.f32 1.442695, %v1999_v54 }
 0x515   :  { %6456 = vpow2.f32 %v2012_v33  ;;  %v8888_v45 = vadd.f32 %v8822_v4, %v1967_v28  ;;  %v8891_v7 = vadd.f32 %v8822_v4, %v1968_v32  ;;  %v2022_v6 = vmul.f32 1.442695, %v2000_v61 }
 0x516   :  { %6458 = vpow2.f32 %v2014_v52  ;;  %v2003_v36 = vsub.f32 0.0, %v8882_v29  ;;  %v2004_v39 = vsub.f32 0.0, %v8885_v59  ;;  %v2024_v12 = vmul.f32 1.442695, %v2001_v60 }
 0x517   :  { %6460 = vpow2.f32 %v2016_v26  ;;  %v2005_v11 = vsub.f32 0.0, %v8888_v45  ;;  %v1969_v22 = vmul.f32 %v8800_v17, %v8761_v53  ;;  %v2026_v28 = vmul.f32 1.442695, %v2002_v42 }
 0x518   :  { %6462 = vpow2.f32 %v2018_v14  ;;  %v1970_v32 = vmul.f32 %v8800_v17, %v8769_v58  ;;  %v2028_v1 = vmul.f32 1.442695, %v2003_v36  ;;  %v2030_v15 = vmul.f32 1.442695, %v2004_v39 }
 0x519   :  { %6464 = vpow2.f32 %v2020_v21  ;;  %v8902_v43 = vadd.f32 %v8822_v4, %v1969_v22  ;;  %v2032_v25 = vmul.f32 1.442695, %v2005_v11 }
 0x51a   :  { %6466 = vpow2.f32 %v2022_v6  ;;  %v8905_v20 = vadd.f32 %v8822_v4, %v1970_v32 }
 0x51b   :  { %6468 = vpow2.f32 %v2024_v12 }
 0x51c   :  { %6470 = vpow2.f32 %v2026_v28 }
 0x51d   :  { %v6453_v53 = vpop.eup %6452  ;;  %6472 = vpow2.f32 %v2028_v1 }
 0x51e   :  { %v6455_v10 = vpop.eup %6454  ;;  %v2057_v54 = vadd.f32 1.0, %v6453_v53  ;;  %6474 = vpow2.f32 %v2030_v15 }
 0x51f   :  { %v6457_v46 = vpop.eup %6456  ;;  %v2042_v58 = vadd.f32 1.0, %v6455_v10  ;;  %6476 = vpow2.f32 %v2032_v25  ;;  %v2006_v10 = vsub.f32 0.0, %v8891_v7 }
 0x520   :  { %v6459_v17 = vpop.eup %6458  ;;  %6478 = vrcp.f32 %v2057_v54  ;;  %v2043_v37 = vadd.f32 1.0, %v6457_v46 }
 0x521   :  { %v6461_v38 = vpop.eup %6460  ;;  %6480 = vrcp.f32 %v2042_v58  ;;  %v2044_v33 = vadd.f32 1.0, %v6459_v17 }
 0x522   :  { %v6463_v52 = vpop.eup %6462  ;;  %6482 = vrcp.f32 %v2043_v37  ;;  %v2045_v4 = vadd.f32 1.0, %v6461_v38 }
 0x523   :  { %v6465_v61 = vpop.eup %6464  ;;  %6484 = vrcp.f32 %v2044_v33  ;;  %v2046_v27 = vadd.f32 1.0, %v6463_v52  ;;  %v2034_v33 = vmul.f32 1.442695, %v2006_v10  ;;  %v2007_v52 = vsub.f32 0.0, %v8902_v43 }
 0x524   :  { %v6467_v26 = vpop.eup %6466  ;;  %6486 = vrcp.f32 %v2045_v4  ;;  %v2047_v14 = vadd.f32 1.0, %v6465_v61  ;;  %v487_v4 = vld [vmem:[%s10687_s16 + $0x80] sm:$0xff] }
 0x525   :  { %v6469_v60 = vpop.eup %6468  ;;  %6488 = vrcp.f32 %v2046_v27  ;;  %v2048_v42 = vadd.f32 1.0, %v6467_v26  ;;  %v2008_v26 = vsub.f32 0.0, %v8905_v20 }
 0x526   :  { %v6471_v21 = vpop.eup %6470  ;;  %6490 = vrcp.f32 %v2047_v14  ;;  %v2049_v6 = vadd.f32 1.0, %v6469_v60 }
 0x527   :  { %v6473_v36 = vpop.eup %6472  ;;  %6492 = vrcp.f32 %v2048_v42  ;;  %v2050_v39 = vadd.f32 1.0, %v6471_v21 }
 0x528   :  { %v6475_v12 = vpop.eup %6474  ;;  %6494 = vrcp.f32 %v2049_v6  ;;  %v2051_v11 = vadd.f32 1.0, %v6473_v36  ;;  %v2036_v6 = vmul.f32 1.442695, %v2007_v52  ;;  %v489_v36 = vld [vmem:[%s10687_s16 + $0x90] sm:$0xff] }
 0x529   :  { %v6477_v22 = vpop.eup %6476  ;;  %6496 = vrcp.f32 %v2050_v39  ;;  %v2052_v28 = vadd.f32 1.0, %v6475_v12  ;;  %v490_v39 = vld [vmem:[%s10687_s16 + $0x98] sm:$0xff] }
 0x52a   :  { %v6479_v32 = vpop.eup %6478  ;;  %6498 = vrcp.f32 %v2051_v11  ;;  %v2053_v27 = vadd.f32 1.0, %v6477_v22  ;;  %v5945_v22 = vpack.c.bf16 %v490_v39, %v489_v36 }
 0x52b   :  { %v6481_v1 = vpop.eup %6480  ;;  %v2089_v15 = vmul.f32 %v6479_v32, %v8836_v19  ;;  %6500 = vrcp.f32 %v2052_v28 }
 0x52c   :  { %v6483_v25 = vpop.eup %6482  ;;  %v2074_v53 = vmul.f32 %v6481_v1, %v8839_v31  ;;  %6502 = vpow2.f32 %v2034_v33 }
 0x52d   :  { %v6485_v54 = vpop.eup %6484  ;;  %2105 = vst.msk [vmem:[#allocation2 + $0x7c] sm:$0xf] %vm494_vm5, %v2089_v15  ;;  %v2075_v46 = vmul.f32 %v6483_v25, %v8842_v8  ;;  %v488_v8 = vld [vmem:[%s10687_s16 + $0x88] sm:$0xff]  ;;  %6504 = vrcp.f32 %v2053_v27 }
 0x52e   :  { %v6487_v58 = vpop.eup %6486  ;;  %2090 = vst.msk [vmem:[#allocation2 + $0x4] sm:$0xff] %vm1051_vm4, %v2074_v53  ;;  %v2076_v17 = vmul.f32 %v6485_v54, %v8845_v41  ;;  %6506 = vpow2.f32 %v2036_v6 }
 0x52f   :  { %v6489_v37 = vpop.eup %6488  ;;  %2091 = vst.msk [vmem:[#allocation2 + $0xc] sm:$0xff] %vm1051_vm4, %v2075_v46  ;;  %v2077_v19 = vmul.f32 %v6487_v58, %v8848_v23  ;;  %v5942_v23 = vpack.c.bf16 %v488_v8, %v487_v4 }
 0x530   :  { %v6491_v31 = vpop.eup %6490  ;;  %2092 = vst.msk [vmem:[#allocation2 + $0x14] sm:$0xff] %vm1051_vm4, %v2076_v17  ;;  %v2078_v38 = vmul.f32 %v6489_v37, %v8851_v47 }
 0x531   :  { %v6493_v61 = vpop.eup %6492  ;;  %2093 = vst.msk [vmem:[#allocation2 + $0x1c] sm:$0xff] %vm1051_vm4, %v2077_v19  ;;  %v2079_v41 = vmul.f32 %v6491_v31, %v8854_v48  ;;  %5943 = vmatpush1.bf16.msra.mxu1 %v5942_v23 }
 0x532   :  { %v6495_v14 = vpop.eup %6494  ;;  %2094 = vst.msk [vmem:[#allocation2 + $0x24] sm:$0xff] %vm1051_vm4, %v2078_v38  ;;  %v2080_v47 = vmul.f32 %v6493_v61, %v8857_v49  ;;  %5944 = vmatprep.subr.bf16.mxu1 %v7360_v18 }
 0x533   :  { %v6497_v60 = vpop.eup %6496  ;;  %2095 = vst.msk [vmem:[#allocation2 + $0x2c] sm:$0xff] %vm1051_vm4, %v2079_v41  ;;  %v2081_v42 = vmul.f32 %v6495_v14, %v8870_v50  ;;  %v2038_v50 = vmul.f32 1.442695, %v2008_v26 }
 0x534   :  { %v6499_v21 = vpop.eup %6498  ;;  %2096 = vst.msk [vmem:[#allocation2 + $0x34] sm:$0xff] %vm1051_vm4, %v2080_v47  ;;  %v2082_v48 = vmul.f32 %v6497_v60, %v8874_v16 }
 0x535   :  { %v6501_v12 = vpop.eup %6500  ;;  %v8933_v11 = vld [vmem:[#allocation2] sm:$0xff]  ;;  %2097 = vst.msk [vmem:[#allocation2 + $0x3c] sm:$0xf] %vm494_vm5, %v2081_v42  ;;  %v2083_v49 = vmul.f32 %v6499_v21, %v8882_v29  ;;  %5946 = vmatpush1.bf16.msra.mxu1 %v5945_v22  ;;  %6508 = vpow2.f32 %v2038_v50 }
 0x536   :  { %v8937_v28 = vld [vmem:[#allocation2 + $0x8] sm:$0xff]  ;;  %v2375_v16 = vrot.slane %v8933_v11, 4  ;;  %v2217_v32 = vrot.slane %v8933_v11, 2  ;;  %v2138_v1 = vrot.slane %v8933_v11, 1  ;;  %v2296_v15 = vrot.slane %v8933_v11, 3  ;;  %2098 = vst.msk [vmem:[#allocation2 + $0x44] sm:$0xff] %vm1051_vm4, %v2082_v48 }
 0x537   :  { %v2376_v25 = vrot.slane %v8937_v28, 4  ;;  %v8945_v53 = vld [vmem:[#allocation2 + $0x10] sm:$0xff]  ;;  %v2218_v29 = vrot.slane %v8937_v28, 2  ;;  %v2139_v10 = vrot.slane %v8937_v28, 1  ;;  %v2297_v54 = vrot.slane %v8937_v28, 3  ;;  %2099 = vst.msk [vmem:[#allocation2 + $0x4c] sm:$0xff] %vm1051_vm4, %v2083_v49 }
 0x538   :  { %v2220_v46 = vrot.slane %v8945_v53, 2  ;;  %v2141_v58 = vrot.slane %v8945_v53, 1  ;;  %v8953_v17 = vld [vmem:[#allocation2 + $0x18] sm:$0xff]  ;;  %v2299_v37 = vrot.slane %v8945_v53, 3  ;;  %v2084_v19 = vmul.f32 %v6501_v12, %v8885_v59  ;;  %v6503_v12 = vpop.eup %6502 }
 0x539   :  { %v2377_v31 = vsel %vm949_vm3, %v2375_v16, %v2376_v25  ;;  %v2219_v38 = vsel %vm749_vm1, %v2217_v32, %v2218_v29  ;;  %v2140_v33 = vsel %vm649_vm0, %v2138_v1, %v2139_v10  ;;  %v8962_v52 = vld [vmem:[#allocation2 + $0x20] sm:$0xff]  ;;  %v2143_v4 = vrot.slane %v8953_v17, 1  ;;  %v6505_v16 = vpop.eup %6504 }
 0x53a   :  { %5630 = vmatprep.mubr.msk.f32.mxu1 %vm1051_vm4, %v2377_v31  ;;  %v2221_v8 = vsel %vm749_vm1, %v2218_v29, %v2220_v46  ;;  %v2142_v61 = vsel %vm649_vm0, %v2139_v10, %v2141_v58  ;;  %v2145_v59 = vrot.slane %v8962_v52, 1  ;;  %v2298_v41 = vsel %vm849_vm2, %v2296_v15, %v2297_v54  ;;  %2100 = vst.msk [vmem:[#allocation2 + $0x54] sm:$0xff] %vm1051_vm4, %v2084_v19  ;;  %v8976_v21 = vld [vmem:[#allocation2 + $0x28] sm:$0xff] }
 0x53b   :  { %v6239_v27 = vpack.i.bf16 %v2221_v8, %v2219_v38  ;;  %v6234_v26 = vpack.i.bf16 %v2142_v61, %v2140_v33  ;;  %v2144_v23 = vsel %vm649_vm0, %v2141_v58, %v2143_v4  ;;  %v2300_v14 = vsel %vm849_vm2, %v2297_v54, %v2299_v37  ;;  %v8978_v48 = vld [vmem:[#allocation2 + $0x30] sm:$0xff] }
 0x53c   :  { %v2146_v47 = vsel %vm649_vm0, %v2143_v4, %v2145_v59  ;;  %v2301_v60 = vrot.slane %v8953_v17, 3  ;;  %v2303_v42 = vrot.slane %v8962_v52, 3  ;;  %v2222_v36 = vrot.slane %v8953_v17, 2  ;;  %v8988_v29 = vld [vmem:[#allocation2 + $0x38] sm:$0xff] }
 0x53d   :  { %6240 = vrot.lane.b32.xlu0 %v6239_v27, %s7361_s9  ;;  %6235 = vrot.lane.b32.xlu1 %v6234_v26, %s7362_s24  ;;  %v2224_v39 = vrot.slane %v8962_v52, 2  ;;  %v6249_v49 = vpack.i.bf16 %v2146_v47, %v2144_v23  ;;  %v6244_v22 = vpack.i.bf16 %v2300_v14, %v2298_v41  ;;  %v2226_v15 = vrot.slane %v8976_v21, 2  ;;  %v8990_v10 = vld [vmem:[#allocation2 + $0x40] sm:$0xff]  ;;  %v6507_v26 = vpop.eup %6506 }
 0x53e   :  { %v2302_v32 = vsel %vm849_vm2, %v2299_v37, %v2301_v60  ;;  %v2304_v1 = vsel %vm849_vm2, %v2301_v60, %v2303_v42  ;;  %v2228_v6 = vrot.slane %v8978_v48, 2  ;;  %v2223_v54 = vsel %vm749_vm1, %v2220_v46, %v2222_v36 }
 0x53f   :  { %v2225_v50 = vsel %vm749_vm1, %v2222_v36, %v2224_v39  ;;  %v2147_v58 = vrot.slane %v8976_v21, 1  ;;  %v2149_v19 = vrot.slane %v8978_v48, 1  ;;  %v2151_v37 = vrot.slane %v8988_v29, 1 }
 0x540   :  { %v2153_v31 = vrot.slane %v8990_v10, 1  ;;  %v6259_v38 = vpack.i.bf16 %v2304_v1, %v2302_v32  ;;  %v6254_v33 = vpack.i.bf16 %v2225_v50, %v2223_v54  ;;  %v2227_v4 = vsel %vm749_vm1, %v2224_v39, %v2226_v15  ;;  %v9017_v50 = vld [vmem:[#allocation2 + $0x48] sm:$0xff] }
 0x541   :  { %6250 = vrot.lane.b32.xlu0 %v6249_v49, %s7362_s24  ;;  %6245 = vrot.lane.b32.xlu1 %v6244_v22, %s7363_s17  ;;  %v2229_v46 = vsel %vm749_vm1, %v2226_v15, %v2228_v6  ;;  %v2148_v8 = vsel %vm649_vm0, %v2145_v59, %v2147_v58  ;;  %v2150_v61 = vsel %vm649_vm0, %v2147_v58, %v2149_v19  ;;  %v2305_v41 = vrot.slane %v8976_v21, 3  ;;  %v6509_v59 = vpop.eup %6508  ;;  %v9019_v58 = vld [vmem:[#allocation2 + $0x50] sm:$0xff] }
 0x542   :  { %v2307_v27 = vrot.slane %v8978_v48, 3  ;;  %v2152_v23 = vsel %vm649_vm0, %v2149_v19, %v2151_v37  ;;  %v2154_v14 = vsel %vm649_vm0, %v2151_v37, %v2153_v31  ;;  %v2309_v47 = vrot.slane %v8988_v29, 3 }
 0x543   :  { %v2311_v60 = vrot.slane %v8990_v10, 3  ;;  %v6269_v36 = vpack.i.bf16 %v2229_v46, %v2227_v4  ;;  %v6264_v39 = vpack.i.bf16 %v2150_v61, %v2148_v8  ;;  %v2054_v49 = vadd.f32 1.0, %v6503_v12 }
 0x544   :  { %v2085_v22 = vmul.f32 %v6505_v16, %v8888_v45  ;;  %v2306_v32 = vsel %vm849_vm2, %v2303_v42, %v2305_v41  ;;  %v2308_v1 = vsel %vm849_vm2, %v2305_v41, %v2307_v27  ;;  %v2230_v15 = vrot.slane %v8988_v29, 2 }
 0x545   :  { %6260 = vrot.lane.b32.xlu0 %v6259_v38, %s7363_s17  ;;  %6255 = vrot.lane.b32.xlu1 %v6254_v33, %s7361_s9  ;;  %v2232_v54 = vrot.slane %v8990_v10, 2  ;;  %v6279_v19 = vpack.i.bf16 %v2154_v14, %v2152_v23  ;;  %6510 = vrcp.f32 %v2054_v49  ;;  %v2310_v45 = vsel %vm849_vm2, %v2307_v27, %v2309_v47 }
 0x546   :  { %2101 = vst.msk [vmem:[#allocation2 + $0x5c] sm:$0xff] %vm1051_vm4, %v2085_v22  ;;  %v2312_v42 = vsel %vm849_vm2, %v2309_v47, %v2311_v60  ;;  %v2055_v12 = vadd.f32 1.0, %v6507_v26  ;;  %v2056_v16 = vadd.f32 1.0, %v6509_v59  ;;  %v6274_v37 = vpack.i.bf16 %v2308_v1, %v2306_v32 }
 0x547   :  { %v2234_v38 = vrot.slane %v9017_v50, 2  ;;  %v2236_v33 = vrot.slane %v9019_v58, 2  ;;  %v2155_v4 = vrot.slane %v9017_v50, 1  ;;  %v2231_v46 = vsel %vm749_vm1, %v2228_v6, %v2230_v15 }
 0x548   :  { %v2233_v8 = vsel %vm749_vm1, %v2230_v15, %v2232_v54  ;;  %v2157_v61 = vrot.slane %v9019_v58, 1  ;;  %6512 = vrcp.f32 %v2055_v12  ;;  %v6289_v41 = vpack.i.bf16 %v2312_v42, %v2310_v45 }
 0x549   :  { %6270 = vrot.lane.b32.xlu0 %v6269_v36, %s7361_s9  ;;  %6265 = vrot.lane.b32.xlu1 %v6264_v39, %s7362_s24  ;;  %6514 = vrcp.f32 %v2056_v16  ;;  %v6284_v27 = vpack.i.bf16 %v2233_v8, %v2231_v46  ;;  %v2235_v26 = vsel %vm749_vm1, %v2232_v54, %v2234_v38  ;;  %v2237_v23 = vsel %vm749_vm1, %v2234_v38, %v2236_v33 }
 0x54a   :  { %v2156_v14 = vsel %vm649_vm0, %v2153_v31, %v2155_v4  ;;  %v2158_v6 = vsel %vm649_vm0, %v2155_v4, %v2157_v61  ;;  %v2313_v47 = vrot.slane %v9017_v50, 3  ;;  %v2315_v59 = vrot.slane %v9019_v58, 3 }
 0x54b   :  { %v6299_v39 = vpack.i.bf16 %v2237_v23, %v2235_v26  ;;  %v6294_v49 = vpack.i.bf16 %v2158_v6, %v2156_v14 }
 0x54c   :  { %v2314_v32 = vsel %vm849_vm2, %v2311_v60, %v2313_v47  ;;  %v2316_v1 = vsel %vm849_vm2, %v2313_v47, %v2315_v59 }
 0x54d   :  { %6280 = vrot.lane.b32.xlu0 %v6279_v19, %s7362_s24  ;;  %6275 = vrot.lane.b32.xlu1 %v6274_v37, %s7363_s17  ;;  %v9048_v15 = vld [vmem:[#allocation2 + $0x58] sm:$0xff]  ;;  %v6304_v19 = vpack.i.bf16 %v2316_v1, %v2314_v32 }
 0x54e   :  { %v2238_v60 = vrot.slane %v9048_v15, 2  ;;  %v2317_v37 = vrot.slane %v9048_v15, 3 }
 0x54f   :  { %v6511_v36 = vpop.eup %6510 }
 0x550   :  { %v2086_v22 = vmul.f32 %v6511_v36, %v8891_v7  ;;  %v2159_v7 = vrot.slane %v9048_v15, 1  ;;  %v2239_v38 = vsel %vm749_vm1, %v2236_v33, %v2238_v60  ;;  %v2318_v26 = vsel %vm849_vm2, %v2315_v59, %v2317_v37 }
 0x551   :  { %6290 = vrot.lane.b32.xlu0 %v6289_v41, %s7363_s17  ;;  %6285 = vrot.lane.b32.xlu1 %v6284_v27, %s7361_s9 }
 0x552   :  { %v6513_v31 = vpop.eup %6512  ;;  %2102 = vst.msk [vmem:[#allocation2 + $0x64] sm:$0xff] %vm1051_vm4, %v2086_v22  ;;  %v2160_v16 = vsel %vm649_vm0, %v2157_v61, %v2159_v7 }
 0x553   :  { %v6515_v54 = vpop.eup %6514  ;;  %v2087_v45 = vmul.f32 %v6513_v31, %v8902_v43 }
 0x554   :  { %v2088_v42 = vmul.f32 %v6515_v54, %v8905_v20 }
 0x555   :  { %6300 = vrot.lane.b32.xlu0 %v6299_v39, %s7361_s9  ;;  %6295 = vrot.lane.b32.xlu1 %v6294_v49, %s7362_s24  ;;  %2103 = vst.msk [vmem:[#allocation2 + $0x6c] sm:$0xff] %vm1051_vm4, %v2087_v45 }
 0x556   :  { %2104 = vst.msk [vmem:[#allocation2 + $0x74] sm:$0xff] %vm1051_vm4, %v2088_v42 }
 0x559   :  { %6305 = vrot.lane.b32.xlu1 %v6304_v19, %s7363_s17  ;;  %v9057_v12 = vld [vmem:[#allocation2 + $0x60] sm:$0xff] }
 0x55a   :  { %v2161_v43 = vrot.slane %v9057_v12, 1  ;;  %v2319_v20 = vrot.slane %v9057_v12, 3  ;;  %v2240_v4 = vrot.slane %v9057_v12, 2 }
 0x55c   :  { %v2162_v46 = vsel %vm649_vm0, %v2159_v7, %v2161_v43  ;;  %v2241_v8 = vsel %vm749_vm1, %v2238_v60, %v2240_v4  ;;  %v9067_v41 = vld [vmem:[#allocation2 + $0x68] sm:$0xff]  ;;  %v2320_v61 = vsel %vm849_vm2, %v2317_v37, %v2319_v20 }
 0x55d   :  { %v6309_v27 = vpack.i.bf16 %v2162_v46, %v2160_v16  ;;  %v6314_v23 = vpack.i.bf16 %v2241_v8, %v2239_v38  ;;  %v9071_v14 = vld [vmem:[#allocation2 + $0x70] sm:$0xff]  ;;  %v2242_v6 = vrot.slane %v9067_v41, 2  ;;  %v2163_v47 = vrot.slane %v9067_v41, 1  ;;  %v9089_v42 = vld [vmem:[#allocation2 + $0x78] sm:$0xff] }
 0x55e   :  { %v2244_v33 = vrot.slane %v9071_v14, 2  ;;  %v2165_v36 = vrot.slane %v9071_v14, 1  ;;  %v2321_v39 = vrot.slane %v9067_v41, 3  ;;  %v2323_v59 = vrot.slane %v9071_v14, 3 }
 0x55f   :  { %6310 = vrot.lane.b32.xlu0 %v6309_v27, %s7362_s24  ;;  %6315 = vrot.lane.b32.xlu1 %v6314_v23, %s7361_s9  ;;  %v2164_v49 = vsel %vm649_vm0, %v2161_v43, %v2163_v47  ;;  %v6319_v32 = vpack.i.bf16 %v2320_v61, %v2318_v26  ;;  %v2243_v31 = vsel %vm749_vm1, %v2240_v4, %v2242_v6  ;;  %v2167_v16 = vrot.slane %v9089_v42, 1 }
 0x560   :  { %v2166_v22 = vsel %vm649_vm0, %v2163_v47, %v2165_v36  ;;  %v2245_v54 = vsel %vm749_vm1, %v2242_v6, %v2244_v33  ;;  %v2322_v19 = vsel %vm849_vm2, %v2319_v20, %v2321_v39  ;;  %v2324_v45 = vsel %vm849_vm2, %v2321_v39, %v2323_v59 }
 0x561   :  { %v6324_v1 = vpack.i.bf16 %v2166_v22, %v2164_v49  ;;  %v6329_v7 = vpack.i.bf16 %v2245_v54, %v2243_v31  ;;  %v6334_v60 = vpack.i.bf16 %v2324_v45, %v2322_v19  ;;  %v2246_v37 = vrot.slane %v9089_v42, 2 }
 0x562   :  { %v2168_v43 = vsel %vm649_vm0, %v2165_v36, %v2167_v16  ;;  %v2325_v20 = vrot.slane %v9089_v42, 3  ;;  %v2378_v47 = vrot.slane %v8945_v53, 4  ;;  %v2380_v19 = vrot.slane %v8953_v17, 4 }
 0x563   :  { %6320 = vrot.lane.b32.xlu0 %v6319_v32, %s7363_s17  ;;  %6325 = vrot.lane.b32.xlu1 %v6324_v1, %s7362_s24  ;;  %v2247_v38 = vsel %vm749_vm1, %v2244_v33, %v2246_v37 }
 0x564   :  { %v2326_v4 = vsel %vm849_vm2, %v2323_v59, %v2325_v20 }
 0x567   :  { %6330 = vrot.lane.b32.xlu0 %v6329_v7, %s7361_s9  ;;  %6335 = vrot.lane.b32.xlu1 %v6334_v60, %s7363_s17 }
 0x56b   :  { %2197 = vrot.lane.b32.xlu0 %v2168_v43, %s7362_s24  ;;  %2276 = vrot.lane.b32.xlu1 %v2247_v38, %s7361_s9 }
 0x56f   :  { %2355 = vrot.lane.b32.xlu0 %v2326_v4, %s7363_s17  ;;  %2199 = vrot.lane.b32.xlu1 %v2167_v16, %s7362_s24 }
 0x573   :  { %2278 = vrot.lane.b32.xlu0 %v2246_v37, %s7361_s9  ;;  %2357 = vrot.lane.b32.xlu1 %v2325_v20, %s7363_s17 }
 0x5af   :  { %v6241_v46 = vpop.permute.xlu0 %6240  ;;  %v6236_v8 = vpop.permute.xlu1 %6235 }
 0x5b0   :  { %v6237_v27 = vunpack.i.l.bf16 %v6236_v8  ;;  %v6242_v26 = vunpack.i.l.bf16 %v6241_v46  ;;  %v6238_v61 = vunpack.i.h.bf16 %v6236_v8  ;;  %v6243_v39 = vunpack.i.h.bf16 %v6241_v46 }
 0x5b1   :  { %v2382_v46 = vrot.slane %v8962_v52, 4 }
 0x5b2   :  { %v2406_v23 = vsel %vm1051_vm4, %v8933_v11, %v6237_v27  ;;  %v2407_v1 = vsel %vm1051_vm4, %v8937_v28, %v6238_v61  ;;  %v2379_v11 = vsel %vm949_vm3, %v2376_v25, %v2378_v47  ;;  %v2381_v28 = vsel %vm949_vm3, %v2378_v47, %v2380_v19 }
 0x5b3   :  { %v6251_v6 = vpop.permute.xlu0 %6250  ;;  %v6246_v33 = vpop.permute.xlu1 %6245  ;;  %v2422_v59 = vsel %vm1621_vm6, %v2406_v23, %v6242_v26  ;;  %v2423_v7 = vsel %vm1621_vm6, %v2407_v1, %v6243_v39  ;;  %v2383_v23 = vsel %vm949_vm3, %v2380_v19, %v2382_v46  ;;  %v2386_v1 = vrot.slane %v8978_v48, 4 }
 0x5b4   :  { %v6247_v36 = vunpack.i.l.bf16 %v6246_v33  ;;  %v6252_v49 = vunpack.i.l.bf16 %v6251_v6  ;;  %v6248_v22 = vunpack.i.h.bf16 %v6246_v33  ;;  %v6253_v60 = vunpack.i.h.bf16 %v6251_v6 }
 0x5b5   :  { %v2384_v33 = vrot.slane %v8976_v21, 4 }
 0x5b6   :  { %v2438_v32 = vsel %vm1638_vm7, %v2422_v59, %v6247_v36  ;;  %v2439_v37 = vsel %vm1638_vm7, %v2423_v7, %v6248_v22  ;;  %v2408_v43 = vsel %vm1051_vm4, %v8945_v53, %v6252_v49  ;;  %v2409_v61 = vsel %vm1051_vm4, %v8953_v17, %v6253_v60 }
 0x5b7   :  { %v6261_v31 = vpop.permute.xlu0 %6260  ;;  %v6256_v54 = vpop.permute.xlu1 %6255  ;;  %2557 = vmatmul.mubr.f32.vlgmr.msra.gmra.mrb[0].mxu1 %v2438_v32  ;;  %v2385_v32 = vsel %vm949_vm3, %v2382_v46, %v2384_v33 }
 0x5b8   :  { %v6257_v45 = vunpack.i.l.bf16 %v6256_v54  ;;  %5631 = vmatprep.mubr.msk.f32.mxu1 %vm1051_vm4, %v2379_v11  ;;  %v6262_v16 = vunpack.i.l.bf16 %v6261_v31  ;;  %v6258_v20 = vunpack.i.h.bf16 %v6256_v54  ;;  %v6263_v8 = vunpack.i.h.bf16 %v6261_v31 }
 0x5ba   :  { %v2424_v25 = vsel %vm1621_vm6, %v2408_v43, %v6257_v45  ;;  %v2425_v6 = vsel %vm1621_vm6, %v2409_v61, %v6258_v20 }
 0x5bb   :  { %v6271_v38 = vpop.permute.xlu0 %6270  ;;  %v6266_v4 = vpop.permute.xlu1 %6265  ;;  %2562 = vmatmul.mubr.f32.gmra.mrb[2].mxu1 %v2439_v37  ;;  %v2440_v26 = vsel %vm1638_vm7, %v2424_v25, %v6262_v16  ;;  %v2441_v49 = vsel %vm1638_vm7, %v2425_v6, %v6263_v8  ;;  %v2387_v16 = vsel %vm949_vm3, %v2384_v33, %v2386_v1  ;;  %v2388_v37 = vrot.slane %v8988_v29, 4 }
 0x5bc   :  { %5632 = vmatprep.mubr.msk.f32.mxu1 %vm1051_vm4, %v2381_v28  ;;  %v6267_v27 = vunpack.i.l.bf16 %v6266_v4  ;;  %v6272_v47 = vunpack.i.l.bf16 %v6271_v38  ;;  %v6268_v39 = vunpack.i.h.bf16 %v6266_v4  ;;  %v6273_v31 = vunpack.i.h.bf16 %v6271_v38 }
 0x5bd   :  { %v2389_v46 = vsel %vm949_vm3, %v2386_v1, %v2388_v37 }
 0x5be   :  { %v2410_v22 = vsel %vm1051_vm4, %v8962_v52, %v6267_v27  ;;  %v2411_v7 = vsel %vm1051_vm4, %v8976_v21, %v6268_v39  ;;  %v2390_v27 = vrot.slane %v8990_v10, 4 }
 0x5bf   :  { %v6276_v53 = vpop.permute.xlu1 %6275  ;;  %2567 = vmatmul.mubr.f32.gmra.mrb[4].mxu1 %v2440_v26  ;;  %v6281_v36 = vpop.permute.xlu0 %6280  ;;  %v2426_v54 = vsel %vm1621_vm6, %v2410_v22, %v6272_v47  ;;  %v2427_v20 = vsel %vm1621_vm6, %v2411_v7, %v6273_v31 }
 0x5c0   :  { %5633 = vmatprep.mubr.msk.f32.mxu1 %vm1051_vm4, %v2383_v23  ;;  %v6277_v59 = vunpack.i.l.bf16 %v6276_v53  ;;  %v6282_v11 = vunpack.i.l.bf16 %v6281_v36  ;;  %v6278_v19 = vunpack.i.h.bf16 %v6276_v53  ;;  %v6283_v38 = vunpack.i.h.bf16 %v6281_v36 }
 0x5c1   :  { %v2392_v36 = vrot.slane %v9017_v50, 4 }
 0x5c2   :  { %v2442_v45 = vsel %vm1638_vm7, %v2426_v54, %v6277_v59  ;;  %v2443_v28 = vsel %vm1638_vm7, %v2427_v20, %v6278_v19  ;;  %v2412_v25 = vsel %vm1051_vm4, %v8978_v48, %v6282_v11  ;;  %v2413_v6 = vsel %vm1051_vm4, %v8988_v29, %v6283_v38 }
 0x5c3   :  { %v6286_v17 = vpop.permute.xlu1 %6285  ;;  %2572 = vmatmul.mubr.f32.gmra.mrb[6].mxu1 %v2441_v49  ;;  %v6291_v60 = vpop.permute.xlu0 %6290  ;;  %v2391_v48 = vsel %vm949_vm3, %v2388_v37, %v2390_v27  ;;  %v2393_v29 = vsel %vm949_vm3, %v2390_v27, %v2392_v36 }
 0x5c4   :  { %5634 = vmatprep.mubr.msk.f32.mxu1 %vm1051_vm4, %v2385_v32  ;;  %v6287_v52 = vunpack.i.l.bf16 %v6286_v17  ;;  %v6292_v4 = vunpack.i.l.bf16 %v6291_v60  ;;  %v6288_v21 = vunpack.i.h.bf16 %v6286_v17  ;;  %v6293_v26 = vunpack.i.h.bf16 %v6291_v60 }
 0x5c5   :  { %v2394_v32 = vrot.slane %v9019_v58, 4 }
 0x5c6   :  { %v2428_v8 = vsel %vm1621_vm6, %v2412_v25, %v6287_v52  ;;  %v2429_v47 = vsel %vm1621_vm6, %v2413_v6, %v6288_v21 }
 0x5c7   :  { %2577 = vmatmul.mubr.f32.gmra.mrb[8].mxu1 %v2442_v45  ;;  %v6296_v43 = vpop.permute.xlu1 %6295  ;;  %v6301_v61 = vpop.permute.xlu0 %6300  ;;  %v2444_v23 = vsel %vm1638_vm7, %v2428_v8, %v6292_v4  ;;  %v2445_v22 = vsel %vm1638_vm7, %v2429_v47, %v6293_v26  ;;  %v2395_v52 = vsel %vm949_vm3, %v2392_v36, %v2394_v32  ;;  %v2398_v8 = vrot.slane %v9057_v12, 4 }
 0x5c8   :  { %5635 = vmatprep.mubr.msk.f32.mxu1 %vm1051_vm4, %v2387_v16  ;;  %v6297_v53 = vunpack.i.l.bf16 %v6296_v43  ;;  %v6302_v39 = vunpack.i.l.bf16 %v6301_v61  ;;  %v6298_v59 = vunpack.i.h.bf16 %v6296_v43  ;;  %v6303_v1 = vunpack.i.h.bf16 %v6301_v61 }
 0x5c9   :  { %v2396_v16 = vrot.slane %v9048_v15, 4 }
 0x5ca   :  { %v2414_v17 = vsel %vm1051_vm4, %v8990_v10, %v6297_v53  ;;  %v2415_v60 = vsel %vm1051_vm4, %v9017_v50, %v6298_v59 }
 0x5cb   :  { %2582 = vmatmul.mubr.f32.gmra.mrb[10].mxu1 %v2443_v28  ;;  %v6306_v33 = vpop.permute.xlu1 %6305  ;;  %v2430_v11 = vsel %vm1621_vm6, %v2414_v17, %v6302_v39  ;;  %v2431_v20 = vsel %vm1621_vm6, %v2415_v60, %v6303_v1  ;;  %v2397_v21 = vsel %vm949_vm3, %v2394_v32, %v2396_v16 }
 0x5cc   :  { %5636 = vmatprep.mubr.msk.f32.mxu1 %vm1051_vm4, %v2389_v46  ;;  %v6307_v49 = vunpack.i.l.bf16 %v6306_v33  ;;  %v6308_v45 = vunpack.i.h.bf16 %v6306_v33 }
 0x5ce   :  { %v2446_v7 = vsel %vm1638_vm7, %v2430_v11, %v6307_v49  ;;  %v2447_v28 = vsel %vm1638_vm7, %v2431_v20, %v6308_v45 }
 0x5cf   :  { %2587 = vmatmul.mubr.f32.gmra.mrb[12].mxu1 %v2444_v23 }
 0x5d0   :  { %5637 = vmatprep.mubr.msk.f32.mxu1 %vm1051_vm4, %v2391_v48  ;;  %v2400_v48 = vrot.slane %v9067_v41, 4 }
 0x5d1   :  { %v6311_v31 = vpop.permute.xlu0 %6310  ;;  %v6316_v54 = vpop.permute.xlu1 %6315 }
 0x5d2   :  { %v6312_v19 = vunpack.i.l.bf16 %v6311_v31  ;;  %v6317_v10 = vunpack.i.l.bf16 %v6316_v54  ;;  %v6313_v38 = vunpack.i.h.bf16 %v6311_v31  ;;  %v6318_v50 = vunpack.i.h.bf16 %v6316_v54 }
 0x5d3   :  { %2592 = vmatmul.mubr.f32.gmra.mrb[14].mxu1 %v2445_v22 }
 0x5d4   :  { %5638 = vmatprep.mubr.msk.f32.mxu1 %vm1051_vm4, %v2393_v29  ;;  %v2416_v25 = vsel %vm1051_vm4, %v9019_v58, %v6312_v19  ;;  %v2417_v6 = vsel %vm1051_vm4, %v9048_v15, %v6313_v38  ;;  %v2399_v58 = vsel %vm949_vm3, %v2396_v16, %v2398_v8  ;;  %v2401_v15 = vsel %vm949_vm3, %v2398_v8, %v2400_v48 }
 0x5d5   :  { %v6321_v37 = vpop.permute.xlu0 %6320  ;;  %v6326_v43 = vpop.permute.xlu1 %6325  ;;  %v2432_v46 = vsel %vm1621_vm6, %v2416_v25, %v6317_v10  ;;  %v2433_v33 = vsel %vm1621_vm6, %v2417_v6, %v6318_v50  ;;  %v2402_v29 = vrot.slane %v9071_v14, 4  ;;  %v2404_v19 = vrot.slane %v9089_v42, 4 }
 0x5d6   :  { %v6322_v4 = vunpack.i.l.bf16 %v6321_v37  ;;  %v6323_v61 = vunpack.i.h.bf16 %v6321_v37  ;;  %v6327_v53 = vunpack.i.l.bf16 %v6326_v43  ;;  %v6328_v36 = vunpack.i.h.bf16 %v6326_v43 }
 0x5d7   :  { %2597 = vmatmul.mubr.f32.gmra.mrb[16].mxu1 %v2446_v7 }
 0x5d8   :  { %5639 = vmatprep.mubr.msk.f32.mxu1 %vm1051_vm4, %v2395_v52  ;;  %v2448_v23 = vsel %vm1638_vm7, %v2432_v46, %v6322_v4  ;;  %v2449_v49 = vsel %vm1638_vm7, %v2433_v33, %v6323_v61  ;;  %v2418_v22 = vsel %vm1051_vm4, %v9057_v12, %v6327_v53  ;;  %v2419_v11 = vsel %vm1051_vm4, %v9067_v41, %v6328_v36 }
 0x5d9   :  { %v6331_v27 = vpop.permute.xlu0 %6330  ;;  %v6336_v26 = vpop.permute.xlu1 %6335  ;;  %v2403_v12 = vsel %vm949_vm3, %v2400_v48, %v2402_v29  ;;  %v2405_v41 = vsel %vm949_vm3, %v2402_v29, %v2404_v19 }
 0x5da   :  { %v6332_v47 = vunpack.i.l.bf16 %v6331_v27  ;;  %v6337_v59 = vunpack.i.l.bf16 %v6336_v26  ;;  %v6333_v32 = vunpack.i.h.bf16 %v6331_v27  ;;  %v6338_v31 = vunpack.i.h.bf16 %v6336_v26 }
 0x5db   :  { %2602 = vmatmul.mubr.f32.gmra.mrb[18].mxu1 %v2447_v28  ;;  %v9214_v28 = vld [vmem:[#allocation16] ss:$0 sm:$0xff] }
 0x5dc   :  { %5640 = vmatprep.mubr.msk.f32.mxu1 %vm1051_vm4, %v2397_v21  ;;  %v2434_v1 = vsel %vm1621_vm6, %v2418_v22, %v6332_v47  ;;  %v2435_v60 = vsel %vm1621_vm6, %v2419_v11, %v6333_v32 }
 0x5dd   :  { %v2198_v39 = vpop.permute.xlu0 %2197  ;;  %v2277_v17 = vpop.permute.xlu1 %2276  ;;  %v2450_v54 = vsel %vm1638_vm7, %v2434_v1, %v6337_v59  ;;  %v2451_v52 = vsel %vm1638_vm7, %v2435_v60, %v6338_v31 }
 0x5de   :  { %v2420_v10 = vsel %vm1051_vm4, %v9071_v14, %v2198_v39 }
 0x5df   :  { %2607 = vmatmul.mubr.f32.gmra.mrb[20].mxu1 %v2448_v23  ;;  %v2436_v16 = vsel %vm1621_vm6, %v2420_v10, %v2277_v17 }
 0x5e0   :  { %5641 = vmatprep.mubr.msk.f32.mxu1 %vm1051_vm4, %v2399_v58 }
 0x5e1   :  { %v2356_v45 = vpop.permute.xlu0 %2355  ;;  %v2200_v7 = vpop.permute.xlu1 %2199 }
 0x5e2   :  { %v2421_v43 = vsel %vm1051_vm4, %v9089_v42, %v2200_v7  ;;  %v2452_v20 = vsel %vm1638_vm7, %v2436_v16, %v2356_v45 }
 0x5e3   :  { %2612 = vmatmul.mubr.f32.gmra.mrb[22].mxu1 %v2449_v49 }
 0x5e4   :  { %5642 = vmatprep.mubr.msk.f32.mxu1 %vm1051_vm4, %v2401_v15 }
 0x5e5   :  { %v2279_v37 = vpop.permute.xlu0 %2278  ;;  %v2358_v38 = vpop.permute.xlu1 %2357 }
 0x5e6   :  { %v2437_v14 = vsel %vm1621_vm6, %v2421_v43, %v2279_v37 }
 0x5e7   :  { %2617 = vmatmul.mubr.f32.gmra.mrb[24].mxu1 %v2450_v54  ;;  %v2453_v4 = vsel %vm1638_vm7, %v2437_v14, %v2358_v38 }
 0x5e8   :  { %5643 = vmatprep.mubr.msk.f32.mxu1 %vm1051_vm4, %v2403_v12 }
 0x5eb   :  { %2622 = vmatmul.mubr.f32.gmra.mrb[26].mxu1 %v2451_v52 }
 0x5ec   :  { %5644 = vmatprep.mubr.msk.f32.mxu1 %vm1051_vm4, %v2405_v41 }
 0x5ef   :  { %2627 = vmatmul.mubr.f32.gmra.mrb[28].mxu1 %v2452_v20 }
 0x5f0   :  { %5645 = vmatprep.mubr.msk.f32.mxu1 %vm1051_vm4, %v2404_v19 }
 0x5f3   :  { %2632 = vmatmul.mubr.f32.gmra.mrb[30].mxu1 %v2453_v4 }
 0x68a   :  { %v2558_v25 = vpop.f32.mrb[0].mxu1 }
 0x68b   :  { %v2559_v50 = vadd.f32 %v9214_v28, %v2558_v25  ;;  %v2560_v21 = vpop.f32.mrb[1].mxu1 }
 0x68d   :  { %v9218_v46 = vadd.f32 %v2559_v50, %v7791_v2 }
 0x68e   :  { %v2563_v42 = vpop.f32.mrb[2].mxu1 }
 0x68f   :  { %v2564_v8 = vadd.f32 %v9214_v28, %v2563_v42  ;;  %v2565_v27 = vpop.f32.mrb[3].mxu1  ;;  %v2653_v26 = vmul.f32 %v9218_v46, %v9218_v46  ;;  %v2669_v23 = vsel %vm1051_vm4, %v9218_v46, 0.0 }
 0x691   :  { %v9224_v61 = vadd.f32 %v2564_v8, %v7798_v9  ;;  %v2691_v47 = vsel %vm1051_vm4, %v2653_v26, 0.0 }
 0x692   :  { %v2568_v53 = vpop.f32.mrb[4].mxu1 }
 0x693   :  { %v2654_v6 = vmul.f32 %v9224_v61, %v9224_v61  ;;  %v2670_v2 = vsel %vm1051_vm4, %v9224_v61, 0.0  ;;  %v2569_v58 = vadd.f32 %v9214_v28, %v2568_v53  ;;  %v2570_v33 = vpop.f32.mrb[5].mxu1 }
 0x694   :  { %v2671_v48 = vadd.f32 %v2670_v2, %v2669_v23 }
 0x695   :  { %v2692_v36 = vsel %vm1051_vm4, %v2654_v6, 0.0  ;;  %v9236_v9 = vadd.f32 %v2569_v58, %v7934_v63 }
 0x696   :  { %v2693_v39 = vadd.f32 %v2692_v36, %v2691_v47  ;;  %v2573_v59 = vpop.f32.mrb[6].mxu1 }
 0x697   :  { %v2655_v49 = vmul.f32 %v9236_v9, %v9236_v9  ;;  %v2672_v22 = vsel %vm1051_vm4, %v9236_v9, 0.0  ;;  %v2574_v17 = vadd.f32 %v9214_v28, %v2573_v59  ;;  %v2575_v15 = vpop.f32.mrb[7].mxu1 }
 0x698   :  { %v2673_v29 = vadd.f32 %v2672_v22, %v2671_v48 }
 0x699   :  { %v2694_v32 = vsel %vm1051_vm4, %v2655_v49, 0.0  ;;  %v9245_v1 = vadd.f32 %v2574_v17, %v8026_v44 }
 0x69a   :  { %v2695_v31 = vadd.f32 %v2694_v32, %v2693_v39  ;;  %v2578_v63 = vpop.f32.mrb[8].mxu1 }
 0x69b   :  { %v2656_v54 = vmul.f32 %v9245_v1, %v9245_v1  ;;  %v2674_v11 = vsel %vm1051_vm4, %v9245_v1, 0.0  ;;  %v2579_v12 = vadd.f32 %v9214_v28, %v2578_v63  ;;  %v2580_v19 = vpop.f32.mrb[9].mxu1 }
 0x69c   :  { %v2675_v45 = vadd.f32 %v2674_v11, %v2673_v29 }
 0x69d   :  { %v2696_v7 = vsel %vm1051_vm4, %v2656_v54, 0.0  ;;  %v9254_v60 = vadd.f32 %v2579_v12, %v8077_v55 }
 0x69e   :  { %v2697_v10 = vadd.f32 %v2696_v7, %v2695_v31  ;;  %v2583_v44 = vpop.f32.mrb[10].mxu1 }
 0x69f   :  { %v2657_v52 = vmul.f32 %v9254_v60, %v9254_v60  ;;  %v2676_v16 = vsel %vm1051_vm4, %v9254_v60, 0.0  ;;  %v2584_v41 = vadd.f32 %v9214_v28, %v2583_v44  ;;  %v2585_v37 = vpop.f32.mrb[11].mxu1 }
 0x6a0   :  { %v2677_v43 = vadd.f32 %v2676_v16, %v2675_v45 }
 0x6a1   :  { %v2698_v20 = vsel %vm1051_vm4, %v2657_v52, 0.0  ;;  %v9263_v38 = vadd.f32 %v2584_v41, %v8141_v3 }
 0x6a2   :  { %v2699_v14 = vadd.f32 %v2698_v20, %v2697_v10  ;;  %v2588_v55 = vpop.f32.mrb[12].mxu1 }
 0x6a3   :  { %v2658_v4 = vmul.f32 %v9263_v38, %v9263_v38  ;;  %v2678_v25 = vsel %vm1051_vm4, %v9263_v38, 0.0  ;;  %v2589_v50 = vadd.f32 %v9214_v28, %v2588_v55  ;;  %v2590_v21 = vpop.f32.mrb[13].mxu1 }
 0x6a4   :  { %v2679_v42 = vadd.f32 %v2678_v25, %v2677_v43 }
 0x6a5   :  { %v2700_v8 = vsel %vm1051_vm4, %v2658_v4, 0.0  ;;  %v9272_v27 = vadd.f32 %v2589_v50, %v8200_v35 }
 0x6a6   :  { %v2701_v26 = vadd.f32 %v2700_v8, %v2699_v14  ;;  %v2593_v3 = vpop.f32.mrb[14].mxu1 }
 0x6a7   :  { %v2659_v53 = vmul.f32 %v9272_v27, %v9272_v27  ;;  %v2680_v23 = vsel %vm1051_vm4, %v9272_v27, 0.0  ;;  %v2594_v6 = vadd.f32 %v9214_v28, %v2593_v3  ;;  %v2595_v2 = vpop.f32.mrb[15].mxu1 }
 0x6a8   :  { %v2681_v58 = vadd.f32 %v2680_v23, %v2679_v42 }
 0x6a9   :  { %v2702_v33 = vsel %vm1051_vm4, %v2659_v53, 0.0  ;;  %v9281_v48 = vadd.f32 %v2594_v6, %v8203_v30 }
 0x6aa   :  { %v2703_v47 = vadd.f32 %v2702_v33, %v2701_v26  ;;  %v2598_v35 = vpop.f32.mrb[16].mxu1 }
 0x6ab   :  { %v2660_v36 = vmul.f32 %v9281_v48, %v9281_v48  ;;  %v2682_v39 = vsel %vm494_vm5, %v9281_v48, 0.0  ;;  %v2600_v59 = vpop.f32.mrb[17].mxu1  ;;  %v2599_v15 = vadd.f32 %v9214_v28, %v2598_v35 }
 0x6ac   :  { %v9287_v49 = vadd.f32 %v2682_v39, %v2681_v58 }
 0x6ad   :  { %v2704_v22 = vsel %vm494_vm5, %v2660_v36, 0.0  ;;  %v9298_v63 = vadd.f32 %v2599_v15, %v7845_v62 }
 0x6ae   :  { %v9290_v17 = vadd.f32 %v2704_v22, %v2703_v47  ;;  %v2603_v29 = vpop.f32.mrb[18].mxu1 }
 0x6af   :  { %v2604_v30 = vadd.f32 %v9214_v28, %v2603_v29  ;;  %v2605_v32 = vpop.f32.mrb[19].mxu1  ;;  %v2661_v7 = vmul.f32 %v9298_v63, %v9298_v63  ;;  %v2713_v16 = vsel %vm1051_vm4, %v9298_v63, 0.0 }
 0x6b0   :  { %v2684_v32 = vrot.slane %v9287_v49, 4 }
 0x6b1   :  { %v9295_v31 = vadd.f32 %v2604_v30, %v7848_v5  ;;  %v2735_v43 = vsel %vm1051_vm4, %v2661_v7, 0.0 }
 0x6b2   :  { %v2608_v54 = vpop.f32.mrb[20].mxu1 }
 0x6b3   :  { %v2609_v11 = vadd.f32 %v9214_v28, %v2608_v54  ;;  %v2610_v12 = vpop.f32.mrb[21].mxu1  ;;  %v2662_v19 = vmul.f32 %v9295_v31, %v9295_v31  ;;  %v2714_v5 = vsel %vm1051_vm4, %v9295_v31, 0.0 }
 0x6b4   :  { %v2715_v20 = vadd.f32 %v2714_v5, %v2713_v16 }
 0x6b5   :  { %v9304_v45 = vadd.f32 %v2609_v11, %v7895_v57  ;;  %v2736_v41 = vsel %vm1051_vm4, %v2662_v19, 0.0 }
 0x6b6   :  { %v2613_v10 = vpop.f32.mrb[22].mxu1  ;;  %v2737_v42 = vadd.f32 %v2736_v41, %v2735_v43 }
 0x6b7   :  { %v2663_v62 = vmul.f32 %v9304_v45, %v9304_v45  ;;  %v2614_v44 = vadd.f32 %v9214_v28, %v2613_v10  ;;  %v2615_v52 = vpop.f32.mrb[23].mxu1  ;;  %v2716_v57 = vsel %vm1051_vm4, %v9304_v45, 0.0 }
 0x6b8   :  { %v2717_v8 = vadd.f32 %v2716_v57, %v2715_v20  ;;  %v2685_v52 = vadd.f32 %v2684_v32, %v9287_v49 }
 0x6b9   :  { %v9319_v37 = vadd.f32 %v2614_v44, %v7972_v40  ;;  %v2738_v55 = vsel %vm1051_vm4, %v2663_v62, 0.0 }
 0x6ba   :  { %v2618_v14 = vpop.f32.mrb[24].mxu1  ;;  %v2739_v3 = vadd.f32 %v2738_v55, %v2737_v42 }
 0x6bb   :  { %v2664_v4 = vmul.f32 %v9319_v37, %v9319_v37  ;;  %v2718_v25 = vsel %vm1051_vm4, %v9319_v37, 0.0  ;;  %v2619_v50 = vadd.f32 %v9214_v28, %v2618_v14  ;;  %v2620_v21 = vpop.f32.mrb[25].mxu1  ;;  %v2686_v14 = vrot.slane %v2685_v52, 2 }
 0x6bc   :  { %v2719_v53 = vadd.f32 %v2718_v25, %v2717_v8 }
 0x6bd   :  { %v2740_v40 = vsel %vm1051_vm4, %v2664_v4, 0.0  ;;  %v9330_v26 = vadd.f32 %v2619_v50, %v8035_v13  ;;  %v2687_v50 = vadd.f32 %v2686_v14, %v2685_v52  ;;  %v2970_v14 = vld [vmem:[%s10688_s25 + $0x50] sm:$0xff] }
 0x6be   :  { %v2623_v23 = vpop.f32.mrb[26].mxu1  ;;  %v2741_v47 = vadd.f32 %v2740_v40, %v2739_v3  ;;  %v2960_v3 = vld [vmem:[%s10688_s25] sm:$0xff] }
 0x6bf   :  { %v2665_v6 = vmul.f32 %v9330_v26, %v9330_v26  ;;  %v2720_v2 = vsel %vm1051_vm4, %v9330_v26, 0.0  ;;  %v2624_v58 = vadd.f32 %v9214_v28, %v2623_v23  ;;  %v2625_v33 = vpop.f32.mrb[27].mxu1  ;;  %v2962_v23 = vld [vmem:[%s10688_s25 + $0x10] sm:$0xff] }
 0x6c0   :  { %v2721_v35 = vadd.f32 %v2720_v2, %v2719_v53  ;;  %v2961_v53 = vld [vmem:[%s10688_s25 + $0x8] sm:$0xff]  ;;  %v2963_v2 = vld [vmem:[%s10688_s25 + $0x18] sm:$0xff] }
 0x6c1   :  { %v2742_v36 = vsel %vm1051_vm4, %v2665_v6, 0.0  ;;  %v9339_v39 = vadd.f32 %v2624_v58, %v8108_v51  ;;  %v2706_v51 = vrot.slane %v9290_v17, 4  ;;  %v5948_v6 = vpack.c.bf16 %v2961_v53, %v2960_v3  ;;  %v2977_v3 = vld [vmem:[%s10688_s25 + $0x88] sm:$0xff] }
 0x6c2   :  { %v2743_v13 = vadd.f32 %v2742_v36, %v2741_v47  ;;  %v2628_v59 = vpop.f32.mrb[28].mxu1  ;;  %v2688_v58 = vrot.slane %v2687_v50, 1 }
 0x6c3   :  { %v2666_v22 = vmul.f32 %v9339_v39, %v9339_v39  ;;  %v2722_v15 = vsel %vm1051_vm4, %v9339_v39, 0.0  ;;  %v2629_v29 = vadd.f32 %v9214_v28, %v2628_v59  ;;  %v2630_v30 = vpop.f32.mrb[29].mxu1  ;;  %v2707_v57 = vadd.f32 %v2706_v51, %v9290_v17  ;;  %5949 = vmatpush1.bf16.msra.mxu0 %v5948_v6 }
 0x6c4   :  { %v2723_v54 = vadd.f32 %v2722_v15, %v2721_v35  ;;  %v5951_v35 = vpack.c.bf16 %v2963_v2, %v2962_v23  ;;  %5950 = vmatprep.subr.bf16.mxu0 %v7360_v18  ;;  %v2965_v15 = vld [vmem:[%s10688_s25 + $0x28] sm:$0xff]  ;;  %v493_v2 = vld [vmem:[#allocation19] sm:$0x1] }
 0x6c5   :  { %v2744_v11 = vsel %vm1051_vm4, %v2666_v22, 0.0  ;;  %v9349_v12 = vadd.f32 %v2629_v29, %v8160_v56  ;;  %v2708_v4 = vrot.slane %v2707_v57, 2  ;;  %v2964_v22 = vld [vmem:[%s10688_s25 + $0x20] sm:$0xff]  ;;  %v2689_v29 = vadd.f32 %v2688_v58, %v2687_v50 }
 0x6c6   :  { %v2745_v19 = vadd.f32 %v2744_v11, %v2743_v13  ;;  %v2633_v7 = vpop.f32.mrb[30].mxu1 }
 0x6c7   :  { %v2667_v10 = vmul.f32 %v9349_v12, %v9349_v12  ;;  %v2724_v5 = vsel %vm1051_vm4, %v9349_v12, 0.0  ;;  %v2634_v62 = vadd.f32 %v9214_v28, %v2633_v7  ;;  %v2635_v44 = vpop.f32.mrb[31].mxu1  ;;  %v2709_v42 = vadd.f32 %v2708_v4, %v2707_v57  ;;  %5952 = vmatpush1.bf16.msra.mxu0 %v5951_v35  ;;  %v2966_v7 = vld [vmem:[%s10688_s25 + $0x30] sm:$0xff]  ;;  %v2969_v57 = vld [vmem:[%s10688_s25 + $0x48] sm:$0xff] }
 0x6c8   :  { %v2725_v16 = vadd.f32 %v2724_v5, %v2723_v54  ;;  %v5954_v54 = vpack.c.bf16 %v2965_v15, %v2964_v22  ;;  %5953 = vmatprep.subr.bf16.mxu0 %v7360_v18 }
 0x6c9   :  { %v2746_v41 = vsel %vm1051_vm4, %v2667_v10, 0.0  ;;  %v9360_v56 = vadd.f32 %v2634_v62, %v8157_v0  ;;  %v2710_v36 = vrot.slane %v2709_v42, 1  ;;  %v2967_v10 = vld [vmem:[%s10688_s25 + $0x38] sm:$0xff] }
 0x6ca   :  { %v2747_v43 = vadd.f32 %v2746_v41, %v2745_v19  ;;  %v5957_v44 = vpack.c.bf16 %v2967_v10, %v2966_v7  ;;  %v2968_v41 = vld [vmem:[%s10688_s25 + $0x40] sm:$0xff] }
 0x6cb   :  { %v2668_v20 = vmul.f32 %v9360_v56, %v9360_v56  ;;  %v2726_v28 = vsel %vm494_vm5, %v9360_v56, 0.0  ;;  %v2711_v11 = vadd.f32 %v2710_v36, %v2709_v42  ;;  %5955 = vmatpush1.bf16.msra.mxu0 %v5954_v54 }
 0x6cc   :  { %v2727_v49 = vadd.f32 %v2726_v28, %v2725_v16  ;;  %5956 = vmatprep.subr.bf16.mxu0 %v7360_v18 }
 0x6cd   :  { %v2748_v55 = vsel %vm494_vm5, %v2668_v20, 0.0  ;;  %v5960_v20 = vpack.c.bf16 %v2969_v57, %v2968_v41 }
 0x6ce   :  { %v2728_v0 = vrot.slane %v2727_v49, 4  ;;  %v2749_v25 = vadd.f32 %v2748_v55, %v2747_v43 }
 0x6cf   :  { %5958 = vmatpush1.bf16.msra.mxu0 %v5957_v44 }
 0x6d0   :  { %v2729_v17 = vadd.f32 %v2728_v0, %v2727_v49  ;;  %v2750_v21 = vrot.slane %v2749_v25, 4  ;;  %5959 = vmatprep.subr.bf16.mxu0 %v7360_v18  ;;  %v2971_v49 = vld [vmem:[%s10688_s25 + $0x58] sm:$0xff]  ;;  %v2972_v0 = vld [vmem:[%s10688_s25 + $0x60] sm:$0xff] }
 0x6d1   :  { %v5963_v4 = vpack.c.bf16 %v2971_v49, %v2970_v14 }
 0x6d2   :  { %v2730_v8 = vrot.slane %v2729_v17, 2  ;;  %v2751_v40 = vadd.f32 %v2750_v21, %v2749_v25  ;;  %v2973_v25 = vld [vmem:[%s10688_s25 + $0x68] sm:$0xff]  ;;  %v2975_v21 = vld [vmem:[%s10688_s25 + $0x78] sm:$0xff] }
 0x6d3   :  { %5961 = vmatpush1.bf16.msra.mxu0 %v5960_v20  ;;  %v5966_v50 = vpack.c.bf16 %v2973_v25, %v2972_v0 }
 0x6d4   :  { %v2731_v33 = vadd.f32 %v2730_v8, %v2729_v17  ;;  %v2752_v47 = vrot.slane %v2751_v40, 2  ;;  %5962 = vmatprep.subr.bf16.mxu0 %v7360_v18  ;;  %v2974_v17 = vld [vmem:[%s10688_s25 + $0x70] sm:$0xff]  ;;  %v492_v8 = vld [vmem:[#allocation17] sm:$0x1] }
 0x6d5   :  { %v5969_v42 = vpack.c.bf16 %v2975_v21, %v2974_v17 }
 0x6d6   :  { %v2732_v13 = vrot.slane %v2731_v33, 1  ;;  %v2753_v59 = vadd.f32 %v2752_v47, %v2751_v40  ;;  %v2976_v40 = vld [vmem:[%s10688_s25 + $0x80] sm:$0xff] }
 0x6d7   :  { %5964 = vmatpush1.bf16.msra.mxu0 %v5963_v4  ;;  %v5972_v6 = vpack.c.bf16 %v2977_v3, %v2976_v40 }
 0x6d8   :  { %v2733_v30 = vadd.f32 %v2732_v13, %v2731_v33  ;;  %v2754_v32 = vrot.slane %v2753_v59, 1  ;;  %5965 = vmatprep.subr.bf16.mxu0 %v7360_v18 }
 0x6da   :  { %v2734_v51 = vadd.f32 %v2733_v30, %v2689_v29  ;;  %v2755_v19 = vadd.f32 %v2754_v32, %v2753_v59 }
 0x6db   :  { %5967 = vmatpush1.bf16.msra.mxu0 %v5966_v50 }
 0x6dc   :  { %v2756_v5 = vadd.f32 %v2755_v19, %v2711_v11  ;;  %v2757_v62 = vmul.f32 0.008333334, %v2734_v51  ;;  %5968 = vmatprep.subr.bf16.mxu0 %v7360_v18 }
 0x6de   :  { %v2758_v52 = vmul.f32 0.008333334, %v2756_v5  ;;  %v2759_v16 = vmul.f32 %v2757_v62, %v2757_v62 }
 0x6df   :  { %5970 = vmatpush1.bf16.msra.mxu0 %v5969_v42 }
 0x6e0   :  { %v2760_v43 = vsub.f32 %v2758_v52, %v2759_v16  ;;  %5971 = vmatprep.subr.bf16.mxu0 %v7360_v18 }
 0x6e2   :  { %v2761_v28 = vmax.f32 %v2760_v43, 0.0 }
 0x6e3   :  { %5973 = vmatpush1.bf16.msra.mxu0 %v5972_v6 }
 0x6e4   :  { %v2762_v55 = vadd.f32 1e-05, %v2761_v28  ;;  %5974 = vmatprep.subr.bf16.mxu0 %v7360_v18 }
 0x6e6   :  { %6516 = vrsqrt.f32 %v2762_v55 }
 0x6f0   :  { %v6517_v53 = vpop.eup %6516 }
 0x6f1   :  { %v2764_v23 = vmul.f32 %v6517_v53, %v492_v8 }
 0x6f3   :  { %v2765_v58 = vmul.f32 %v2764_v23, %v2757_v62  ;;  %v9395_v33 = vrot.slane %v2764_v23, %v7684_v24 }
 0x6f5   :  { %v2766_v47 = vsub.f32 %v493_v2, %v2765_v58  ;;  %v2786_v35 = vmul.f32 %v9395_v33, %v9360_v56  ;;  %v2771_v36 = vmul.f32 %v9395_v33, %v9218_v46  ;;  %v2772_v13 = vmul.f32 %v9395_v33, %v9224_v61 }
 0x6f6   :  { %v2773_v59 = vmul.f32 %v9395_v33, %v9236_v9  ;;  %v2774_v22 = vmul.f32 %v9395_v33, %v9245_v1  ;;  %v2775_v15 = vmul.f32 %v9395_v33, %v9254_v60  ;;  %v2776_v29 = vmul.f32 %v9395_v33, %v9263_v38 }
 0x6f7   :  { %v2791_v46 = vrot.slane %v2766_v47, %v7684_v24  ;;  %v2777_v61 = vmul.f32 %v9395_v33, %v9272_v27  ;;  %v2778_v56 = vmul.f32 %v9395_v33, %v9281_v48  ;;  %v2779_v9 = vmul.f32 %v9395_v33, %v9298_v63 }
 0x6f8   :  { %v2780_v1 = vmul.f32 %v9395_v33, %v9295_v31  ;;  %v2782_v60 = vmul.f32 %v9395_v33, %v9319_v37  ;;  %v2783_v18 = vmul.f32 %v9395_v33, %v9330_v26  ;;  %v2781_v43 = vmul.f32 %v9395_v33, %v9304_v45 }
 0x6f9   :  { %v9425_v38 = vadd.f32 %v2791_v46, %v2786_v35  ;;  %v9427_v30 = vadd.f32 %v2791_v46, %v2771_v36  ;;  %v9429_v27 = vadd.f32 %v2791_v46, %v2772_v13  ;;  %v9431_v32 = vadd.f32 %v2791_v46, %v2773_v59 }
 0x6fa   :  { %v9433_v48 = vadd.f32 %v2791_v46, %v2774_v22  ;;  %v9435_v63 = vadd.f32 %v2791_v46, %v2775_v15  ;;  %v9437_v54 = vadd.f32 %v2791_v46, %v2776_v29  ;;  %v9439_v31 = vadd.f32 %v2791_v46, %v2777_v61 }
 0x6fb   :  { %v2824_v37 = vsub.f32 0.0, %v9425_v38  ;;  %v2809_v26 = vsub.f32 0.0, %v9427_v30  ;;  %v2810_v11 = vsub.f32 0.0, %v9429_v27  ;;  %v2811_v51 = vsub.f32 0.0, %v9431_v32 }
 0x6fc   :  { %v2812_v19 = vsub.f32 0.0, %v9433_v48  ;;  %v2813_v7 = vsub.f32 0.0, %v9435_v63  ;;  %v2814_v10 = vsub.f32 0.0, %v9437_v54  ;;  %v9448_v5 = vadd.f32 %v2791_v46, %v2778_v56 }
 0x6fd   :  { %v2855_v62 = vmul.f32 1.442695, %v2824_v37  ;;  %v2825_v44 = vmul.f32 1.442695, %v2809_v26  ;;  %v2827_v52 = vmul.f32 1.442695, %v2810_v11  ;;  %v9450_v16 = vadd.f32 %v2791_v46, %v2779_v9 }
 0x6fe   :  { %v2829_v41 = vmul.f32 1.442695, %v2811_v51  ;;  %v9452_v57 = vadd.f32 %v2791_v46, %v2780_v1  ;;  %v2831_v20 = vmul.f32 1.442695, %v2812_v19  ;;  %v2815_v28 = vsub.f32 0.0, %v9439_v31 }
 0x6ff   :  { %6518 = vpow2.f32 %v2855_v62  ;;  %v2816_v14 = vsub.f32 0.0, %v9448_v5  ;;  %v2833_v49 = vmul.f32 1.442695, %v2813_v7  ;;  %v2817_v55 = vsub.f32 0.0, %v9450_v16 }
 0x700   :  { %6520 = vpow2.f32 %v2825_v44  ;;  %v2784_v4 = vmul.f32 %v9395_v33, %v9339_v39  ;;  %v2835_v0 = vmul.f32 1.442695, %v2814_v10  ;;  %v2818_v25 = vsub.f32 0.0, %v9452_v57 }
 0x701   :  { %6522 = vpow2.f32 %v2827_v52  ;;  %v9462_v50 = vadd.f32 %v2791_v46, %v2781_v43  ;;  %v2837_v45 = vmul.f32 1.442695, %v2815_v28  ;;  %v2839_v17 = vmul.f32 1.442695, %v2816_v14 }
 0x702   :  { %6524 = vpow2.f32 %v2829_v41  ;;  %v9464_v21 = vadd.f32 %v2791_v46, %v2782_v60  ;;  %v9466_v42 = vadd.f32 %v2791_v46, %v2783_v18  ;;  %v9468_v8 = vadd.f32 %v2791_v46, %v2784_v4 }
 0x703   :  { %6526 = vpow2.f32 %v2831_v20  ;;  %v2819_v40 = vsub.f32 0.0, %v9462_v50  ;;  %v2841_v39 = vmul.f32 1.442695, %v2817_v55  ;;  %v2785_v53 = vmul.f32 %v9395_v33, %v9349_v12 }
 0x704   :  { %6528 = vpow2.f32 %v2833_v49  ;;  %v2820_v3 = vsub.f32 0.0, %v9464_v21  ;;  %v2843_v23 = vmul.f32 1.442695, %v2818_v25  ;;  %v2821_v9 = vsub.f32 0.0, %v9466_v42 }
 0x705   :  { %6530 = vpow2.f32 %v2835_v0  ;;  %v2845_v6 = vmul.f32 1.442695, %v2819_v40  ;;  %v9474_v2 = vadd.f32 %v2791_v46, %v2785_v53  ;;  %v2822_v18 = vsub.f32 0.0, %v9468_v8 }
 0x706   :  { %6532 = vpow2.f32 %v2837_v45  ;;  %v2847_v58 = vmul.f32 1.442695, %v2820_v3  ;;  %v2849_v10 = vmul.f32 1.442695, %v2821_v9  ;;  %v2978_v9 = vld [vmem:[%s10688_s25 + $0x90] sm:$0xff] }
 0x707   :  { %6534 = vpow2.f32 %v2839_v17  ;;  %v2823_v62 = vsub.f32 0.0, %v9474_v2  ;;  %v2851_v41 = vmul.f32 1.442695, %v2822_v18 }
 0x708   :  { %6536 = vpow2.f32 %v2841_v39 }
 0x709   :  { %v6519_v47 = vpop.eup %6518  ;;  %6538 = vpow2.f32 %v2843_v23  ;;  %v2853_v4 = vmul.f32 1.442695, %v2823_v62 }
 0x70a   :  { %v6521_v35 = vpop.eup %6520  ;;  %v2872_v36 = vadd.f32 1.0, %v6519_v47  ;;  %6540 = vpow2.f32 %v2845_v6 }
 0x70b   :  { %v6523_v13 = vpop.eup %6522  ;;  %v2857_v59 = vadd.f32 1.0, %v6521_v35  ;;  %6542 = vpow2.f32 %v2847_v58 }
 0x70c   :  { %v6525_v22 = vpop.eup %6524  ;;  %6544 = vrcp.f32 %v2872_v36  ;;  %v2858_v12 = vadd.f32 1.0, %v6523_v13 }
 0x70d   :  { %v6527_v33 = vpop.eup %6526  ;;  %v2859_v15 = vadd.f32 1.0, %v6525_v22  ;;  %6546 = vrcp.f32 %v2857_v59 }
 0x70e   :  { %v6529_v29 = vpop.eup %6528  ;;  %v2860_v46 = vadd.f32 1.0, %v6527_v33  ;;  %6548 = vrcp.f32 %v2858_v12 }
 0x70f   :  { %v6531_v61 = vpop.eup %6530  ;;  %6550 = vrcp.f32 %v2859_v15  ;;  %v2861_v56 = vadd.f32 1.0, %v6529_v29 }
 0x710   :  { %v6533_v1 = vpop.eup %6532  ;;  %6552 = vrcp.f32 %v2860_v46  ;;  %v2862_v60 = vadd.f32 1.0, %v6531_v61 }
 0x711   :  { %v6535_v37 = vpop.eup %6534  ;;  %6554 = vrcp.f32 %v2861_v56  ;;  %v2863_v26 = vadd.f32 1.0, %v6533_v1  ;;  %v2979_v1 = vld [vmem:[%s10688_s25 + $0x98] sm:$0xff] }
 0x712   :  { %v6537_v11 = vpop.eup %6536  ;;  %6556 = vrcp.f32 %v2862_v60  ;;  %v2864_v51 = vadd.f32 1.0, %v6535_v37 }
 0x713   :  { %v6539_v19 = vpop.eup %6538  ;;  %v2865_v7 = vadd.f32 1.0, %v6537_v11  ;;  %6558 = vrcp.f32 %v2863_v26 }
 0x714   :  { %v6541_v44 = vpop.eup %6540  ;;  %v2866_v52 = vadd.f32 1.0, %v6539_v19  ;;  %6560 = vrcp.f32 %v2864_v51 }
 0x715   :  { %v6543_v43 = vpop.eup %6542  ;;  %6562 = vrcp.f32 %v2865_v7  ;;  %v2867_v20 = vadd.f32 1.0, %v6541_v44 }
 0x716   :  { %v6545_v28 = vpop.eup %6544  ;;  %6564 = vrcp.f32 %v2866_v52  ;;  %v2868_v14 = vadd.f32 1.0, %v6543_v43 }
 0x717   :  { %v6547_v49 = vpop.eup %6546  ;;  %v2904_v55 = vmul.f32 %v6545_v28, %v9425_v38  ;;  %6566 = vpow2.f32 %v2849_v10 }
 0x718   :  { %v6549_v0 = vpop.eup %6548  ;;  %v2889_v25 = vmul.f32 %v6547_v49, %v9427_v30  ;;  %6568 = vpow2.f32 %v2851_v41 }
 0x719   :  { %v6551_v45 = vpop.eup %6550  ;;  %2920 = vst.msk [vmem:[#allocation2 + $0x7c] sm:$0xf] %vm494_vm5, %v2904_v55  ;;  %v2890_v17 = vmul.f32 %v6549_v0, %v9429_v27  ;;  %6570 = vrcp.f32 %v2867_v20 }
 0x71a   :  { %v6553_v40 = vpop.eup %6552  ;;  %v2891_v39 = vmul.f32 %v6551_v45, %v9431_v32  ;;  %2905 = vst.msk [vmem:[#allocation2 + $0x4] sm:$0xff] %vm1051_vm4, %v2889_v25  ;;  %6572 = vrcp.f32 %v2868_v14 }
 0x71b   :  { %v6555_v3 = vpop.eup %6554  ;;  %v2892_v38 = vmul.f32 %v6553_v40, %v9433_v48  ;;  %2906 = vst.msk [vmem:[#allocation2 + $0xc] sm:$0xff] %vm1051_vm4, %v2890_v17  ;;  %6574 = vpow2.f32 %v2853_v4 }
 0x71c   :  { %v6557_v30 = vpop.eup %6556  ;;  %2907 = vst.msk [vmem:[#allocation2 + $0x14] sm:$0xff] %vm1051_vm4, %v2891_v39  ;;  %v2893_v53 = vmul.f32 %v6555_v3, %v9435_v63 }
 0x71d   :  { %v6559_v23 = vpop.eup %6558  ;;  %2908 = vst.msk [vmem:[#allocation2 + $0x1c] sm:$0xff] %vm1051_vm4, %v2892_v38  ;;  %v2894_v27 = vmul.f32 %v6557_v30, %v9437_v54 }
 0x71e   :  { %v6561_v32 = vpop.eup %6560  ;;  %2909 = vst.msk [vmem:[#allocation2 + $0x24] sm:$0xff] %vm1051_vm4, %v2893_v53  ;;  %v2895_v6 = vmul.f32 %v6559_v23, %v9439_v31 }
 0x71f   :  { %v6563_v58 = vpop.eup %6562  ;;  %2910 = vst.msk [vmem:[#allocation2 + $0x2c] sm:$0xff] %vm1051_vm4, %v2894_v27  ;;  %v2896_v48 = vmul.f32 %v6561_v32, %v9448_v5 }
 0x720   :  { %v6565_v47 = vpop.eup %6564  ;;  %v2897_v35 = vmul.f32 %v6563_v58, %v9450_v16  ;;  %2911 = vst.msk [vmem:[#allocation2 + $0x34] sm:$0xff] %vm1051_vm4, %v2895_v6 }
 0x721   :  { %v6567_v63 = vpop.eup %6566  ;;  %v2898_v36 = vmul.f32 %v6565_v47, %v9452_v57  ;;  %2912 = vst.msk [vmem:[#allocation2 + $0x3c] sm:$0xf] %vm494_vm5, %v2896_v48 }
 0x722   :  { %v6569_v54 = vpop.eup %6568  ;;  %v2921_v13 = vld [vmem:[#allocation2] ss:$2 sm:$0xff]  ;;  %v2937_v59 = vld [vmem:[#allocation2 + $0x1] ss:$2 sm:$0xff]  ;;  %2913 = vst.msk [vmem:[#allocation2 + $0x44] sm:$0xff] %vm1051_vm4, %v2897_v35  ;;  %v2869_v31 = vadd.f32 1.0, %v6567_v63 }
 0x723   :  { %v6571_v22 = vpop.eup %6570  ;;  %v9500_v5 = vmax.f32 %v2921_v13, %v2937_v59  ;;  %2914 = vst.msk [vmem:[#allocation2 + $0x4c] sm:$0xff] %vm1051_vm4, %v2898_v36  ;;  %v2870_v16 = vadd.f32 1.0, %v6569_v54 }
 0x724   :  { %v6573_v12 = vpop.eup %6572  ;;  %v2923_v33 = vld [vmem:[#allocation2 + $0x10] ss:$2 sm:$0xff]  ;;  %v2939_v15 = vld [vmem:[#allocation2 + $0x11] ss:$2 sm:$0xff]  ;;  %6576 = vrcp.f32 %v2869_v31  ;;  %v2899_v57 = vmul.f32 %v6571_v22, %v9462_v50 }
 0x725   :  { %v6575_v29 = vpop.eup %6574  ;;  %v9504_v46 = vmax.f32 %v2923_v33, %v2939_v15  ;;  %v3137_v61 = vrot.slane %v9500_v5, 4  ;;  %v3059_v56 = vrot.slane %v9500_v5, 2  ;;  %v3020_v37 = vrot.slane %v9500_v5, 1 }
 0x726   :  { %v2925_v60 = vld [vmem:[#allocation2 + $0x20] ss:$2 sm:$0xff]  ;;  %v2941_v18 = vld [vmem:[#allocation2 + $0x21] ss:$2 sm:$0xff]  ;;  %6578 = vrcp.f32 %v2870_v16  ;;  %v2900_v26 = vmul.f32 %v6573_v12, %v9464_v21  ;;  %2915 = vst.msk [vmem:[#allocation2 + $0x54] sm:$0xff] %vm1051_vm4, %v2899_v57  ;;  %v2871_v11 = vadd.f32 1.0, %v6575_v29  ;;  %v5975_v21 = vpack.c.bf16 %v2979_v1, %v2978_v9 }
 0x727   :  { %v3138_v50 = vrot.slane %v9504_v46, 4  ;;  %v9514_v51 = vmax.f32 %v2925_v60, %v2941_v18  ;;  %v3060_v19 = vrot.slane %v9504_v46, 2  ;;  %v3021_v7 = vrot.slane %v9504_v46, 1 }
 0x728   :  { %v2927_v10 = vld [vmem:[#allocation2 + $0x30] ss:$2 sm:$0xff]  ;;  %v2943_v62 = vld [vmem:[#allocation2 + $0x31] ss:$2 sm:$0xff]  ;;  %v3098_v44 = vrot.slane %v9500_v5, 3  ;;  %v3099_v52 = vrot.slane %v9504_v46, 3  ;;  %6580 = vrcp.f32 %v2871_v11  ;;  %5976 = vmatpush1.bf16.msra.mxu0 %v5975_v21 }
 0x729   :  { %2916 = vst.msk [vmem:[#allocation2 + $0x5c] sm:$0xff] %vm1051_vm4, %v2900_v26  ;;  %v3139_v41 = vsel %vm949_vm3, %v3137_v61, %v3138_v50  ;;  %v3061_v43 = vsel %vm749_vm1, %v3059_v56, %v3060_v19  ;;  %v3062_v20 = vrot.slane %v9514_v51, 2  ;;  %v3022_v28 = vsel %vm649_vm0, %v3020_v37, %v3021_v7 }
 0x72a   :  { %5647 = vmatprep.mubr.msk.f32.mxu0 %vm1051_vm4, %v3139_v41  ;;  %v3023_v14 = vrot.slane %v9514_v51, 1  ;;  %v2929_v49 = vld [vmem:[#allocation2 + $0x40] ss:$2 sm:$0xff]  ;;  %v2945_v55 = vld [vmem:[#allocation2 + $0x41] ss:$2 sm:$0xff]  ;;  %v9529_v4 = vmax.f32 %v2927_v10, %v2943_v62  ;;  %v3101_v0 = vrot.slane %v9514_v51, 3  ;;  %v3100_v3 = vsel %vm849_vm2, %v3098_v44, %v3099_v52 }
 0x72b   :  { %v3063_v25 = vsel %vm749_vm1, %v3060_v19, %v3062_v20  ;;  %v9533_v45 = vmax.f32 %v2929_v49, %v2945_v55 }
 0x72c   :  { %v6344_v17 = vpack.i.bf16 %v3063_v25, %v3061_v43  ;;  %v3024_v40 = vsel %vm649_vm0, %v3021_v7, %v3023_v14  ;;  %v3025_v39 = vrot.slane %v9529_v4, 1  ;;  %v3102_v53 = vsel %vm849_vm2, %v3099_v52, %v3101_v0 }
 0x72d   :  { %v6339_v38 = vpack.i.bf16 %v3024_v40, %v3022_v28  ;;  %v3027_v30 = vrot.slane %v9533_v45, 1  ;;  %v3103_v23 = vrot.slane %v9529_v4, 3  ;;  %v3105_v6 = vrot.slane %v9533_v45, 3 }
 0x72e   :  { %v6577_v27 = vpop.eup %6576  ;;  %6345 = vrot.lane.b32.xlu1 %v6344_v17, %s7361_s9  ;;  %v3026_v32 = vsel %vm649_vm0, %v3023_v14, %v3025_v39  ;;  %v3064_v58 = vrot.slane %v9529_v4, 2  ;;  %v3066_v48 = vrot.slane %v9533_v45, 2  ;;  %v6349_v54 = vpack.i.bf16 %v3102_v53, %v3100_v3 }
 0x72f   :  { %6340 = vrot.lane.b32.xlu0 %v6339_v38, %s7362_s24  ;;  %v3028_v47 = vsel %vm649_vm0, %v3025_v39, %v3027_v30  ;;  %v2901_v35 = vmul.f32 %v6577_v27, %v9466_v42  ;;  %v3104_v13 = vsel %vm849_vm2, %v3101_v0, %v3103_v23  ;;  %v3106_v59 = vsel %vm849_vm2, %v3103_v23, %v3105_v6 }
 0x730   :  { %v6579_v63 = vpop.eup %6578  ;;  %v6354_v36 = vpack.i.bf16 %v3028_v47, %v3026_v32  ;;  %v2931_v22 = vld [vmem:[#allocation2 + $0x50] ss:$2 sm:$0xff]  ;;  %v2947_v16 = vld [vmem:[#allocation2 + $0x51] ss:$2 sm:$0xff]  ;;  %v3065_v33 = vsel %vm749_vm1, %v3062_v20, %v3064_v58  ;;  %v3067_v42 = vsel %vm749_vm1, %v3064_v58, %v3066_v48  ;;  %v6364_v57 = vpack.i.bf16 %v3106_v59, %v3104_v13 }
 0x731   :  { %v2902_v31 = vmul.f32 %v6579_v63, %v9468_v8  ;;  %2917 = vst.msk [vmem:[#allocation2 + $0x64] sm:$0xff] %vm1051_vm4, %v2901_v35  ;;  %v9559_v29 = vmax.f32 %v2931_v22, %v2947_v16  ;;  %v6359_v8 = vpack.i.bf16 %v3067_v42, %v3065_v33  ;;  %v3140_v32 = vrot.slane %v9514_v51, 4 }
 0x732   :  { %v6581_v12 = vpop.eup %6580  ;;  %6355 = vrot.lane.b32.xlu1 %v6354_v36, %s7362_s24  ;;  %v3142_v59 = vrot.slane %v9529_v4, 4 }
 0x733   :  { %6350 = vrot.lane.b32.xlu0 %v6349_v54, %s7363_s17  ;;  %2918 = vst.msk [vmem:[#allocation2 + $0x6c] sm:$0xff] %vm1051_vm4, %v2902_v31  ;;  %v2903_v15 = vmul.f32 %v6581_v12, %v9474_v2  ;;  %v3068_v61 = vrot.slane %v9559_v29, 2  ;;  %v3029_v56 = vrot.slane %v9559_v29, 1  ;;  %v3107_v11 = vrot.slane %v9559_v29, 3 }
 0x735   :  { %2919 = vst.msk [vmem:[#allocation2 + $0x74] sm:$0xff] %vm1051_vm4, %v2903_v15  ;;  %v3069_v2 = vsel %vm749_vm1, %v3066_v48, %v3068_v61  ;;  %v3030_v18 = vsel %vm649_vm0, %v3027_v30, %v3029_v56  ;;  %v3108_v20 = vsel %vm849_vm2, %v3105_v6, %v3107_v11 }
 0x736   :  { %6365 = vrot.lane.b32.xlu1 %v6364_v57, %s7363_s17  ;;  %v3144_v57 = vrot.slane %v9533_v45, 4 }
 0x737   :  { %6360 = vrot.lane.b32.xlu0 %v6359_v8, %s7361_s9 }
 0x73a   :  { %v2933_v9 = vld [vmem:[#allocation2 + $0x60] ss:$2 sm:$0xff]  ;;  %v2949_v1 = vld [vmem:[#allocation2 + $0x61] ss:$2 sm:$0xff] }
 0x73b   :  { %v9566_v60 = vmax.f32 %v2933_v9, %v2949_v1  ;;  %v3145_v9 = vsel %vm949_vm3, %v3142_v59, %v3144_v57  ;;  %v3146_v1 = vrot.slane %v9559_v29, 4 }
 0x73c   :  { %v2935_v37 = vld [vmem:[#allocation2 + $0x70] ss:$2 sm:$0xff]  ;;  %v2951_v26 = vld [vmem:[#allocation2 + $0x71] ss:$2 sm:$0xff] }
 0x73d   :  { %v3070_v19 = vrot.slane %v9566_v60, 2  ;;  %v3031_v7 = vrot.slane %v9566_v60, 1  ;;  %v9573_v10 = vmax.f32 %v2935_v37, %v2951_v26  ;;  %v3109_v62 = vrot.slane %v9566_v60, 3 }
 0x73f   :  { %v3071_v44 = vsel %vm749_vm1, %v3068_v61, %v3070_v19  ;;  %v3032_v52 = vsel %vm649_vm0, %v3029_v56, %v3031_v7  ;;  %v3033_v43 = vrot.slane %v9573_v10, 1  ;;  %v3110_v28 = vsel %vm849_vm2, %v3107_v11, %v3109_v62 }
 0x740   :  { %v6374_v21 = vpack.i.bf16 %v3071_v44, %v3069_v2  ;;  %v6369_v41 = vpack.i.bf16 %v3032_v52, %v3030_v18  ;;  %v6379_v14 = vpack.i.bf16 %v3110_v28, %v3108_v20  ;;  %v3111_v55 = vrot.slane %v9573_v10, 3 }
 0x741   :  { %v3034_v49 = vsel %vm649_vm0, %v3031_v7, %v3033_v43  ;;  %v3072_v0 = vrot.slane %v9573_v10, 2  ;;  %v3147_v11 = vsel %vm949_vm3, %v3144_v57, %v3146_v1  ;;  %v3148_v52 = vrot.slane %v9566_v60, 4 }
 0x742   :  { %6375 = vrot.lane.b32.xlu1 %v6374_v21, %s7361_s9  ;;  %6370 = vrot.lane.b32.xlu0 %v6369_v41, %s7362_s24  ;;  %v3112_v25 = vsel %vm849_vm2, %v3109_v62, %v3111_v55 }
 0x743   :  { %v3073_v17 = vsel %vm749_vm1, %v3070_v19, %v3072_v0 }
 0x746   :  { %3047 = vrot.lane.b32.xlu1 %v3034_v49, %s7362_s24  ;;  %6380 = vrot.lane.b32.xlu0 %v6379_v14, %s7363_s17 }
 0x74a   :  { %3125 = vrot.lane.b32.xlu1 %v3112_v25, %s7363_s17  ;;  %3086 = vrot.lane.b32.xlu0 %v3073_v17, %s7361_s9 }
 0x74e   :  { %3088 = vrot.lane.b32.xlu1 %v3072_v0, %s7361_s9  ;;  %3049 = vrot.lane.b32.xlu0 %v3033_v43, %s7362_s24 }
 0x752   :  { %3127 = vrot.lane.b32.xlu0 %v3111_v55, %s7363_s17  ;;  %v3149_v55 = vsel %vm949_vm3, %v3146_v1, %v3148_v52 }
 0x7a0   :  { %v6346_v40 = vpop.permute.xlu1 %6345 }
 0x7a1   :  { %v6341_v39 = vpop.permute.xlu0 %6340  ;;  %v6347_v38 = vunpack.i.l.bf16 %v6346_v40  ;;  %v6348_v58 = vunpack.i.h.bf16 %v6346_v40 }
 0x7a2   :  { %v6342_v3 = vunpack.i.l.bf16 %v6341_v39  ;;  %v6343_v30 = vunpack.i.h.bf16 %v6341_v39 }
 0x7a4   :  { %v3152_v53 = vsel %vm1051_vm4, %v9500_v5, %v6342_v3  ;;  %v6356_v23 = vpop.permute.xlu1 %6355  ;;  %v3153_v36 = vsel %vm1051_vm4, %v9504_v46, %v6343_v30  ;;  %v3141_v5 = vsel %vm949_vm3, %v3138_v50, %v3140_v32  ;;  %v3143_v46 = vsel %vm949_vm3, %v3140_v32, %v3142_v59 }
 0x7a5   :  { %v6351_v27 = vpop.permute.xlu0 %6350  ;;  %v3160_v48 = vsel %vm1621_vm6, %v3152_v53, %v6347_v38  ;;  %v6357_v47 = vunpack.i.l.bf16 %v6356_v23  ;;  %v3161_v22 = vsel %vm1621_vm6, %v3153_v36, %v6348_v58  ;;  %v6358_v16 = vunpack.i.h.bf16 %v6356_v23 }
 0x7a6   :  { %v6352_v6 = vunpack.i.l.bf16 %v6351_v27  ;;  %v6353_v35 = vunpack.i.h.bf16 %v6351_v27 }
 0x7a7   :  { %v3154_v42 = vsel %vm1051_vm4, %v9514_v51, %v6357_v47  ;;  %v3155_v56 = vsel %vm1051_vm4, %v9529_v4, %v6358_v16  ;;  %v5646_v47 = vld [vmem:[#allocation20] ss:$0 sm:$0xff] }
 0x7a8   :  { %v3168_v63 = vsel %vm1638_vm7, %v3160_v48, %v6352_v6  ;;  %v6366_v54 = vpop.permute.xlu1 %6365  ;;  %v3169_v33 = vsel %vm1638_vm7, %v3161_v22, %v6353_v35 }
 0x7a9   :  { %v6361_v13 = vpop.permute.xlu0 %6360  ;;  %3263 = vmatmul.mubr.f32.vlgmr.msra.gmra.mrb[32].mxu0 %v3168_v63  ;;  %v6367_v12 = vunpack.i.l.bf16 %v6366_v54  ;;  %v6368_v8 = vunpack.i.h.bf16 %v6366_v54 }
 0x7aa   :  { %v6362_v31 = vunpack.i.l.bf16 %v6361_v13  ;;  %5648 = vmatprep.mubr.msk.f32.mxu0 %vm1051_vm4, %v3141_v5  ;;  %v6363_v15 = vunpack.i.h.bf16 %v6361_v13 }
 0x7ac   :  { %v3162_v50 = vsel %vm1621_vm6, %v3154_v42, %v6362_v31  ;;  %v3163_v51 = vsel %vm1621_vm6, %v3155_v56, %v6363_v15 }
 0x7ad   :  { %3268 = vmatmul.mubr.f32.gmra.mrb[34].mxu0 %v3169_v33  ;;  %v3170_v61 = vsel %vm1638_vm7, %v3162_v50, %v6367_v12  ;;  %v3171_v37 = vsel %vm1638_vm7, %v3163_v51, %v6368_v8 }
 0x7ae   :  { %5649 = vmatprep.mubr.msk.f32.mxu0 %vm1051_vm4, %v3143_v46 }
 0x7b1   :  { %3273 = vmatmul.mubr.f32.gmra.mrb[36].mxu0 %v3170_v61 }
 0x7b2   :  { %5650 = vmatprep.mubr.msk.f32.mxu0 %vm1051_vm4, %v3145_v9 }
 0x7b4   :  { %v6376_v2 = vpop.permute.xlu1 %6375  ;;  %v6371_v18 = vpop.permute.xlu0 %6370 }
 0x7b5   :  { %v6372_v26 = vunpack.i.l.bf16 %v6371_v18  ;;  %3278 = vmatmul.mubr.f32.gmra.mrb[38].mxu0 %v3171_v37  ;;  %v6377_v19 = vunpack.i.l.bf16 %v6376_v2  ;;  %v6373_v4 = vunpack.i.h.bf16 %v6371_v18  ;;  %v6378_v41 = vunpack.i.h.bf16 %v6376_v2 }
 0x7b6   :  { %5651 = vmatprep.mubr.msk.f32.mxu0 %vm1051_vm4, %v3147_v11 }
 0x7b7   :  { %v3156_v7 = vsel %vm1051_vm4, %v9533_v45, %v6372_v26  ;;  %v3157_v14 = vsel %vm1051_vm4, %v9559_v29, %v6373_v4  ;;  %v3150_v45 = vrot.slane %v9573_v10, 4 }
 0x7b8   :  { %v3048_v62 = vpop.permute.xlu1 %3047  ;;  %v6381_v44 = vpop.permute.xlu0 %6380  ;;  %v3164_v43 = vsel %vm1621_vm6, %v3156_v7, %v6377_v19  ;;  %v3165_v25 = vsel %vm1621_vm6, %v3157_v14, %v6378_v41 }
 0x7b9   :  { %v6382_v21 = vunpack.i.l.bf16 %v6381_v44  ;;  %v6383_v20 = vunpack.i.h.bf16 %v6381_v44  ;;  %v3158_v17 = vsel %vm1051_vm4, %v9566_v60, %v3048_v62  ;;  %v3151_v29 = vsel %vm949_vm3, %v3148_v52, %v3150_v45 }
 0x7bb   :  { %v3172_v28 = vsel %vm1638_vm7, %v3164_v43, %v6382_v21  ;;  %v3173_v40 = vsel %vm1638_vm7, %v3165_v25, %v6383_v20 }
 0x7bc   :  { %v3087_v49 = vpop.permute.xlu0 %3086  ;;  %3283 = vmatmul.mubr.f32.gmra.mrb[40].mxu0 %v3172_v28  ;;  %v3126_v0 = vpop.permute.xlu1 %3125 }
 0x7bd   :  { %5652 = vmatprep.mubr.msk.f32.mxu0 %vm1051_vm4, %v3149_v55  ;;  %v3166_v39 = vsel %vm1621_vm6, %v3158_v17, %v3087_v49 }
 0x7be   :  { %v3174_v53 = vsel %vm1638_vm7, %v3166_v39, %v3126_v0 }
 0x7c0   :  { %v3050_v3 = vpop.permute.xlu0 %3049  ;;  %3288 = vmatmul.mubr.f32.gmra.mrb[42].mxu0 %v3173_v40  ;;  %v3089_v38 = vpop.permute.xlu1 %3088 }
 0x7c1   :  { %5653 = vmatprep.mubr.msk.f32.mxu0 %vm1051_vm4, %v3151_v29  ;;  %v3159_v30 = vsel %vm1051_vm4, %v9573_v10, %v3050_v3 }
 0x7c2   :  { %v3167_v60 = vsel %vm1621_vm6, %v3159_v30, %v3089_v38 }
 0x7c4   :  { %v3128_v23 = vpop.permute.xlu0 %3127  ;;  %3293 = vmatmul.mubr.f32.gmra.mrb[44].mxu0 %v3174_v53 }
 0x7c5   :  { %5654 = vmatprep.mubr.msk.f32.mxu0 %vm1051_vm4, %v3150_v45  ;;  %v3175_v27 = vsel %vm1638_vm7, %v3167_v60, %v3128_v23 }
 0x7c8   :  { %3298 = vmatmul.mubr.f32.gmra.mrb[46].mxu0 %v3175_v27 }
 0x87c   :  { %v3264_v32 = vpop.f32.mrb[32].mxu0 }
 0x87d   :  { %v3266_v10 = vpop.f32.mrb[33].mxu0  ;;  %v9654_v36 = vadd.f32 %v5646_v47, %v3264_v32 }
 0x87f   :  { %v3303_v22 = vmul.f32 %v9654_v36, %v9654_v36  ;;  %v3312_v33 = vsel %vm3311_vm9, %v9654_v36, 0.0 }
 0x880   :  { %v3269_v6 = vpop.f32.mrb[34].mxu0 }
 0x881   :  { %v3271_v58 = vpop.f32.mrb[35].mxu0  ;;  %v9652_v63 = vadd.f32 %v5646_v47, %v3269_v6  ;;  %v3326_v8 = vsel %vm3311_vm9, %v3303_v22, 0.0 }
 0x883   :  { %v3304_v59 = vmul.f32 %v9652_v63, %v9652_v63  ;;  %v3313_v16 = vsel %vm3311_vm9, %v9652_v63, 0.0 }
 0x884   :  { %v3274_v48 = vpop.f32.mrb[36].mxu0  ;;  %v3314_v50 = vadd.f32 %v3313_v16, %v3312_v33 }
 0x885   :  { %v3276_v35 = vpop.f32.mrb[37].mxu0  ;;  %v9656_v54 = vadd.f32 %v5646_v47, %v3274_v48  ;;  %v3327_v42 = vsel %vm3311_vm9, %v3304_v59, 0.0 }
 0x886   :  { %v3328_v51 = vadd.f32 %v3327_v42, %v3326_v8 }
 0x887   :  { %v3305_v12 = vmul.f32 %v9656_v54, %v9656_v54  ;;  %v3315_v15 = vsel %vm3311_vm9, %v9656_v54, 0.0 }
 0x888   :  { %v3279_v13 = vpop.f32.mrb[38].mxu0  ;;  %v3316_v1 = vadd.f32 %v3315_v15, %v3314_v50 }
 0x889   :  { %v3281_v5 = vpop.f32.mrb[39].mxu0  ;;  %v9660_v31 = vadd.f32 %v5646_v47, %v3279_v13  ;;  %v3329_v61 = vsel %vm3311_vm9, %v3305_v12, 0.0 }
 0x88a   :  { %v3330_v18 = vadd.f32 %v3329_v61, %v3328_v51 }
 0x88b   :  { %v3306_v46 = vmul.f32 %v9660_v31, %v9660_v31  ;;  %v3317_v56 = vsel %vm3009_vm8, %v9660_v31, 0.0 }
 0x88c   :  { %v3318_v37 = vadd.f32 %v3317_v56, %v3316_v1 }
 0x88d   :  { %v3331_v2 = vsel %vm3009_vm8, %v3306_v46, 0.0 }
 0x88e   :  { %v3332_v7 = vadd.f32 %v3331_v2, %v3330_v18  ;;  %v3319_v44 = vrot.slane %v3318_v37, 4 }
 0x88f   :  { %v3284_v57 = vpop.f32.mrb[40].mxu0 }
 0x890   :  { %v3286_v9 = vpop.f32.mrb[41].mxu0  ;;  %v9680_v11 = vadd.f32 %v5646_v47, %v3284_v57  ;;  %v3333_v28 = vrot.slane %v3332_v7, 4  ;;  %v3320_v0 = vadd.f32 %v3319_v44, %v3318_v37  ;;  %v2984_v44 = vld [vmem:[%s10689_s3 + $0x8] sm:$0xff] }
 0x892   :  { %v3307_v21 = vmul.f32 %v9680_v11, %v9680_v11  ;;  %v3340_v14 = vsel %vm3311_vm9, %v9680_v11, 0.0  ;;  %v3334_v38 = vadd.f32 %v3333_v28, %v3332_v7  ;;  %v3321_v27 = vrot.slane %v3320_v0, 2  ;;  %v2981_v28 = vld [vmem:[#allocation22] sm:$0x1] }
 0x893   :  { %v3289_v26 = vpop.f32.mrb[42].mxu0 }
 0x894   :  { %v9682_v19 = vadd.f32 %v5646_v47, %v3289_v26  ;;  %v3291_v4 = vpop.f32.mrb[43].mxu0  ;;  %v3354_v40 = vsel %vm3311_vm9, %v3307_v21, 0.0  ;;  %v3335_v58 = vrot.slane %v3334_v38, 2 }
 0x896   :  { %v3308_v62 = vmul.f32 %v9682_v19, %v9682_v19  ;;  %v3341_v41 = vsel %vm3311_vm9, %v9682_v19, 0.0  ;;  %v3336_v59 = vadd.f32 %v3335_v58, %v3334_v38 }
 0x897   :  { %v3294_v52 = vpop.f32.mrb[44].mxu0  ;;  %v3342_v25 = vadd.f32 %v3341_v41, %v3340_v14  ;;  %v2986_v41 = vld [vmem:[%s10689_s3 + $0x18] sm:$0xff] }
 0x898   :  { %v9690_v43 = vadd.f32 %v5646_v47, %v3294_v52  ;;  %v3296_v20 = vpop.f32.mrb[45].mxu0  ;;  %v3355_v49 = vsel %vm3311_vm9, %v3308_v62, 0.0  ;;  %v3337_v15 = vrot.slane %v3336_v59, 1  ;;  %v2983_v62 = vld [vmem:[%s10689_s3] sm:$0xff]  ;;  %v2985_v52 = vld [vmem:[%s10689_s3 + $0x10] sm:$0xff] }
 0x899   :  { %v3356_v30 = vadd.f32 %v3355_v49, %v3354_v40  ;;  %v5977_v21 = vpack.c.bf16 %v2984_v44, %v2983_v62  ;;  %v5981_v20 = vpack.c.bf16 %v2986_v41, %v2985_v52 }
 0x89a   :  { %v3309_v55 = vmul.f32 %v9690_v43, %v9690_v43  ;;  %v3343_v45 = vsel %vm3311_vm9, %v9690_v43, 0.0  ;;  %v3338_v56 = vadd.f32 %v3337_v15, %v3336_v59 }
 0x89b   :  { %v3299_v17 = vpop.f32.mrb[46].mxu0  ;;  %v3344_v53 = vadd.f32 %v3343_v45, %v3342_v25  ;;  %5978 = vmatprep.subr.bf16.mxu1 %v5977_v21 }
 0x89c   :  { %v3357_v39 = vsel %vm3311_vm9, %v3309_v55, 0.0  ;;  %v9701_v3 = vadd.f32 %v5646_v47, %v3299_v17  ;;  %v3301_v29 = vpop.f32.mrb[47].mxu0  ;;  %v3322_v47 = vadd.f32 %v3321_v27, %v3320_v0  ;;  %5980 = vmatpush3.bf16.msra.mxu1 %v5977_v21  ;;  %v2982_v55 = vld [vmem:[#allocation23] sm:$0x1] }
 0x89d   :  { %v3358_v32 = vadd.f32 %v3357_v39, %v3356_v30  ;;  %5982 = vmatprep.subr.bf16.mxu1 %v5981_v20 }
 0x89e   :  { %v3310_v23 = vmul.f32 %v9701_v3, %v9701_v3  ;;  %v3345_v60 = vsel %vm3009_vm8, %v9701_v3, 0.0  ;;  %v3323_v12 = vrot.slane %v3322_v47, 1 }
 0x89f   :  { %v3346_v10 = vadd.f32 %v3345_v60, %v3344_v53 }
 0x8a0   :  { %v3359_v6 = vsel %vm3009_vm8, %v3310_v23, 0.0  ;;  %v3324_v57 = vadd.f32 %v3323_v12, %v3322_v47  ;;  %5984 = vmatpush3.bf16.msra.mxu1 %v5981_v20 }
 0x8a1   :  { %v3347_v48 = vrot.slane %v3346_v10, 4  ;;  %v3360_v35 = vadd.f32 %v3359_v6, %v3358_v32 }
 0x8a3   :  { %v3348_v13 = vadd.f32 %v3347_v48, %v3346_v10  ;;  %v3361_v5 = vrot.slane %v3360_v35, 4 }
 0x8a5   :  { %v3349_v22 = vrot.slane %v3348_v13, 2  ;;  %v3362_v16 = vadd.f32 %v3361_v5, %v3360_v35 }
 0x8a7   :  { %v3350_v33 = vadd.f32 %v3349_v22, %v3348_v13  ;;  %v3363_v42 = vrot.slane %v3362_v16, 2 }
 0x8a9   :  { %v3351_v46 = vrot.slane %v3350_v33, 1  ;;  %v3364_v50 = vadd.f32 %v3363_v42, %v3362_v16 }
 0x8ab   :  { %v3352_v8 = vadd.f32 %v3351_v46, %v3350_v33  ;;  %v3365_v61 = vrot.slane %v3364_v50, 1 }
 0x8ad   :  { %v3353_v9 = vadd.f32 %v3352_v8, %v3324_v57  ;;  %v3366_v51 = vadd.f32 %v3365_v61, %v3364_v50 }
 0x8af   :  { %v3367_v1 = vadd.f32 %v3366_v51, %v3338_v56  ;;  %v3369_v2 = vmul.f32 0.017857144, %v3353_v9 }
 0x8b1   :  { %v3370_v18 = vmul.f32 0.017857144, %v3367_v1  ;;  %v3371_v37 = vmul.f32 %v3369_v2, %v3369_v2 }
 0x8b3   :  { %v3372_v26 = vsub.f32 %v3370_v18, %v3371_v37 }
 0x8b5   :  { %v3373_v4 = vmax.f32 %v3372_v26, 0.0 }
 0x8b7   :  { %v3374_v7 = vadd.f32 1e-05, %v3373_v4 }
 0x8b9   :  { %6582 = vrsqrt.f32 %v3374_v7 }
 0x8c3   :  { %v6583_v14 = vpop.eup %6582 }
 0x8c4   :  { %v3376_v49 = vmul.f32 %v6583_v14, %v2981_v28 }
 0x8c6   :  { %v3377_v45 = vmul.f32 %v3376_v49, %v3369_v2  ;;  %v3382_v0 = vrot.slane %v3376_v49, %v7684_v24 }
 0x8c8   :  { %v3378_v25 = vsub.f32 %v2982_v55, %v3377_v45  ;;  %v3383_v17 = vmul.f32 %v3382_v0, %v9654_v36  ;;  %v3384_v40 = vmul.f32 %v3382_v0, %v9652_v63  ;;  %v3385_v39 = vmul.f32 %v3382_v0, %v9656_v54 }
 0x8c9   :  { %v3386_v29 = vmul.f32 %v3382_v0, %v9660_v31  ;;  %v3387_v30 = vmul.f32 %v3382_v0, %v9680_v11  ;;  %v3388_v53 = vmul.f32 %v3382_v0, %v9682_v19  ;;  %v3389_v23 = vmul.f32 %v3382_v0, %v9690_v43 }
 0x8ca   :  { %v3395_v38 = vrot.slane %v3378_v25, %v7684_v24  ;;  %v3390_v60 = vmul.f32 %v3382_v0, %v9701_v3 }
 0x8cc   :  { %v3397_v27 = vadd.f32 %v3395_v38, %v3383_v17  ;;  %v3398_v32 = vadd.f32 %v3395_v38, %v3384_v40  ;;  %v3399_v10 = vadd.f32 %v3395_v38, %v3385_v39  ;;  %v3400_v6 = vadd.f32 %v3395_v38, %v3386_v29 }
 0x8cd   :  { %v9722_v58 = vadd.f32 %v3395_v38, %v3387_v30  ;;  %v9724_v48 = vadd.f32 %v3395_v38, %v3388_v53  ;;  %v9726_v35 = vadd.f32 %v3395_v38, %v3389_v23  ;;  %v9728_v47 = vadd.f32 %v3395_v38, %v3390_v60 }
 0x8ce   :  { %v3405_v13 = vsub.f32 0.0, %v3397_v27  ;;  %v3406_v5 = vsub.f32 0.0, %v3398_v32  ;;  %v3407_v59 = vsub.f32 0.0, %v3399_v10  ;;  %v3408_v22 = vsub.f32 0.0, %v3400_v6 }
 0x8cf   :  { %v3409_v16 = vsub.f32 0.0, %v9722_v58  ;;  %v3410_v12 = vsub.f32 0.0, %v9724_v48  ;;  %v3411_v33 = vsub.f32 0.0, %v9726_v35  ;;  %v3412_v50 = vsub.f32 0.0, %v9728_v47 }
 0x8d0   :  { %v3413_v42 = vmul.f32 1.442695, %v3405_v13  ;;  %v3415_v15 = vmul.f32 1.442695, %v3406_v5  ;;  %v3417_v46 = vmul.f32 1.442695, %v3407_v59 }
 0x8d1   :  { %v3419_v57 = vmul.f32 1.442695, %v3408_v22  ;;  %v3421_v8 = vmul.f32 1.442695, %v3409_v16  ;;  %v3423_v61 = vmul.f32 1.442695, %v3410_v12 }
 0x8d2   :  { %6584 = vpow2.f32 %v3413_v42  ;;  %v3425_v56 = vmul.f32 1.442695, %v3411_v33  ;;  %v3427_v9 = vmul.f32 1.442695, %v3412_v50 }
 0x8d3   :  { %6586 = vpow2.f32 %v3415_v15 }
 0x8d4   :  { %6588 = vpow2.f32 %v3417_v46 }
 0x8d5   :  { %6590 = vpow2.f32 %v3419_v57  ;;  %v2987_v57 = vld [vmem:[%s10689_s3 + $0x20] sm:$0xff] }
 0x8d6   :  { %6592 = vpow2.f32 %v3421_v8  ;;  %v2988_v8 = vld [vmem:[%s10689_s3 + $0x28] sm:$0xff] }
 0x8d7   :  { %6594 = vpow2.f32 %v3423_v61  ;;  %v2989_v61 = vld [vmem:[%s10689_s3 + $0x30] sm:$0xff] }
 0x8d8   :  { %6596 = vpow2.f32 %v3425_v56  ;;  %v2990_v56 = vld [vmem:[%s10689_s3 + $0x38] sm:$0xff] }
 0x8d9   :  { %6598 = vpow2.f32 %v3427_v9 }
 0x8dc   :  { %v6585_v51 = vpop.eup %6584 }
 0x8dd   :  { %v6587_v1 = vpop.eup %6586  ;;  %v3429_v2 = vadd.f32 1.0, %v6585_v51 }
 0x8de   :  { %v6589_v18 = vpop.eup %6588  ;;  %v3430_v37 = vadd.f32 1.0, %v6587_v1 }
 0x8df   :  { %v6591_v26 = vpop.eup %6590  ;;  %v3431_v4 = vadd.f32 1.0, %v6589_v18  ;;  %6600 = vrcp.f32 %v3429_v2  ;;  %v5985_v2 = vpack.c.bf16 %v2988_v8, %v2987_v57  ;;  %v5989_v18 = vpack.c.bf16 %v2990_v56, %v2989_v61 }
 0x8e0   :  { %v6593_v7 = vpop.eup %6592  ;;  %v3432_v62 = vadd.f32 1.0, %v6591_v26  ;;  %6602 = vrcp.f32 %v3430_v37 }
 0x8e1   :  { %v6595_v44 = vpop.eup %6594  ;;  %v3433_v52 = vadd.f32 1.0, %v6593_v7  ;;  %6604 = vrcp.f32 %v3431_v4  ;;  %v2991_v4 = vld [vmem:[%s10689_s3 + $0x40] sm:$0xff]  ;;  %v2992_v7 = vld [vmem:[%s10689_s3 + $0x48] sm:$0xff]  ;;  %5986 = vmatprep.subr.bf16.mxu1 %v5985_v2 }
 0x8e2   :  { %v6597_v21 = vpop.eup %6596  ;;  %v3434_v41 = vadd.f32 1.0, %v6595_v44  ;;  %6606 = vrcp.f32 %v3432_v62  ;;  %5988 = vmatpush3.bf16.msra.mxu1 %v5985_v2 }
 0x8e3   :  { %v6599_v20 = vpop.eup %6598  ;;  %v3435_v28 = vadd.f32 1.0, %v6597_v21  ;;  %6608 = vrcp.f32 %v3433_v52  ;;  %5990 = vmatprep.subr.bf16.mxu1 %v5989_v18  ;;  %v5993_v21 = vpack.c.bf16 %v2992_v7, %v2991_v4 }
 0x8e4   :  { %v3436_v14 = vadd.f32 1.0, %v6599_v20  ;;  %6610 = vrcp.f32 %v3434_v41 }
 0x8e5   :  { %6612 = vrcp.f32 %v3435_v28 }
 0x8e6   :  { %6614 = vrcp.f32 %v3436_v14  ;;  %5992 = vmatpush3.bf16.msra.mxu1 %v5989_v18 }
 0x8e7   :  { %5994 = vmatprep.subr.bf16.mxu1 %v5993_v21 }
 0x8e9   :  { %v6601_v49 = vpop.eup %6600 }
 0x8ea   :  { %v6603_v55 = vpop.eup %6602  ;;  %v3445_v45 = vmul.f32 %v6601_v49, %v3397_v27  ;;  %5996 = vmatpush3.bf16.msra.mxu1 %v5993_v21 }
 0x8eb   :  { %v6605_v0 = vpop.eup %6604  ;;  %v3446_v25 = vmul.f32 %v6603_v55, %v3398_v32 }
 0x8ec   :  { %v6607_v17 = vpop.eup %6606  ;;  %v3447_v40 = vmul.f32 %v6605_v0, %v3399_v10  ;;  %3453 = vst.msk [vmem:[#allocation3 + $0x4] sm:$0xff] %vm3311_vm9, %v3445_v45 }
 0x8ed   :  { %v6609_v39 = vpop.eup %6608  ;;  %v3448_v29 = vmul.f32 %v6607_v17, %v3400_v6  ;;  %3454 = vst.msk [vmem:[#allocation3 + $0xc] sm:$0xff] %vm3311_vm9, %v3446_v25 }
 0x8ee   :  { %v6611_v38 = vpop.eup %6610  ;;  %3455 = vst.msk [vmem:[#allocation3 + $0x14] sm:$0xff] %vm3311_vm9, %v3447_v40  ;;  %v3449_v30 = vmul.f32 %v6609_v39, %v9722_v58 }
 0x8ef   :  { %v6613_v53 = vpop.eup %6612  ;;  %v3450_v23 = vmul.f32 %v6611_v38, %v9724_v48  ;;  %3456 = vst.msk [vmem:[#allocation3 + $0x1c] sm:$0xf] %vm3009_vm8, %v3448_v29 }
 0x8f0   :  { %v6615_v60 = vpop.eup %6614  ;;  %v3451_v27 = vmul.f32 %v6613_v53, %v9726_v35  ;;  %3457 = vst.msk [vmem:[#allocation3 + $0x24] sm:$0xff] %vm3311_vm9, %v3449_v30 }
 0x8f1   :  { %v3452_v32 = vmul.f32 %v6615_v60, %v9728_v47  ;;  %3458 = vst.msk [vmem:[#allocation3 + $0x2c] sm:$0xff] %vm3311_vm9, %v3450_v23 }
 0x8f2   :  { %3459 = vst.msk [vmem:[#allocation3 + $0x34] sm:$0xff] %vm3311_vm9, %v3451_v27 }
 0x8f3   :  { %3460 = vst.msk [vmem:[#allocation3 + $0x3c] sm:$0xf] %vm3009_vm8, %v3452_v32  ;;  %v9746_v10 = vld [vmem:[#allocation3] sm:$0xff] }
 0x8f4   :  { %v9748_v6 = vld [vmem:[#allocation3 + $0x8] sm:$0xff]  ;;  %v3477_v58 = vrot.slane %v9746_v10, 1  ;;  %v3516_v13 = vrot.slane %v9746_v10, 2  ;;  %v3555_v16 = vrot.slane %v9746_v10, 3  ;;  %v3594_v46 = vrot.slane %v9746_v10, 4 }
 0x8f5   :  { %v3478_v48 = vrot.slane %v9748_v6, 1  ;;  %v3517_v47 = vrot.slane %v9748_v6, 2  ;;  %v3556_v12 = vrot.slane %v9748_v6, 3  ;;  %v9768_v15 = vld [vmem:[#allocation3 + $0x10] sm:$0xff]  ;;  %v3595_v50 = vrot.slane %v9748_v6, 4 }
 0x8f6   :  { %v3597_v9 = vrot.slane %v9768_v15, 4  ;;  %v3480_v37 = vrot.slane %v9768_v15, 1  ;;  %v9785_v26 = vld [vmem:[#allocation3 + $0x18] sm:$0xff]  ;;  %v3519_v62 = vrot.slane %v9768_v15, 2  ;;  %v3558_v20 = vrot.slane %v9768_v15, 3 }
 0x8f7   :  { %v3479_v35 = vsel %vm649_vm0, %v3477_v58, %v3478_v48  ;;  %v3518_v22 = vsel %vm749_vm1, %v3516_v13, %v3517_v47  ;;  %v3557_v42 = vsel %vm849_vm2, %v3555_v16, %v3556_v12  ;;  %v3596_v1 = vsel %vm949_vm3, %v3594_v46, %v3595_v50  ;;  %v9809_v17 = vld [vmem:[#allocation3 + $0x20] sm:$0xff] }
 0x8f8   :  { %3492 = vrot.lane.b32.xlu1 %v3479_v35, %s7364_s18  ;;  %v3598_v44 = vsel %vm949_vm3, %v3595_v50, %v3597_v9  ;;  %v3521_v52 = vrot.slane %v9785_v26, 2  ;;  %v3481_v41 = vsel %vm649_vm0, %v3478_v48, %v3480_v37  ;;  %v3560_v14 = vrot.slane %v9785_v26, 3  ;;  %v9817_v30 = vld [vmem:[#allocation3 + $0x28] sm:$0xff] }
 0x8f9   :  { %v3520_v49 = vsel %vm749_vm1, %v3517_v47, %v3519_v62  ;;  %v3599_v45 = vrot.slane %v9785_v26, 4  ;;  %v3559_v0 = vsel %vm849_vm2, %v3556_v12, %v3558_v20  ;;  %v3482_v25 = vrot.slane %v9785_v26, 1  ;;  %v9837_v12 = vld [vmem:[#allocation3 + $0x30] sm:$0xff] }
 0x8fa   :  { %v9756_v5 = vld [vmem:[#allocation3 + $0x38] sm:$0xff]  ;;  %v3522_v28 = vsel %vm749_vm1, %v3519_v62, %v3521_v52  ;;  %v3561_v55 = vsel %vm849_vm2, %v3558_v20, %v3560_v14  ;;  %v3601_v39 = vrot.slane %v9809_v17, 4  ;;  %v3484_v38 = vrot.slane %v9809_v17, 1 }
 0x8fb   :  { %v3490_v59 = vrot.slane %v9756_v5, 1  ;;  %v3529_v33 = vrot.slane %v9756_v5, 2  ;;  %v3568_v51 = vrot.slane %v9756_v5, 3  ;;  %v3600_v40 = vsel %vm949_vm3, %v3597_v9, %v3599_v45 }
 0x8fc   :  { %3531 = vrot.lane.b32.xlu1 %v3518_v22, %s7362_s24  ;;  %v3483_v29 = vsel %vm649_vm0, %v3480_v37, %v3482_v25  ;;  %v3523_v53 = vrot.slane %v9809_v17, 2  ;;  %v3602_v23 = vsel %vm949_vm3, %v3599_v45, %v3601_v39  ;;  %v3525_v60 = vrot.slane %v9817_v30, 2 }
 0x8fd   :  { %3506 = vrot.lane.b32.xlu0 %v3490_v59, %s7364_s18  ;;  %v3485_v27 = vsel %vm649_vm0, %v3482_v25, %v3484_v38  ;;  %v3562_v32 = vrot.slane %v9809_v17, 3  ;;  %v3564_v48 = vrot.slane %v9817_v30, 3  ;;  %v3603_v47 = vrot.slane %v9817_v30, 4 }
 0x8fe   :  { %v3526_v58 = vsel %vm749_vm1, %v3523_v53, %v3525_v60  ;;  %v3524_v35 = vsel %vm749_vm1, %v3521_v52, %v3523_v53  ;;  %v3486_v16 = vrot.slane %v9817_v30, 1  ;;  %v3605_v46 = vrot.slane %v9837_v12, 4 }
 0x8ff   :  { %v3565_v13 = vsel %vm849_vm2, %v3562_v32, %v3564_v48  ;;  %v3563_v22 = vsel %vm849_vm2, %v3560_v14, %v3562_v32  ;;  %v3488_v57 = vrot.slane %v9837_v12, 1  ;;  %v3527_v8 = vrot.slane %v9837_v12, 2 }
 0x900   :  { %3570 = vrot.lane.b32.xlu1 %v3557_v42, %s7365_s12  ;;  %v3604_v42 = vsel %vm949_vm3, %v3601_v39, %v3603_v47  ;;  %v3487_v50 = vsel %vm649_vm0, %v3484_v38, %v3486_v16  ;;  %v3606_v61 = vsel %vm949_vm3, %v3603_v47, %v3605_v46  ;;  %v3566_v9 = vrot.slane %v9837_v12, 3 }
 0x901   :  { %3545 = vrot.lane.b32.xlu0 %v3529_v33, %s7362_s24  ;;  %v3489_v56 = vsel %vm649_vm0, %v3486_v16, %v3488_v57  ;;  %v3528_v2 = vsel %vm749_vm1, %v3525_v60, %v3527_v8  ;;  %v3607_v37 = vrot.slane %v9756_v5, 4  ;;  %v3491_v7 = vsel %vm649_vm0, %v3488_v57, %v3490_v59 }
 0x902   :  { %v3569_v18 = vsel %vm849_vm2, %v3566_v9, %v3568_v51  ;;  %v3567_v4 = vsel %vm849_vm2, %v3564_v48, %v3566_v9 }
 0x904   :  { %3609 = vrot.lane.b32.xlu1 %v3596_v1, %s7361_s9  ;;  %v3530_v1 = vsel %vm749_vm1, %v3527_v8, %v3529_v33  ;;  %v3608_v33 = vsel %vm949_vm3, %v3605_v46, %v3607_v37 }
 0x905   :  { %3584 = vrot.lane.b32.xlu0 %v3568_v51, %s7365_s12 }
 0x908   :  { %3611 = vrot.lane.b32.xlu1 %v3598_v44, %s7361_s9 }
 0x909   :  { %3494 = vrot.lane.b32.xlu0 %v3481_v41, %s7364_s18 }
 0x90c   :  { %3535 = vrot.lane.b32.xlu1 %v3522_v28, %s7362_s24 }
 0x90d   :  { %3533 = vrot.lane.b32.xlu0 %v3520_v49, %s7362_s24 }
 0x910   :  { %3574 = vrot.lane.b32.xlu1 %v3561_v55, %s7365_s12 }
 0x911   :  { %3572 = vrot.lane.b32.xlu0 %v3559_v0, %s7365_s12 }
 0x914   :  { %3613 = vrot.lane.b32.xlu1 %v3600_v40, %s7361_s9 }
 0x915   :  { %3496 = vrot.lane.b32.xlu0 %v3483_v29, %s7364_s18 }
 0x918   :  { %3615 = vrot.lane.b32.xlu1 %v3602_v23, %s7361_s9 }
 0x919   :  { %3498 = vrot.lane.b32.xlu0 %v3485_v27, %s7364_s18 }
 0x91c   :  { %3539 = vrot.lane.b32.xlu1 %v3526_v58, %s7362_s24 }
 0x91d   :  { %3537 = vrot.lane.b32.xlu0 %v3524_v35, %s7362_s24 }
 0x920   :  { %3578 = vrot.lane.b32.xlu1 %v3565_v13, %s7365_s12 }
 0x921   :  { %3576 = vrot.lane.b32.xlu0 %v3563_v22, %s7365_s12 }
 0x924   :  { %3617 = vrot.lane.b32.xlu1 %v3604_v42, %s7361_s9 }
 0x925   :  { %3500 = vrot.lane.b32.xlu0 %v3487_v50, %s7364_s18 }
 0x928   :  { %3619 = vrot.lane.b32.xlu1 %v3606_v61, %s7361_s9 }
 0x929   :  { %3502 = vrot.lane.b32.xlu0 %v3489_v56, %s7364_s18 }
 0x92c   :  { %3543 = vrot.lane.b32.xlu1 %v3530_v1, %s7362_s24 }
 0x92d   :  { %3541 = vrot.lane.b32.xlu0 %v3528_v2, %s7362_s24 }
 0x930   :  { %3582 = vrot.lane.b32.xlu1 %v3569_v18, %s7365_s12 }
 0x931   :  { %3580 = vrot.lane.b32.xlu0 %v3567_v4, %s7365_s12 }
 0x934   :  { %3621 = vrot.lane.b32.xlu1 %v3608_v33, %s7361_s9 }
 0x935   :  { %3504 = vrot.lane.b32.xlu0 %v3491_v7, %s7364_s18 }
 0x939   :  { %3623 = vrot.lane.b32.xlu0 %v3607_v37, %s7361_s9 }
 0x96a   :  { %v3493_v51 = vpop.permute.xlu1 %3492 }
 0x96b   :  { %v3633_v41 = vsel %vm3311_vm9, %v9746_v10, %v3493_v51 }
 0x96e   :  { %v3532_v62 = vpop.permute.xlu1 %3531 }
 0x96f   :  { %v9872_v44 = vpop.permute.xlu0 %3506  ;;  %v3641_v20 = vsel %vm1051_vm4, %v3633_v41, %v3532_v62 }
 0x972   :  { %v3571_v52 = vpop.permute.xlu1 %3570 }
 0x973   :  { %v9874_v21 = vpop.permute.xlu0 %3545  ;;  %v3650_v59 = vsel %vm3649_vm10, %v3641_v20, %v3571_v52 }
 0x976   :  { %v3610_v28 = vpop.permute.xlu1 %3609 }
 0x977   :  { %v3585_v14 = vpop.permute.xlu0 %3584  ;;  %v3658_v49 = vsel %vm1621_vm6, %v3650_v59, %v3610_v28  ;;  %v3640_v59 = vsel %vm3311_vm9, %v9756_v5, %v9872_v44 }
 0x978   :  { %5780 = vmatprep.mubr.msk.f32.mxu1 %vm3672_vm11, %v3658_v49  ;;  %v3648_v28 = vsel %vm1051_vm4, %v3640_v59, %v9874_v21 }
 0x97a   :  { %v3612_v55 = vpop.permute.xlu1 %3611 }
 0x97b   :  { %v3495_v45 = vpop.permute.xlu0 %3494 }
 0x97c   :  { %v3634_v40 = vsel %vm3311_vm9, %v9748_v6, %v3495_v45 }
 0x97e   :  { %v3536_v0 = vpop.permute.xlu1 %3535 }
 0x97f   :  { %v3534_v25 = vpop.permute.xlu0 %3533 }
 0x980   :  { %v3642_v10 = vsel %vm1051_vm4, %v3634_v40, %v3534_v25 }
 0x982   :  { %v3575_v39 = vpop.permute.xlu1 %3574 }
 0x983   :  { %v3573_v29 = vpop.permute.xlu0 %3572 }
 0x984   :  { %v3651_v38 = vsel %vm3649_vm10, %v3642_v10, %v3573_v29 }
 0x985   :  { %v3659_v53 = vsel %vm1621_vm6, %v3651_v38, %v3612_v55  ;;  %v3657_v55 = vsel %vm3649_vm10, %v3648_v28, %v3585_v14 }
 0x986   :  { %5781 = vmatmul.mubr.msk.f32.vlgmr.msra.gmra.mrb[32].mxu1 %vm3672_vm11, %v3659_v53  ;;  %v3614_v23 = vpop.permute.xlu1 %3613 }
 0x987   :  { %v3497_v60 = vpop.permute.xlu0 %3496 }
 0x988   :  { %v3635_v27 = vsel %vm3311_vm9, %v9768_v15, %v3497_v60 }
 0x989   :  { %v3643_v32 = vsel %vm1051_vm4, %v3635_v27, %v3536_v0 }
 0x98a   :  { %v3652_v58 = vsel %vm3649_vm10, %v3643_v32, %v3575_v39  ;;  %v3616_v6 = vpop.permute.xlu1 %3615 }
 0x98b   :  { %v3499_v48 = vpop.permute.xlu0 %3498  ;;  %v3660_v35 = vsel %vm1621_vm6, %v3652_v58, %v3614_v23 }
 0x98c   :  { %5783 = vmatprep.mubr.msk.f32.mxu1 %vm3672_vm11, %v3660_v35  ;;  %v3636_v22 = vsel %vm3311_vm9, %v9785_v26, %v3499_v48 }
 0x98e   :  { %v3540_v13 = vpop.permute.xlu1 %3539 }
 0x98f   :  { %v3538_v47 = vpop.permute.xlu0 %3537 }
 0x990   :  { %v3644_v42 = vsel %vm1051_vm4, %v3636_v22, %v3538_v47 }
 0x992   :  { %v3579_v16 = vpop.permute.xlu1 %3578 }
 0x993   :  { %v3577_v46 = vpop.permute.xlu0 %3576 }
 0x994   :  { %v3653_v15 = vsel %vm3649_vm10, %v3644_v42, %v3577_v46 }
 0x995   :  { %v3661_v50 = vsel %vm1621_vm6, %v3653_v15, %v3616_v6 }
 0x996   :  { %5784 = vmatmul.mubr.msk.f32.gmra.mrb[34].mxu1 %vm3672_vm11, %v3661_v50  ;;  %v3618_v57 = vpop.permute.xlu1 %3617 }
 0x997   :  { %v3501_v8 = vpop.permute.xlu0 %3500 }
 0x998   :  { %v3637_v61 = vsel %vm3311_vm9, %v9809_v17, %v3501_v8 }
 0x999   :  { %v3645_v56 = vsel %vm1051_vm4, %v3637_v61, %v3540_v13 }
 0x99a   :  { %v3654_v9 = vsel %vm3649_vm10, %v3645_v56, %v3579_v16  ;;  %v3620_v26 = vpop.permute.xlu1 %3619 }
 0x99b   :  { %v3503_v1 = vpop.permute.xlu0 %3502  ;;  %v3662_v2 = vsel %vm1621_vm6, %v3654_v9, %v3618_v57 }
 0x99c   :  { %5786 = vmatprep.mubr.msk.f32.mxu1 %vm3672_vm11, %v3662_v2  ;;  %v3638_v4 = vsel %vm3311_vm9, %v9817_v30, %v3503_v1 }
 0x99e   :  { %v3544_v18 = vpop.permute.xlu1 %3543 }
 0x99f   :  { %v3542_v37 = vpop.permute.xlu0 %3541 }
 0x9a0   :  { %v3646_v7 = vsel %vm1051_vm4, %v3638_v4, %v3542_v37 }
 0x9a2   :  { %v3583_v33 = vpop.permute.xlu1 %3582 }
 0x9a3   :  { %v3581_v51 = vpop.permute.xlu0 %3580 }
 0x9a4   :  { %v3655_v17 = vsel %vm3649_vm10, %v3646_v7, %v3581_v51 }
 0x9a5   :  { %v3663_v62 = vsel %vm1621_vm6, %v3655_v17, %v3620_v26 }
 0x9a6   :  { %5787 = vmatmul.mubr.msk.f32.gmra.mrb[36].mxu1 %vm3672_vm11, %v3663_v62  ;;  %v3622_v20 = vpop.permute.xlu1 %3621 }
 0x9a7   :  { %v3505_v52 = vpop.permute.xlu0 %3504 }
 0x9a8   :  { %v3639_v41 = vsel %vm3311_vm9, %v9837_v12, %v3505_v52  ;;  %v5655_v12 = vld [vmem:[#allocation25] ss:$0 sm:$0xff] }
 0x9a9   :  { %v3647_v30 = vsel %vm1051_vm4, %v3639_v41, %v3544_v18 }
 0x9aa   :  { %v3656_v49 = vsel %vm3649_vm10, %v3647_v30, %v3583_v33 }
 0x9ab   :  { %v3624_v45 = vpop.permute.xlu0 %3623  ;;  %v3664_v0 = vsel %vm1621_vm6, %v3656_v49, %v3622_v20 }
 0x9ac   :  { %v3665_v25 = vsel %vm1621_vm6, %v3657_v55, %v3624_v45  ;;  %5789 = vmatprep.mubr.msk.f32.mxu1 %vm3672_vm11, %v3664_v0 }
 0x9ad   :  { %5790 = vmatmul.mubr.msk.f32.gmra.mrb[38].mxu1 %vm3672_vm11, %v3665_v25 }
 0xa59   :  { %v5782_v5 = vpop.f32.mrb[32].mxu1 }
 0xa5a   :  { %v9926_v44 = vadd.f32 %v5782_v5, %v5655_v12  ;;  %v3763_v40 = vpop.f32.mrb[33].mxu1 }
 0xa5b   :  { %v9928_v39 = vadd.f32 %v5655_v12, %v3763_v40 }
 0xa5c   :  { %v3803_v21 = vmul.f32 %v9926_v44, %v9926_v44  ;;  %v3811_v14 = vsel %vm3311_vm9, %v9926_v44, 0.0 }
 0xa5d   :  { %v3802_v10 = vmul.f32 %v9928_v39, %v9928_v39  ;;  %v3810_v29 = vsel %vm3311_vm9, %v9928_v39, 0.0 }
 0xa5e   :  { %v3825_v38 = vsel %vm3311_vm9, %v3803_v21, 0.0  ;;  %v3812_v53 = vadd.f32 %v3811_v14, %v3810_v29 }
 0xa5f   :  { %v3824_v23 = vsel %vm3311_vm9, %v3802_v10, 0.0 }
 0xa60   :  { %v3826_v60 = vadd.f32 %v3825_v38, %v3824_v23 }
 0xa69   :  { %v5785_v27 = vpop.f32.mrb[34].mxu1 }
 0xa6a   :  { %v9940_v32 = vadd.f32 %v5785_v27, %v5655_v12  ;;  %v3773_v58 = vpop.f32.mrb[35].mxu1 }
 0xa6b   :  { %v9942_v6 = vadd.f32 %v5655_v12, %v3773_v58 }
 0xa6c   :  { %v3805_v48 = vmul.f32 %v9940_v32, %v9940_v32  ;;  %v3815_v22 = vsel %vm3009_vm8, %v9940_v32, 0.0 }
 0xa6d   :  { %v3804_v35 = vmul.f32 %v9942_v6, %v9942_v6  ;;  %v3813_v13 = vsel %vm3311_vm9, %v9942_v6, 0.0 }
 0xa6e   :  { %v3814_v47 = vadd.f32 %v3813_v13, %v3812_v53  ;;  %v3829_v15 = vsel %vm3009_vm8, %v3805_v48, 0.0 }
 0xa6f   :  { %v3827_v16 = vsel %vm3311_vm9, %v3804_v35, 0.0 }
 0xa70   :  { %v3816_v42 = vadd.f32 %v3815_v22, %v3814_v47  ;;  %v3828_v46 = vadd.f32 %v3827_v16, %v3826_v60 }
 0xa72   :  { %v3830_v50 = vadd.f32 %v3829_v15, %v3828_v46  ;;  %v3817_v4 = vrot.slane %v3816_v42, 4 }
 0xa74   :  { %v3831_v17 = vrot.slane %v3830_v50, 4  ;;  %v3818_v20 = vadd.f32 %v3817_v4, %v3816_v42  ;;  %v2994_v4 = vld [vmem:[#allocation26] sm:$0x1] }
 0xa76   :  { %v3832_v49 = vadd.f32 %v3831_v17, %v3830_v50  ;;  %v3819_v25 = vrot.slane %v3818_v20, 2 }
 0xa78   :  { %v3833_v14 = vrot.slane %v3832_v49, 2 }
 0xa79   :  { %v5788_v57 = vpop.f32.mrb[36].mxu1 }
 0xa7a   :  { %v9954_v8 = vadd.f32 %v5788_v57, %v5655_v12  ;;  %v3783_v61 = vpop.f32.mrb[37].mxu1  ;;  %v3834_v23 = vadd.f32 %v3833_v14, %v3832_v49 }
 0xa7b   :  { %v9956_v56 = vadd.f32 %v5655_v12, %v3783_v61 }
 0xa7c   :  { %v3807_v9 = vmul.f32 %v9954_v8, %v9954_v8  ;;  %v3839_v26 = vsel %vm3311_vm9, %v9954_v8, 0.0  ;;  %v3835_v13 = vrot.slane %v3834_v23, 1 }
 0xa7d   :  { %v3806_v1 = vmul.f32 %v9956_v56, %v9956_v56  ;;  %v3838_v2 = vsel %vm3311_vm9, %v9956_v56, 0.0 }
 0xa7e   :  { %v3853_v18 = vsel %vm3311_vm9, %v3807_v9, 0.0  ;;  %v3840_v37 = vadd.f32 %v3839_v26, %v3838_v2  ;;  %v3836_v15 = vadd.f32 %v3835_v13, %v3834_v23 }
 0xa7f   :  { %v3852_v33 = vsel %vm3311_vm9, %v3806_v1, 0.0 }
 0xa80   :  { %v3854_v7 = vadd.f32 %v3853_v18, %v3852_v33  ;;  %v5791_v51 = vpop.f32.mrb[38].mxu1 }
 0xa81   :  { %v3799_v62 = vadd.f32 %v5791_v51, %v5655_v12  ;;  %v3793_v52 = vpop.f32.mrb[39].mxu1  ;;  %v2995_v51 = vld [vmem:[#allocation28] sm:$0x1] }
 0xa82   :  { %v3794_v41 = vadd.f32 %v5655_v12, %v3793_v52  ;;  %v3820_v12 = vadd.f32 %v3819_v25, %v3818_v20 }
 0xa83   :  { %v3809_v59 = vmul.f32 %v3799_v62, %v3799_v62  ;;  %v3843_v45 = vsel %vm3009_vm8, %v3799_v62, 0.0 }
 0xa84   :  { %v3808_v30 = vmul.f32 %v3794_v41, %v3794_v41  ;;  %v3841_v28 = vsel %vm3311_vm9, %v3794_v41, 0.0  ;;  %v3821_v58 = vrot.slane %v3820_v12, 1 }
 0xa85   :  { %v3842_v55 = vadd.f32 %v3841_v28, %v3840_v37  ;;  %v3857_v21 = vsel %vm3009_vm8, %v3809_v59, 0.0 }
 0xa86   :  { %v3855_v0 = vsel %vm3311_vm9, %v3808_v30, 0.0  ;;  %v3822_v16 = vadd.f32 %v3821_v58, %v3820_v12 }
 0xa87   :  { %v3844_v5 = vadd.f32 %v3843_v45, %v3842_v55  ;;  %v3856_v40 = vadd.f32 %v3855_v0, %v3854_v7 }
 0xa89   :  { %v3845_v10 = vrot.slane %v3844_v5, 4  ;;  %v3858_v29 = vadd.f32 %v3857_v21, %v3856_v40 }
 0xa8b   :  { %v3846_v38 = vadd.f32 %v3845_v10, %v3844_v5  ;;  %v3859_v53 = vrot.slane %v3858_v29, 4 }
 0xa8d   :  { %v3847_v60 = vrot.slane %v3846_v38, 2  ;;  %v3860_v27 = vadd.f32 %v3859_v53, %v3858_v29 }
 0xa8f   :  { %v3848_v48 = vadd.f32 %v3847_v60, %v3846_v38  ;;  %v3861_v35 = vrot.slane %v3860_v27, 2 }
 0xa91   :  { %v3849_v47 = vrot.slane %v3848_v48, 1  ;;  %v3862_v22 = vadd.f32 %v3861_v35, %v3860_v27 }
 0xa93   :  { %v3850_v42 = vadd.f32 %v3849_v47, %v3848_v48  ;;  %v3863_v46 = vrot.slane %v3862_v22, 1 }
 0xa95   :  { %v3851_v50 = vadd.f32 %v3850_v42, %v3822_v16  ;;  %v3864_v57 = vadd.f32 %v3863_v46, %v3862_v22 }
 0xa97   :  { %v3865_v61 = vadd.f32 %v3864_v57, %v3836_v15  ;;  %v3866_v9 = vmul.f32 0.017857144, %v3851_v50 }
 0xa99   :  { %v3867_v26 = vmul.f32 0.017857144, %v3865_v61  ;;  %v3868_v1 = vmul.f32 %v3866_v9, %v3866_v9 }
 0xa9b   :  { %v3869_v2 = vsub.f32 %v3867_v26, %v3868_v1 }
 0xa9d   :  { %v3870_v18 = vmax.f32 %v3869_v2, 0.0 }
 0xa9f   :  { %v3871_v37 = vadd.f32 1e-05, %v3870_v18 }
 0xaa1   :  { %6616 = vrsqrt.f32 %v3871_v37 }
 0xaab   :  { %v6617_v33 = vpop.eup %6616 }
 0xaac   :  { %v3873_v7 = vmul.f32 %v6617_v33, %v2994_v4 }
 0xaae   :  { %v3874_v17 = vmul.f32 %v3873_v7, %v3866_v9  ;;  %v3879_v52 = vrot.slane %v3873_v7, %v7684_v24 }
 0xab0   :  { %v3875_v20 = vsub.f32 %v2995_v51, %v3874_v17  ;;  %v3880_v59 = vmul.f32 %v3879_v52, %v9928_v39  ;;  %v3881_v30 = vmul.f32 %v3879_v52, %v9926_v44  ;;  %v3882_v28 = vmul.f32 %v3879_v52, %v9942_v6 }
 0xab1   :  { %v3883_v49 = vmul.f32 %v3879_v52, %v9940_v32  ;;  %v3884_v55 = vmul.f32 %v3879_v52, %v9956_v56  ;;  %v3885_v45 = vmul.f32 %v3879_v52, %v9954_v8  ;;  %v3886_v0 = vmul.f32 %v3879_v52, %v3794_v41 }
 0xab2   :  { %v3887_v25 = vmul.f32 %v3879_v52, %v3799_v62  ;;  %v3892_v5 = vrot.slane %v3875_v20, %v7684_v24 }
 0xab4   :  { %v3894_v40 = vadd.f32 %v3892_v5, %v3880_v59  ;;  %v3895_v21 = vadd.f32 %v3892_v5, %v3881_v30  ;;  %v3896_v14 = vadd.f32 %v3892_v5, %v3882_v28  ;;  %v3897_v10 = vadd.f32 %v3892_v5, %v3883_v49 }
 0xab5   :  { %v9980_v29 = vadd.f32 %v3892_v5, %v3884_v55  ;;  %v9982_v39 = vadd.f32 %v3892_v5, %v3885_v45  ;;  %v9984_v44 = vadd.f32 %v3892_v5, %v3886_v0  ;;  %v9986_v6 = vadd.f32 %v3892_v5, %v3887_v25 }
 0xab6   :  { %v3902_v32 = vsub.f32 0.0, %v3894_v40  ;;  %v3903_v56 = vsub.f32 0.0, %v3895_v21  ;;  %v3904_v12 = vsub.f32 0.0, %v3896_v14  ;;  %v3905_v8 = vsub.f32 0.0, %v3897_v10 }
 0xab7   :  { %v3906_v62 = vsub.f32 0.0, %v9980_v29  ;;  %v3907_v41 = vsub.f32 0.0, %v9982_v39  ;;  %v3908_v38 = vsub.f32 0.0, %v9984_v44  ;;  %v3909_v27 = vsub.f32 0.0, %v9986_v6 }
 0xab8   :  { %v3910_v53 = vmul.f32 1.442695, %v3902_v32  ;;  %v3912_v23 = vmul.f32 1.442695, %v3903_v56  ;;  %v3914_v60 = vmul.f32 1.442695, %v3904_v12 }
 0xab9   :  { %v3916_v58 = vmul.f32 1.442695, %v3905_v8  ;;  %v3918_v48 = vmul.f32 1.442695, %v3906_v62  ;;  %v3920_v35 = vmul.f32 1.442695, %v3907_v41 }
 0xaba   :  { %6618 = vpow2.f32 %v3910_v53  ;;  %v3922_v13 = vmul.f32 1.442695, %v3908_v38  ;;  %v3924_v47 = vmul.f32 1.442695, %v3909_v27 }
 0xabb   :  { %6620 = vpow2.f32 %v3912_v23 }
 0xabc   :  { %6622 = vpow2.f32 %v3914_v60 }
 0xabd   :  { %6624 = vpow2.f32 %v3916_v58 }
 0xabe   :  { %6626 = vpow2.f32 %v3918_v48 }
 0xabf   :  { %6628 = vpow2.f32 %v3920_v35  ;;  %v2998_v35 = vld [vmem:[%s10690_s22 + $0x10] sm:$0xff] }
 0xac0   :  { %6630 = vpow2.f32 %v3922_v13  ;;  %v2999_v13 = vld [vmem:[%s10690_s22 + $0x18] sm:$0xff] }
 0xac1   :  { %6632 = vpow2.f32 %v3924_v47 }
 0xac4   :  { %v6619_v22 = vpop.eup %6618 }
 0xac5   :  { %v6621_v16 = vpop.eup %6620  ;;  %v3926_v42 = vadd.f32 1.0, %v6619_v22  ;;  %v3000_v22 = vld [vmem:[%s10690_s22 + $0x20] sm:$0xff] }
 0xac6   :  { %v6623_v46 = vpop.eup %6622  ;;  %v3927_v15 = vadd.f32 1.0, %v6621_v16  ;;  %v3001_v16 = vld [vmem:[%s10690_s22 + $0x28] sm:$0xff] }
 0xac7   :  { %v6625_v50 = vpop.eup %6624  ;;  %v3928_v57 = vadd.f32 1.0, %v6623_v46  ;;  %6634 = vrcp.f32 %v3926_v42  ;;  %v6001_v42 = vpack.c.bf16 %v2999_v13, %v2998_v35 }
 0xac8   :  { %v6627_v61 = vpop.eup %6626  ;;  %v3929_v9 = vadd.f32 1.0, %v6625_v50  ;;  %6636 = vrcp.f32 %v3927_v15 }
 0xac9   :  { %v6629_v26 = vpop.eup %6628  ;;  %v3930_v1 = vadd.f32 1.0, %v6627_v61  ;;  %6638 = vrcp.f32 %v3928_v57  ;;  %v6005_v57 = vpack.c.bf16 %v3001_v16, %v3000_v22  ;;  %v3002_v61 = vld [vmem:[%s10690_s22 + $0x30] sm:$0xff] }
 0xaca   :  { %v6631_v2 = vpop.eup %6630  ;;  %v3931_v18 = vadd.f32 1.0, %v6629_v26  ;;  %6640 = vrcp.f32 %v3929_v9  ;;  %v3003_v9 = vld [vmem:[%s10690_s22 + $0x38] sm:$0xff] }
 0xacb   :  { %v6633_v37 = vpop.eup %6632  ;;  %v3932_v4 = vadd.f32 1.0, %v6631_v2  ;;  %6642 = vrcp.f32 %v3930_v1  ;;  %v6009_v2 = vpack.c.bf16 %v3003_v9, %v3002_v61 }
 0xacc   :  { %v3933_v33 = vadd.f32 1.0, %v6633_v37  ;;  %6644 = vrcp.f32 %v3931_v18 }
 0xacd   :  { %6646 = vrcp.f32 %v3932_v4 }
 0xace   :  { %6648 = vrcp.f32 %v3933_v33  ;;  %v3004_v33 = vld [vmem:[%s10690_s22 + $0x40] sm:$0xff] }
 0xad1   :  { %v6635_v7 = vpop.eup %6634 }
 0xad2   :  { %v6637_v51 = vpop.eup %6636  ;;  %v3942_v17 = vmul.f32 %v6635_v7, %v3894_v40  ;;  %v3005_v7 = vld [vmem:[%s10690_s22 + $0x48] sm:$0xff] }
 0xad3   :  { %v6639_v52 = vpop.eup %6638  ;;  %v3943_v20 = vmul.f32 %v6637_v51, %v3895_v21  ;;  %v2996_v21 = vld [vmem:[%s10690_s22] sm:$0xff] }
 0xad4   :  { %v6641_v59 = vpop.eup %6640  ;;  %v3944_v30 = vmul.f32 %v6639_v52, %v3896_v14  ;;  %3950 = vst.msk [vmem:[#allocation3 + $0x4] sm:$0xff] %vm3311_vm9, %v3942_v17  ;;  %v2997_v14 = vld [vmem:[%s10690_s22 + $0x8] sm:$0xff]  ;;  %v6013_v17 = vpack.c.bf16 %v3005_v7, %v3004_v33 }
 0xad5   :  { %v6643_v28 = vpop.eup %6642  ;;  %v3945_v49 = vmul.f32 %v6641_v59, %v3897_v10  ;;  %3951 = vst.msk [vmem:[#allocation3 + $0xc] sm:$0xff] %vm3311_vm9, %v3943_v20  ;;  %v5997_v32 = vpack.c.bf16 %v2997_v14, %v2996_v21 }
 0xad6   :  { %v6645_v55 = vpop.eup %6644  ;;  %v3946_v45 = vmul.f32 %v6643_v28, %v9980_v29  ;;  %3952 = vst.msk [vmem:[#allocation3 + $0x14] sm:$0xff] %vm3311_vm9, %v3944_v30 }
 0xad7   :  { %v6647_v0 = vpop.eup %6646  ;;  %v3947_v25 = vmul.f32 %v6645_v55, %v9982_v39  ;;  %3953 = vst.msk [vmem:[#allocation3 + $0x1c] sm:$0xf] %vm3009_vm8, %v3945_v49  ;;  %5998 = vmatprep.subr.bf16.mxu1 %v5997_v32 }
 0xad8   :  { %v6649_v5 = vpop.eup %6648  ;;  %v3948_v40 = vmul.f32 %v6647_v0, %v9984_v44  ;;  %3954 = vst.msk [vmem:[#allocation3 + $0x24] sm:$0xff] %vm3311_vm9, %v3946_v45  ;;  %6000 = vmatpush3.bf16.msra.mxu1 %v5997_v32 }
 0xad9   :  { %v3949_v10 = vmul.f32 %v6649_v5, %v9986_v6  ;;  %3955 = vst.msk [vmem:[#allocation3 + $0x2c] sm:$0xff] %vm3311_vm9, %v3947_v25  ;;  %6002 = vmatprep.subr.bf16.mxu1 %v6001_v42 }
 0xada   :  { %3956 = vst.msk [vmem:[#allocation3 + $0x34] sm:$0xff] %vm3311_vm9, %v3948_v40 }
 0xadb   :  { %3957 = vst.msk [vmem:[#allocation3 + $0x3c] sm:$0xf] %vm3009_vm8, %v3949_v10  ;;  %v10006_v29 = vld [vmem:[#allocation3] sm:$0xff] }
 0xadc   :  { %v10008_v39 = vld [vmem:[#allocation3 + $0x8] sm:$0xff]  ;;  %v3974_v44 = vrot.slane %v10006_v29, 1  ;;  %v4013_v12 = vrot.slane %v10006_v29, 2  ;;  %v4052_v53 = vrot.slane %v10006_v29, 3  ;;  %v4091_v58 = vrot.slane %v10006_v29, 4  ;;  %6004 = vmatpush3.bf16.msra.mxu1 %v6001_v42 }
 0xadd   :  { %v3975_v56 = vrot.slane %v10008_v39, 1  ;;  %v4014_v8 = vrot.slane %v10008_v39, 2  ;;  %v4053_v23 = vrot.slane %v10008_v39, 3  ;;  %v4092_v48 = vrot.slane %v10008_v39, 4  ;;  %v10033_v47 = vld [vmem:[#allocation3 + $0x10] sm:$0xff]  ;;  %6006 = vmatprep.subr.bf16.mxu1 %v6005_v57 }
 0xade   :  { %v4094_v50 = vrot.slane %v10033_v47, 4  ;;  %v3977_v26 = vrot.slane %v10033_v47, 1  ;;  %v10047_v1 = vld [vmem:[#allocation3 + $0x18] sm:$0xff]  ;;  %v4016_v18 = vrot.slane %v10033_v47, 2  ;;  %v4055_v52 = vrot.slane %v10033_v47, 3 }
 0xadf   :  { %v3976_v6 = vsel %vm649_vm0, %v3974_v44, %v3975_v56  ;;  %v4015_v38 = vsel %vm749_vm1, %v4013_v12, %v4014_v8  ;;  %v4054_v27 = vsel %vm849_vm2, %v4052_v53, %v4053_v23  ;;  %v4093_v15 = vsel %vm949_vm3, %v4091_v58, %v4092_v48  ;;  %v10071_v0 = vld [vmem:[#allocation3 + $0x20] sm:$0xff] }
 0xae0   :  { %3989 = vrot.lane.b32.xlu1 %v3976_v6, %s7364_s18  ;;  %v4095_v37 = vsel %vm949_vm3, %v4092_v48, %v4094_v50  ;;  %v4018_v4 = vrot.slane %v10047_v1, 2  ;;  %v3978_v51 = vsel %vm649_vm0, %v3975_v56, %v3977_v26  ;;  %6008 = vmatpush3.bf16.msra.mxu1 %v6005_v57  ;;  %v4057_v59 = vrot.slane %v10047_v1, 3  ;;  %v10079_v14 = vld [vmem:[#allocation3 + $0x28] sm:$0xff] }
 0xae1   :  { %6010 = vmatprep.subr.bf16.mxu1 %v6009_v2  ;;  %v4017_v30 = vsel %vm749_vm1, %v4014_v8, %v4016_v18  ;;  %v4096_v49 = vrot.slane %v10047_v1, 4  ;;  %v4056_v55 = vsel %vm849_vm2, %v4053_v23, %v4055_v52  ;;  %v3979_v45 = vrot.slane %v10047_v1, 1  ;;  %v10099_v48 = vld [vmem:[#allocation3 + $0x30] sm:$0xff] }
 0xae2   :  { %v10016_v62 = vld [vmem:[#allocation3 + $0x38] sm:$0xff]  ;;  %v4019_v20 = vsel %vm749_vm1, %v4016_v18, %v4018_v4  ;;  %v4058_v28 = vsel %vm849_vm2, %v4055_v52, %v4057_v59  ;;  %v4098_v5 = vrot.slane %v10071_v0, 4  ;;  %v3981_v21 = vrot.slane %v10071_v0, 1 }
 0xae3   :  { %v3987_v41 = vrot.slane %v10016_v62, 1  ;;  %v4026_v60 = vrot.slane %v10016_v62, 2  ;;  %v4065_v46 = vrot.slane %v10016_v62, 3  ;;  %v4097_v25 = vsel %vm949_vm3, %v4094_v50, %v4096_v49 }
 0xae4   :  { %4028 = vrot.lane.b32.xlu1 %v4015_v38, %s7362_s24  ;;  %6012 = vmatpush3.bf16.msra.mxu1 %v6009_v2  ;;  %v3980_v40 = vsel %vm649_vm0, %v3977_v26, %v3979_v45  ;;  %v4020_v10 = vrot.slane %v10071_v0, 2  ;;  %v4099_v32 = vsel %vm949_vm3, %v4096_v49, %v4098_v5  ;;  %v4022_v44 = vrot.slane %v10079_v14, 2 }
 0xae5   :  { %4003 = vrot.lane.b32.xlu0 %v3987_v41, %s7364_s18  ;;  %6014 = vmatprep.subr.bf16.mxu1 %v6013_v17  ;;  %v3982_v56 = vsel %vm649_vm0, %v3979_v45, %v3981_v21  ;;  %v4059_v6 = vrot.slane %v10071_v0, 3  ;;  %v4061_v8 = vrot.slane %v10079_v14, 3  ;;  %v4100_v23 = vrot.slane %v10079_v14, 4 }
 0xae6   :  { %v4023_v12 = vsel %vm749_vm1, %v4020_v10, %v4022_v44  ;;  %v4021_v38 = vsel %vm749_vm1, %v4018_v4, %v4020_v10  ;;  %v3983_v58 = vrot.slane %v10079_v14, 1  ;;  %v4102_v13 = vrot.slane %v10099_v48, 4 }
 0xae7   :  { %v4062_v53 = vsel %vm849_vm2, %v4059_v6, %v4061_v8  ;;  %v4101_v35 = vsel %vm949_vm3, %v4098_v5, %v4100_v23  ;;  %v3985_v16 = vrot.slane %v10099_v48, 1  ;;  %v4024_v42 = vrot.slane %v10099_v48, 2 }
 0xae8   :  { %4067 = vrot.lane.b32.xlu1 %v4054_v27, %s7365_s12  ;;  %6016 = vmatpush3.bf16.msra.mxu1 %v6013_v17  ;;  %v4060_v27 = vsel %vm849_vm2, %v4057_v59, %v4059_v6  ;;  %v3984_v22 = vsel %vm649_vm0, %v3981_v21, %v3983_v58  ;;  %v4063_v57 = vrot.slane %v10099_v48, 3  ;;  %v4104_v2 = vrot.slane %v10016_v62, 4 }
 0xae9   :  { %4042 = vrot.lane.b32.xlu0 %v4026_v60, %s7362_s24  ;;  %v3986_v50 = vsel %vm649_vm0, %v3983_v58, %v3985_v16  ;;  %v4027_v61 = vsel %vm749_vm1, %v4024_v42, %v4026_v60  ;;  %v4025_v9 = vsel %vm749_vm1, %v4022_v44, %v4024_v42 }
 0xaea   :  { %v4066_v26 = vsel %vm849_vm2, %v4063_v57, %v4065_v46  ;;  %v4064_v18 = vsel %vm849_vm2, %v4061_v8, %v4063_v57  ;;  %v4105_v60 = vsel %vm949_vm3, %v4102_v13, %v4104_v2 }
 0xaec   :  { %4106 = vrot.lane.b32.xlu1 %v4093_v15, %s7361_s9  ;;  %v4103_v15 = vsel %vm949_vm3, %v4100_v23, %v4102_v13 }
 0xaed   :  { %4081 = vrot.lane.b32.xlu0 %v4065_v46, %s7365_s12 }
 0xaf0   :  { %4108 = vrot.lane.b32.xlu1 %v4095_v37, %s7361_s9  ;;  %v3988_v37 = vsel %vm649_vm0, %v3985_v16, %v3987_v41 }
 0xaf1   :  { %3991 = vrot.lane.b32.xlu0 %v3978_v51, %s7364_s18 }
 0xaf4   :  { %4032 = vrot.lane.b32.xlu1 %v4019_v20, %s7362_s24 }
 0xaf5   :  { %4030 = vrot.lane.b32.xlu0 %v4017_v30, %s7362_s24 }
 0xaf8   :  { %4071 = vrot.lane.b32.xlu1 %v4058_v28, %s7365_s12 }
 0xaf9   :  { %4069 = vrot.lane.b32.xlu0 %v4056_v55, %s7365_s12 }
 0xafc   :  { %4110 = vrot.lane.b32.xlu1 %v4097_v25, %s7361_s9 }
 0xafd   :  { %3993 = vrot.lane.b32.xlu0 %v3980_v40, %s7364_s18 }
 0xb00   :  { %4112 = vrot.lane.b32.xlu1 %v4099_v32, %s7361_s9 }
 0xb01   :  { %3995 = vrot.lane.b32.xlu0 %v3982_v56, %s7364_s18 }
 0xb04   :  { %4036 = vrot.lane.b32.xlu1 %v4023_v12, %s7362_s24 }
 0xb05   :  { %4034 = vrot.lane.b32.xlu0 %v4021_v38, %s7362_s24 }
 0xb08   :  { %4075 = vrot.lane.b32.xlu1 %v4062_v53, %s7365_s12 }
 0xb09   :  { %4073 = vrot.lane.b32.xlu0 %v4060_v27, %s7365_s12 }
 0xb0c   :  { %4114 = vrot.lane.b32.xlu1 %v4101_v35, %s7361_s9 }
 0xb0d   :  { %3997 = vrot.lane.b32.xlu0 %v3984_v22, %s7364_s18 }
 0xb10   :  { %4116 = vrot.lane.b32.xlu1 %v4103_v15, %s7361_s9 }
 0xb11   :  { %3999 = vrot.lane.b32.xlu0 %v3986_v50, %s7364_s18 }
 0xb14   :  { %4040 = vrot.lane.b32.xlu1 %v4027_v61, %s7362_s24 }
 0xb15   :  { %4038 = vrot.lane.b32.xlu0 %v4025_v9, %s7362_s24 }
 0xb18   :  { %4079 = vrot.lane.b32.xlu1 %v4066_v26, %s7365_s12 }
 0xb19   :  { %4077 = vrot.lane.b32.xlu0 %v4064_v18, %s7365_s12 }
 0xb1c   :  { %4118 = vrot.lane.b32.xlu1 %v4105_v60, %s7361_s9 }
 0xb1d   :  { %4001 = vrot.lane.b32.xlu0 %v3988_v37, %s7364_s18 }
 0xb21   :  { %4120 = vrot.lane.b32.xlu0 %v4104_v2, %s7361_s9 }
 0xb52   :  { %v3990_v46 = vpop.permute.xlu1 %3989 }
 0xb53   :  { %v4130_v17 = vsel %vm3311_vm9, %v10006_v29, %v3990_v46 }
 0xb56   :  { %v4029_v4 = vpop.permute.xlu1 %4028 }
 0xb57   :  { %v4004_v33 = vpop.permute.xlu0 %4003  ;;  %v4138_v52 = vsel %vm1051_vm4, %v4130_v17, %v4029_v4 }
 0xb5a   :  { %v4068_v7 = vpop.permute.xlu1 %4067 }
 0xb5b   :  { %v4043_v51 = vpop.permute.xlu0 %4042  ;;  %v4146_v20 = vsel %vm3649_vm10, %v4138_v52, %v4068_v7 }
 0xb5e   :  { %v4107_v59 = vpop.permute.xlu1 %4106 }
 0xb5f   :  { %v4082_v41 = vpop.permute.xlu0 %4081  ;;  %v4154_v30 = vsel %vm1621_vm6, %v4146_v20, %v4107_v59  ;;  %v4137_v20 = vsel %vm3311_vm9, %v10016_v62, %v4004_v33 }
 0xb60   :  { %5812 = vmatprep.mubr.msk.f32.mxu1 %vm3672_vm11, %v4154_v30  ;;  %v4145_v59 = vsel %vm1051_vm4, %v4137_v20, %v4043_v51 }
 0xb62   :  { %v4109_v28 = vpop.permute.xlu1 %4108 }
 0xb63   :  { %v3992_v49 = vpop.permute.xlu0 %3991 }
 0xb64   :  { %v4131_v25 = vsel %vm3311_vm9, %v10008_v39, %v3992_v49 }
 0xb66   :  { %v4033_v55 = vpop.permute.xlu1 %4032 }
 0xb67   :  { %v4031_v45 = vpop.permute.xlu0 %4030 }
 0xb68   :  { %v4139_v29 = vsel %vm1051_vm4, %v4131_v25, %v4031_v45 }
 0xb6a   :  { %v4072_v5 = vpop.permute.xlu1 %4071 }
 0xb6b   :  { %v4070_v40 = vpop.permute.xlu0 %4069 }
 0xb6c   :  { %v4147_v21 = vsel %vm3649_vm10, %v4139_v29, %v4070_v40 }
 0xb6d   :  { %v4155_v10 = vsel %vm1621_vm6, %v4147_v21, %v4109_v28  ;;  %v4153_v28 = vsel %vm3649_vm10, %v4145_v59, %v4082_v41  ;;  %v4480_v59 = vld [vmem:[%s10691_s23] sm:$0xff] }
 0xb6e   :  { %5813 = vmatmul.mubr.msk.f32.vlgmr.msra.gmra.mrb[40].mxu1 %vm3672_vm11, %v4155_v10  ;;  %v4111_v32 = vpop.permute.xlu1 %4110 }
 0xb6f   :  { %v3994_v44 = vpop.permute.xlu0 %3993 }
 0xb70   :  { %v4132_v56 = vsel %vm3311_vm9, %v10033_v47, %v3994_v44 }
 0xb71   :  { %v4140_v6 = vsel %vm1051_vm4, %v4132_v56, %v4033_v55 }
 0xb72   :  { %v4148_v12 = vsel %vm3649_vm10, %v4140_v6, %v4072_v5  ;;  %v4113_v39 = vpop.permute.xlu1 %4112 }
 0xb73   :  { %v3996_v8 = vpop.permute.xlu0 %3995  ;;  %v4156_v38 = vsel %vm1621_vm6, %v4148_v12, %v4111_v32 }
 0xb74   :  { %5815 = vmatprep.mubr.msk.f32.mxu1 %vm3672_vm11, %v4156_v38  ;;  %v4133_v27 = vsel %vm3311_vm9, %v10047_v1, %v3996_v8 }
 0xb76   :  { %v4037_v53 = vpop.permute.xlu1 %4036 }
 0xb77   :  { %v4035_v23 = vpop.permute.xlu0 %4034 }
 0xb78   :  { %v4141_v35 = vsel %vm1051_vm4, %v4133_v27, %v4035_v23 }
 0xb7a   :  { %v4076_v58 = vpop.permute.xlu1 %4075 }
 0xb7b   :  { %v4074_v13 = vpop.permute.xlu0 %4073 }
 0xb7c   :  { %v4149_v47 = vsel %vm3649_vm10, %v4141_v35, %v4074_v13 }
 0xb7d   :  { %v4157_v22 = vsel %vm1621_vm6, %v4149_v47, %v4113_v39 }
 0xb7e   :  { %5816 = vmatmul.mubr.msk.f32.gmra.mrb[42].mxu1 %vm3672_vm11, %v4157_v22  ;;  %v4115_v16 = vpop.permute.xlu1 %4114 }
 0xb7f   :  { %v3998_v42 = vpop.permute.xlu0 %3997 }
 0xb80   :  { %v4134_v15 = vsel %vm3311_vm9, %v10071_v0, %v3998_v42 }
 0xb81   :  { %v4142_v50 = vsel %vm1051_vm4, %v4134_v15, %v4037_v53 }
 0xb82   :  { %v4150_v57 = vsel %vm3649_vm10, %v4142_v50, %v4076_v58  ;;  %v4117_v1 = vpop.permute.xlu1 %4116 }
 0xb83   :  { %v4000_v61 = vpop.permute.xlu0 %3999  ;;  %v4158_v9 = vsel %vm1621_vm6, %v4150_v57, %v4115_v16 }
 0xb84   :  { %5818 = vmatprep.mubr.msk.f32.mxu1 %vm3672_vm11, %v4158_v9  ;;  %v4135_v18 = vsel %vm3311_vm9, %v10079_v14, %v4000_v61 }
 0xb86   :  { %v4041_v26 = vpop.permute.xlu1 %4040 }
 0xb87   :  { %v4039_v2 = vpop.permute.xlu0 %4038 }
 0xb88   :  { %v4143_v37 = vsel %vm1051_vm4, %v4135_v18, %v4039_v2 }
 0xb8a   :  { %v4080_v60 = vpop.permute.xlu1 %4079 }
 0xb8b   :  { %v4078_v46 = vpop.permute.xlu0 %4077 }
 0xb8c   :  { %v4151_v0 = vsel %vm3649_vm10, %v4143_v37, %v4078_v46 }
 0xb8d   :  { %v4159_v4 = vsel %vm1621_vm6, %v4151_v0, %v4117_v1 }
 0xb8e   :  { %5819 = vmatmul.mubr.msk.f32.gmra.mrb[44].mxu1 %vm3672_vm11, %v4159_v4  ;;  %v4119_v52 = vpop.permute.xlu1 %4118 }
 0xb8f   :  { %v4002_v7 = vpop.permute.xlu0 %4001 }
 0xb90   :  { %v4136_v17 = vsel %vm3311_vm9, %v10099_v48, %v4002_v7  ;;  %v5664_v48 = vld [vmem:[#allocation29] ss:$0 sm:$0xff] }
 0xb91   :  { %v4144_v14 = vsel %vm1051_vm4, %v4136_v17, %v4041_v26 }
 0xb92   :  { %v4152_v30 = vsel %vm3649_vm10, %v4144_v14, %v4080_v60 }
 0xb93   :  { %v4121_v49 = vpop.permute.xlu0 %4120  ;;  %v4160_v55 = vsel %vm1621_vm6, %v4152_v30, %v4119_v52  ;;  %v4481_v30 = vld [vmem:[%s10691_s23 + $0x8] sm:$0xff] }
 0xb94   :  { %v4161_v45 = vsel %vm1621_vm6, %v4153_v28, %v4121_v49  ;;  %5821 = vmatprep.mubr.msk.f32.mxu1 %vm3672_vm11, %v4160_v55 }
 0xb95   :  { %5822 = vmatmul.mubr.msk.f32.gmra.mrb[46].mxu1 %vm3672_vm11, %v4161_v45  ;;  %v6017_v45 = vpack.c.bf16 %v4481_v30, %v4480_v59 }
 0xb97   :  { %6018 = vmatprep.subr.bf16.mxu0 %v6017_v45 }
 0xb98   :  { %6020 = vmatpush3.bf16.msra.mxu0 %v6017_v45 }
 0xc41   :  { %v5814_v25 = vpop.f32.mrb[40].mxu1 }
 0xc42   :  { %v4264_v62 = vadd.f32 %v5814_v25, %v5664_v48  ;;  %v4258_v33 = vpop.f32.mrb[41].mxu1 }
 0xc43   :  { %v4259_v5 = vadd.f32 %v5664_v48, %v4258_v33 }
 0xc44   :  { %v10183_v51 = vadd.f32 %v4264_v62, %v9652_v63 }
 0xc45   :  { %v10186_v29 = vadd.f32 %v4259_v5, %v9654_v36 }
 0xc46   :  { %v4306_v41 = vmul.f32 %v10183_v51, %v10183_v51  ;;  %v4314_v40 = vsel %vm3311_vm9, %v10183_v51, 0.0 }
 0xc47   :  { %v4305_v21 = vmul.f32 %v10186_v29, %v10186_v29  ;;  %v4313_v10 = vsel %vm3311_vm9, %v10186_v29, 0.0 }
 0xc48   :  { %v4328_v32 = vsel %vm3311_vm9, %v4306_v41, 0.0  ;;  %v4315_v44 = vadd.f32 %v4314_v40, %v4313_v10 }
 0xc49   :  { %v4327_v63 = vsel %vm3311_vm9, %v4305_v21, 0.0 }
 0xc4a   :  { %v4329_v56 = vadd.f32 %v4328_v32, %v4327_v63 }
 0xc51   :  { %v5817_v36 = vpop.f32.mrb[42].mxu1 }
 0xc52   :  { %v4274_v6 = vadd.f32 %v5817_v36, %v5664_v48  ;;  %v4268_v12 = vpop.f32.mrb[43].mxu1 }
 0xc53   :  { %v4269_v39 = vadd.f32 %v5664_v48, %v4268_v12 }
 0xc54   :  { %v10199_v8 = vadd.f32 %v4274_v6, %v9660_v31 }
 0xc55   :  { %v10202_v38 = vadd.f32 %v4269_v39, %v9656_v54 }
 0xc56   :  { %v4308_v53 = vmul.f32 %v10199_v8, %v10199_v8  ;;  %v4318_v35 = vsel %vm3009_vm8, %v10199_v8, 0.0 }
 0xc57   :  { %v4307_v23 = vmul.f32 %v10202_v38, %v10202_v38  ;;  %v4316_v27 = vsel %vm3311_vm9, %v10202_v38, 0.0 }
 0xc58   :  { %v4317_v58 = vadd.f32 %v4316_v27, %v4315_v44  ;;  %v4332_v54 = vsel %vm3009_vm8, %v4308_v53, 0.0 }
 0xc59   :  { %v4330_v13 = vsel %vm3311_vm9, %v4307_v23, 0.0 }
 0xc5a   :  { %v4319_v31 = vadd.f32 %v4318_v35, %v4317_v58  ;;  %v4331_v47 = vadd.f32 %v4330_v13, %v4329_v56 }
 0xc5c   :  { %v4333_v22 = vadd.f32 %v4332_v54, %v4331_v47 }
 0xc5e   :  { %v4334_v17 = vrot.slane %v4333_v22, 4 }
 0xc60   :  { %v4335_v25 = vadd.f32 %v4334_v17, %v4333_v22 }
 0xc61   :  { %v5820_v16 = vpop.f32.mrb[44].mxu1 }
 0xc62   :  { %v4284_v42 = vadd.f32 %v5820_v16, %v5664_v48  ;;  %v4278_v15 = vpop.f32.mrb[45].mxu1  ;;  %v4336_v40 = vrot.slane %v4335_v25, 2 }
 0xc63   :  { %v4279_v50 = vadd.f32 %v5664_v48, %v4278_v15 }
 0xc64   :  { %v10215_v57 = vadd.f32 %v4284_v42, %v9682_v19  ;;  %v4337_v56 = vadd.f32 %v4336_v40, %v4335_v25 }
 0xc65   :  { %v10218_v1 = vadd.f32 %v4279_v50, %v9680_v11  ;;  %v4320_v11 = vrot.slane %v4319_v31, 4 }
 0xc66   :  { %v4310_v61 = vmul.f32 %v10215_v57, %v10215_v57  ;;  %v4342_v9 = vsel %vm3311_vm9, %v10215_v57, 0.0  ;;  %v4338_v23 = vrot.slane %v4337_v56, 1 }
 0xc67   :  { %v4309_v26 = vmul.f32 %v10218_v1, %v10218_v1  ;;  %v4341_v2 = vsel %vm3311_vm9, %v10218_v1, 0.0  ;;  %v4321_v14 = vadd.f32 %v4320_v11, %v4319_v31 }
 0xc68   :  { %v4356_v19 = vsel %vm3311_vm9, %v4310_v61, 0.0  ;;  %v4343_v18 = vadd.f32 %v4342_v9, %v4341_v2  ;;  %v5823_v60 = vpop.f32.mrb[46].mxu1  ;;  %v4339_v47 = vadd.f32 %v4338_v23, %v4337_v56  ;;  %v3007_v2 = vld [vmem:[#allocation31] sm:$0x1] }
 0xc69   :  { %v4355_v37 = vsel %vm3311_vm9, %v4309_v26, 0.0  ;;  %v4294_v46 = vadd.f32 %v5823_v60, %v5664_v48  ;;  %v4288_v0 = vpop.f32.mrb[47].mxu1  ;;  %v3008_v60 = vld [vmem:[#allocation32] sm:$0x1] }
 0xc6a   :  { %v4357_v4 = vadd.f32 %v4356_v19, %v4355_v37  ;;  %v4289_v7 = vadd.f32 %v5664_v48, %v4288_v0  ;;  %v4322_v48 = vrot.slane %v4321_v14, 2 }
 0xc6b   :  { %v4304_v52 = vadd.f32 %v4294_v46, %v9701_v3 }
 0xc6c   :  { %v4303_v20 = vadd.f32 %v4289_v7, %v9690_v43  ;;  %v4323_v32 = vadd.f32 %v4322_v48, %v4321_v14 }
 0xc6d   :  { %v4312_v28 = vmul.f32 %v4304_v52, %v4304_v52  ;;  %v4346_v33 = vsel %vm3009_vm8, %v4304_v52, 0.0 }
 0xc6e   :  { %v4311_v49 = vmul.f32 %v4303_v20, %v4303_v20  ;;  %v4344_v55 = vsel %vm3311_vm9, %v4303_v20, 0.0  ;;  %v4324_v12 = vrot.slane %v4323_v32, 1 }
 0xc6f   :  { %v4345_v62 = vadd.f32 %v4344_v55, %v4343_v18  ;;  %v4360_v43 = vsel %vm3009_vm8, %v4312_v28, 0.0 }
 0xc70   :  { %v4358_v5 = vsel %vm3311_vm9, %v4311_v49, 0.0  ;;  %v4325_v35 = vadd.f32 %v4324_v12, %v4323_v32 }
 0xc71   :  { %v4347_v41 = vadd.f32 %v4346_v33, %v4345_v62  ;;  %v4359_v3 = vadd.f32 %v4358_v5, %v4357_v4 }
 0xc73   :  { %v4348_v21 = vrot.slane %v4347_v41, 4  ;;  %v4361_v10 = vadd.f32 %v4360_v43, %v4359_v3 }
 0xc75   :  { %v4349_v44 = vadd.f32 %v4348_v21, %v4347_v41  ;;  %v4362_v63 = vrot.slane %v4361_v10, 4 }
 0xc77   :  { %v4350_v36 = vrot.slane %v4349_v44, 2  ;;  %v4363_v6 = vadd.f32 %v4362_v63, %v4361_v10 }
 0xc79   :  { %v4351_v39 = vadd.f32 %v4350_v36, %v4349_v44  ;;  %v4364_v53 = vrot.slane %v4363_v6, 2 }
 0xc7b   :  { %v4352_v27 = vrot.slane %v4351_v39, 1  ;;  %v4365_v58 = vadd.f32 %v4364_v53, %v4363_v6 }
 0xc7d   :  { %v4353_v13 = vadd.f32 %v4352_v27, %v4351_v39  ;;  %v4366_v31 = vrot.slane %v4365_v58, 1 }
 0xc7f   :  { %v4354_v54 = vadd.f32 %v4353_v13, %v4325_v35  ;;  %v4367_v22 = vadd.f32 %v4366_v31, %v4365_v58 }
 0xc81   :  { %v4368_v16 = vadd.f32 %v4367_v22, %v4339_v47  ;;  %v4369_v42 = vmul.f32 0.017857144, %v4354_v54 }
 0xc83   :  { %v4370_v15 = vmul.f32 0.017857144, %v4368_v16  ;;  %v4371_v50 = vmul.f32 %v4369_v42, %v4369_v42 }
 0xc85   :  { %v4372_v61 = vsub.f32 %v4370_v15, %v4371_v50 }
 0xc87   :  { %v4373_v9 = vmax.f32 %v4372_v61, 0.0 }
 0xc89   :  { %v4374_v26 = vadd.f32 1e-05, %v4373_v9 }
 0xc8b   :  { %6650 = vrsqrt.f32 %v4374_v26 }
 0xc95   :  { %v6651_v19 = vpop.eup %6650 }
 0xc96   :  { %v4376_v18 = vmul.f32 %v6651_v19, %v3007_v2 }
 0xc98   :  { %v4377_v11 = vmul.f32 %v4376_v18, %v4369_v42  ;;  %v4382_v37 = vrot.slane %v4376_v18, %v7684_v24 }
 0xc9a   :  { %v4378_v46 = vsub.f32 %v3008_v60, %v4377_v11  ;;  %v4383_v0 = vmul.f32 %v4382_v37, %v10186_v29  ;;  %v4384_v4 = vmul.f32 %v4382_v37, %v10183_v51  ;;  %v4385_v7 = vmul.f32 %v4382_v37, %v10202_v38 }
 0xc9b   :  { %v4386_v17 = vmul.f32 %v4382_v37, %v10199_v8  ;;  %v4387_v14 = vmul.f32 %v4382_v37, %v10218_v1  ;;  %v4388_v59 = vmul.f32 %v4382_v37, %v10215_v57  ;;  %v4389_v30 = vmul.f32 %v4382_v37, %v4303_v20 }
 0xc9c   :  { %v4390_v28 = vmul.f32 %v4382_v37, %v4304_v52  ;;  %v4395_v49 = vrot.slane %v4378_v46, %v7684_v24 }
 0xc9e   :  { %v4397_v55 = vadd.f32 %v4395_v49, %v4383_v0  ;;  %v4398_v45 = vadd.f32 %v4395_v49, %v4384_v4  ;;  %v4399_v25 = vadd.f32 %v4395_v49, %v4385_v7  ;;  %v4400_v62 = vadd.f32 %v4395_v49, %v4386_v17  ;;  %v4482_v17 = vld [vmem:[%s10691_s23 + $0x10] sm:$0xff] }
 0xc9f   :  { %v10246_v33 = vadd.f32 %v4395_v49, %v4387_v14  ;;  %v10248_v29 = vadd.f32 %v4395_v49, %v4388_v59  ;;  %v10250_v51 = vadd.f32 %v4395_v49, %v4389_v30  ;;  %v10252_v38 = vadd.f32 %v4395_v49, %v4390_v28  ;;  %v4483_v14 = vld [vmem:[%s10691_s23 + $0x18] sm:$0xff] }
 0xca0   :  { %v4405_v8 = vsub.f32 0.0, %v4397_v55  ;;  %v4406_v1 = vsub.f32 0.0, %v4398_v45  ;;  %v4407_v5 = vsub.f32 0.0, %v4399_v25  ;;  %v4408_v57 = vsub.f32 0.0, %v4400_v62 }
 0xca1   :  { %v4409_v52 = vsub.f32 0.0, %v10246_v33  ;;  %v4410_v20 = vsub.f32 0.0, %v10248_v29  ;;  %v4411_v48 = vsub.f32 0.0, %v10250_v51  ;;  %v4412_v40 = vsub.f32 0.0, %v10252_v38 }
 0xca2   :  { %v4413_v41 = vmul.f32 1.442695, %v4405_v8  ;;  %v4415_v3 = vmul.f32 1.442695, %v4406_v1  ;;  %v4417_v43 = vmul.f32 1.442695, %v4407_v5  ;;  %v6021_v59 = vpack.c.bf16 %v4483_v14, %v4482_v17 }
 0xca3   :  { %v4419_v21 = vmul.f32 1.442695, %v4408_v57  ;;  %v4421_v10 = vmul.f32 1.442695, %v4409_v52  ;;  %v4423_v32 = vmul.f32 1.442695, %v4410_v20 }
 0xca4   :  { %6652 = vpow2.f32 %v4413_v41  ;;  %v4425_v44 = vmul.f32 1.442695, %v4411_v48  ;;  %v4427_v63 = vmul.f32 1.442695, %v4412_v40  ;;  %6022 = vmatprep.subr.bf16.mxu0 %v6021_v59  ;;  %v4486_v41 = vld [vmem:[%s10691_s23 + $0x30] sm:$0xff] }
 0xca5   :  { %6654 = vpow2.f32 %v4415_v3  ;;  %6024 = vmatpush3.bf16.msra.mxu0 %v6021_v59  ;;  %v4487_v3 = vld [vmem:[%s10691_s23 + $0x38] sm:$0xff] }
 0xca6   :  { %6656 = vpow2.f32 %v4417_v43 }
 0xca7   :  { %6658 = vpow2.f32 %v4419_v21 }
 0xca8   :  { %6660 = vpow2.f32 %v4421_v10 }
 0xca9   :  { %6662 = vpow2.f32 %v4423_v32 }
 0xcaa   :  { %6664 = vpow2.f32 %v4425_v44  ;;  %v6029_v44 = vpack.c.bf16 %v4487_v3, %v4486_v41 }
 0xcab   :  { %6666 = vpow2.f32 %v4427_v63 }
 0xcae   :  { %v6653_v56 = vpop.eup %6652 }
 0xcaf   :  { %v6655_v36 = vpop.eup %6654  ;;  %v4429_v6 = vadd.f32 1.0, %v6653_v56 }
 0xcb0   :  { %v6657_v12 = vpop.eup %6656  ;;  %v4430_v39 = vadd.f32 1.0, %v6655_v36  ;;  %v4488_v36 = vld [vmem:[%s10691_s23 + $0x40] sm:$0xff] }
 0xcb1   :  { %v6659_v53 = vpop.eup %6658  ;;  %v4431_v23 = vadd.f32 1.0, %v6657_v12  ;;  %6668 = vrcp.f32 %v4429_v6  ;;  %v4489_v6 = vld [vmem:[%s10691_s23 + $0x48] sm:$0xff] }
 0xcb2   :  { %v6661_v27 = vpop.eup %6660  ;;  %v4432_v58 = vadd.f32 1.0, %v6659_v53  ;;  %6670 = vrcp.f32 %v4430_v39 }
 0xcb3   :  { %v6663_v35 = vpop.eup %6662  ;;  %v4433_v13 = vadd.f32 1.0, %v6661_v27  ;;  %6672 = vrcp.f32 %v4431_v23  ;;  %v6033_v23 = vpack.c.bf16 %v4489_v6, %v4488_v36 }
 0xcb4   :  { %v6665_v31 = vpop.eup %6664  ;;  %v4434_v47 = vadd.f32 1.0, %v6663_v35  ;;  %6674 = vrcp.f32 %v4432_v58 }
 0xcb5   :  { %v6667_v54 = vpop.eup %6666  ;;  %v4435_v22 = vadd.f32 1.0, %v6665_v31  ;;  %6676 = vrcp.f32 %v4433_v13 }
 0xcb6   :  { %v4436_v16 = vadd.f32 1.0, %v6667_v54  ;;  %6678 = vrcp.f32 %v4434_v47 }
 0xcb7   :  { %6680 = vrcp.f32 %v4435_v22 }
 0xcb8   :  { %6682 = vrcp.f32 %v4436_v16 }
 0xcbb   :  { %v6669_v42 = vpop.eup %6668 }
 0xcbc   :  { %v6671_v15 = vpop.eup %6670  ;;  %v4445_v50 = vmul.f32 %v6669_v42, %v4397_v55 }
 0xcbd   :  { %v6673_v61 = vpop.eup %6672  ;;  %v4446_v9 = vmul.f32 %v6671_v15, %v4398_v45 }
 0xcbe   :  { %v6675_v26 = vpop.eup %6674  ;;  %v4447_v2 = vmul.f32 %v6673_v61, %v4399_v25  ;;  %4453 = vst.msk [vmem:[#allocation3 + $0x4] sm:$0xff] %vm3311_vm9, %v4445_v50  ;;  %v4484_v25 = vld [vmem:[%s10691_s23 + $0x20] sm:$0xff] }
 0xcbf   :  { %v6677_v19 = vpop.eup %6676  ;;  %v4448_v18 = vmul.f32 %v6675_v26, %v4400_v62  ;;  %4454 = vst.msk [vmem:[#allocation3 + $0xc] sm:$0xff] %vm3311_vm9, %v4446_v9 }
 0xcc0   :  { %v6679_v60 = vpop.eup %6678  ;;  %v4449_v11 = vmul.f32 %v6677_v19, %v10246_v33  ;;  %4455 = vst.msk [vmem:[#allocation3 + $0x14] sm:$0xff] %vm3311_vm9, %v4447_v2 }
 0xcc1   :  { %v6681_v37 = vpop.eup %6680  ;;  %v4450_v46 = vmul.f32 %v6679_v60, %v10248_v29  ;;  %4456 = vst.msk [vmem:[#allocation3 + $0x1c] sm:$0xf] %vm3009_vm8, %v4448_v18  ;;  %v4485_v29 = vld [vmem:[%s10691_s23 + $0x28] sm:$0xff] }
 0xcc2   :  { %v6683_v0 = vpop.eup %6682  ;;  %v4451_v4 = vmul.f32 %v6681_v37, %v10250_v51  ;;  %4457 = vst.msk [vmem:[#allocation3 + $0x24] sm:$0xff] %vm3311_vm9, %v4449_v11  ;;  %v6025_v51 = vpack.c.bf16 %v4485_v29, %v4484_v25 }
 0xcc3   :  { %v4452_v7 = vmul.f32 %v6683_v0, %v10252_v38  ;;  %4458 = vst.msk [vmem:[#allocation3 + $0x2c] sm:$0xff] %vm3311_vm9, %v4450_v46 }
 0xcc4   :  { %4459 = vst.msk [vmem:[#allocation3 + $0x34] sm:$0xff] %vm3311_vm9, %v4451_v4  ;;  %6026 = vmatprep.subr.bf16.mxu0 %v6025_v51 }
 0xcc5   :  { %4460 = vst.msk [vmem:[#allocation3 + $0x3c] sm:$0xf] %vm3009_vm8, %v4452_v7  ;;  %6028 = vmatpush3.bf16.msra.mxu0 %v6025_v51 }
 0xcc6   :  { %v4461_v30 = vld [vmem:[#allocation3] ss:$2 sm:$0xff]  ;;  %v4469_v28 = vld [vmem:[#allocation3 + $0x1] ss:$2 sm:$0xff]  ;;  %6030 = vmatprep.subr.bf16.mxu0 %v6029_v44 }
 0xcc7   :  { %v10272_v49 = vmax.f32 %v4461_v30, %v4469_v28 }
 0xcc8   :  { %v4463_v55 = vld [vmem:[#allocation3 + $0x10] ss:$2 sm:$0xff]  ;;  %v4471_v45 = vld [vmem:[#allocation3 + $0x11] ss:$2 sm:$0xff] }
 0xcc9   :  { %v10275_v62 = vmax.f32 %v4463_v55, %v4471_v45  ;;  %v4516_v33 = vrot.slane %v10272_v49, 1  ;;  %v4535_v52 = vrot.slane %v10272_v49, 2  ;;  %v4554_v40 = vrot.slane %v10272_v49, 3  ;;  %6032 = vmatpush3.bf16.msra.mxu0 %v6029_v44 }
 0xcca   :  { %v4465_v10 = vld [vmem:[#allocation3 + $0x20] ss:$2 sm:$0xff]  ;;  %v4473_v32 = vld [vmem:[#allocation3 + $0x21] ss:$2 sm:$0xff]  ;;  %v4573_v39 = vrot.slane %v10272_v49, 4  ;;  %6034 = vmatprep.subr.bf16.mxu0 %v6033_v23 }
 0xccb   :  { %v4517_v38 = vrot.slane %v10275_v62, 1  ;;  %v4536_v20 = vrot.slane %v10275_v62, 2  ;;  %v4555_v21 = vrot.slane %v10275_v62, 3  ;;  %v10295_v56 = vmax.f32 %v4465_v10, %v4473_v32 }
 0xccc   :  { %v4467_v8 = vld [vmem:[#allocation3 + $0x30] ss:$2 sm:$0xff]  ;;  %v4475_v1 = vld [vmem:[#allocation3 + $0x31] ss:$2 sm:$0xff]  ;;  %v4574_v53 = vrot.slane %v10275_v62, 4 }
 0xccd   :  { %v10280_v5 = vmax.f32 %v4467_v8, %v4475_v1  ;;  %v4518_v57 = vsel %vm649_vm0, %v4516_v33, %v4517_v38  ;;  %v4537_v43 = vsel %vm749_vm1, %v4535_v52, %v4536_v20  ;;  %v4556_v12 = vsel %vm849_vm2, %v4554_v40, %v4555_v21  ;;  %6036 = vmatpush3.bf16.msra.mxu0 %v6033_v23 }
 0xcce   :  { %4523 = vrot.lane.b32.xlu1 %v4518_v57, %s7364_s18  ;;  %v4519_v58 = vrot.slane %v10295_v56, 1  ;;  %v4575_v35 = vsel %vm949_vm3, %v4573_v39, %v4574_v53  ;;  %v4576_v13 = vrot.slane %v10295_v56, 4  ;;  %v4538_v47 = vrot.slane %v10295_v56, 2 }
 0xccf   :  { %v4521_v48 = vrot.slane %v10280_v5, 1  ;;  %v4540_v63 = vrot.slane %v10280_v5, 2  ;;  %v4559_v27 = vrot.slane %v10280_v5, 3  ;;  %v4557_v16 = vrot.slane %v10295_v56, 3 }
 0xcd0   :  { %v4520_v31 = vsel %vm649_vm0, %v4517_v38, %v4519_v58  ;;  %v4577_v54 = vsel %vm949_vm3, %v4574_v53, %v4576_v13  ;;  %v4539_v22 = vsel %vm749_vm1, %v4536_v20, %v4538_v47  ;;  %v4578_v61 = vrot.slane %v10280_v5, 4 }
 0xcd1   :  { %4529 = vrot.lane.b32.xlu0 %v4521_v48, %s7364_s18  ;;  %v4541_v42 = vsel %vm749_vm1, %v4538_v47, %v4540_v63  ;;  %v4558_v15 = vsel %vm849_vm2, %v4555_v21, %v4557_v16  ;;  %v4560_v50 = vsel %vm849_vm2, %v4557_v16, %v4559_v27  ;;  %v4522_v9 = vsel %vm649_vm0, %v4519_v58, %v4521_v48 }
 0xcd2   :  { %4542 = vrot.lane.b32.xlu1 %v4537_v43, %s7362_s24  ;;  %v4579_v26 = vsel %vm949_vm3, %v4576_v13, %v4578_v61  ;;  %v5673_v43 = vld [vmem:[#allocation34] ss:$0 sm:$0xff] }
 0xcd5   :  { %4548 = vrot.lane.b32.xlu0 %v4540_v63, %s7362_s24 }
 0xcd6   :  { %4561 = vrot.lane.b32.xlu1 %v4556_v12, %s7365_s12 }
 0xcd9   :  { %4567 = vrot.lane.b32.xlu0 %v4559_v27, %s7365_s12 }
 0xcda   :  { %4580 = vrot.lane.b32.xlu1 %v4575_v35, %s7361_s9 }
 0xcdd   :  { %4525 = vrot.lane.b32.xlu0 %v4520_v31, %s7364_s18 }
 0xcde   :  { %4582 = vrot.lane.b32.xlu1 %v4577_v54, %s7361_s9 }
 0xce1   :  { %4544 = vrot.lane.b32.xlu0 %v4539_v22, %s7362_s24 }
 0xce2   :  { %4546 = vrot.lane.b32.xlu1 %v4541_v42, %s7362_s24 }
 0xce5   :  { %4563 = vrot.lane.b32.xlu0 %v4558_v15, %s7365_s12 }
 0xce6   :  { %4565 = vrot.lane.b32.xlu1 %v4560_v50, %s7365_s12 }
 0xce9   :  { %4527 = vrot.lane.b32.xlu0 %v4522_v9, %s7364_s18 }
 0xcea   :  { %4584 = vrot.lane.b32.xlu1 %v4579_v26, %s7361_s9 }
 0xced   :  { %4586 = vrot.lane.b32.xlu0 %v4578_v61, %s7361_s9 }
 0xd40   :  { %v4524_v2 = vpop.permute.xlu1 %4523 }
 0xd41   :  { %v4592_v37 = vsel %vm3311_vm9, %v10272_v49, %v4524_v2 }
 0xd43   :  { %v4530_v19 = vpop.permute.xlu0 %4529 }
 0xd44   :  { %v4543_v18 = vpop.permute.xlu1 %4542  ;;  %v4595_v1 = vsel %vm3311_vm9, %v10280_v5, %v4530_v19 }
 0xd45   :  { %v4596_v46 = vsel %vm1051_vm4, %v4592_v37, %v4543_v18 }
 0xd47   :  { %v4549_v60 = vpop.permute.xlu0 %4548 }
 0xd48   :  { %v4562_v11 = vpop.permute.xlu1 %4561  ;;  %v4599_v57 = vsel %vm1051_vm4, %v4595_v1, %v4549_v60 }
 0xd49   :  { %v4600_v4 = vsel %vm3649_vm10, %v4596_v46, %v4562_v11 }
 0xd4b   :  { %v4568_v0 = vpop.permute.xlu0 %4567 }
 0xd4c   :  { %v4581_v7 = vpop.permute.xlu1 %4580  ;;  %v4603_v20 = vsel %vm3649_vm10, %v4599_v57, %v4568_v0 }
 0xd4d   :  { %v4604_v17 = vsel %vm1621_vm6, %v4600_v4, %v4581_v7 }
 0xd4e   :  { %5844 = vmatprep.mubr.msk.f32.mxu0 %vm3672_vm11, %v4604_v17 }
 0xd4f   :  { %v4526_v14 = vpop.permute.xlu0 %4525 }
 0xd50   :  { %v4583_v59 = vpop.permute.xlu1 %4582  ;;  %v4593_v55 = vsel %vm3311_vm9, %v10275_v62, %v4526_v14 }
 0xd53   :  { %v4545_v30 = vpop.permute.xlu0 %4544 }
 0xd54   :  { %v4547_v28 = vpop.permute.xlu1 %4546  ;;  %v4597_v45 = vsel %vm1051_vm4, %v4593_v55, %v4545_v30 }
 0xd57   :  { %v4564_v49 = vpop.permute.xlu0 %4563 }
 0xd58   :  { %v4601_v25 = vsel %vm3649_vm10, %v4597_v45, %v4564_v49  ;;  %v4566_v33 = vpop.permute.xlu1 %4565 }
 0xd59   :  { %v4605_v29 = vsel %vm1621_vm6, %v4601_v25, %v4583_v59 }
 0xd5a   :  { %5845 = vmatmul.mubr.msk.f32.vlgmr.msra.gmra.mrb[48].mxu0 %vm3672_vm11, %v4605_v29 }
 0xd5b   :  { %v4528_v51 = vpop.permute.xlu0 %4527 }
 0xd5c   :  { %v4594_v38 = vsel %vm3311_vm9, %v10295_v56, %v4528_v51  ;;  %v4585_v8 = vpop.permute.xlu1 %4584 }
 0xd5d   :  { %v4598_v62 = vsel %vm1051_vm4, %v4594_v38, %v4547_v28 }
 0xd5e   :  { %v4602_v52 = vsel %vm3649_vm10, %v4598_v62, %v4566_v33 }
 0xd5f   :  { %v4587_v48 = vpop.permute.xlu0 %4586  ;;  %v4606_v41 = vsel %vm1621_vm6, %v4602_v52, %v4585_v8  ;;  %v4491_v52 = vld [vmem:[%s10692_s0] sm:$0x1] }
 0xd60   :  { %v4607_v3 = vsel %vm1621_vm6, %v4603_v20, %v4587_v48  ;;  %5847 = vmatprep.mubr.msk.f32.mxu0 %vm3672_vm11, %v4606_v41  ;;  %v4492_v41 = vld [vmem:[#allocation35] sm:$0x1] }
 0xd61   :  { %5848 = vmatmul.mubr.msk.f32.gmra.mrb[50].mxu0 %vm3672_vm11, %v4607_v3 }
 0xe2d   :  { %v5846_v40 = vpop.f32.mrb[48].mxu0 }
 0xe2e   :  { %v10358_v5 = vadd.f32 %v5846_v40, %v5673_v43  ;;  %v4692_v21 = vpop.f32.mrb[49].mxu0 }
 0xe2f   :  { %v10360_v10 = vadd.f32 %v5673_v43, %v4692_v21 }
 0xe30   :  { %v4712_v32 = vmul.f32 %v10358_v5, %v10358_v5  ;;  %v4717_v44 = vsel %vm4509_vm12, %v10358_v5, 0.0 }
 0xe31   :  { %v4711_v63 = vmul.f32 %v10360_v10, %v10360_v10  ;;  %v4716_v56 = vsel %vm4715_vm13, %v10360_v10, 0.0 }
 0xe32   :  { %v4727_v36 = vsel %vm4509_vm12, %v4712_v32, 0.0  ;;  %v4718_v6 = vadd.f32 %v4717_v44, %v4716_v56 }
 0xe33   :  { %v4726_v12 = vsel %vm4715_vm13, %v4711_v63, 0.0 }
 0xe34   :  { %v4719_v39 = vrot.slane %v4718_v6, 4  ;;  %v4728_v53 = vadd.f32 %v4727_v36, %v4726_v12  ;;  %v5849_v23 = vpop.f32.mrb[50].mxu0 }
 0xe35   :  { %v10372_v27 = vadd.f32 %v5849_v23, %v5673_v43  ;;  %v4702_v58 = vpop.f32.mrb[51].mxu0 }
 0xe36   :  { %v4720_v35 = vadd.f32 %v4719_v39, %v4718_v6  ;;  %v4729_v13 = vrot.slane %v4728_v53, 4  ;;  %v10374_v31 = vadd.f32 %v5673_v43, %v4702_v58 }
 0xe37   :  { %v4714_v47 = vmul.f32 %v10372_v27, %v10372_v27  ;;  %v4737_v54 = vsel %vm4509_vm12, %v10372_v27, 0.0 }
 0xe38   :  { %v4730_v22 = vadd.f32 %v4729_v13, %v4728_v53  ;;  %v4713_v16 = vmul.f32 %v10374_v31, %v10374_v31  ;;  %v4736_v42 = vsel %vm4715_vm13, %v10374_v31, 0.0  ;;  %v4721_v15 = vrot.slane %v4720_v35, 2 }
 0xe39   :  { %v4747_v50 = vsel %vm4509_vm12, %v4714_v47, 0.0  ;;  %v4738_v61 = vadd.f32 %v4737_v54, %v4736_v42 }
 0xe3a   :  { %v4746_v9 = vsel %vm4715_vm13, %v4713_v16, 0.0  ;;  %v4731_v26 = vrot.slane %v4730_v22, 2  ;;  %v4722_v18 = vadd.f32 %v4721_v15, %v4720_v35 }
 0xe3b   :  { %v4739_v2 = vrot.slane %v4738_v61, 4  ;;  %v4748_v19 = vadd.f32 %v4747_v50, %v4746_v9 }
 0xe3c   :  { %v4732_v37 = vadd.f32 %v4731_v26, %v4730_v22  ;;  %v4723_v4 = vrot.slane %v4722_v18, 1 }
 0xe3d   :  { %v4740_v60 = vadd.f32 %v4739_v2, %v4738_v61  ;;  %v4749_v11 = vrot.slane %v4748_v19, 4 }
 0xe3e   :  { %v4733_v14 = vrot.slane %v4732_v37, 1  ;;  %v4724_v28 = vadd.f32 %v4723_v4, %v4722_v18 }
 0xe3f   :  { %v4741_v46 = vrot.slane %v4740_v60, 2  ;;  %v4750_v0 = vadd.f32 %v4749_v11, %v4748_v19 }
 0xe40   :  { %v4734_v49 = vadd.f32 %v4733_v14, %v4732_v37 }
 0xe41   :  { %v4742_v7 = vadd.f32 %v4741_v46, %v4740_v60  ;;  %v4751_v17 = vrot.slane %v4750_v0, 2 }
 0xe43   :  { %v4743_v59 = vrot.slane %v4742_v7, 1  ;;  %v4752_v30 = vadd.f32 %v4751_v17, %v4750_v0 }
 0xe45   :  { %v4744_v55 = vadd.f32 %v4743_v59, %v4742_v7  ;;  %v4753_v45 = vrot.slane %v4752_v30, 1 }
 0xe47   :  { %v4745_v25 = vadd.f32 %v4744_v55, %v4724_v28  ;;  %v4754_v33 = vadd.f32 %v4753_v45, %v4752_v30 }
 0xe49   :  { %v4755_v29 = vadd.f32 %v4754_v33, %v4734_v49  ;;  %v4757_v51 = vmul.f32 0.041666668, %v4745_v25  ;;  %v4493_v25 = vld [vmem:[%s10693_s20] sm:$0xff]  ;;  %v4494_v33 = vld [vmem:[%s10693_s20 + $0x8] sm:$0xff] }
 0xe4b   :  { %v4758_v38 = vmul.f32 0.041666668, %v4755_v29  ;;  %v4759_v8 = vmul.f32 %v4757_v51, %v4757_v51  ;;  %v6037_v29 = vpack.c.bf16 %v4494_v33, %v4493_v25 }
 0xe4d   :  { %v4760_v1 = vsub.f32 %v4758_v38, %v4759_v8  ;;  %6038 = vmatprep.subr.bf16.mxu1 %v6037_v29 }
 0xe4e   :  { %6040 = vmatpush3.bf16.msra.mxu1 %v6037_v29 }
 0xe4f   :  { %v4761_v62 = vmax.f32 %v4760_v1, 0.0 }
 0xe51   :  { %v4762_v57 = vadd.f32 1e-05, %v4761_v62  ;;  %v4495_v62 = vld [vmem:[%s10693_s20 + $0x10] sm:$0xff] }
 0xe53   :  { %6684 = vrsqrt.f32 %v4762_v57  ;;  %v4496_v57 = vld [vmem:[%s10693_s20 + $0x18] sm:$0xff] }
 0xe5d   :  { %v6685_v20 = vpop.eup %6684 }
 0xe5e   :  { %v4764_v48 = vmul.f32 %v6685_v20, %v4491_v52  ;;  %v6041_v20 = vpack.c.bf16 %v4496_v57, %v4495_v62 }
 0xe60   :  { %v4765_v3 = vmul.f32 %v4764_v48, %v4757_v51  ;;  %v4770_v43 = vrot.slane %v4764_v48, %v7684_v24  ;;  %6042 = vmatprep.subr.bf16.mxu1 %v6041_v20 }
 0xe61   :  { %6044 = vmatpush3.bf16.msra.mxu1 %v6041_v20 }
 0xe62   :  { %v4766_v40 = vsub.f32 %v4492_v41, %v4765_v3  ;;  %v4771_v21 = vmul.f32 %v4770_v43, %v10360_v10  ;;  %v4772_v32 = vmul.f32 %v4770_v43, %v10358_v5  ;;  %v4773_v44 = vmul.f32 %v4770_v43, %v10374_v31 }
 0xe63   :  { %v4774_v63 = vmul.f32 %v4770_v43, %v10372_v27 }
 0xe64   :  { %v4779_v56 = vrot.slane %v4766_v40, %v7684_v24 }
 0xe66   :  { %v4781_v36 = vadd.f32 %v4779_v56, %v4771_v21  ;;  %v4782_v6 = vadd.f32 %v4779_v56, %v4772_v32  ;;  %v4783_v12 = vadd.f32 %v4779_v56, %v4773_v44  ;;  %v4784_v39 = vadd.f32 %v4779_v56, %v4774_v63  ;;  %v4497_v21 = vld [vmem:[%s10693_s20 + $0x20] sm:$0xff] }
 0xe67   :  { %5858 = vmatprep.subr.mxu1 %v4497_v21 }
 0xe68   :  { %v4785_v53 = vsub.f32 0.0, %v4781_v36  ;;  %v4786_v23 = vsub.f32 0.0, %v4782_v6  ;;  %v4787_v58 = vsub.f32 0.0, %v4783_v12  ;;  %v4788_v35 = vsub.f32 0.0, %v4784_v39  ;;  %5859 = vmatpush3.msra.mxu1 %v4497_v21 }
 0xe69   :  { %5882 = vmatprep.subr.mxu1 %v7359_v34 }
 0xe6a   :  { %v4789_v13 = vmul.f32 1.442695, %v4785_v53  ;;  %v4791_v47 = vmul.f32 1.442695, %v4786_v23  ;;  %v4793_v54 = vmul.f32 1.442695, %v4787_v58 }
 0xe6b   :  { %v4795_v22 = vmul.f32 1.442695, %v4788_v35 }
 0xe6c   :  { %6686 = vpow2.f32 %v4789_v13 }
 0xe6d   :  { %6688 = vpow2.f32 %v4791_v47 }
 0xe6e   :  { %6690 = vpow2.f32 %v4793_v54 }
 0xe6f   :  { %6692 = vpow2.f32 %v4795_v22 }
 0xe76   :  { %v6687_v16 = vpop.eup %6686 }
 0xe77   :  { %v6689_v42 = vpop.eup %6688  ;;  %v4797_v15 = vadd.f32 1.0, %v6687_v16 }
 0xe78   :  { %v6691_v50 = vpop.eup %6690  ;;  %v4798_v61 = vadd.f32 1.0, %v6689_v42 }
 0xe79   :  { %v6693_v9 = vpop.eup %6692  ;;  %v4799_v26 = vadd.f32 1.0, %v6691_v50  ;;  %6694 = vrcp.f32 %v4797_v15 }
 0xe7a   :  { %v4800_v2 = vadd.f32 1.0, %v6693_v9  ;;  %6696 = vrcp.f32 %v4798_v61 }
 0xe7b   :  { %6698 = vrcp.f32 %v4799_v26 }
 0xe7c   :  { %6700 = vrcp.f32 %v4800_v2 }
 0xe83   :  { %v6695_v19 = vpop.eup %6694 }
 0xe84   :  { %v6697_v18 = vpop.eup %6696  ;;  %v4805_v60 = vmul.f32 %v6695_v19, %v4781_v36 }
 0xe85   :  { %v6699_v11 = vpop.eup %6698  ;;  %v4806_v37 = vmul.f32 %v6697_v18, %v4782_v6 }
 0xe86   :  { %v6701_v46 = vpop.eup %6700  ;;  %v4807_v0 = vmul.f32 %v6699_v11, %v4783_v12  ;;  %4809 = vst.msk [vmem:[#allocation4 + $0x4] sm:$0xff] %vm4715_vm13, %v4805_v60 }
 0xe87   :  { %v4808_v4 = vmul.f32 %v6701_v46, %v4784_v39  ;;  %4810 = vst.msk [vmem:[#allocation4 + $0xc] sm:$0xf] %vm4509_vm12, %v4806_v37 }
 0xe88   :  { %4811 = vst.msk [vmem:[#allocation4 + $0x14] sm:$0xff] %vm4715_vm13, %v4807_v0 }
 0xe89   :  { %4812 = vst.msk [vmem:[#allocation4 + $0x1c] sm:$0xf] %vm4509_vm12, %v4808_v4 }
 0xe8d   :  { %v10397_v7 = vld [vmem:[#allocation4] sm:$0xff] }
 0xe8e   :  { %v10399_v17 = vld [vmem:[#allocation4 + $0x8] sm:$0xff]  ;;  %v4821_v14 = vrot.slane %v10397_v7, 1  ;;  %v4840_v45 = vrot.slane %v10397_v7, 2  ;;  %v4859_v8 = vrot.slane %v10397_v7, 3  ;;  %v4878_v3 = vrot.slane %v10397_v7, 4 }
 0xe8f   :  { %v4822_v59 = vrot.slane %v10399_v17, 1  ;;  %v4841_v49 = vrot.slane %v10399_v17, 2  ;;  %v4860_v1 = vrot.slane %v10399_v17, 3  ;;  %v10421_v52 = vld [vmem:[#allocation4 + $0x10] sm:$0xff]  ;;  %v4879_v43 = vrot.slane %v10399_v17, 4 }
 0xe90   :  { %v10403_v30 = vld [vmem:[#allocation4 + $0x18] sm:$0xff]  ;;  %v4824_v40 = vrot.slane %v10421_v52, 1  ;;  %v4881_v44 = vrot.slane %v10421_v52, 4  ;;  %v4843_v56 = vrot.slane %v10421_v52, 2  ;;  %v4862_v12 = vrot.slane %v10421_v52, 3 }
 0xe91   :  { %v4826_v28 = vrot.slane %v10403_v30, 1  ;;  %v4823_v55 = vsel %vm649_vm0, %v4821_v14, %v4822_v59  ;;  %v4845_v51 = vrot.slane %v10403_v30, 2  ;;  %v4842_v38 = vsel %vm749_vm1, %v4840_v45, %v4841_v49 }
 0xe92   :  { %4828 = vrot.lane.b32.xlu1 %v4823_v55, %s7366_s29  ;;  %v4864_v48 = vrot.slane %v10403_v30, 3  ;;  %v4861_v41 = vsel %vm849_vm2, %v4859_v8, %v4860_v1  ;;  %v4880_v32 = vsel %vm949_vm3, %v4878_v3, %v4879_v43  ;;  %v4825_v63 = vsel %vm649_vm0, %v4822_v59, %v4824_v40  ;;  %v5678_v8 = vld [vmem:[#allocation37] ss:$0 sm:$0xff] }
 0xe93   :  { %4834 = vrot.lane.b32.xlu0 %v4826_v28, %s7366_s29  ;;  %v4882_v36 = vsel %vm949_vm3, %v4879_v43, %v4881_v44  ;;  %v4844_v6 = vsel %vm749_vm1, %v4841_v49, %v4843_v56  ;;  %v4846_v39 = vsel %vm749_vm1, %v4843_v56, %v4845_v51  ;;  %v4863_v53 = vsel %vm849_vm2, %v4860_v1, %v4862_v12 }
 0xe94   :  { %v4865_v23 = vsel %vm849_vm2, %v4862_v12, %v4864_v48  ;;  %v4883_v58 = vrot.slane %v10403_v30, 4  ;;  %v4827_v35 = vsel %vm649_vm0, %v4824_v40, %v4826_v28 }
 0xe96   :  { %4847 = vrot.lane.b32.xlu1 %v4842_v38, %s7364_s18  ;;  %v4884_v13 = vsel %vm949_vm3, %v4881_v44, %v4883_v58 }
 0xe97   :  { %4853 = vrot.lane.b32.xlu0 %v4845_v51, %s7364_s18 }
 0xe9a   :  { %4866 = vrot.lane.b32.xlu1 %v4861_v41, %s7367_s26 }
 0xe9b   :  { %4872 = vrot.lane.b32.xlu0 %v4864_v48, %s7367_s26 }
 0xe9e   :  { %4885 = vrot.lane.b32.xlu1 %v4880_v32, %s7362_s24 }
 0xe9f   :  { %4830 = vrot.lane.b32.xlu0 %v4825_v63, %s7366_s29 }
 0xea2   :  { %4887 = vrot.lane.b32.xlu1 %v4882_v36, %s7362_s24 }
 0xea3   :  { %4849 = vrot.lane.b32.xlu0 %v4844_v6, %s7364_s18 }
 0xea6   :  { %4851 = vrot.lane.b32.xlu1 %v4846_v39, %s7364_s18 }
 0xea7   :  { %4868 = vrot.lane.b32.xlu0 %v4863_v53, %s7367_s26 }
 0xeaa   :  { %4870 = vrot.lane.b32.xlu1 %v4865_v23, %s7367_s26 }
 0xeab   :  { %4832 = vrot.lane.b32.xlu0 %v4827_v35, %s7366_s29 }
 0xeae   :  { %4889 = vrot.lane.b32.xlu1 %v4884_v13, %s7362_s24 }
 0xeaf   :  { %4891 = vrot.lane.b32.xlu0 %v4883_v58, %s7362_s24 }
 0xf04   :  { %v4829_v47 = vpop.permute.xlu1 %4828 }
 0xf05   :  { %v4835_v54 = vpop.permute.xlu0 %4834  ;;  %v4897_v50 = vsel %vm4715_vm13, %v10397_v7, %v4829_v47 }
 0xf06   :  { %v4900_v55 = vsel %vm4715_vm13, %v10403_v30, %v4835_v54 }
 0xf08   :  { %v4848_v22 = vpop.permute.xlu1 %4847 }
 0xf09   :  { %v4854_v16 = vpop.permute.xlu0 %4853  ;;  %v4901_v61 = vsel %vm3311_vm9, %v4897_v50, %v4848_v22 }
 0xf0a   :  { %v4904_v45 = vsel %vm3311_vm9, %v4900_v55, %v4854_v16 }
 0xf0c   :  { %v4867_v42 = vpop.permute.xlu1 %4866 }
 0xf0d   :  { %v4873_v15 = vpop.permute.xlu0 %4872  ;;  %v4906_v9 = vsel %vm4905_vm14, %v4901_v61, %v4867_v42 }
 0xf0e   :  { %v4909_v33 = vsel %vm4905_vm14, %v4904_v45, %v4873_v15 }
 0xf10   :  { %v4886_v26 = vpop.permute.xlu1 %4885 }
 0xf11   :  { %v4831_v2 = vpop.permute.xlu0 %4830  ;;  %v4910_v19 = vsel %vm1051_vm4, %v4906_v9, %v4886_v26 }
 0xf12   :  { %5860 = vmatprep.mubr.msk.f32.mxu1 %vm4920_vm15, %v4910_v19  ;;  %v4898_v11 = vsel %vm4715_vm13, %v10399_v17, %v4831_v2 }
 0xf14   :  { %v4888_v18 = vpop.permute.xlu1 %4887 }
 0xf15   :  { %v4850_v60 = vpop.permute.xlu0 %4849 }
 0xf16   :  { %v4902_v46 = vsel %vm3311_vm9, %v4898_v11, %v4850_v60 }
 0xf18   :  { %v4852_v37 = vpop.permute.xlu1 %4851 }
 0xf19   :  { %v4869_v0 = vpop.permute.xlu0 %4868 }
 0xf1a   :  { %v4907_v4 = vsel %vm4905_vm14, %v4902_v46, %v4869_v0 }
 0xf1b   :  { %v4911_v7 = vsel %vm1051_vm4, %v4907_v4, %v4888_v18 }
 0xf1c   :  { %5861 = vmatmul.mubr.msk.f32.vlgmr.msra.gmra.mrb[48].mxu1 %vm4920_vm15, %v4911_v7  ;;  %v4871_v14 = vpop.permute.xlu1 %4870 }
 0xf1d   :  { %v4833_v59 = vpop.permute.xlu0 %4832 }
 0xf1e   :  { %v4899_v28 = vsel %vm4715_vm13, %v10421_v52, %v4833_v59 }
 0xf1f   :  { %v4903_v17 = vsel %vm3311_vm9, %v4899_v28, %v4852_v37 }
 0xf20   :  { %v4908_v49 = vsel %vm4905_vm14, %v4903_v17, %v4871_v14  ;;  %v4890_v25 = vpop.permute.xlu1 %4889 }
 0xf21   :  { %v4892_v29 = vpop.permute.xlu0 %4891  ;;  %v4912_v51 = vsel %vm1051_vm4, %v4908_v49, %v4890_v25 }
 0xf22   :  { %v4913_v38 = vsel %vm1051_vm4, %v4909_v33, %v4892_v29  ;;  %5863 = vmatprep.mubr.msk.f32.mxu1 %vm4920_vm15, %v4912_v51 }
 0xf23   :  { %5864 = vmatmul.mubr.msk.f32.gmra.mrb[50].mxu1 %vm4920_vm15, %v4913_v38  ;;  %v4499_v38 = vld [vmem:[%s10694_s27] sm:$0x1] }
 0xfef   :  { %v5862_v30 = vpop.f32.mrb[48].mxu1 }
 0xff0   :  { %v10479_v1 = vadd.f32 %v5862_v30, %v5678_v8  ;;  %v4999_v62 = vpop.f32.mrb[49].mxu1 }
 0xff1   :  { %v5000_v57 = vadd.f32 %v5678_v8, %v4999_v62  ;;  %v4500_v62 = vld [vmem:[#allocation38] sm:$0x1] }
 0xff2   :  { %v5019_v52 = vmul.f32 %v10479_v1, %v10479_v1  ;;  %v5023_v20 = vsel %vm4509_vm12, %v10479_v1, 0.0 }
 0xff3   :  { %v5018_v48 = vmul.f32 %v5000_v57, %v5000_v57  ;;  %v5022_v41 = vsel %vm4715_vm13, %v5000_v57, 0.0 }
 0xff4   :  { %v5033_v3 = vsel %vm4509_vm12, %v5019_v52, 0.0  ;;  %v5024_v43 = vadd.f32 %v5023_v20, %v5022_v41 }
 0xff5   :  { %v5032_v40 = vsel %vm4715_vm13, %v5018_v48, 0.0 }
 0xff6   :  { %v5025_v21 = vrot.slane %v5024_v43, 4  ;;  %v5034_v32 = vadd.f32 %v5033_v3, %v5032_v40  ;;  %v5865_v44 = vpop.f32.mrb[50].mxu1 }
 0xff7   :  { %v5015_v63 = vadd.f32 %v5865_v44, %v5678_v8  ;;  %v5009_v56 = vpop.f32.mrb[51].mxu1 }
 0xff8   :  { %v5026_v36 = vadd.f32 %v5025_v21, %v5024_v43  ;;  %v5035_v6 = vrot.slane %v5034_v32, 4  ;;  %v5010_v12 = vadd.f32 %v5678_v8, %v5009_v56 }
 0xff9   :  { %v5021_v39 = vmul.f32 %v5015_v63, %v5015_v63  ;;  %v5043_v53 = vsel %vm4509_vm12, %v5015_v63, 0.0 }
 0xffa   :  { %v5036_v23 = vadd.f32 %v5035_v6, %v5034_v32  ;;  %v5020_v58 = vmul.f32 %v5010_v12, %v5010_v12  ;;  %v5042_v35 = vsel %vm4715_vm13, %v5010_v12, 0.0  ;;  %v5027_v13 = vrot.slane %v5026_v36, 2 }
 0xffb   :  { %v5053_v47 = vsel %vm4509_vm12, %v5021_v39, 0.0  ;;  %v5044_v54 = vadd.f32 %v5043_v53, %v5042_v35 }
 0xffc   :  { %v5052_v22 = vsel %vm4715_vm13, %v5020_v58, 0.0  ;;  %v5037_v16 = vrot.slane %v5036_v23, 2  ;;  %v5028_v50 = vadd.f32 %v5027_v13, %v5026_v36 }
 0xffd   :  { %v5045_v42 = vrot.slane %v5044_v54, 4  ;;  %v5054_v15 = vadd.f32 %v5053_v47, %v5052_v22 }
 0xffe   :  { %v5038_v26 = vadd.f32 %v5037_v16, %v5036_v23  ;;  %v5029_v18 = vrot.slane %v5028_v50, 1 }
 0xfff   :  { %v5046_v61 = vadd.f32 %v5045_v42, %v5044_v54  ;;  %v5055_v9 = vrot.slane %v5054_v15, 4 }
0x1000   :  { %v5039_v37 = vrot.slane %v5038_v26, 1  ;;  %v5030_v4 = vadd.f32 %v5029_v18, %v5028_v50 }
0x1001   :  { %v5047_v2 = vrot.slane %v5046_v61, 2  ;;  %v5056_v19 = vadd.f32 %v5055_v9, %v5054_v15 }
0x1002   :  { %v5040_v59 = vadd.f32 %v5039_v37, %v5038_v26 }
0x1003   :  { %v5048_v60 = vadd.f32 %v5047_v2, %v5046_v61  ;;  %v5057_v11 = vrot.slane %v5056_v19, 2 }
0x1005   :  { %v5049_v46 = vrot.slane %v5048_v60, 1  ;;  %v5058_v0 = vadd.f32 %v5057_v11, %v5056_v19 }
0x1007   :  { %v5050_v7 = vadd.f32 %v5049_v46, %v5048_v60  ;;  %v5059_v14 = vrot.slane %v5058_v0, 1 }
0x1009   :  { %v5051_v28 = vadd.f32 %v5050_v7, %v5030_v4  ;;  %v5060_v55 = vadd.f32 %v5059_v14, %v5058_v0 }
0x100b   :  { %v5061_v17 = vadd.f32 %v5060_v55, %v5040_v59  ;;  %v5062_v45 = vmul.f32 0.041666668, %v5051_v28  ;;  %v4501_v28 = vld [vmem:[%s10695_s30] sm:$0xff]  ;;  %v4502_v55 = vld [vmem:[%s10695_s30 + $0x8] sm:$0xff] }
0x100d   :  { %v5063_v49 = vmul.f32 0.041666668, %v5061_v17  ;;  %v5064_v25 = vmul.f32 %v5062_v45, %v5062_v45  ;;  %v6045_v17 = vpack.c.bf16 %v4502_v55, %v4501_v28 }
0x100f   :  { %v5065_v33 = vsub.f32 %v5063_v49, %v5064_v25  ;;  %6046 = vmatprep.subr.bf16.mxu0 %v6045_v17 }
0x1010   :  { %6048 = vmatpush3.bf16.msra.mxu0 %v6045_v17 }
0x1011   :  { %v5066_v29 = vmax.f32 %v5065_v33, 0.0 }
0x1013   :  { %v5067_v51 = vadd.f32 1e-05, %v5066_v29  ;;  %v4503_v29 = vld [vmem:[%s10695_s30 + $0x10] sm:$0xff] }
0x1015   :  { %6702 = vrsqrt.f32 %v5067_v51  ;;  %v4504_v51 = vld [vmem:[%s10695_s30 + $0x18] sm:$0xff] }
0x101f   :  { %v6703_v8 = vpop.eup %6702 }
0x1020   :  { %v5069_v30 = vmul.f32 %v6703_v8, %v4499_v38  ;;  %v6049_v8 = vpack.c.bf16 %v4504_v51, %v4503_v29 }
0x1022   :  { %v5070_v52 = vmul.f32 %v5069_v30, %v5062_v45  ;;  %v5075_v20 = vrot.slane %v5069_v30, %v7684_v24  ;;  %6050 = vmatprep.subr.bf16.mxu0 %v6049_v8 }
0x1023   :  { %6052 = vmatpush3.bf16.msra.mxu0 %v6049_v8 }
0x1024   :  { %v5071_v48 = vsub.f32 %v4500_v62, %v5070_v52  ;;  %v5076_v41 = vmul.f32 %v5075_v20, %v5000_v57  ;;  %v5077_v3 = vmul.f32 %v5075_v20, %v10479_v1  ;;  %v5078_v43 = vmul.f32 %v5075_v20, %v5010_v12 }
0x1025   :  { %v5079_v40 = vmul.f32 %v5075_v20, %v5015_v63 }
0x1026   :  { %v5084_v21 = vrot.slane %v5071_v48, %v7684_v24 }
0x1028   :  { %v5086_v32 = vadd.f32 %v5084_v21, %v5076_v41  ;;  %v5087_v44 = vadd.f32 %v5084_v21, %v5077_v3  ;;  %v5088_v56 = vadd.f32 %v5084_v21, %v5078_v43  ;;  %v5089_v36 = vadd.f32 %v5084_v21, %v5079_v40  ;;  %v4505_v41 = vld [vmem:[%s10695_s30 + $0x20] sm:$0xff] }
0x1029   :  { %5874 = vmatprep.subr.mxu0 %v4505_v41 }
0x102a   :  { %v5090_v6 = vsub.f32 0.0, %v5086_v32  ;;  %v5091_v39 = vsub.f32 0.0, %v5087_v44  ;;  %v5092_v53 = vsub.f32 0.0, %v5088_v56  ;;  %v5093_v23 = vsub.f32 0.0, %v5089_v36  ;;  %5875 = vmatpush3.msra.mxu0 %v4505_v41 }
0x102c   :  { %v5094_v58 = vmul.f32 1.442695, %v5090_v6  ;;  %v5096_v35 = vmul.f32 1.442695, %v5091_v39  ;;  %v5098_v13 = vmul.f32 1.442695, %v5092_v53 }
0x102d   :  { %v5100_v47 = vmul.f32 1.442695, %v5093_v23 }
0x102e   :  { %6704 = vpow2.f32 %v5094_v58 }
0x102f   :  { %6706 = vpow2.f32 %v5096_v35 }
0x1030   :  { %6708 = vpow2.f32 %v5098_v13 }
0x1031   :  { %6710 = vpow2.f32 %v5100_v47 }
0x1038   :  { %v6705_v1 = vpop.eup %6704 }
0x1039   :  { %v6707_v57 = vpop.eup %6706  ;;  %v5102_v63 = vadd.f32 1.0, %v6705_v1 }
0x103a   :  { %v6709_v12 = vpop.eup %6708  ;;  %v5103_v54 = vadd.f32 1.0, %v6707_v57 }
0x103b   :  { %v6711_v22 = vpop.eup %6710  ;;  %v5104_v16 = vadd.f32 1.0, %v6709_v12  ;;  %6712 = vrcp.f32 %v5102_v63 }
0x103c   :  { %v5105_v42 = vadd.f32 1.0, %v6711_v22  ;;  %6714 = vrcp.f32 %v5103_v54 }
0x103d   :  { %6716 = vrcp.f32 %v5104_v16 }
0x103e   :  { %6718 = vrcp.f32 %v5105_v42 }
0x1045   :  { %v6713_v15 = vpop.eup %6712 }
0x1046   :  { %v6715_v50 = vpop.eup %6714  ;;  %v5110_v61 = vmul.f32 %v6713_v15, %v5086_v32 }
0x1047   :  { %v6717_v9 = vpop.eup %6716  ;;  %v5111_v26 = vmul.f32 %v6715_v50, %v5087_v44 }
0x1048   :  { %v6719_v2 = vpop.eup %6718  ;;  %v5112_v19 = vmul.f32 %v6717_v9, %v5088_v56  ;;  %5114 = vst.msk [vmem:[#allocation4 + $0x4] sm:$0xff] %vm4715_vm13, %v5110_v61 }
0x1049   :  { %v5113_v18 = vmul.f32 %v6719_v2, %v5089_v36  ;;  %5115 = vst.msk [vmem:[#allocation4 + $0xc] sm:$0xf] %vm4509_vm12, %v5111_v26 }
0x104a   :  { %5116 = vst.msk [vmem:[#allocation4 + $0x14] sm:$0xff] %vm4715_vm13, %v5112_v19 }
0x104b   :  { %5117 = vst.msk [vmem:[#allocation4 + $0x1c] sm:$0xf] %vm4509_vm12, %v5113_v18 }
0x104f   :  { %v10500_v60 = vld [vmem:[#allocation4] sm:$0xff] }
0x1050   :  { %v10502_v11 = vld [vmem:[#allocation4 + $0x8] sm:$0xff]  ;;  %v5126_v37 = vrot.slane %v10500_v60, 1  ;;  %v5145_v14 = vrot.slane %v10500_v60, 2  ;;  %v5164_v25 = vrot.slane %v10500_v60, 3  ;;  %v5183_v52 = vrot.slane %v10500_v60, 4 }
0x1051   :  { %v5127_v46 = vrot.slane %v10502_v11, 1  ;;  %v5146_v59 = vrot.slane %v10502_v11, 2  ;;  %v5165_v33 = vrot.slane %v10502_v11, 3  ;;  %v10524_v38 = vld [vmem:[#allocation4 + $0x10] sm:$0xff]  ;;  %v5184_v20 = vrot.slane %v10502_v11, 4 }
0x1052   :  { %v10506_v0 = vld [vmem:[#allocation4 + $0x18] sm:$0xff]  ;;  %v5129_v48 = vrot.slane %v10524_v38, 1  ;;  %v5186_v43 = vrot.slane %v10524_v38, 4  ;;  %v5148_v21 = vrot.slane %v10524_v38, 2  ;;  %v5167_v56 = vrot.slane %v10524_v38, 3 }
0x1053   :  { %v5131_v4 = vrot.slane %v10506_v0, 1  ;;  %v5128_v7 = vsel %vm649_vm0, %v5126_v37, %v5127_v46  ;;  %v5150_v45 = vrot.slane %v10506_v0, 2  ;;  %v5147_v49 = vsel %vm749_vm1, %v5145_v14, %v5146_v59 }
0x1054   :  { %5133 = vrot.lane.b32.xlu1 %v5128_v7, %s7366_s29  ;;  %v5169_v30 = vrot.slane %v10506_v0, 3  ;;  %v5166_v62 = vsel %vm849_vm2, %v5164_v25, %v5165_v33  ;;  %v5185_v3 = vsel %vm949_vm3, %v5183_v52, %v5184_v20  ;;  %v5130_v40 = vsel %vm649_vm0, %v5127_v46, %v5129_v48  ;;  %v5452_v25 = vld [vmem:[%s7563_s4] sm:$0xff]  ;;  %s10696_s4 = sld [smem:[#allocation76_spill]] }
0x1055   :  { %5139 = vrot.lane.b32.xlu0 %v5131_v4, %s7366_s29  ;;  %v5187_v32 = vsel %vm949_vm3, %v5184_v20, %v5186_v43  ;;  %v5149_v44 = vsel %vm749_vm1, %v5146_v59, %v5148_v21  ;;  %v5151_v36 = vsel %vm749_vm1, %v5148_v21, %v5150_v45  ;;  %v5168_v6 = vsel %vm849_vm2, %v5165_v33, %v5167_v56 }
0x1056   :  { %v5170_v39 = vsel %vm849_vm2, %v5167_v56, %v5169_v30  ;;  %v5188_v53 = vrot.slane %v10506_v0, 4  ;;  %v5132_v23 = vsel %vm649_vm0, %v5129_v48, %v5131_v4  ;;  %5883 = vmatpush3.msra.mxu1 %v5452_v25  ;;  %vm7368_vm0 = vmmov 0  }
0x1057   :  { %5884 = vmatprep.mubr.msk.f32.mxu1 %vm7368_vm0, %v7359_v34  ;;  %vm5450_vm1 = vcmask 1040384   ;;  %vm5533_vm2 = vcmask 33792  }
0x1058   :  { %5152 = vrot.lane.b32.xlu1 %v5147_v49, %s7364_s18  ;;  %v5189_v58 = vsel %vm949_vm3, %v5186_v43, %v5188_v53 }
0x1059   :  { %5158 = vrot.lane.b32.xlu0 %v5150_v45, %s7364_s18 }
0x105c   :  { %5171 = vrot.lane.b32.xlu1 %v5166_v62, %s7367_s26 }
0x105d   :  { %5177 = vrot.lane.b32.xlu0 %v5169_v30, %s7367_s26 }
0x1060   :  { %5190 = vrot.lane.b32.xlu1 %v5185_v3, %s7362_s24 }
0x1061   :  { %5135 = vrot.lane.b32.xlu0 %v5130_v40, %s7366_s29 }
0x1064   :  { %5192 = vrot.lane.b32.xlu1 %v5187_v32, %s7362_s24 }
0x1065   :  { %5154 = vrot.lane.b32.xlu0 %v5149_v44, %s7364_s18 }
0x1068   :  { %5156 = vrot.lane.b32.xlu1 %v5151_v36, %s7364_s18 }
0x1069   :  { %5173 = vrot.lane.b32.xlu0 %v5168_v6, %s7367_s26 }
0x106c   :  { %5175 = vrot.lane.b32.xlu1 %v5170_v39, %s7367_s26 }
0x106d   :  { %5137 = vrot.lane.b32.xlu0 %v5132_v23, %s7366_s29 }
0x1070   :  { %5194 = vrot.lane.b32.xlu1 %v5189_v58, %s7362_s24 }
0x1071   :  { %5196 = vrot.lane.b32.xlu0 %v5188_v53, %s7362_s24 }
0x10c6   :  { %v5134_v35 = vpop.permute.xlu1 %5133 }
0x10c7   :  { %v5140_v13 = vpop.permute.xlu0 %5139  ;;  %v5202_v12 = vsel %vm4715_vm13, %v10500_v60, %v5134_v35 }
0x10c8   :  { %v5205_v7 = vsel %vm4715_vm13, %v10506_v0, %v5140_v13  ;;  %v5683_v0 = vld [vmem:[#allocation40] ss:$0 sm:$0xff] }
0x10ca   :  { %v5153_v47 = vpop.permute.xlu1 %5152 }
0x10cb   :  { %v5159_v1 = vpop.permute.xlu0 %5158  ;;  %v5206_v54 = vsel %vm3311_vm9, %v5202_v12, %v5153_v47 }
0x10cc   :  { %v5209_v14 = vsel %vm3311_vm9, %v5205_v7, %v5159_v1 }
0x10ce   :  { %v5172_v57 = vpop.permute.xlu1 %5171 }
0x10cf   :  { %v5178_v63 = vpop.permute.xlu0 %5177  ;;  %v5210_v22 = vsel %vm4905_vm14, %v5206_v54, %v5172_v57 }
0x10d0   :  { %v5213_v55 = vsel %vm4905_vm14, %v5209_v14, %v5178_v63 }
0x10d2   :  { %v5191_v16 = vpop.permute.xlu1 %5190 }
0x10d3   :  { %v5136_v42 = vpop.permute.xlu0 %5135  ;;  %v5214_v15 = vsel %vm1051_vm4, %v5210_v22, %v5191_v16 }
0x10d4   :  { %5876 = vmatprep.mubr.msk.f32.mxu0 %vm4920_vm15, %v5214_v15  ;;  %v5203_v9 = vsel %vm4715_vm13, %v10502_v11, %v5136_v42 }
0x10d6   :  { %v5193_v50 = vpop.permute.xlu1 %5192 }
0x10d7   :  { %v5155_v61 = vpop.permute.xlu0 %5154 }
0x10d8   :  { %v5207_v2 = vsel %vm3311_vm9, %v5203_v9, %v5155_v61 }
0x10da   :  { %v5157_v26 = vpop.permute.xlu1 %5156 }
0x10db   :  { %v5174_v19 = vpop.permute.xlu0 %5173 }
0x10dc   :  { %v5211_v18 = vsel %vm4905_vm14, %v5207_v2, %v5174_v19 }
0x10dd   :  { %v5215_v60 = vsel %vm1051_vm4, %v5211_v18, %v5193_v50 }
0x10de   :  { %5877 = vmatmul.mubr.msk.f32.vlgmr.msra.gmra.mrb[52].mxu0 %vm4920_vm15, %v5215_v60  ;;  %v5176_v37 = vpop.permute.xlu1 %5175 }
0x10df   :  { %v5138_v46 = vpop.permute.xlu0 %5137 }
0x10e0   :  { %v5204_v4 = vsel %vm4715_vm13, %v10524_v38, %v5138_v46 }
0x10e1   :  { %v5208_v11 = vsel %vm3311_vm9, %v5204_v4, %v5157_v26 }
0x10e2   :  { %v5212_v59 = vsel %vm4905_vm14, %v5208_v11, %v5176_v37  ;;  %v5195_v28 = vpop.permute.xlu1 %5194 }
0x10e3   :  { %v5197_v17 = vpop.permute.xlu0 %5196  ;;  %v5216_v45 = vsel %vm1051_vm4, %v5212_v59, %v5195_v28 }
0x10e4   :  { %v5217_v49 = vsel %vm1051_vm4, %v5213_v55, %v5197_v17  ;;  %5879 = vmatprep.mubr.msk.f32.mxu0 %vm4920_vm15, %v5216_v45 }
0x10e5   :  { %5880 = vmatmul.mubr.msk.f32.gmra.mrb[54].mxu0 %vm4920_vm15, %v5217_v49  ;;  %v4507_v49 = vld [vmem:[%s10696_s4] sm:$0x1] }
0x11b1   :  { %v5878_v33 = vpop.f32.mrb[52].mxu0 }
0x11b2   :  { %v5308_v29 = vadd.f32 %v5878_v33, %v5683_v0  ;;  %v5302_v51 = vpop.f32.mrb[53].mxu0  ;;  %v4508_v33 = vld [vmem:[%s7558_s19] sm:$0x1]  ;;  %s7369_s19 = smov [#allocation41]  }
0x11b3   :  { %v5303_v38 = vadd.f32 %v5683_v0, %v5302_v51  ;;  %s5552_s28 = sshll.u32 %s7369_s19, 4  ;;  %s5553_s28 = int_to_ptr.vmem [resolvable:$true] %s5552_s28 }
0x11b4   :  { %v10584_v8 = vadd.f32 %v5308_v29, %v10358_v5  ;;  %p7253_p3 = scmp.lt.s32.totalorder %s5553_s28, %s5553_s28 }
0x11b5   :  { %v10587_v30 = vadd.f32 %v5303_v38, %v10360_v10 }
0x11b6   :  { %v5326_v62 = vmul.f32 %v10584_v8, %v10584_v8  ;;  %v5330_v52 = vsel %vm4509_vm12, %v10584_v8, 0.0 }
0x11b7   :  { %v5325_v34 = vmul.f32 %v10587_v30, %v10587_v30  ;;  %v5329_v20 = vsel %vm4715_vm13, %v10587_v30, 0.0 }
0x11b8   :  { %v5340_v48 = vsel %vm4509_vm12, %v5326_v62, 0.0  ;;  %v5331_v41 = vadd.f32 %v5330_v52, %v5329_v20  ;;  %v5881_v5 = vpop.f32.mrb[54].mxu0 }
0x11b9   :  { %v5339_v3 = vsel %vm4715_vm13, %v5325_v34, 0.0  ;;  %v5318_v10 = vadd.f32 %v5881_v5, %v5683_v0  ;;  %v5312_v43 = vpop.f32.mrb[55].mxu0 }
0x11ba   :  { %v5332_v40 = vrot.slane %v5331_v41, 4  ;;  %v5341_v21 = vadd.f32 %v5340_v48, %v5339_v3  ;;  %v5313_v32 = vadd.f32 %v5683_v0, %v5312_v43 }
0x11bb   :  { %v5324_v44 = vadd.f32 %v5318_v10, %v10372_v27 }
0x11bc   :  { %v5333_v56 = vadd.f32 %v5332_v40, %v5331_v41  ;;  %v5342_v36 = vrot.slane %v5341_v21, 4  ;;  %v5323_v6 = vadd.f32 %v5313_v32, %v10374_v31 }
0x11bd   :  { %v5328_v39 = vmul.f32 %v5324_v44, %v5324_v44  ;;  %v5350_v53 = vsel %vm4509_vm12, %v5324_v44, 0.0 }
0x11be   :  { %v5343_v23 = vadd.f32 %v5342_v36, %v5341_v21  ;;  %v5327_v58 = vmul.f32 %v5323_v6, %v5323_v6  ;;  %v5349_v35 = vsel %vm4715_vm13, %v5323_v6, 0.0  ;;  %v5334_v13 = vrot.slane %v5333_v56, 2 }
0x11bf   :  { %v5360_v47 = vsel %vm4509_vm12, %v5328_v39, 0.0  ;;  %v5351_v1 = vadd.f32 %v5350_v53, %v5349_v35 }
0x11c0   :  { %v5359_v57 = vsel %vm4715_vm13, %v5327_v58, 0.0  ;;  %v5344_v63 = vrot.slane %v5343_v23, 2  ;;  %v5335_v54 = vadd.f32 %v5334_v13, %v5333_v56 }
0x11c1   :  { %v5352_v12 = vrot.slane %v5351_v1, 4  ;;  %v5361_v27 = vadd.f32 %v5360_v47, %v5359_v57 }
0x11c2   :  { %v5345_v31 = vadd.f32 %v5344_v63, %v5343_v23  ;;  %v5336_v50 = vrot.slane %v5335_v54, 1 }
0x11c3   :  { %v5353_v22 = vadd.f32 %v5352_v12, %v5351_v1  ;;  %v5362_v16 = vrot.slane %v5361_v27, 4 }
0x11c4   :  { %v5346_v26 = vrot.slane %v5345_v31, 1  ;;  %v5337_v18 = vadd.f32 %v5336_v50, %v5335_v54 }
0x11c5   :  { %v5354_v42 = vrot.slane %v5353_v22, 2  ;;  %v5363_v15 = vadd.f32 %v5362_v16, %v5361_v27 }
0x11c6   :  { %v5347_v46 = vadd.f32 %v5346_v26, %v5345_v31 }
0x11c7   :  { %v5355_v61 = vadd.f32 %v5354_v42, %v5353_v22  ;;  %v5364_v9 = vrot.slane %v5363_v15, 2 }
0x11c9   :  { %v5356_v2 = vrot.slane %v5355_v61, 1  ;;  %v5365_v19 = vadd.f32 %v5364_v9, %v5363_v15 }
0x11cb   :  { %v5357_v60 = vadd.f32 %v5356_v2, %v5355_v61  ;;  %v5366_v37 = vrot.slane %v5365_v19, 1 }
0x11cd   :  { %v5358_v4 = vadd.f32 %v5357_v60, %v5337_v18  ;;  %v5367_v7 = vadd.f32 %v5366_v37, %v5365_v19 }
0x11cf   :  { %v5368_v11 = vadd.f32 %v5367_v7, %v5347_v46  ;;  %v5369_v14 = vmul.f32 0.041666668, %v5358_v4 }
0x11d1   :  { %v5370_v59 = vmul.f32 0.041666668, %v5368_v11  ;;  %v5371_v28 = vmul.f32 %v5369_v14, %v5369_v14 }
0x11d3   :  { %v5372_v55 = vsub.f32 %v5370_v59, %v5371_v28 }
0x11d5   :  { %v5373_v17 = vmax.f32 %v5372_v55, 0.0 }
0x11d7   :  { %v5374_v45 = vadd.f32 1e-05, %v5373_v17 }
0x11d9   :  { %6720 = vrsqrt.f32 %v5374_v45  ;;  %v5688_v45 = vld [vmem:[%s7568_s6] ss:$0 sm:$0xff]  ;;  %s7248_s6 = scalar_lea.vmem %s5553_s28, 32 }
0x11da   :  { %p7249_p2 = scmp.ne.s32.totalorder %s5553_s28, %s7248_s6  ;;  %p7254_p4 = scmp.lt.s32.totalorder %s7248_s6, %s7248_s6 }
0x11dc   :  { %p7255_p5 = por %p7254_p4, %p7253_p3 }
0x11de   :  { %p7256_p6 = pnand %p7255_p5, %p7249_p2 }
0x11e3   :  { %v6721_v25 = vpop.eup %6720 }
0x11e4   :  { %v5376_v0 = vmul.f32 %v6721_v25, %v4507_v49 }
0x11e6   :  { %v5377_v29 = vmul.f32 %v5376_v0, %v5369_v14  ;;  %v5382_v51 = vrot.slane %v5376_v0, %v7684_v24 }
0x11e8   :  { %v5378_v38 = vsub.f32 %v4508_v33, %v5377_v29  ;;  %v5383_v62 = vmul.f32 %v5382_v51, %v10587_v30  ;;  %v5384_v52 = vmul.f32 %v5382_v51, %v10584_v8  ;;  %v5385_v34 = vmul.f32 %v5382_v51, %v5323_v6 }
0x11e9   :  { %v5386_v20 = vmul.f32 %v5382_v51, %v5324_v44 }
0x11ea   :  { %v5391_v48 = vrot.slane %v5378_v38, %v7684_v24 }
0x11ec   :  { %v5393_v41 = vadd.f32 %v5391_v48, %v5383_v62  ;;  %v5394_v5 = vadd.f32 %v5391_v48, %v5384_v52  ;;  %v5395_v3 = vadd.f32 %v5391_v48, %v5385_v34  ;;  %v5396_v10 = vadd.f32 %v5391_v48, %v5386_v20 }
0x11ee   :  { %v5397_v43 = vsub.f32 0.0, %v5393_v41  ;;  %v5398_v40 = vsub.f32 0.0, %v5394_v5  ;;  %v5399_v21 = vsub.f32 0.0, %v5395_v3  ;;  %v5400_v32 = vsub.f32 0.0, %v5396_v10 }
0x11f0   :  { %v5401_v56 = vmul.f32 1.442695, %v5397_v43  ;;  %v5403_v36 = vmul.f32 1.442695, %v5398_v40  ;;  %v5405_v39 = vmul.f32 1.442695, %v5399_v21 }
0x11f1   :  { %v5407_v53 = vmul.f32 1.442695, %v5400_v32 }
0x11f2   :  { %6722 = vpow2.f32 %v5401_v56 }
0x11f3   :  { %6724 = vpow2.f32 %v5403_v36 }
0x11f4   :  { %6726 = vpow2.f32 %v5405_v39 }
0x11f5   :  { %6728 = vpow2.f32 %v5407_v53 }
0x11fc   :  { %v6723_v8 = vpop.eup %6722 }
0x11fd   :  { %v6725_v30 = vpop.eup %6724  ;;  %v5409_v44 = vadd.f32 1.0, %v6723_v8 }
0x11fe   :  { %v6727_v24 = vpop.eup %6726  ;;  %v5410_v6 = vadd.f32 1.0, %v6725_v30 }
0x11ff   :  { %v6729_v23 = vpop.eup %6728  ;;  %v5411_v58 = vadd.f32 1.0, %v6727_v24  ;;  %6730 = vrcp.f32 %v5409_v44 }
0x1200   :  { %v5412_v35 = vadd.f32 1.0, %v6729_v23  ;;  %6732 = vrcp.f32 %v5410_v6 }
0x1201   :  { %6734 = vrcp.f32 %v5411_v58 }
0x1202   :  { %6736 = vrcp.f32 %v5412_v35 }
0x1209   :  { %v6731_v13 = vpop.eup %6730 }
0x120a   :  { %v6733_v47 = vpop.eup %6732  ;;  %v5417_v1 = vmul.f32 %v6731_v13, %v5393_v41 }
0x120b   :  { %v6735_v57 = vpop.eup %6734  ;;  %v5418_v63 = vmul.f32 %v6733_v47, %v5394_v5 }
0x120c   :  { %v6737_v12 = vpop.eup %6736  ;;  %v5419_v27 = vmul.f32 %v6735_v57, %v5395_v3  ;;  %5421 = vst.msk [vmem:[#allocation4 + $0x4] sm:$0xff] %vm4715_vm13, %v5417_v1 }
0x120d   :  { %v5420_v54 = vmul.f32 %v6737_v12, %v5396_v10  ;;  %5422 = vst.msk [vmem:[#allocation4 + $0xc] sm:$0xf] %vm4509_vm12, %v5418_v63 }
0x120e   :  { %5423 = vst.msk [vmem:[#allocation4 + $0x14] sm:$0xff] %vm4715_vm13, %v5419_v27 }
0x120f   :  { %5424 = vst.msk [vmem:[#allocation4 + $0x1c] sm:$0xf] %vm4509_vm12, %v5420_v54 }
0x1214   :  { %v5425_v22 = vld [vmem:[#allocation4] ss:$2 sm:$0xff]  ;;  %v5429_v16 = vld [vmem:[#allocation4 + $0x1] ss:$2 sm:$0xff] }
0x1215   :  { %v5432_v31 = vmax.f32 %v5425_v22, %v5429_v16 }
0x1216   :  { %v5427_v42 = vld [vmem:[#allocation4 + $0x10] ss:$2 sm:$0xff]  ;;  %v5431_v15 = vld [vmem:[#allocation4 + $0x11] ss:$2 sm:$0xff] }
0x1217   :  { %v5433_v50 = vmax.f32 %v5427_v42, %v5431_v15  ;;  %v5434_v61 = vsel %vm4715_vm13, %v5432_v31, 0.0 }
0x1218   :  { %v5435_v9 = vrot.slane %v5434_v61, 4 }
0x1219   :  { %v5442_v26 = vsel %vm4715_vm13, %v5433_v50, 0.0 }
0x121a   :  { %v5436_v2 = vadd.f32 %v5435_v9, %v5434_v61  ;;  %v5443_v19 = vrot.slane %v5442_v26, 4 }
0x121c   :  { %v5437_v18 = vrot.slane %v5436_v2, 2  ;;  %v5444_v60 = vadd.f32 %v5443_v19, %v5442_v26 }
0x121e   :  { %v5438_v37 = vadd.f32 %v5437_v18, %v5436_v2  ;;  %v5445_v46 = vrot.slane %v5444_v60, 2 }
0x1220   :  { %v5439_v4 = vrot.slane %v5438_v37, 1  ;;  %v5446_v7 = vadd.f32 %v5445_v46, %v5444_v60 }
0x1222   :  { %v5440_v11 = vadd.f32 %v5439_v4, %v5438_v37  ;;  %v5447_v14 = vrot.slane %v5446_v7, 1 }
0x1224   :  { %v5441_v59 = vmul.f32 0.125, %v5440_v11  ;;  %v5448_v28 = vadd.f32 %v5447_v14, %v5446_v7 }
0x1226   :  { %v5449_v55 = vmul.f32 0.125, %v5448_v28 }
0x1228   :  { %v5451_v17 = vsel %vm5450_vm1, %v5441_v59, %v5449_v55 }
0x1229   :  { %5885 = vmatmul.mubr.msk.f32.vlgmr.msra.gmra.mrb[52].mxu1 %vm4715_vm13, %v5451_v17 }
0x12fc   :  { %v5529_v49 = vpop.f32.mrb[52].mxu1 }
0x12fd   :  { %v5530_v25 = vadd.f32 %v5688_v45, %v5529_v49  ;;  %v5886_v0 = vpop.f32.mrb[53].mxu1 }
0x12ff   :  { %v5534_v33 = vsel %vm5533_vm2, %v5530_v25, -inf }
0x1300   :  { %5535 = vmax.xlane.f32.xlu1 %v5534_v33 }
0x138d   :  { %v5536_v29 = vpop.xlane.xlu1 %5535 }
0x138e   :  { %v5537_v51 = vsub.f32 %v5530_v25, %v5536_v29 }
0x1390   :  { %v5538_v38 = vmul.f32 1.442695, %v5537_v51 }
0x1392   :  { %6738 = vpow2.f32 %v5538_v38 }
0x139c   :  { %v6739_v62 = vpop.eup %6738 }
0x139d   :  { %v5540_v52 = vsel %vm5533_vm2, %v6739_v62, 0.0 }
0x139e   :  { %5541 = vadd.xlane.f32.xlu0 %v5540_v52 }
0x142b   :  { %v5542_v34 = vpop.xlane.xlu0 %5541 }
0x142c   :  { %6740 = vrcp.f32 %v5542_v34 }
0x1436   :  { %v6741_v20 = vpop.eup %6740 }
0x1437   :  { %v5544_v48 = vmul.f32 %v6741_v20, %v6739_v62 }
0x1439   :  { %5545 = vst.msk [vmem:[#allocation41] sm:$0x3] %vm5533_vm2, %v5544_v48 }
0x143a   :  { %7259 = shalt.err (!%p7256_p6)
}
0x143b   :  { %s7260_s1 = scalar_lea.hbm %s7573_s5, 32 }
0x143c   :  { %p7261_p7 = scmp.ne.s32.totalorder %s7573_s5, %s7260_s1  ;;  %p7264_p8 = scmp.lt.u32.totalorder %s7260_s1, %s7573_s5 }
0x143e   :  { %p7266_p9 = pnand %p7264_p8, %p7261_p7 }
0x1440   :  { %7269 = shalt.err (!%p7266_p9)
}
0x1441   :  { %5555 = dma.vmem_to_hbm [thread:$0]  %s5553_s28, 32, %s7573_s5, [#allocation7]  }
0x1442   :  { %7294 = dma.done.wait [#allocation7], 32  }
0x1443   :  { %7295 = vsyncadd [#allocation7], 4294967264 }
0x1444   :  { %5559 = vsyncpa [#allocation6], 1 }
0x1445   :  { %5560 = vsyncpa [#allocation9], 1 }
0x1446   :  { %5561 = vsyncpa [#allocation12], 1 }
0x1447   :  { %5562 = vsyncpa [#allocation15], 1 }
0x1448   :  { %5563 = vsyncpa [#allocation18], 1 }
0x1449   :  { %5564 = vsyncpa [#allocation21], 1 }
0x144a   :  { %5565 = vsyncpa [#allocation24], 1 }
0x144b   :  { %5566 = vsyncpa [#allocation27], 1 }
0x144c   :  { %5567 = vsyncpa [#allocation30], 1 }
0x144d   :  { %5568 = vsyncpa [#allocation33], 1 }
0x144e   :  { %5569 = vsyncpa [#allocation36], 1 }
0x144f   :  { %5570 = vsyncpa [#allocation39], 1 }
0x1450   :  { %5571 = vsyncpa [#allocation7], 1 }

</bundles_post_ra>
